<compile_context>
chip_gen: v7x
topology: tpu7x:2x2x1
jax: 0.10.0
libtpu: 0.0.40
codegen_flags: <defaults>
</compile_context>

<pallas_src>
import functools

import jax
import jax.numpy as jnp
from jax.experimental import pallas as pl
from jax.experimental.pallas import tpu as pltpu

LEAKY_SLOPE = 0.01             # PyTorch nn.LeakyReLU default
BN_EPS = 1e-5                  # PyTorch nn.BatchNorm2d default
VMEM_LIMIT = 32 * 1024 * 1024  # explicit scoped-VMEM limit (safe on v5e/v6e/v7x)

_VMEM = pl.BlockSpec(memory_space=pltpu.MemorySpace.VMEM)


# ----------------------------------------------------------------------------
# Pallas kernels
# ----------------------------------------------------------------------------
def _conv_kernel(*refs, k, stride, sp, PH, OH, OW, act, has_res):
    """In-VMEM convolution for one batch element.

    Inputs:
      ph_ref : (1, sp*sp*PH, PW, Cin) bf16 stride-phase decomposed padded input
      w_ref  : (k*k, Cin, Cout)       bf16 weights, tap-major
      b_ref  : (1, Cout)              f32 bias (BN already folded in)
      res_ref: (1, OH*OW, Cout)       bf16 optional residual (fused add+leaky)
      o_ref  : (1, OH*OW, Cout)       bf16 output (flattened spatial)
    """
    if has_res:
        ph_ref, w_ref, b_ref, res_ref, o_ref = refs
    else:
        ph_ref, w_ref, b_ref, o_ref = refs
    Cin, Cout = w_ref.shape[1], w_ref.shape[2]

    acc = jnp.zeros((OH * OW, Cout), jnp.float32)
    for i in range(k):
        for j in range(k):
            # tap (i, j) reads stride-phase (i % s, j % s) at unit-stride
            # in-phase offset (i // s, j // s)
            p = (i % stride) * sp + (j % stride)
            qi, qj = i // stride, j // stride
            base = p * PH + qi
            a = ph_ref[0, base:base + OH, qj:qj + OW, :]       # (OH, OW, Cin)
            a = a.reshape(OH * OW, Cin)
            acc = acc + jnp.dot(a, w_ref[i * k + j],
                                preferred_element_type=jnp.float32)

    acc = acc + b_ref[...]                                      # (1, Cout) bcast
    if act == "leaky":
        acc = jnp.where(acc >= 0, acc, LEAKY_SLOPE * acc)
    if has_res:
        acc = acc + res_ref[0].astype(jnp.float32)
        acc = jnp.where(acc >= 0, acc, LEAKY_SLOPE * acc)
    o_ref[0] = acc.astype(o_ref.dtype)


def _se_kernel(x_ref, w1_ref, w2_ref, o_ref):
    """Whole SE block: GAP -> FC1+ReLU -> FC2+sigmoid -> channel scale."""
    x = x_ref[...].astype(jnp.float32)                          # (N, HW, C)
    hw = x.shape[1]
    pooled = jnp.sum(x, axis=1) * (1.0 / hw)                    # (N, C)
    h = jnp.maximum(jnp.dot(pooled, w1_ref[...],
                            preferred_element_type=jnp.float32), 0.0)
    s = jax.nn.sigmoid(jnp.dot(h, w2_ref[...],
                               preferred_element_type=jnp.float32))
    o_ref[...] = (x * s[:, None, :]).astype(o_ref.dtype)


def _head_kernel(x_ref, w1_ref, b1_ref, w2_ref, b2_ref, o_ref):
    """GAP -> FC1+ReLU -> (dropout = identity) -> FC2."""
    x = x_ref[...].astype(jnp.float32)                          # (N, HW, C)
    hw = x.shape[1]
    pooled = jnp.sum(x, axis=1) * (1.0 / hw)                    # (N, C)
    h = jnp.dot(pooled, w1_ref[...],
                preferred_element_type=jnp.float32) + b1_ref[...]
    h = jnp.maximum(h, 0.0)
    # TODO(synk): nn.Dropout(0.5) is training-mode stochastic; eval-mode identity here.
    o_ref[...] = jnp.dot(h, w2_ref[...],
                         preferred_element_type=jnp.float32) + b2_ref[...]


# ----------------------------------------------------------------------------
# Convolution wrapper (stride-phase decomposition, NHWC, fused epilogue)
# ----------------------------------------------------------------------------
def conv2d(x, w, b, *, stride, pad, act="leaky", residual=None,
           out_dtype=jnp.bfloat16):
    """NHWC conv with PyTorch-layout weight (Cout, Cin, kh, kw)."""
    N, H, W, Cin = x.shape
    Cout, Cin2, k, _ = w.shape
    assert Cin == Cin2
    OH = (H + 2 * pad - k) // stride + 1
    OW = (W + 2 * pad - k) // stride + 1
    sp = min(stride, k)                     # stride phases per spatial axis
    PH = OH + (k - 1) // stride             # rows needed per phase
    PW = OW + (k - 1) // stride
    Hp = max(stride * PH, H + 2 * pad)
    Wp = max(stride * PW, W + 2 * pad)

    xp = jnp.pad(x.astype(jnp.bfloat16),
                 ((0, 0), (pad, Hp - H - pad), (pad, Wp - W - pad), (0, 0)))
    # Total phase bytes ~= input bytes (vs k*k duplication for im2col).
    phases = jnp.concatenate(
        [xp[:, r::stride, c::stride, :][:, :PH, :PW, :]
         for r in range(sp) for c in range(sp)],
        axis=1)                                                # (N, sp*sp*PH, PW, Cin)

    wm = w.transpose(2, 3, 1, 0).reshape(k * k, Cin, Cout).astype(jnp.bfloat16)
    bias = b.reshape(1, Cout).astype(jnp.float32)

    args = [phases, wm, bias]
    in_specs = [
        pl.BlockSpec((1, sp * sp * PH, PW, Cin), lambda n: (n, 0, 0, 0)),
        pl.BlockSpec((k * k, Cin, Cout), lambda n: (0, 0, 0)),
        pl.BlockSpec((1, Cout), lambda n: (0, 0)),
    ]
    if residual is not None:
        args.append(residual.astype(jnp.bfloat16).reshape(N, OH * OW, Cout))
        in_specs.append(pl.BlockSpec((1, OH * OW, Cout), lambda n: (n, 0, 0)))

    out = pl.pallas_call(
        functools.partial(_conv_kernel, k=k, stride=stride, sp=sp, PH=PH,
                          OH=OH, OW=OW, act=act, has_res=residual is not None),
        out_shape=jax.ShapeDtypeStruct((N, OH * OW, Cout), out_dtype),
        grid=(N,),
        in_specs=in_specs,
        out_specs=pl.BlockSpec((1, OH * OW, Cout), lambda n: (n, 0, 0)),
        compiler_params=pltpu.CompilerParams(
            dimension_semantics=("parallel",),
            vmem_limit_bytes=VMEM_LIMIT),
    )(*args)
    return out.reshape(N, OH, OW, Cout)


def se_block(p, x):
    """SE_Block fused into a single kernel. x: (N, H, W, C) -> (N, H*W, C)."""
    N, H, W, C = x.shape
    x2 = x.reshape(N, H * W, C)
    return pl.pallas_call(
        _se_kernel,
        out_shape=jax.ShapeDtypeStruct((N, H * W, C), jnp.bfloat16),
        in_specs=[_VMEM, _VMEM, _VMEM],
        out_specs=_VMEM,
        compiler_params=pltpu.CompilerParams(vmem_limit_bytes=VMEM_LIMIT),
    )(x2, p["w1"].T.astype(jnp.float32), p["w2"].T.astype(jnp.float32))


def head(p, x_flat):
    """Global-avg-pool + fc1(ReLU) + fc2 fused. x_flat: (N, H*W, C)."""
    N = x_flat.shape[0]
    A = p["w2"].shape[0]
    return pl.pallas_call(
        _head_kernel,
        out_shape=jax.ShapeDtypeStruct((N, A), jnp.float32),
        in_specs=[_VMEM] * 5,
        out_specs=_VMEM,
        compiler_params=pltpu.CompilerParams(vmem_limit_bytes=VMEM_LIMIT),
    )(x_flat,
      p["w1"].T.astype(jnp.float32), p["b1"].reshape(1, -1).astype(jnp.float32),
      p["w2"].T.astype(jnp.float32), p["b2"].reshape(1, -1).astype(jnp.float32))


# ----------------------------------------------------------------------------
# BN folding & parameters
# ----------------------------------------------------------------------------
def fold_bn(w, b, gamma, beta, mean, var):
    """Fold eval-mode BatchNorm2d into the preceding conv's weight/bias."""
    scale = gamma / jnp.sqrt(var + BN_EPS)
    w2 = w * scale[:, None, None, None]
    b2 = (b - mean) * scale + beta
    return w2, b2


def init_params(key, in_ch, num_actions):
    keys = iter(jax.random.split(key, 32))

    def conv_w(cout, cin, k):
        fan_in = cin * k * k
        return jax.random.normal(next(keys), (cout, cin, k, k), jnp.float32) / jnp.sqrt(fan_in)

    def lin_w(cout, cin):
        return jax.random.normal(next(keys), (cout, cin), jnp.float32) / jnp.sqrt(cin)

    def bias(c):
        return 0.01 * jax.random.normal(next(keys), (c,), jnp.float32)

    def bn(c):  # PyTorch default init / running stats
        return dict(gamma=jnp.ones((c,), jnp.float32), beta=jnp.zeros((c,), jnp.float32),
                    mean=jnp.zeros((c,), jnp.float32), var=jnp.ones((c,), jnp.float32))

    def res_block(cin, cout):
        blocks = []
        for i in range(3):
            ci = cin if i == 0 else cout
            blocks.append(dict(w=conv_w(cout, ci, 3), b=bias(cout)))
        return dict(blocks=blocks, adj_w=conv_w(cout, cin, 1), adj_bn=bn(cout))

    return dict(
        basic=dict(w=conv_w(32, in_ch, 3), b=bias(32), bn=bn(32)),
        res1=res_block(32, 64),
        res2=res_block(64, 128),
        se=dict(w1=lin_w(128 // 16, 128), w2=lin_w(128, 128 // 16)),
        fc=dict(w1=lin_w(256, 128), b1=bias(256),
                w2=lin_w(num_actions, 256), b2=bias(num_actions)),
    )


# ----------------------------------------------------------------------------
# Forward pass
# ----------------------------------------------------------------------------
def res_c2d_block(p, x, stride):
    # residual path: 1x1 strided conv (bias-free) + folded BN, no activation
    zero_b = jnp.zeros((p["adj_w"].shape[0],), jnp.float32)
    w_adj, b_adj = fold_bn(p["adj_w"], zero_b, p["adj_bn"]["gamma"],
                           p["adj_bn"]["beta"], p["adj_bn"]["mean"], p["adj_bn"]["var"])
    residual = conv2d(x, w_adj, b_adj, stride=stride, pad=0, act="none")
    # main path: 3x (conv3x3 + LeakyReLU), first strided; the residual add +
    # final LeakyReLU are fused into the third conv's epilogue.
    b0, b1, b2 = p["blocks"]
    y = conv2d(x, b0["w"], b0["b"], stride=stride, pad=1, act="leaky")
    y = conv2d(y, b1["w"], b1["b"], stride=1, pad=1, act="leaky")
    y = conv2d(y, b2["w"], b2["b"], stride=1, pad=1, act="leaky", residual=residual)
    return y


def improved_cnn_forward(params, x_nchw):
    # Single NCHW -> NHWC transpose at entry; channel-last (lane-dense) after.
    x = jnp.transpose(x_nchw, (0, 2, 3, 1)).astype(jnp.bfloat16)
    pb = params["basic"]
    w, b = fold_bn(pb["w"], pb["b"], pb["bn"]["gamma"], pb["bn"]["beta"],
                   pb["bn"]["mean"], pb["bn"]["var"])
    x = conv2d(x, w, b, stride=2, pad=1, act="leaky")          # (N, 8, 8, 32)
    x = res_c2d_block(params["res1"], x, stride=2)             # (N, 4, 4, 64)
    x = res_c2d_block(params["res2"], x, stride=2)             # (N, 2, 2, 128)
    x = se_block(params["se"], x)                              # (N, 4, 128)
    return head(params["fc"], x)                               # (N, num_actions)


if __name__ == "__main__":
    key = jax.random.PRNGKey(0)
    pkey, xkey = jax.random.split(key)

    B, C, H, W = 2, 4, 16, 16
    num_actions = 6

    params = init_params(pkey, in_ch=C, num_actions=num_actions)
    x = jax.random.normal(xkey, (B, C, H, W), jnp.float32)     # NCHW like PyTorch

    fwd = jax.jit(improved_cnn_forward)
    out = fwd(params, x)
    out = jax.block_until_ready(out)

    assert out.shape == (B, num_actions), out.shape
    assert jnp.all(jnp.isfinite(out))
    print("KERNEL_OK")
</pallas_src>

<mosaic_0001>
module attributes {stable_mosaic.version = 11 : i64} {
  func.func @_conv_kernel(%arg0: i32, %arg1: memref<1x36x9x4xbf16, #tpu.memory_space<vmem>>, %arg2: memref<9x4x32xbf16, #tpu.memory_space<vmem>>, %arg3: memref<1x32xf32, #tpu.memory_space<vmem>>, %arg4: memref<1x64x32xbf16, #tpu.memory_space<vmem>>) attributes {dimension_semantics = [#tpu.dimension_semantics<parallel>], iteration_bounds = array<i64: 2>, scalar_prefetch = 0 : i64, scratch_operands = 0 : i64, tpu.core_type = #tpu.core_type<tc>, window_params = [{transform_indices = @transform_0, window_bounds = array<i64: 1, 36, 9, 4>}, {pipeline_mode = #tpu.pipeline_mode<synchronous>, transform_indices = @transform_1, window_bounds = array<i64: 9, 4, 32>}, {pipeline_mode = #tpu.pipeline_mode<synchronous>, transform_indices = @transform_2, window_bounds = array<i64: 1, 32>}, {transform_indices = @transform_3, window_bounds = array<i64: 1, 64, 32>}]} {
    %cst = arith.constant 0.000000e+00 : f32
    %0 = vector.broadcast %cst : f32 to vector<64x32xf32>
    %c0 = arith.constant 0 : index
    %c0_0 = arith.constant 0 : index
    %c0_1 = arith.constant 0 : index
    %c0_2 = arith.constant 0 : index
    %1 = vector.load %arg1[%c0, %c0_0, %c0_1, %c0_2] : memref<1x36x9x4xbf16, #tpu.memory_space<vmem>>, vector<1x8x8x4xbf16>
    %2 = vector.shape_cast %1 : vector<1x8x8x4xbf16> to vector<8x8x4xbf16>
    %3 = vector.shape_cast %2 : vector<8x8x4xbf16> to vector<64x4xbf16>
    %c0_3 = arith.constant 0 : index
    %c0_4 = arith.constant 0 : index
    %c0_5 = arith.constant 0 : index
    %4 = vector.load %arg2[%c0_3, %c0_4, %c0_5] : memref<9x4x32xbf16, #tpu.memory_space<vmem>>, vector<1x4x32xbf16>
    %5 = vector.shape_cast %4 : vector<1x4x32xbf16> to vector<4x32xbf16>
    %cst_6 = arith.constant dense<0.000000e+00> : vector<64x32xf32>
    %6 = tpu.matmul %3, %5, %cst_6 {dimension_numbers = #tpu.dot_dimension_numbers<[1], [0], [0], [1], [0, 0, 1, 1], [], []>} : vector<64x4xbf16>, vector<4x32xbf16>, vector<64x32xf32> -> vector<64x32xf32>
    %7 = arith.addf %0, %6 : vector<64x32xf32>
    %c0_7 = arith.constant 0 : index
    %c9 = arith.constant 9 : index
    %c0_8 = arith.constant 0 : index
    %c0_9 = arith.constant 0 : index
    %8 = vector.load %arg1[%c0_7, %c9, %c0_8, %c0_9] : memref<1x36x9x4xbf16, #tpu.memory_space<vmem>>, vector<1x8x8x4xbf16>
    %9 = vector.shape_cast %8 : vector<1x8x8x4xbf16> to vector<8x8x4xbf16>
    %10 = vector.shape_cast %9 : vector<8x8x4xbf16> to vector<64x4xbf16>
    %c1 = arith.constant 1 : index
    %c0_10 = arith.constant 0 : index
    %c0_11 = arith.constant 0 : index
    %11 = vector.load %arg2[%c1, %c0_10, %c0_11] : memref<9x4x32xbf16, #tpu.memory_space<vmem>>, vector<1x4x32xbf16>
    %12 = vector.shape_cast %11 : vector<1x4x32xbf16> to vector<4x32xbf16>
    %cst_12 = arith.constant dense<0.000000e+00> : vector<64x32xf32>
    %13 = tpu.matmul %10, %12, %cst_12 {dimension_numbers = #tpu.dot_dimension_numbers<[1], [0], [0], [1], [0, 0, 1, 1], [], []>} : vector<64x4xbf16>, vector<4x32xbf16>, vector<64x32xf32> -> vector<64x32xf32>
    %14 = arith.addf %7, %13 : vector<64x32xf32>
    %c0_13 = arith.constant 0 : index
    %c0_14 = arith.constant 0 : index
    %c1_15 = arith.constant 1 : index
    %c0_16 = arith.constant 0 : index
    %15 = vector.load %arg1[%c0_13, %c0_14, %c1_15, %c0_16] : memref<1x36x9x4xbf16, #tpu.memory_space<vmem>>, vector<1x8x8x4xbf16>
    %16 = vector.shape_cast %15 : vector<1x8x8x4xbf16> to vector<8x8x4xbf16>
    %17 = vector.shape_cast %16 : vector<8x8x4xbf16> to vector<64x4xbf16>
    %c2 = arith.constant 2 : index
    %c0_17 = arith.constant 0 : index
    %c0_18 = arith.constant 0 : index
    %18 = vector.load %arg2[%c2, %c0_17, %c0_18] : memref<9x4x32xbf16, #tpu.memory_space<vmem>>, vector<1x4x32xbf16>
    %19 = vector.shape_cast %18 : vector<1x4x32xbf16> to vector<4x32xbf16>
    %cst_19 = arith.constant dense<0.000000e+00> : vector<64x32xf32>
    %20 = tpu.matmul %17, %19, %cst_19 {dimension_numbers = #tpu.dot_dimension_numbers<[1], [0], [0], [1], [0, 0, 1, 1], [], []>} : vector<64x4xbf16>, vector<4x32xbf16>, vector<64x32xf32> -> vector<64x32xf32>
    %21 = arith.addf %14, %20 : vector<64x32xf32>
    %c0_20 = arith.constant 0 : index
    %c18 = arith.constant 18 : index
    %c0_21 = arith.constant 0 : index
    %c0_22 = arith.constant 0 : index
    %22 = vector.load %arg1[%c0_20, %c18, %c0_21, %c0_22] : memref<1x36x9x4xbf16, #tpu.memory_space<vmem>>, vector<1x8x8x4xbf16>
    %23 = vector.shape_cast %22 : vector<1x8x8x4xbf16> to vector<8x8x4xbf16>
    %24 = vector.shape_cast %23 : vector<8x8x4xbf16> to vector<64x4xbf16>
    %c3 = arith.constant 3 : index
    %c0_23 = arith.constant 0 : index
    %c0_24 = arith.constant 0 : index
    %25 = vector.load %arg2[%c3, %c0_23, %c0_24] : memref<9x4x32xbf16, #tpu.memory_space<vmem>>, vector<1x4x32xbf16>
    %26 = vector.shape_cast %25 : vector<1x4x32xbf16> to vector<4x32xbf16>
    %cst_25 = arith.constant dense<0.000000e+00> : vector<64x32xf32>
    %27 = tpu.matmul %24, %26, %cst_25 {dimension_numbers = #tpu.dot_dimension_numbers<[1], [0], [0], [1], [0, 0, 1, 1], [], []>} : vector<64x4xbf16>, vector<4x32xbf16>, vector<64x32xf32> -> vector<64x32xf32>
    %28 = arith.addf %21, %27 : vector<64x32xf32>
    %c0_26 = arith.constant 0 : index
    %c27 = arith.constant 27 : index
    %c0_27 = arith.constant 0 : index
    %c0_28 = arith.constant 0 : index
    %29 = vector.load %arg1[%c0_26, %c27, %c0_27, %c0_28] : memref<1x36x9x4xbf16, #tpu.memory_space<vmem>>, vector<1x8x8x4xbf16>
    %30 = vector.shape_cast %29 : vector<1x8x8x4xbf16> to vector<8x8x4xbf16>
    %31 = vector.shape_cast %30 : vector<8x8x4xbf16> to vector<64x4xbf16>
    %c4 = arith.constant 4 : index
    %c0_29 = arith.constant 0 : index
    %c0_30 = arith.constant 0 : index
    %32 = vector.load %arg2[%c4, %c0_29, %c0_30] : memref<9x4x32xbf16, #tpu.memory_space<vmem>>, vector<1x4x32xbf16>
    %33 = vector.shape_cast %32 : vector<1x4x32xbf16> to vector<4x32xbf16>
    %cst_31 = arith.constant dense<0.000000e+00> : vector<64x32xf32>
    %34 = tpu.matmul %31, %33, %cst_31 {dimension_numbers = #tpu.dot_dimension_numbers<[1], [0], [0], [1], [0, 0, 1, 1], [], []>} : vector<64x4xbf16>, vector<4x32xbf16>, vector<64x32xf32> -> vector<64x32xf32>
    %35 = arith.addf %28, %34 : vector<64x32xf32>
    %c0_32 = arith.constant 0 : index
    %c18_33 = arith.constant 18 : index
    %c1_34 = arith.constant 1 : index
    %c0_35 = arith.constant 0 : index
    %36 = vector.load %arg1[%c0_32, %c18_33, %c1_34, %c0_35] : memref<1x36x9x4xbf16, #tpu.memory_space<vmem>>, vector<1x8x8x4xbf16>
    %37 = vector.shape_cast %36 : vector<1x8x8x4xbf16> to vector<8x8x4xbf16>
    %38 = vector.shape_cast %37 : vector<8x8x4xbf16> to vector<64x4xbf16>
    %c5 = arith.constant 5 : index
    %c0_36 = arith.constant 0 : index
    %c0_37 = arith.constant 0 : index
    %39 = vector.load %arg2[%c5, %c0_36, %c0_37] : memref<9x4x32xbf16, #tpu.memory_space<vmem>>, vector<1x4x32xbf16>
    %40 = vector.shape_cast %39 : vector<1x4x32xbf16> to vector<4x32xbf16>
    %cst_38 = arith.constant dense<0.000000e+00> : vector<64x32xf32>
    %41 = tpu.matmul %38, %40, %cst_38 {dimension_numbers = #tpu.dot_dimension_numbers<[1], [0], [0], [1], [0, 0, 1, 1], [], []>} : vector<64x4xbf16>, vector<4x32xbf16>, vector<64x32xf32> -> vector<64x32xf32>
    %42 = arith.addf %35, %41 : vector<64x32xf32>
    %c0_39 = arith.constant 0 : index
    %c1_40 = arith.constant 1 : index
    %c0_41 = arith.constant 0 : index
    %c0_42 = arith.constant 0 : index
    %43 = vector.load %arg1[%c0_39, %c1_40, %c0_41, %c0_42] : memref<1x36x9x4xbf16, #tpu.memory_space<vmem>>, vector<1x8x8x4xbf16>
    %44 = vector.shape_cast %43 : vector<1x8x8x4xbf16> to vector<8x8x4xbf16>
    %45 = vector.shape_cast %44 : vector<8x8x4xbf16> to vector<64x4xbf16>
    %c6 = arith.constant 6 : index
    %c0_43 = arith.constant 0 : index
    %c0_44 = arith.constant 0 : index
    %46 = vector.load %arg2[%c6, %c0_43, %c0_44] : memref<9x4x32xbf16, #tpu.memory_space<vmem>>, vector<1x4x32xbf16>
    %47 = vector.shape_cast %46 : vector<1x4x32xbf16> to vector<4x32xbf16>
    %cst_45 = arith.constant dense<0.000000e+00> : vector<64x32xf32>
    %48 = tpu.matmul %45, %47, %cst_45 {dimension_numbers = #tpu.dot_dimension_numbers<[1], [0], [0], [1], [0, 0, 1, 1], [], []>} : vector<64x4xbf16>, vector<4x32xbf16>, vector<64x32xf32> -> vector<64x32xf32>
    %49 = arith.addf %42, %48 : vector<64x32xf32>
    %c0_46 = arith.constant 0 : index
    %c10 = arith.constant 10 : index
    %c0_47 = arith.constant 0 : index
    %c0_48 = arith.constant 0 : index
    %50 = vector.load %arg1[%c0_46, %c10, %c0_47, %c0_48] : memref<1x36x9x4xbf16, #tpu.memory_space<vmem>>, vector<1x8x8x4xbf16>
    %51 = vector.shape_cast %50 : vector<1x8x8x4xbf16> to vector<8x8x4xbf16>
    %52 = vector.shape_cast %51 : vector<8x8x4xbf16> to vector<64x4xbf16>
    %c7 = arith.constant 7 : index
    %c0_49 = arith.constant 0 : index
    %c0_50 = arith.constant 0 : index
    %53 = vector.load %arg2[%c7, %c0_49, %c0_50] : memref<9x4x32xbf16, #tpu.memory_space<vmem>>, vector<1x4x32xbf16>
    %54 = vector.shape_cast %53 : vector<1x4x32xbf16> to vector<4x32xbf16>
    %cst_51 = arith.constant dense<0.000000e+00> : vector<64x32xf32>
    %55 = tpu.matmul %52, %54, %cst_51 {dimension_numbers = #tpu.dot_dimension_numbers<[1], [0], [0], [1], [0, 0, 1, 1], [], []>} : vector<64x4xbf16>, vector<4x32xbf16>, vector<64x32xf32> -> vector<64x32xf32>
    %56 = arith.addf %49, %55 : vector<64x32xf32>
    %c0_52 = arith.constant 0 : index
    %c1_53 = arith.constant 1 : index
    %c1_54 = arith.constant 1 : index
    %c0_55 = arith.constant 0 : index
    %57 = vector.load %arg1[%c0_52, %c1_53, %c1_54, %c0_55] : memref<1x36x9x4xbf16, #tpu.memory_space<vmem>>, vector<1x8x8x4xbf16>
    %58 = vector.shape_cast %57 : vector<1x8x8x4xbf16> to vector<8x8x4xbf16>
    %59 = vector.shape_cast %58 : vector<8x8x4xbf16> to vector<64x4xbf16>
    %c8 = arith.constant 8 : index
    %c0_56 = arith.constant 0 : index
    %c0_57 = arith.constant 0 : index
    %60 = vector.load %arg2[%c8, %c0_56, %c0_57] : memref<9x4x32xbf16, #tpu.memory_space<vmem>>, vector<1x4x32xbf16>
    %61 = vector.shape_cast %60 : vector<1x4x32xbf16> to vector<4x32xbf16>
    %cst_58 = arith.constant dense<0.000000e+00> : vector<64x32xf32>
    %62 = tpu.matmul %59, %61, %cst_58 {dimension_numbers = #tpu.dot_dimension_numbers<[1], [0], [0], [1], [0, 0, 1, 1], [], []>} : vector<64x4xbf16>, vector<4x32xbf16>, vector<64x32xf32> -> vector<64x32xf32>
    %63 = arith.addf %56, %62 : vector<64x32xf32>
    %c0_59 = arith.constant 0 : index
    %c0_60 = arith.constant 0 : index
    %64 = vector.load %arg3[%c0_59, %c0_60] : memref<1x32xf32, #tpu.memory_space<vmem>>, vector<1x32xf32>
    %65 = vector.broadcast %64 : vector<1x32xf32> to vector<64x32xf32>
    %66 = arith.addf %63, %65 : vector<64x32xf32>
    %cst_61 = arith.constant 0.000000e+00 : f32
    %67 = vector.broadcast %cst_61 : f32 to vector<64x32xf32>
    %68 = arith.cmpf oge, %66, %67 : vector<64x32xf32>
    %cst_62 = arith.constant 0.00999999977 : f32
    %69 = vector.broadcast %cst_62 : f32 to vector<64x32xf32>
    %70 = arith.mulf %69, %66 : vector<64x32xf32>
    %71 = arith.select %68, %66, %70 : vector<64x32xi1>, vector<64x32xf32>
    %72 = arith.truncf %71 : vector<64x32xf32> to vector<64x32xbf16>
    %c0_63 = arith.constant 0 : index
    %c0_64 = arith.constant 0 : index
    %c0_65 = arith.constant 0 : index
    %73 = vector.load %arg4[%c0_63, %c0_64, %c0_65] : memref<1x64x32xbf16, #tpu.memory_space<vmem>>, vector<1x64x32xbf16>
    %74 = vector.shape_cast %73 : vector<1x64x32xbf16> to vector<64x32xbf16>
    %75 = vector.shape_cast %72 : vector<64x32xbf16> to vector<1x64x32xbf16>
    tpu.vector_store %arg4[%c0_63, %c0_64, %c0_65], %75 {strides = array<i32>} : memref<1x64x32xbf16, #tpu.memory_space<vmem>>, vector<1x64x32xbf16>,
    return
  }
  func.func @transform_0(%arg0: i32) -> (i32, i32, i32, i32) {
    %c0_i32 = arith.constant 0 : i32
    %c0_i32_0 = arith.constant 0 : i32
    %c0_i32_1 = arith.constant 0 : i32
    %c0_i32_2 = arith.constant 0 : i32
    return %arg0, %c0_i32, %c0_i32_0, %c0_i32_1 : i32, i32, i32, i32
  }
  func.func @transform_1(%arg0: i32) -> (i32, i32, i32) {
    %c0_i32 = arith.constant 0 : i32
    %c0_i32_0 = arith.constant 0 : i32
    %c0_i32_1 = arith.constant 0 : i32
    %c0_i32_2 = arith.constant 0 : i32
    return %c0_i32, %c0_i32_0, %c0_i32_1 : i32, i32, i32
  }
  func.func @transform_2(%arg0: i32) -> (i32, i32) {
    %c0_i32 = arith.constant 0 : i32
    %c0_i32_0 = arith.constant 0 : i32
    %c0_i32_1 = arith.constant 0 : i32
    return %c0_i32, %c0_i32_0 : i32, i32
  }
  func.func @transform_3(%arg0: i32) -> (i32, i32, i32) {
    %c0_i32 = arith.constant 0 : i32
    %c0_i32_0 = arith.constant 0 : i32
    %c0_i32_1 = arith.constant 0 : i32
    return %arg0, %c0_i32, %c0_i32_0 : i32, i32, i32
  }
}

module attributes {stable_mosaic.version = 11 : i64} {
  func.func @_conv_kernel(%arg0: i32, %arg1: memref<1x20x5x32xbf16, #tpu.memory_space<vmem>>, %arg2: memref<9x32x64xbf16, #tpu.memory_space<vmem>>, %arg3: memref<1x64xf32, #tpu.memory_space<vmem>>, %arg4: memref<1x16x64xbf16, #tpu.memory_space<vmem>>) attributes {dimension_semantics = [#tpu.dimension_semantics<parallel>], iteration_bounds = array<i64: 2>, scalar_prefetch = 0 : i64, scratch_operands = 0 : i64, tpu.core_type = #tpu.core_type<tc>, window_params = [{transform_indices = @transform_0, window_bounds = array<i64: 1, 20, 5, 32>}, {pipeline_mode = #tpu.pipeline_mode<synchronous>, transform_indices = @transform_1, window_bounds = array<i64: 9, 32, 64>}, {pipeline_mode = #tpu.pipeline_mode<synchronous>, transform_indices = @transform_2, window_bounds = array<i64: 1, 64>}, {transform_indices = @transform_3, window_bounds = array<i64: 1, 16, 64>}]} {
    %cst = arith.constant 0.000000e+00 : f32
    %0 = vector.broadcast %cst : f32 to vector<16x64xf32>
    %c0 = arith.constant 0 : index
    %c0_0 = arith.constant 0 : index
    %c0_1 = arith.constant 0 : index
    %c0_2 = arith.constant 0 : index
    %1 = vector.load %arg1[%c0, %c0_0, %c0_1, %c0_2] : memref<1x20x5x32xbf16, #tpu.memory_space<vmem>>, vector<1x4x4x32xbf16>
    %2 = vector.shape_cast %1 : vector<1x4x4x32xbf16> to vector<4x4x32xbf16>
    %3 = vector.shape_cast %2 : vector<4x4x32xbf16> to vector<16x32xbf16>
    %c0_3 = arith.constant 0 : index
    %c0_4 = arith.constant 0 : index
    %c0_5 = arith.constant 0 : index
    %4 = vector.load %arg2[%c0_3, %c0_4, %c0_5] : memref<9x32x64xbf16, #tpu.memory_space<vmem>>, vector<1x32x64xbf16>
    %5 = vector.shape_cast %4 : vector<1x32x64xbf16> to vector<32x64xbf16>
    %cst_6 = arith.constant dense<0.000000e+00> : vector<16x64xf32>
    %6 = tpu.matmul %3, %5, %cst_6 {dimension_numbers = #tpu.dot_dimension_numbers<[1], [0], [0], [1], [0, 0, 1, 1], [], []>} : vector<16x32xbf16>, vector<32x64xbf16>, vector<16x64xf32> -> vector<16x64xf32>
    %7 = arith.addf %0, %6 : vector<16x64xf32>
    %c0_7 = arith.constant 0 : index
    %c5 = arith.constant 5 : index
    %c0_8 = arith.constant 0 : index
    %c0_9 = arith.constant 0 : index
    %8 = vector.load %arg1[%c0_7, %c5, %c0_8, %c0_9] : memref<1x20x5x32xbf16, #tpu.memory_space<vmem>>, vector<1x4x4x32xbf16>
    %9 = vector.shape_cast %8 : vector<1x4x4x32xbf16> to vector<4x4x32xbf16>
    %10 = vector.shape_cast %9 : vector<4x4x32xbf16> to vector<16x32xbf16>
    %c1 = arith.constant 1 : index
    %c0_10 = arith.constant 0 : index
    %c0_11 = arith.constant 0 : index
    %11 = vector.load %arg2[%c1, %c0_10, %c0_11] : memref<9x32x64xbf16, #tpu.memory_space<vmem>>, vector<1x32x64xbf16>
    %12 = vector.shape_cast %11 : vector<1x32x64xbf16> to vector<32x64xbf16>
    %cst_12 = arith.constant dense<0.000000e+00> : vector<16x64xf32>
    %13 = tpu.matmul %10, %12, %cst_12 {dimension_numbers = #tpu.dot_dimension_numbers<[1], [0], [0], [1], [0, 0, 1, 1], [], []>} : vector<16x32xbf16>, vector<32x64xbf16>, vector<16x64xf32> -> vector<16x64xf32>
    %14 = arith.addf %7, %13 : vector<16x64xf32>
    %c0_13 = arith.constant 0 : index
    %c0_14 = arith.constant 0 : index
    %c1_15 = arith.constant 1 : index
    %c0_16 = arith.constant 0 : index
    %15 = vector.load %arg1[%c0_13, %c0_14, %c1_15, %c0_16] : memref<1x20x5x32xbf16, #tpu.memory_space<vmem>>, vector<1x4x4x32xbf16>
    %16 = vector.shape_cast %15 : vector<1x4x4x32xbf16> to vector<4x4x32xbf16>
    %17 = vector.shape_cast %16 : vector<4x4x32xbf16> to vector<16x32xbf16>
    %c2 = arith.constant 2 : index
    %c0_17 = arith.constant 0 : index
    %c0_18 = arith.constant 0 : index
    %18 = vector.load %arg2[%c2, %c0_17, %c0_18] : memref<9x32x64xbf16, #tpu.memory_space<vmem>>, vector<1x32x64xbf16>
    %19 = vector.shape_cast %18 : vector<1x32x64xbf16> to vector<32x64xbf16>
    %cst_19 = arith.constant dense<0.000000e+00> : vector<16x64xf32>
    %20 = tpu.matmul %17, %19, %cst_19 {dimension_numbers = #tpu.dot_dimension_numbers<[1], [0], [0], [1], [0, 0, 1, 1], [], []>} : vector<16x32xbf16>, vector<32x64xbf16>, vector<16x64xf32> -> vector<16x64xf32>
    %21 = arith.addf %14, %20 : vector<16x64xf32>
    %c0_20 = arith.constant 0 : index
    %c10 = arith.constant 10 : index
    %c0_21 = arith.constant 0 : index
    %c0_22 = arith.constant 0 : index
    %22 = vector.load %arg1[%c0_20, %c10, %c0_21, %c0_22] : memref<1x20x5x32xbf16, #tpu.memory_space<vmem>>, vector<1x4x4x32xbf16>
    %23 = vector.shape_cast %22 : vector<1x4x4x32xbf16> to vector<4x4x32xbf16>
    %24 = vector.shape_cast %23 : vector<4x4x32xbf16> to vector<16x32xbf16>
    %c3 = arith.constant 3 : index
    %c0_23 = arith.constant 0 : index
    %c0_24 = arith.constant 0 : index
    %25 = vector.load %arg2[%c3, %c0_23, %c0_24] : memref<9x32x64xbf16, #tpu.memory_space<vmem>>, vector<1x32x64xbf16>
    %26 = vector.shape_cast %25 : vector<1x32x64xbf16> to vector<32x64xbf16>
    %cst_25 = arith.constant dense<0.000000e+00> : vector<16x64xf32>
    %27 = tpu.matmul %24, %26, %cst_25 {dimension_numbers = #tpu.dot_dimension_numbers<[1], [0], [0], [1], [0, 0, 1, 1], [], []>} : vector<16x32xbf16>, vector<32x64xbf16>, vector<16x64xf32> -> vector<16x64xf32>
    %28 = arith.addf %21, %27 : vector<16x64xf32>
    %c0_26 = arith.constant 0 : index
    %c15 = arith.constant 15 : index
    %c0_27 = arith.constant 0 : index
    %c0_28 = arith.constant 0 : index
    %29 = vector.load %arg1[%c0_26, %c15, %c0_27, %c0_28] : memref<1x20x5x32xbf16, #tpu.memory_space<vmem>>, vector<1x4x4x32xbf16>
    %30 = vector.shape_cast %29 : vector<1x4x4x32xbf16> to vector<4x4x32xbf16>
    %31 = vector.shape_cast %30 : vector<4x4x32xbf16> to vector<16x32xbf16>
    %c4 = arith.constant 4 : index
    %c0_29 = arith.constant 0 : index
    %c0_30 = arith.constant 0 : index
    %32 = vector.load %arg2[%c4, %c0_29, %c0_30] : memref<9x32x64xbf16, #tpu.memory_space<vmem>>, vector<1x32x64xbf16>
    %33 = vector.shape_cast %32 : vector<1x32x64xbf16> to vector<32x64xbf16>
    %cst_31 = arith.constant dense<0.000000e+00> : vector<16x64xf32>
    %34 = tpu.matmul %31, %33, %cst_31 {dimension_numbers = #tpu.dot_dimension_numbers<[1], [0], [0], [1], [0, 0, 1, 1], [], []>} : vector<16x32xbf16>, vector<32x64xbf16>, vector<16x64xf32> -> vector<16x64xf32>
    %35 = arith.addf %28, %34 : vector<16x64xf32>
    %c0_32 = arith.constant 0 : index
    %c10_33 = arith.constant 10 : index
    %c1_34 = arith.constant 1 : index
    %c0_35 = arith.constant 0 : index
    %36 = vector.load %arg1[%c0_32, %c10_33, %c1_34, %c0_35] : memref<1x20x5x32xbf16, #tpu.memory_space<vmem>>, vector<1x4x4x32xbf16>
    %37 = vector.shape_cast %36 : vector<1x4x4x32xbf16> to vector<4x4x32xbf16>
    %38 = vector.shape_cast %37 : vector<4x4x32xbf16> to vector<16x32xbf16>
    %c5_36 = arith.constant 5 : index
    %c0_37 = arith.constant 0 : index
    %c0_38 = arith.constant 0 : index
    %39 = vector.load %arg2[%c5_36, %c0_37, %c0_38] : memref<9x32x64xbf16, #tpu.memory_space<vmem>>, vector<1x32x64xbf16>
    %40 = vector.shape_cast %39 : vector<1x32x64xbf16> to vector<32x64xbf16>
    %cst_39 = arith.constant dense<0.000000e+00> : vector<16x64xf32>
    %41 = tpu.matmul %38, %40, %cst_39 {dimension_numbers = #tpu.dot_dimension_numbers<[1], [0], [0], [1], [0, 0, 1, 1], [], []>} : vector<16x32xbf16>, vector<32x64xbf16>, vector<16x64xf32> -> vector<16x64xf32>
    %42 = arith.addf %35, %41 : vector<16x64xf32>
    %c0_40 = arith.constant 0 : index
    %c1_41 = arith.constant 1 : index
    %c0_42 = arith.constant 0 : index
    %c0_43 = arith.constant 0 : index
    %43 = vector.load %arg1[%c0_40, %c1_41, %c0_42, %c0_43] : memref<1x20x5x32xbf16, #tpu.memory_space<vmem>>, vector<1x4x4x32xbf16>
    %44 = vector.shape_cast %43 : vector<1x4x4x32xbf16> to vector<4x4x32xbf16>
    %45 = vector.shape_cast %44 : vector<4x4x32xbf16> to vector<16x32xbf16>
    %c6 = arith.constant 6 : index
    %c0_44 = arith.constant 0 : index
    %c0_45 = arith.constant 0 : index
    %46 = vector.load %arg2[%c6, %c0_44, %c0_45] : memref<9x32x64xbf16, #tpu.memory_space<vmem>>, vector<1x32x64xbf16>
    %47 = vector.shape_cast %46 : vector<1x32x64xbf16> to vector<32x64xbf16>
    %cst_46 = arith.constant dense<0.000000e+00> : vector<16x64xf32>
    %48 = tpu.matmul %45, %47, %cst_46 {dimension_numbers = #tpu.dot_dimension_numbers<[1], [0], [0], [1], [0, 0, 1, 1], [], []>} : vector<16x32xbf16>, vector<32x64xbf16>, vector<16x64xf32> -> vector<16x64xf32>
    %49 = arith.addf %42, %48 : vector<16x64xf32>
    %c0_47 = arith.constant 0 : index
    %c6_48 = arith.constant 6 : index
    %c0_49 = arith.constant 0 : index
    %c0_50 = arith.constant 0 : index
    %50 = vector.load %arg1[%c0_47, %c6_48, %c0_49, %c0_50] : memref<1x20x5x32xbf16, #tpu.memory_space<vmem>>, vector<1x4x4x32xbf16>
    %51 = vector.shape_cast %50 : vector<1x4x4x32xbf16> to vector<4x4x32xbf16>
    %52 = vector.shape_cast %51 : vector<4x4x32xbf16> to vector<16x32xbf16>
    %c7 = arith.constant 7 : index
    %c0_51 = arith.constant 0 : index
    %c0_52 = arith.constant 0 : index
    %53 = vector.load %arg2[%c7, %c0_51, %c0_52] : memref<9x32x64xbf16, #tpu.memory_space<vmem>>, vector<1x32x64xbf16>
    %54 = vector.shape_cast %53 : vector<1x32x64xbf16> to vector<32x64xbf16>
    %cst_53 = arith.constant dense<0.000000e+00> : vector<16x64xf32>
    %55 = tpu.matmul %52, %54, %cst_53 {dimension_numbers = #tpu.dot_dimension_numbers<[1], [0], [0], [1], [0, 0, 1, 1], [], []>} : vector<16x32xbf16>, vector<32x64xbf16>, vector<16x64xf32> -> vector<16x64xf32>
    %56 = arith.addf %49, %55 : vector<16x64xf32>
    %c0_54 = arith.constant 0 : index
    %c1_55 = arith.constant 1 : index
    %c1_56 = arith.constant 1 : index
    %c0_57 = arith.constant 0 : index
    %57 = vector.load %arg1[%c0_54, %c1_55, %c1_56, %c0_57] : memref<1x20x5x32xbf16, #tpu.memory_space<vmem>>, vector<1x4x4x32xbf16>
    %58 = vector.shape_cast %57 : vector<1x4x4x32xbf16> to vector<4x4x32xbf16>
    %59 = vector.shape_cast %58 : vector<4x4x32xbf16> to vector<16x32xbf16>
    %c8 = arith.constant 8 : index
    %c0_58 = arith.constant 0 : index
    %c0_59 = arith.constant 0 : index
    %60 = vector.load %arg2[%c8, %c0_58, %c0_59] : memref<9x32x64xbf16, #tpu.memory_space<vmem>>, vector<1x32x64xbf16>
    %61 = vector.shape_cast %60 : vector<1x32x64xbf16> to vector<32x64xbf16>
    %cst_60 = arith.constant dense<0.000000e+00> : vector<16x64xf32>
    %62 = tpu.matmul %59, %61, %cst_60 {dimension_numbers = #tpu.dot_dimension_numbers<[1], [0], [0], [1], [0, 0, 1, 1], [], []>} : vector<16x32xbf16>, vector<32x64xbf16>, vector<16x64xf32> -> vector<16x64xf32>
    %63 = arith.addf %56, %62 : vector<16x64xf32>
    %c0_61 = arith.constant 0 : index
    %c0_62 = arith.constant 0 : index
    %64 = vector.load %arg3[%c0_61, %c0_62] : memref<1x64xf32, #tpu.memory_space<vmem>>, vector<1x64xf32>
    %65 = vector.broadcast %64 : vector<1x64xf32> to vector<16x64xf32>
    %66 = arith.addf %63, %65 : vector<16x64xf32>
    %cst_63 = arith.constant 0.000000e+00 : f32
    %67 = vector.broadcast %cst_63 : f32 to vector<16x64xf32>
    %68 = arith.cmpf oge, %66, %67 : vector<16x64xf32>
    %cst_64 = arith.constant 0.00999999977 : f32
    %69 = vector.broadcast %cst_64 : f32 to vector<16x64xf32>
    %70 = arith.mulf %69, %66 : vector<16x64xf32>
    %71 = arith.select %68, %66, %70 : vector<16x64xi1>, vector<16x64xf32>
    %72 = arith.truncf %71 : vector<16x64xf32> to vector<16x64xbf16>
    %c0_65 = arith.constant 0 : index
    %c0_66 = arith.constant 0 : index
    %c0_67 = arith.constant 0 : index
    %73 = vector.load %arg4[%c0_65, %c0_66, %c0_67] : memref<1x16x64xbf16, #tpu.memory_space<vmem>>, vector<1x16x64xbf16>
    %74 = vector.shape_cast %73 : vector<1x16x64xbf16> to vector<16x64xbf16>
    %75 = vector.shape_cast %72 : vector<16x64xbf16> to vector<1x16x64xbf16>
    tpu.vector_store %arg4[%c0_65, %c0_66, %c0_67], %75 {strides = array<i32>} : memref<1x16x64xbf16, #tpu.memory_space<vmem>>, vector<1x16x64xbf16>,
    return
  }
  func.func @transform_0(%arg0: i32) -> (i32, i32, i32, i32) {
    %c0_i32 = arith.constant 0 : i32
    %c0_i32_0 = arith.constant 0 : i32
    %c0_i32_1 = arith.constant 0 : i32
    %c0_i32_2 = arith.constant 0 : i32
    return %arg0, %c0_i32, %c0_i32_0, %c0_i32_1 : i32, i32, i32, i32
  }
  func.func @transform_1(%arg0: i32) -> (i32, i32, i32) {
    %c0_i32 = arith.constant 0 : i32
    %c0_i32_0 = arith.constant 0 : i32
    %c0_i32_1 = arith.constant 0 : i32
    %c0_i32_2 = arith.constant 0 : i32
    return %c0_i32, %c0_i32_0, %c0_i32_1 : i32, i32, i32
  }
  func.func @transform_2(%arg0: i32) -> (i32, i32) {
    %c0_i32 = arith.constant 0 : i32
    %c0_i32_0 = arith.constant 0 : i32
    %c0_i32_1 = arith.constant 0 : i32
    return %c0_i32, %c0_i32_0 : i32, i32
  }
  func.func @transform_3(%arg0: i32) -> (i32, i32, i32) {
    %c0_i32 = arith.constant 0 : i32
    %c0_i32_0 = arith.constant 0 : i32
    %c0_i32_1 = arith.constant 0 : i32
    return %arg0, %c0_i32, %c0_i32_0 : i32, i32, i32
  }
}

module attributes {stable_mosaic.version = 11 : i64} {
  func.func @_conv_kernel(%arg0: i32, %arg1: memref<1x6x6x64xbf16, #tpu.memory_space<vmem>>, %arg2: memref<9x64x64xbf16, #tpu.memory_space<vmem>>, %arg3: memref<1x64xf32, #tpu.memory_space<vmem>>, %arg4: memref<1x16x64xbf16, #tpu.memory_space<vmem>>) attributes {dimension_semantics = [#tpu.dimension_semantics<parallel>], iteration_bounds = array<i64: 2>, scalar_prefetch = 0 : i64, scratch_operands = 0 : i64, tpu.core_type = #tpu.core_type<tc>, window_params = [{transform_indices = @transform_0, window_bounds = array<i64: 1, 6, 6, 64>}, {pipeline_mode = #tpu.pipeline_mode<synchronous>, transform_indices = @transform_1, window_bounds = array<i64: 9, 64, 64>}, {pipeline_mode = #tpu.pipeline_mode<synchronous>, transform_indices = @transform_2, window_bounds = array<i64: 1, 64>}, {transform_indices = @transform_3, window_bounds = array<i64: 1, 16, 64>}]} {
    %cst = arith.constant 0.000000e+00 : f32
    %0 = vector.broadcast %cst : f32 to vector<16x64xf32>
    %c0 = arith.constant 0 : index
    %c0_0 = arith.constant 0 : index
    %c0_1 = arith.constant 0 : index
    %c0_2 = arith.constant 0 : index
    %1 = vector.load %arg1[%c0, %c0_0, %c0_1, %c0_2] : memref<1x6x6x64xbf16, #tpu.memory_space<vmem>>, vector<1x4x4x64xbf16>
    %2 = vector.shape_cast %1 : vector<1x4x4x64xbf16> to vector<4x4x64xbf16>
    %3 = vector.shape_cast %2 : vector<4x4x64xbf16> to vector<16x64xbf16>
    %c0_3 = arith.constant 0 : index
    %c0_4 = arith.constant 0 : index
    %c0_5 = arith.constant 0 : index
    %4 = vector.load %arg2[%c0_3, %c0_4, %c0_5] : memref<9x64x64xbf16, #tpu.memory_space<vmem>>, vector<1x64x64xbf16>
    %5 = vector.shape_cast %4 : vector<1x64x64xbf16> to vector<64x64xbf16>
    %cst_6 = arith.constant dense<0.000000e+00> : vector<16x64xf32>
    %6 = tpu.matmul %3, %5, %cst_6 {dimension_numbers = #tpu.dot_dimension_numbers<[1], [0], [0], [1], [0, 0, 1, 1], [], []>} : vector<16x64xbf16>, vector<64x64xbf16>, vector<16x64xf32> -> vector<16x64xf32>
    %7 = arith.addf %0, %6 : vector<16x64xf32>
    %c0_7 = arith.constant 0 : index
    %c0_8 = arith.constant 0 : index
    %c1 = arith.constant 1 : index
    %c0_9 = arith.constant 0 : index
    %8 = vector.load %arg1[%c0_7, %c0_8, %c1, %c0_9] : memref<1x6x6x64xbf16, #tpu.memory_space<vmem>>, vector<1x4x4x64xbf16>
    %9 = vector.shape_cast %8 : vector<1x4x4x64xbf16> to vector<4x4x64xbf16>
    %10 = vector.shape_cast %9 : vector<4x4x64xbf16> to vector<16x64xbf16>
    %c1_10 = arith.constant 1 : index
    %c0_11 = arith.constant 0 : index
    %c0_12 = arith.constant 0 : index
    %11 = vector.load %arg2[%c1_10, %c0_11, %c0_12] : memref<9x64x64xbf16, #tpu.memory_space<vmem>>, vector<1x64x64xbf16>
    %12 = vector.shape_cast %11 : vector<1x64x64xbf16> to vector<64x64xbf16>
    %cst_13 = arith.constant dense<0.000000e+00> : vector<16x64xf32>
    %13 = tpu.matmul %10, %12, %cst_13 {dimension_numbers = #tpu.dot_dimension_numbers<[1], [0], [0], [1], [0, 0, 1, 1], [], []>} : vector<16x64xbf16>, vector<64x64xbf16>, vector<16x64xf32> -> vector<16x64xf32>
    %14 = arith.addf %7, %13 : vector<16x64xf32>
    %c0_14 = arith.constant 0 : index
    %c0_15 = arith.constant 0 : index
    %c2 = arith.constant 2 : index
    %c0_16 = arith.constant 0 : index
    %15 = vector.load %arg1[%c0_14, %c0_15, %c2, %c0_16] : memref<1x6x6x64xbf16, #tpu.memory_space<vmem>>, vector<1x4x4x64xbf16>
    %16 = vector.shape_cast %15 : vector<1x4x4x64xbf16> to vector<4x4x64xbf16>
    %17 = vector.shape_cast %16 : vector<4x4x64xbf16> to vector<16x64xbf16>
    %c2_17 = arith.constant 2 : index
    %c0_18 = arith.constant 0 : index
    %c0_19 = arith.constant 0 : index
    %18 = vector.load %arg2[%c2_17, %c0_18, %c0_19] : memref<9x64x64xbf16, #tpu.memory_space<vmem>>, vector<1x64x64xbf16>
    %19 = vector.shape_cast %18 : vector<1x64x64xbf16> to vector<64x64xbf16>
    %cst_20 = arith.constant dense<0.000000e+00> : vector<16x64xf32>
    %20 = tpu.matmul %17, %19, %cst_20 {dimension_numbers = #tpu.dot_dimension_numbers<[1], [0], [0], [1], [0, 0, 1, 1], [], []>} : vector<16x64xbf16>, vector<64x64xbf16>, vector<16x64xf32> -> vector<16x64xf32>
    %21 = arith.addf %14, %20 : vector<16x64xf32>
    %c0_21 = arith.constant 0 : index
    %c1_22 = arith.constant 1 : index
    %c0_23 = arith.constant 0 : index
    %c0_24 = arith.constant 0 : index
    %22 = vector.load %arg1[%c0_21, %c1_22, %c0_23, %c0_24] : memref<1x6x6x64xbf16, #tpu.memory_space<vmem>>, vector<1x4x4x64xbf16>
    %23 = vector.shape_cast %22 : vector<1x4x4x64xbf16> to vector<4x4x64xbf16>
    %24 = vector.shape_cast %23 : vector<4x4x64xbf16> to vector<16x64xbf16>
    %c3 = arith.constant 3 : index
    %c0_25 = arith.constant 0 : index
    %c0_26 = arith.constant 0 : index
    %25 = vector.load %arg2[%c3, %c0_25, %c0_26] : memref<9x64x64xbf16, #tpu.memory_space<vmem>>, vector<1x64x64xbf16>
    %26 = vector.shape_cast %25 : vector<1x64x64xbf16> to vector<64x64xbf16>
    %cst_27 = arith.constant dense<0.000000e+00> : vector<16x64xf32>
    %27 = tpu.matmul %24, %26, %cst_27 {dimension_numbers = #tpu.dot_dimension_numbers<[1], [0], [0], [1], [0, 0, 1, 1], [], []>} : vector<16x64xbf16>, vector<64x64xbf16>, vector<16x64xf32> -> vector<16x64xf32>
    %28 = arith.addf %21, %27 : vector<16x64xf32>
    %c0_28 = arith.constant 0 : index
    %c1_29 = arith.constant 1 : index
    %c1_30 = arith.constant 1 : index
    %c0_31 = arith.constant 0 : index
    %29 = vector.load %arg1[%c0_28, %c1_29, %c1_30, %c0_31] : memref<1x6x6x64xbf16, #tpu.memory_space<vmem>>, vector<1x4x4x64xbf16>
    %30 = vector.shape_cast %29 : vector<1x4x4x64xbf16> to vector<4x4x64xbf16>
    %31 = vector.shape_cast %30 : vector<4x4x64xbf16> to vector<16x64xbf16>
    %c4 = arith.constant 4 : index
    %c0_32 = arith.constant 0 : index
    %c0_33 = arith.constant 0 : index
    %32 = vector.load %arg2[%c4, %c0_32, %c0_33] : memref<9x64x64xbf16, #tpu.memory_space<vmem>>, vector<1x64x64xbf16>
    %33 = vector.shape_cast %32 : vector<1x64x64xbf16> to vector<64x64xbf16>
    %cst_34 = arith.constant dense<0.000000e+00> : vector<16x64xf32>
    %34 = tpu.matmul %31, %33, %cst_34 {dimension_numbers = #tpu.dot_dimension_numbers<[1], [0], [0], [1], [0, 0, 1, 1], [], []>} : vector<16x64xbf16>, vector<64x64xbf16>, vector<16x64xf32> -> vector<16x64xf32>
    %35 = arith.addf %28, %34 : vector<16x64xf32>
    %c0_35 = arith.constant 0 : index
    %c1_36 = arith.constant 1 : index
    %c2_37 = arith.constant 2 : index
    %c0_38 = arith.constant 0 : index
    %36 = vector.load %arg1[%c0_35, %c1_36, %c2_37, %c0_38] : memref<1x6x6x64xbf16, #tpu.memory_space<vmem>>, vector<1x4x4x64xbf16>
    %37 = vector.shape_cast %36 : vector<1x4x4x64xbf16> to vector<4x4x64xbf16>
    %38 = vector.shape_cast %37 : vector<4x4x64xbf16> to vector<16x64xbf16>
    %c5 = arith.constant 5 : index
    %c0_39 = arith.constant 0 : index
    %c0_40 = arith.constant 0 : index
    %39 = vector.load %arg2[%c5, %c0_39, %c0_40] : memref<9x64x64xbf16, #tpu.memory_space<vmem>>, vector<1x64x64xbf16>
    %40 = vector.shape_cast %39 : vector<1x64x64xbf16> to vector<64x64xbf16>
    %cst_41 = arith.constant dense<0.000000e+00> : vector<16x64xf32>
    %41 = tpu.matmul %38, %40, %cst_41 {dimension_numbers = #tpu.dot_dimension_numbers<[1], [0], [0], [1], [0, 0, 1, 1], [], []>} : vector<16x64xbf16>, vector<64x64xbf16>, vector<16x64xf32> -> vector<16x64xf32>
    %42 = arith.addf %35, %41 : vector<16x64xf32>
    %c0_42 = arith.constant 0 : index
    %c2_43 = arith.constant 2 : index
    %c0_44 = arith.constant 0 : index
    %c0_45 = arith.constant 0 : index
    %43 = vector.load %arg1[%c0_42, %c2_43, %c0_44, %c0_45] : memref<1x6x6x64xbf16, #tpu.memory_space<vmem>>, vector<1x4x4x64xbf16>
    %44 = vector.shape_cast %43 : vector<1x4x4x64xbf16> to vector<4x4x64xbf16>
    %45 = vector.shape_cast %44 : vector<4x4x64xbf16> to vector<16x64xbf16>
    %c6 = arith.constant 6 : index
    %c0_46 = arith.constant 0 : index
    %c0_47 = arith.constant 0 : index
    %46 = vector.load %arg2[%c6, %c0_46, %c0_47] : memref<9x64x64xbf16, #tpu.memory_space<vmem>>, vector<1x64x64xbf16>
    %47 = vector.shape_cast %46 : vector<1x64x64xbf16> to vector<64x64xbf16>
    %cst_48 = arith.constant dense<0.000000e+00> : vector<16x64xf32>
    %48 = tpu.matmul %45, %47, %cst_48 {dimension_numbers = #tpu.dot_dimension_numbers<[1], [0], [0], [1], [0, 0, 1, 1], [], []>} : vector<16x64xbf16>, vector<64x64xbf16>, vector<16x64xf32> -> vector<16x64xf32>
    %49 = arith.addf %42, %48 : vector<16x64xf32>
    %c0_49 = arith.constant 0 : index
    %c2_50 = arith.constant 2 : index
    %c1_51 = arith.constant 1 : index
    %c0_52 = arith.constant 0 : index
    %50 = vector.load %arg1[%c0_49, %c2_50, %c1_51, %c0_52] : memref<1x6x6x64xbf16, #tpu.memory_space<vmem>>, vector<1x4x4x64xbf16>
    %51 = vector.shape_cast %50 : vector<1x4x4x64xbf16> to vector<4x4x64xbf16>
    %52 = vector.shape_cast %51 : vector<4x4x64xbf16> to vector<16x64xbf16>
    %c7 = arith.constant 7 : index
    %c0_53 = arith.constant 0 : index
    %c0_54 = arith.constant 0 : index
    %53 = vector.load %arg2[%c7, %c0_53, %c0_54] : memref<9x64x64xbf16, #tpu.memory_space<vmem>>, vector<1x64x64xbf16>
    %54 = vector.shape_cast %53 : vector<1x64x64xbf16> to vector<64x64xbf16>
    %cst_55 = arith.constant dense<0.000000e+00> : vector<16x64xf32>
    %55 = tpu.matmul %52, %54, %cst_55 {dimension_numbers = #tpu.dot_dimension_numbers<[1], [0], [0], [1], [0, 0, 1, 1], [], []>} : vector<16x64xbf16>, vector<64x64xbf16>, vector<16x64xf32> -> vector<16x64xf32>
    %56 = arith.addf %49, %55 : vector<16x64xf32>
    %c0_56 = arith.constant 0 : index
    %c2_57 = arith.constant 2 : index
    %c2_58 = arith.constant 2 : index
    %c0_59 = arith.constant 0 : index
    %57 = vector.load %arg1[%c0_56, %c2_57, %c2_58, %c0_59] : memref<1x6x6x64xbf16, #tpu.memory_space<vmem>>, vector<1x4x4x64xbf16>
    %58 = vector.shape_cast %57 : vector<1x4x4x64xbf16> to vector<4x4x64xbf16>
    %59 = vector.shape_cast %58 : vector<4x4x64xbf16> to vector<16x64xbf16>
    %c8 = arith.constant 8 : index
    %c0_60 = arith.constant 0 : index
    %c0_61 = arith.constant 0 : index
    %60 = vector.load %arg2[%c8, %c0_60, %c0_61] : memref<9x64x64xbf16, #tpu.memory_space<vmem>>, vector<1x64x64xbf16>
    %61 = vector.shape_cast %60 : vector<1x64x64xbf16> to vector<64x64xbf16>
    %cst_62 = arith.constant dense<0.000000e+00> : vector<16x64xf32>
    %62 = tpu.matmul %59, %61, %cst_62 {dimension_numbers = #tpu.dot_dimension_numbers<[1], [0], [0], [1], [0, 0, 1, 1], [], []>} : vector<16x64xbf16>, vector<64x64xbf16>, vector<16x64xf32> -> vector<16x64xf32>
    %63 = arith.addf %56, %62 : vector<16x64xf32>
    %c0_63 = arith.constant 0 : index
    %c0_64 = arith.constant 0 : index
    %64 = vector.load %arg3[%c0_63, %c0_64] : memref<1x64xf32, #tpu.memory_space<vmem>>, vector<1x64xf32>
    %65 = vector.broadcast %64 : vector<1x64xf32> to vector<16x64xf32>
    %66 = arith.addf %63, %65 : vector<16x64xf32>
    %cst_65 = arith.constant 0.000000e+00 : f32
    %67 = vector.broadcast %cst_65 : f32 to vector<16x64xf32>
    %68 = arith.cmpf oge, %66, %67 : vector<16x64xf32>
    %cst_66 = arith.constant 0.00999999977 : f32
    %69 = vector.broadcast %cst_66 : f32 to vector<16x64xf32>
    %70 = arith.mulf %69, %66 : vector<16x64xf32>
    %71 = arith.select %68, %66, %70 : vector<16x64xi1>, vector<16x64xf32>
    %72 = arith.truncf %71 : vector<16x64xf32> to vector<16x64xbf16>
    %c0_67 = arith.constant 0 : index
    %c0_68 = arith.constant 0 : index
    %c0_69 = arith.constant 0 : index
    %73 = vector.load %arg4[%c0_67, %c0_68, %c0_69] : memref<1x16x64xbf16, #tpu.memory_space<vmem>>, vector<1x16x64xbf16>
    %74 = vector.shape_cast %73 : vector<1x16x64xbf16> to vector<16x64xbf16>
    %75 = vector.shape_cast %72 : vector<16x64xbf16> to vector<1x16x64xbf16>
    tpu.vector_store %arg4[%c0_67, %c0_68, %c0_69], %75 {strides = array<i32>} : memref<1x16x64xbf16, #tpu.memory_space<vmem>>, vector<1x16x64xbf16>,
    return
  }
  func.func @transform_0(%arg0: i32) -> (i32, i32, i32, i32) {
    %c0_i32 = arith.constant 0 : i32
    %c0_i32_0 = arith.constant 0 : i32
    %c0_i32_1 = arith.constant 0 : i32
    %c0_i32_2 = arith.constant 0 : i32
    return %arg0, %c0_i32, %c0_i32_0, %c0_i32_1 : i32, i32, i32, i32
  }
  func.func @transform_1(%arg0: i32) -> (i32, i32, i32) {
    %c0_i32 = arith.constant 0 : i32
    %c0_i32_0 = arith.constant 0 : i32
    %c0_i32_1 = arith.constant 0 : i32
    %c0_i32_2 = arith.constant 0 : i32
    return %c0_i32, %c0_i32_0, %c0_i32_1 : i32, i32, i32
  }
  func.func @transform_2(%arg0: i32) -> (i32, i32) {
    %c0_i32 = arith.constant 0 : i32
    %c0_i32_0 = arith.constant 0 : i32
    %c0_i32_1 = arith.constant 0 : i32
    return %c0_i32, %c0_i32_0 : i32, i32
  }
  func.func @transform_3(%arg0: i32) -> (i32, i32, i32) {
    %c0_i32 = arith.constant 0 : i32
    %c0_i32_0 = arith.constant 0 : i32
    %c0_i32_1 = arith.constant 0 : i32
    return %arg0, %c0_i32, %c0_i32_0 : i32, i32, i32
  }
}

module attributes {stable_mosaic.version = 11 : i64} {
  func.func @_conv_kernel(%arg0: i32, %arg1: memref<1x4x4x32xbf16, #tpu.memory_space<vmem>>, %arg2: memref<1x32x64xbf16, #tpu.memory_space<vmem>>, %arg3: memref<1x64xf32, #tpu.memory_space<vmem>>, %arg4: memref<1x16x64xbf16, #tpu.memory_space<vmem>>) attributes {dimension_semantics = [#tpu.dimension_semantics<parallel>], iteration_bounds = array<i64: 2>, scalar_prefetch = 0 : i64, scratch_operands = 0 : i64, tpu.core_type = #tpu.core_type<tc>, window_params = [{transform_indices = @transform_0, window_bounds = array<i64: 1, 4, 4, 32>}, {pipeline_mode = #tpu.pipeline_mode<synchronous>, transform_indices = @transform_1, window_bounds = array<i64: 1, 32, 64>}, {pipeline_mode = #tpu.pipeline_mode<synchronous>, transform_indices = @transform_2, window_bounds = array<i64: 1, 64>}, {transform_indices = @transform_3, window_bounds = array<i64: 1, 16, 64>}]} {
    %cst = arith.constant 0.000000e+00 : f32
    %0 = vector.broadcast %cst : f32 to vector<16x64xf32>
    %c0 = arith.constant 0 : index
    %c0_0 = arith.constant 0 : index
    %c0_1 = arith.constant 0 : index
    %c0_2 = arith.constant 0 : index
    %1 = vector.load %arg1[%c0, %c0_0, %c0_1, %c0_2] : memref<1x4x4x32xbf16, #tpu.memory_space<vmem>>, vector<1x4x4x32xbf16>
    %2 = vector.shape_cast %1 : vector<1x4x4x32xbf16> to vector<4x4x32xbf16>
    %3 = vector.shape_cast %2 : vector<4x4x32xbf16> to vector<16x32xbf16>
    %c0_3 = arith.constant 0 : index
    %c0_4 = arith.constant 0 : index
    %c0_5 = arith.constant 0 : index
    %4 = vector.load %arg2[%c0_3, %c0_4, %c0_5] : memref<1x32x64xbf16, #tpu.memory_space<vmem>>, vector<1x32x64xbf16>
    %5 = vector.shape_cast %4 : vector<1x32x64xbf16> to vector<32x64xbf16>
    %cst_6 = arith.constant dense<0.000000e+00> : vector<16x64xf32>
    %6 = tpu.matmul %3, %5, %cst_6 {dimension_numbers = #tpu.dot_dimension_numbers<[1], [0], [0], [1], [0, 0, 1, 1], [], []>} : vector<16x32xbf16>, vector<32x64xbf16>, vector<16x64xf32> -> vector<16x64xf32>
    %7 = arith.addf %0, %6 : vector<16x64xf32>
    %c0_7 = arith.constant 0 : index
    %c0_8 = arith.constant 0 : index
    %8 = vector.load %arg3[%c0_7, %c0_8] : memref<1x64xf32, #tpu.memory_space<vmem>>, vector<1x64xf32>
    %9 = vector.broadcast %8 : vector<1x64xf32> to vector<16x64xf32>
    %10 = arith.addf %7, %9 : vector<16x64xf32>
    %11 = arith.truncf %10 : vector<16x64xf32> to vector<16x64xbf16>
    %c0_9 = arith.constant 0 : index
    %c0_10 = arith.constant 0 : index
    %c0_11 = arith.constant 0 : index
    %12 = vector.load %arg4[%c0_9, %c0_10, %c0_11] : memref<1x16x64xbf16, #tpu.memory_space<vmem>>, vector<1x16x64xbf16>
    %13 = vector.shape_cast %12 : vector<1x16x64xbf16> to vector<16x64xbf16>
    %14 = vector.shape_cast %11 : vector<16x64xbf16> to vector<1x16x64xbf16>
    tpu.vector_store %arg4[%c0_9, %c0_10, %c0_11], %14 {strides = array<i32>} : memref<1x16x64xbf16, #tpu.memory_space<vmem>>, vector<1x16x64xbf16>,
    return
  }
  func.func @transform_0(%arg0: i32) -> (i32, i32, i32, i32) {
    %c0_i32 = arith.constant 0 : i32
    %c0_i32_0 = arith.constant 0 : i32
    %c0_i32_1 = arith.constant 0 : i32
    %c0_i32_2 = arith.constant 0 : i32
    return %arg0, %c0_i32, %c0_i32_0, %c0_i32_1 : i32, i32, i32, i32
  }
  func.func @transform_1(%arg0: i32) -> (i32, i32, i32) {
    %c0_i32 = arith.constant 0 : i32
    %c0_i32_0 = arith.constant 0 : i32
    %c0_i32_1 = arith.constant 0 : i32
    %c0_i32_2 = arith.constant 0 : i32
    return %c0_i32, %c0_i32_0, %c0_i32_1 : i32, i32, i32
  }
  func.func @transform_2(%arg0: i32) -> (i32, i32) {
    %c0_i32 = arith.constant 0 : i32
    %c0_i32_0 = arith.constant 0 : i32
    %c0_i32_1 = arith.constant 0 : i32
    return %c0_i32, %c0_i32_0 : i32, i32
  }
  func.func @transform_3(%arg0: i32) -> (i32, i32, i32) {
    %c0_i32 = arith.constant 0 : i32
    %c0_i32_0 = arith.constant 0 : i32
    %c0_i32_1 = arith.constant 0 : i32
    return %arg0, %c0_i32, %c0_i32_0 : i32, i32, i32
  }
}

module attributes {stable_mosaic.version = 11 : i64} {
  func.func @_conv_kernel(%arg0: i32, %arg1: memref<1x6x6x64xbf16, #tpu.memory_space<vmem>>, %arg2: memref<9x64x64xbf16, #tpu.memory_space<vmem>>, %arg3: memref<1x64xf32, #tpu.memory_space<vmem>>, %arg4: memref<1x16x64xbf16, #tpu.memory_space<vmem>>, %arg5: memref<1x16x64xbf16, #tpu.memory_space<vmem>>) attributes {dimension_semantics = [#tpu.dimension_semantics<parallel>], iteration_bounds = array<i64: 2>, scalar_prefetch = 0 : i64, scratch_operands = 0 : i64, tpu.core_type = #tpu.core_type<tc>, window_params = [{transform_indices = @transform_0, window_bounds = array<i64: 1, 6, 6, 64>}, {pipeline_mode = #tpu.pipeline_mode<synchronous>, transform_indices = @transform_1, window_bounds = array<i64: 9, 64, 64>}, {pipeline_mode = #tpu.pipeline_mode<synchronous>, transform_indices = @transform_2, window_bounds = array<i64: 1, 64>}, {transform_indices = @transform_3, window_bounds = array<i64: 1, 16, 64>}, {transform_indices = @transform_4, window_bounds = array<i64: 1, 16, 64>}]} {
    %cst = arith.constant 0.000000e+00 : f32
    %0 = vector.broadcast %cst : f32 to vector<16x64xf32>
    %c0 = arith.constant 0 : index
    %c0_0 = arith.constant 0 : index
    %c0_1 = arith.constant 0 : index
    %c0_2 = arith.constant 0 : index
    %1 = vector.load %arg1[%c0, %c0_0, %c0_1, %c0_2] : memref<1x6x6x64xbf16, #tpu.memory_space<vmem>>, vector<1x4x4x64xbf16>
    %2 = vector.shape_cast %1 : vector<1x4x4x64xbf16> to vector<4x4x64xbf16>
    %3 = vector.shape_cast %2 : vector<4x4x64xbf16> to vector<16x64xbf16>
    %c0_3 = arith.constant 0 : index
    %c0_4 = arith.constant 0 : index
    %c0_5 = arith.constant 0 : index
    %4 = vector.load %arg2[%c0_3, %c0_4, %c0_5] : memref<9x64x64xbf16, #tpu.memory_space<vmem>>, vector<1x64x64xbf16>
    %5 = vector.shape_cast %4 : vector<1x64x64xbf16> to vector<64x64xbf16>
    %cst_6 = arith.constant dense<0.000000e+00> : vector<16x64xf32>
    %6 = tpu.matmul %3, %5, %cst_6 {dimension_numbers = #tpu.dot_dimension_numbers<[1], [0], [0], [1], [0, 0, 1, 1], [], []>} : vector<16x64xbf16>, vector<64x64xbf16>, vector<16x64xf32> -> vector<16x64xf32>
    %7 = arith.addf %0, %6 : vector<16x64xf32>
    %c0_7 = arith.constant 0 : index
    %c0_8 = arith.constant 0 : index
    %c1 = arith.constant 1 : index
    %c0_9 = arith.constant 0 : index
    %8 = vector.load %arg1[%c0_7, %c0_8, %c1, %c0_9] : memref<1x6x6x64xbf16, #tpu.memory_space<vmem>>, vector<1x4x4x64xbf16>
    %9 = vector.shape_cast %8 : vector<1x4x4x64xbf16> to vector<4x4x64xbf16>
    %10 = vector.shape_cast %9 : vector<4x4x64xbf16> to vector<16x64xbf16>
    %c1_10 = arith.constant 1 : index
    %c0_11 = arith.constant 0 : index
    %c0_12 = arith.constant 0 : index
    %11 = vector.load %arg2[%c1_10, %c0_11, %c0_12] : memref<9x64x64xbf16, #tpu.memory_space<vmem>>, vector<1x64x64xbf16>
    %12 = vector.shape_cast %11 : vector<1x64x64xbf16> to vector<64x64xbf16>
    %cst_13 = arith.constant dense<0.000000e+00> : vector<16x64xf32>
    %13 = tpu.matmul %10, %12, %cst_13 {dimension_numbers = #tpu.dot_dimension_numbers<[1], [0], [0], [1], [0, 0, 1, 1], [], []>} : vector<16x64xbf16>, vector<64x64xbf16>, vector<16x64xf32> -> vector<16x64xf32>
    %14 = arith.addf %7, %13 : vector<16x64xf32>
    %c0_14 = arith.constant 0 : index
    %c0_15 = arith.constant 0 : index
    %c2 = arith.constant 2 : index
    %c0_16 = arith.constant 0 : index
    %15 = vector.load %arg1[%c0_14, %c0_15, %c2, %c0_16] : memref<1x6x6x64xbf16, #tpu.memory_space<vmem>>, vector<1x4x4x64xbf16>
    %16 = vector.shape_cast %15 : vector<1x4x4x64xbf16> to vector<4x4x64xbf16>
    %17 = vector.shape_cast %16 : vector<4x4x64xbf16> to vector<16x64xbf16>
    %c2_17 = arith.constant 2 : index
    %c0_18 = arith.constant 0 : index
    %c0_19 = arith.constant 0 : index
    %18 = vector.load %arg2[%c2_17, %c0_18, %c0_19] : memref<9x64x64xbf16, #tpu.memory_space<vmem>>, vector<1x64x64xbf16>
    %19 = vector.shape_cast %18 : vector<1x64x64xbf16> to vector<64x64xbf16>
    %cst_20 = arith.constant dense<0.000000e+00> : vector<16x64xf32>
    %20 = tpu.matmul %17, %19, %cst_20 {dimension_numbers = #tpu.dot_dimension_numbers<[1], [0], [0], [1], [0, 0, 1, 1], [], []>} : vector<16x64xbf16>, vector<64x64xbf16>, vector<16x64xf32> -> vector<16x64xf32>
    %21 = arith.addf %14, %20 : vector<16x64xf32>
    %c0_21 = arith.constant 0 : index
    %c1_22 = arith.constant 1 : index
    %c0_23 = arith.constant 0 : index
    %c0_24 = arith.constant 0 : index
    %22 = vector.load %arg1[%c0_21, %c1_22, %c0_23, %c0_24] : memref<1x6x6x64xbf16, #tpu.memory_space<vmem>>, vector<1x4x4x64xbf16>
    %23 = vector.shape_cast %22 : vector<1x4x4x64xbf16> to vector<4x4x64xbf16>
    %24 = vector.shape_cast %23 : vector<4x4x64xbf16> to vector<16x64xbf16>
    %c3 = arith.constant 3 : index
    %c0_25 = arith.constant 0 : index
    %c0_26 = arith.constant 0 : index
    %25 = vector.load %arg2[%c3, %c0_25, %c0_26] : memref<9x64x64xbf16, #tpu.memory_space<vmem>>, vector<1x64x64xbf16>
    %26 = vector.shape_cast %25 : vector<1x64x64xbf16> to vector<64x64xbf16>
    %cst_27 = arith.constant dense<0.000000e+00> : vector<16x64xf32>
    %27 = tpu.matmul %24, %26, %cst_27 {dimension_numbers = #tpu.dot_dimension_numbers<[1], [0], [0], [1], [0, 0, 1, 1], [], []>} : vector<16x64xbf16>, vector<64x64xbf16>, vector<16x64xf32> -> vector<16x64xf32>
    %28 = arith.addf %21, %27 : vector<16x64xf32>
    %c0_28 = arith.constant 0 : index
    %c1_29 = arith.constant 1 : index
    %c1_30 = arith.constant 1 : index
    %c0_31 = arith.constant 0 : index
    %29 = vector.load %arg1[%c0_28, %c1_29, %c1_30, %c0_31] : memref<1x6x6x64xbf16, #tpu.memory_space<vmem>>, vector<1x4x4x64xbf16>
    %30 = vector.shape_cast %29 : vector<1x4x4x64xbf16> to vector<4x4x64xbf16>
    %31 = vector.shape_cast %30 : vector<4x4x64xbf16> to vector<16x64xbf16>
    %c4 = arith.constant 4 : index
    %c0_32 = arith.constant 0 : index
    %c0_33 = arith.constant 0 : index
    %32 = vector.load %arg2[%c4, %c0_32, %c0_33] : memref<9x64x64xbf16, #tpu.memory_space<vmem>>, vector<1x64x64xbf16>
    %33 = vector.shape_cast %32 : vector<1x64x64xbf16> to vector<64x64xbf16>
    %cst_34 = arith.constant dense<0.000000e+00> : vector<16x64xf32>
    %34 = tpu.matmul %31, %33, %cst_34 {dimension_numbers = #tpu.dot_dimension_numbers<[1], [0], [0], [1], [0, 0, 1, 1], [], []>} : vector<16x64xbf16>, vector<64x64xbf16>, vector<16x64xf32> -> vector<16x64xf32>
    %35 = arith.addf %28, %34 : vector<16x64xf32>
    %c0_35 = arith.constant 0 : index
    %c1_36 = arith.constant 1 : index
    %c2_37 = arith.constant 2 : index
    %c0_38 = arith.constant 0 : index
    %36 = vector.load %arg1[%c0_35, %c1_36, %c2_37, %c0_38] : memref<1x6x6x64xbf16, #tpu.memory_space<vmem>>, vector<1x4x4x64xbf16>
    %37 = vector.shape_cast %36 : vector<1x4x4x64xbf16> to vector<4x4x64xbf16>
    %38 = vector.shape_cast %37 : vector<4x4x64xbf16> to vector<16x64xbf16>
    %c5 = arith.constant 5 : index
    %c0_39 = arith.constant 0 : index
    %c0_40 = arith.constant 0 : index
    %39 = vector.load %arg2[%c5, %c0_39, %c0_40] : memref<9x64x64xbf16, #tpu.memory_space<vmem>>, vector<1x64x64xbf16>
    %40 = vector.shape_cast %39 : vector<1x64x64xbf16> to vector<64x64xbf16>
    %cst_41 = arith.constant dense<0.000000e+00> : vector<16x64xf32>
    %41 = tpu.matmul %38, %40, %cst_41 {dimension_numbers = #tpu.dot_dimension_numbers<[1], [0], [0], [1], [0, 0, 1, 1], [], []>} : vector<16x64xbf16>, vector<64x64xbf16>, vector<16x64xf32> -> vector<16x64xf32>
    %42 = arith.addf %35, %41 : vector<16x64xf32>
    %c0_42 = arith.constant 0 : index
    %c2_43 = arith.constant 2 : index
    %c0_44 = arith.constant 0 : index
    %c0_45 = arith.constant 0 : index
    %43 = vector.load %arg1[%c0_42, %c2_43, %c0_44, %c0_45] : memref<1x6x6x64xbf16, #tpu.memory_space<vmem>>, vector<1x4x4x64xbf16>
    %44 = vector.shape_cast %43 : vector<1x4x4x64xbf16> to vector<4x4x64xbf16>
    %45 = vector.shape_cast %44 : vector<4x4x64xbf16> to vector<16x64xbf16>
    %c6 = arith.constant 6 : index
    %c0_46 = arith.constant 0 : index
    %c0_47 = arith.constant 0 : index
    %46 = vector.load %arg2[%c6, %c0_46, %c0_47] : memref<9x64x64xbf16, #tpu.memory_space<vmem>>, vector<1x64x64xbf16>
    %47 = vector.shape_cast %46 : vector<1x64x64xbf16> to vector<64x64xbf16>
    %cst_48 = arith.constant dense<0.000000e+00> : vector<16x64xf32>
    %48 = tpu.matmul %45, %47, %cst_48 {dimension_numbers = #tpu.dot_dimension_numbers<[1], [0], [0], [1], [0, 0, 1, 1], [], []>} : vector<16x64xbf16>, vector<64x64xbf16>, vector<16x64xf32> -> vector<16x64xf32>
    %49 = arith.addf %42, %48 : vector<16x64xf32>
    %c0_49 = arith.constant 0 : index
    %c2_50 = arith.constant 2 : index
    %c1_51 = arith.constant 1 : index
    %c0_52 = arith.constant 0 : index
    %50 = vector.load %arg1[%c0_49, %c2_50, %c1_51, %c0_52] : memref<1x6x6x64xbf16, #tpu.memory_space<vmem>>, vector<1x4x4x64xbf16>
    %51 = vector.shape_cast %50 : vector<1x4x4x64xbf16> to vector<4x4x64xbf16>
    %52 = vector.shape_cast %51 : vector<4x4x64xbf16> to vector<16x64xbf16>
    %c7 = arith.constant 7 : index
    %c0_53 = arith.constant 0 : index
    %c0_54 = arith.constant 0 : index
    %53 = vector.load %arg2[%c7, %c0_53, %c0_54] : memref<9x64x64xbf16, #tpu.memory_space<vmem>>, vector<1x64x64xbf16>
    %54 = vector.shape_cast %53 : vector<1x64x64xbf16> to vector<64x64xbf16>
    %cst_55 = arith.constant dense<0.000000e+00> : vector<16x64xf32>
    %55 = tpu.matmul %52, %54, %cst_55 {dimension_numbers = #tpu.dot_dimension_numbers<[1], [0], [0], [1], [0, 0, 1, 1], [], []>} : vector<16x64xbf16>, vector<64x64xbf16>, vector<16x64xf32> -> vector<16x64xf32>
    %56 = arith.addf %49, %55 : vector<16x64xf32>
    %c0_56 = arith.constant 0 : index
    %c2_57 = arith.constant 2 : index
    %c2_58 = arith.constant 2 : index
    %c0_59 = arith.constant 0 : index
    %57 = vector.load %arg1[%c0_56, %c2_57, %c2_58, %c0_59] : memref<1x6x6x64xbf16, #tpu.memory_space<vmem>>, vector<1x4x4x64xbf16>
    %58 = vector.shape_cast %57 : vector<1x4x4x64xbf16> to vector<4x4x64xbf16>
    %59 = vector.shape_cast %58 : vector<4x4x64xbf16> to vector<16x64xbf16>
    %c8 = arith.constant 8 : index
    %c0_60 = arith.constant 0 : index
    %c0_61 = arith.constant 0 : index
    %60 = vector.load %arg2[%c8, %c0_60, %c0_61] : memref<9x64x64xbf16, #tpu.memory_space<vmem>>, vector<1x64x64xbf16>
    %61 = vector.shape_cast %60 : vector<1x64x64xbf16> to vector<64x64xbf16>
    %cst_62 = arith.constant dense<0.000000e+00> : vector<16x64xf32>
    %62 = tpu.matmul %59, %61, %cst_62 {dimension_numbers = #tpu.dot_dimension_numbers<[1], [0], [0], [1], [0, 0, 1, 1], [], []>} : vector<16x64xbf16>, vector<64x64xbf16>, vector<16x64xf32> -> vector<16x64xf32>
    %63 = arith.addf %56, %62 : vector<16x64xf32>
    %c0_63 = arith.constant 0 : index
    %c0_64 = arith.constant 0 : index
    %64 = vector.load %arg3[%c0_63, %c0_64] : memref<1x64xf32, #tpu.memory_space<vmem>>, vector<1x64xf32>
    %65 = vector.broadcast %64 : vector<1x64xf32> to vector<16x64xf32>
    %66 = arith.addf %63, %65 : vector<16x64xf32>
    %cst_65 = arith.constant 0.000000e+00 : f32
    %67 = vector.broadcast %cst_65 : f32 to vector<16x64xf32>
    %68 = arith.cmpf oge, %66, %67 : vector<16x64xf32>
    %cst_66 = arith.constant 0.00999999977 : f32
    %69 = vector.broadcast %cst_66 : f32 to vector<16x64xf32>
    %70 = arith.mulf %69, %66 : vector<16x64xf32>
    %71 = arith.select %68, %66, %70 : vector<16x64xi1>, vector<16x64xf32>
    %c0_67 = arith.constant 0 : index
    %c0_68 = arith.constant 0 : index
    %c0_69 = arith.constant 0 : index
    %72 = vector.load %arg4[%c0_67, %c0_68, %c0_69] : memref<1x16x64xbf16, #tpu.memory_space<vmem>>, vector<1x16x64xbf16>
    %73 = vector.shape_cast %72 : vector<1x16x64xbf16> to vector<16x64xbf16>
    %74 = arith.extf %73 : vector<16x64xbf16> to vector<16x64xf32>
    %75 = arith.addf %71, %74 : vector<16x64xf32>
    %cst_70 = arith.constant 0.000000e+00 : f32
    %76 = vector.broadcast %cst_70 : f32 to vector<16x64xf32>
    %77 = arith.cmpf oge, %75, %76 : vector<16x64xf32>
    %cst_71 = arith.constant 0.00999999977 : f32
    %78 = vector.broadcast %cst_71 : f32 to vector<16x64xf32>
    %79 = arith.mulf %78, %75 : vector<16x64xf32>
    %80 = arith.select %77, %75, %79 : vector<16x64xi1>, vector<16x64xf32>
    %81 = arith.truncf %80 : vector<16x64xf32> to vector<16x64xbf16>
    %c0_72 = arith.constant 0 : index
    %c0_73 = arith.constant 0 : index
    %c0_74 = arith.constant 0 : index
    %82 = vector.load %arg5[%c0_72, %c0_73, %c0_74] : memref<1x16x64xbf16, #tpu.memory_space<vmem>>, vector<1x16x64xbf16>
    %83 = vector.shape_cast %82 : vector<1x16x64xbf16> to vector<16x64xbf16>
    %84 = vector.shape_cast %81 : vector<16x64xbf16> to vector<1x16x64xbf16>
    tpu.vector_store %arg5[%c0_72, %c0_73, %c0_74], %84 {strides = array<i32>} : memref<1x16x64xbf16, #tpu.memory_space<vmem>>, vector<1x16x64xbf16>,
    return
  }
  func.func @transform_0(%arg0: i32) -> (i32, i32, i32, i32) {
    %c0_i32 = arith.constant 0 : i32
    %c0_i32_0 = arith.constant 0 : i32
    %c0_i32_1 = arith.constant 0 : i32
    %c0_i32_2 = arith.constant 0 : i32
    return %arg0, %c0_i32, %c0_i32_0, %c0_i32_1 : i32, i32, i32, i32
  }
  func.func @transform_1(%arg0: i32) -> (i32, i32, i32) {
    %c0_i32 = arith.constant 0 : i32
    %c0_i32_0 = arith.constant 0 : i32
    %c0_i32_1 = arith.constant 0 : i32
    %c0_i32_2 = arith.constant 0 : i32
    return %c0_i32, %c0_i32_0, %c0_i32_1 : i32, i32, i32
  }
  func.func @transform_2(%arg0: i32) -> (i32, i32) {
    %c0_i32 = arith.constant 0 : i32
    %c0_i32_0 = arith.constant 0 : i32
    %c0_i32_1 = arith.constant 0 : i32
    return %c0_i32, %c0_i32_0 : i32, i32
  }
  func.func @transform_3(%arg0: i32) -> (i32, i32, i32) {
    %c0_i32 = arith.constant 0 : i32
    %c0_i32_0 = arith.constant 0 : i32
    %c0_i32_1 = arith.constant 0 : i32
    return %arg0, %c0_i32, %c0_i32_0 : i32, i32, i32
  }
  func.func @transform_4(%arg0: i32) -> (i32, i32, i32) {
    %c0_i32 = arith.constant 0 : i32
    %c0_i32_0 = arith.constant 0 : i32
    %c0_i32_1 = arith.constant 0 : i32
    return %arg0, %c0_i32, %c0_i32_0 : i32, i32, i32
  }
}

module attributes {stable_mosaic.version = 11 : i64} {
  func.func @_conv_kernel(%arg0: i32, %arg1: memref<1x12x3x64xbf16, #tpu.memory_space<vmem>>, %arg2: memref<9x64x128xbf16, #tpu.memory_space<vmem>>, %arg3: memref<1x128xf32, #tpu.memory_space<vmem>>, %arg4: memref<1x4x128xbf16, #tpu.memory_space<vmem>>) attributes {dimension_semantics = [#tpu.dimension_semantics<parallel>], iteration_bounds = array<i64: 2>, scalar_prefetch = 0 : i64, scratch_operands = 0 : i64, tpu.core_type = #tpu.core_type<tc>, window_params = [{transform_indices = @transform_0, window_bounds = array<i64: 1, 12, 3, 64>}, {pipeline_mode = #tpu.pipeline_mode<synchronous>, transform_indices = @transform_1, window_bounds = array<i64: 9, 64, 128>}, {pipeline_mode = #tpu.pipeline_mode<synchronous>, transform_indices = @transform_2, window_bounds = array<i64: 1, 128>}, {transform_indices = @transform_3, window_bounds = array<i64: 1, 4, 128>}]} {
    %cst = arith.constant 0.000000e+00 : f32
    %0 = vector.broadcast %cst : f32 to vector<4x128xf32>
    %c0 = arith.constant 0 : index
    %c0_0 = arith.constant 0 : index
    %c0_1 = arith.constant 0 : index
    %c0_2 = arith.constant 0 : index
    %1 = vector.load %arg1[%c0, %c0_0, %c0_1, %c0_2] : memref<1x12x3x64xbf16, #tpu.memory_space<vmem>>, vector<1x2x2x64xbf16>
    %2 = vector.shape_cast %1 : vector<1x2x2x64xbf16> to vector<2x2x64xbf16>
    %3 = vector.shape_cast %2 : vector<2x2x64xbf16> to vector<4x64xbf16>
    %c0_3 = arith.constant 0 : index
    %c0_4 = arith.constant 0 : index
    %c0_5 = arith.constant 0 : index
    %4 = vector.load %arg2[%c0_3, %c0_4, %c0_5] : memref<9x64x128xbf16, #tpu.memory_space<vmem>>, vector<1x64x128xbf16>
    %5 = vector.shape_cast %4 : vector<1x64x128xbf16> to vector<64x128xbf16>
    %cst_6 = arith.constant dense<0.000000e+00> : vector<4x128xf32>
    %6 = tpu.matmul %3, %5, %cst_6 {dimension_numbers = #tpu.dot_dimension_numbers<[1], [0], [0], [1], [0, 0, 1, 1], [], []>} : vector<4x64xbf16>, vector<64x128xbf16>, vector<4x128xf32> -> vector<4x128xf32>
    %7 = arith.addf %0, %6 : vector<4x128xf32>
    %c0_7 = arith.constant 0 : index
    %c3 = arith.constant 3 : index
    %c0_8 = arith.constant 0 : index
    %c0_9 = arith.constant 0 : index
    %8 = vector.load %arg1[%c0_7, %c3, %c0_8, %c0_9] : memref<1x12x3x64xbf16, #tpu.memory_space<vmem>>, vector<1x2x2x64xbf16>
    %9 = vector.shape_cast %8 : vector<1x2x2x64xbf16> to vector<2x2x64xbf16>
    %10 = vector.shape_cast %9 : vector<2x2x64xbf16> to vector<4x64xbf16>
    %c1 = arith.constant 1 : index
    %c0_10 = arith.constant 0 : index
    %c0_11 = arith.constant 0 : index
    %11 = vector.load %arg2[%c1, %c0_10, %c0_11] : memref<9x64x128xbf16, #tpu.memory_space<vmem>>, vector<1x64x128xbf16>
    %12 = vector.shape_cast %11 : vector<1x64x128xbf16> to vector<64x128xbf16>
    %cst_12 = arith.constant dense<0.000000e+00> : vector<4x128xf32>
    %13 = tpu.matmul %10, %12, %cst_12 {dimension_numbers = #tpu.dot_dimension_numbers<[1], [0], [0], [1], [0, 0, 1, 1], [], []>} : vector<4x64xbf16>, vector<64x128xbf16>, vector<4x128xf32> -> vector<4x128xf32>
    %14 = arith.addf %7, %13 : vector<4x128xf32>
    %c0_13 = arith.constant 0 : index
    %c0_14 = arith.constant 0 : index
    %c1_15 = arith.constant 1 : index
    %c0_16 = arith.constant 0 : index
    %15 = vector.load %arg1[%c0_13, %c0_14, %c1_15, %c0_16] : memref<1x12x3x64xbf16, #tpu.memory_space<vmem>>, vector<1x2x2x64xbf16>
    %16 = vector.shape_cast %15 : vector<1x2x2x64xbf16> to vector<2x2x64xbf16>
    %17 = vector.shape_cast %16 : vector<2x2x64xbf16> to vector<4x64xbf16>
    %c2 = arith.constant 2 : index
    %c0_17 = arith.constant 0 : index
    %c0_18 = arith.constant 0 : index
    %18 = vector.load %arg2[%c2, %c0_17, %c0_18] : memref<9x64x128xbf16, #tpu.memory_space<vmem>>, vector<1x64x128xbf16>
    %19 = vector.shape_cast %18 : vector<1x64x128xbf16> to vector<64x128xbf16>
    %cst_19 = arith.constant dense<0.000000e+00> : vector<4x128xf32>
    %20 = tpu.matmul %17, %19, %cst_19 {dimension_numbers = #tpu.dot_dimension_numbers<[1], [0], [0], [1], [0, 0, 1, 1], [], []>} : vector<4x64xbf16>, vector<64x128xbf16>, vector<4x128xf32> -> vector<4x128xf32>
    %21 = arith.addf %14, %20 : vector<4x128xf32>
    %c0_20 = arith.constant 0 : index
    %c6 = arith.constant 6 : index
    %c0_21 = arith.constant 0 : index
    %c0_22 = arith.constant 0 : index
    %22 = vector.load %arg1[%c0_20, %c6, %c0_21, %c0_22] : memref<1x12x3x64xbf16, #tpu.memory_space<vmem>>, vector<1x2x2x64xbf16>
    %23 = vector.shape_cast %22 : vector<1x2x2x64xbf16> to vector<2x2x64xbf16>
    %24 = vector.shape_cast %23 : vector<2x2x64xbf16> to vector<4x64xbf16>
    %c3_23 = arith.constant 3 : index
    %c0_24 = arith.constant 0 : index
    %c0_25 = arith.constant 0 : index
    %25 = vector.load %arg2[%c3_23, %c0_24, %c0_25] : memref<9x64x128xbf16, #tpu.memory_space<vmem>>, vector<1x64x128xbf16>
    %26 = vector.shape_cast %25 : vector<1x64x128xbf16> to vector<64x128xbf16>
    %cst_26 = arith.constant dense<0.000000e+00> : vector<4x128xf32>
    %27 = tpu.matmul %24, %26, %cst_26 {dimension_numbers = #tpu.dot_dimension_numbers<[1], [0], [0], [1], [0, 0, 1, 1], [], []>} : vector<4x64xbf16>, vector<64x128xbf16>, vector<4x128xf32> -> vector<4x128xf32>
    %28 = arith.addf %21, %27 : vector<4x128xf32>
    %c0_27 = arith.constant 0 : index
    %c9 = arith.constant 9 : index
    %c0_28 = arith.constant 0 : index
    %c0_29 = arith.constant 0 : index
    %29 = vector.load %arg1[%c0_27, %c9, %c0_28, %c0_29] : memref<1x12x3x64xbf16, #tpu.memory_space<vmem>>, vector<1x2x2x64xbf16>
    %30 = vector.shape_cast %29 : vector<1x2x2x64xbf16> to vector<2x2x64xbf16>
    %31 = vector.shape_cast %30 : vector<2x2x64xbf16> to vector<4x64xbf16>
    %c4 = arith.constant 4 : index
    %c0_30 = arith.constant 0 : index
    %c0_31 = arith.constant 0 : index
    %32 = vector.load %arg2[%c4, %c0_30, %c0_31] : memref<9x64x128xbf16, #tpu.memory_space<vmem>>, vector<1x64x128xbf16>
    %33 = vector.shape_cast %32 : vector<1x64x128xbf16> to vector<64x128xbf16>
    %cst_32 = arith.constant dense<0.000000e+00> : vector<4x128xf32>
    %34 = tpu.matmul %31, %33, %cst_32 {dimension_numbers = #tpu.dot_dimension_numbers<[1], [0], [0], [1], [0, 0, 1, 1], [], []>} : vector<4x64xbf16>, vector<64x128xbf16>, vector<4x128xf32> -> vector<4x128xf32>
    %35 = arith.addf %28, %34 : vector<4x128xf32>
    %c0_33 = arith.constant 0 : index
    %c6_34 = arith.constant 6 : index
    %c1_35 = arith.constant 1 : index
    %c0_36 = arith.constant 0 : index
    %36 = vector.load %arg1[%c0_33, %c6_34, %c1_35, %c0_36] : memref<1x12x3x64xbf16, #tpu.memory_space<vmem>>, vector<1x2x2x64xbf16>
    %37 = vector.shape_cast %36 : vector<1x2x2x64xbf16> to vector<2x2x64xbf16>
    %38 = vector.shape_cast %37 : vector<2x2x64xbf16> to vector<4x64xbf16>
    %c5 = arith.constant 5 : index
    %c0_37 = arith.constant 0 : index
    %c0_38 = arith.constant 0 : index
    %39 = vector.load %arg2[%c5, %c0_37, %c0_38] : memref<9x64x128xbf16, #tpu.memory_space<vmem>>, vector<1x64x128xbf16>
    %40 = vector.shape_cast %39 : vector<1x64x128xbf16> to vector<64x128xbf16>
    %cst_39 = arith.constant dense<0.000000e+00> : vector<4x128xf32>
    %41 = tpu.matmul %38, %40, %cst_39 {dimension_numbers = #tpu.dot_dimension_numbers<[1], [0], [0], [1], [0, 0, 1, 1], [], []>} : vector<4x64xbf16>, vector<64x128xbf16>, vector<4x128xf32> -> vector<4x128xf32>
    %42 = arith.addf %35, %41 : vector<4x128xf32>
    %c0_40 = arith.constant 0 : index
    %c1_41 = arith.constant 1 : index
    %c0_42 = arith.constant 0 : index
    %c0_43 = arith.constant 0 : index
    %43 = vector.load %arg1[%c0_40, %c1_41, %c0_42, %c0_43] : memref<1x12x3x64xbf16, #tpu.memory_space<vmem>>, vector<1x2x2x64xbf16>
    %44 = vector.shape_cast %43 : vector<1x2x2x64xbf16> to vector<2x2x64xbf16>
    %45 = vector.shape_cast %44 : vector<2x2x64xbf16> to vector<4x64xbf16>
    %c6_44 = arith.constant 6 : index
    %c0_45 = arith.constant 0 : index
    %c0_46 = arith.constant 0 : index
    %46 = vector.load %arg2[%c6_44, %c0_45, %c0_46] : memref<9x64x128xbf16, #tpu.memory_space<vmem>>, vector<1x64x128xbf16>
    %47 = vector.shape_cast %46 : vector<1x64x128xbf16> to vector<64x128xbf16>
    %cst_47 = arith.constant dense<0.000000e+00> : vector<4x128xf32>
    %48 = tpu.matmul %45, %47, %cst_47 {dimension_numbers = #tpu.dot_dimension_numbers<[1], [0], [0], [1], [0, 0, 1, 1], [], []>} : vector<4x64xbf16>, vector<64x128xbf16>, vector<4x128xf32> -> vector<4x128xf32>
    %49 = arith.addf %42, %48 : vector<4x128xf32>
    %c0_48 = arith.constant 0 : index
    %c4_49 = arith.constant 4 : index
    %c0_50 = arith.constant 0 : index
    %c0_51 = arith.constant 0 : index
    %50 = vector.load %arg1[%c0_48, %c4_49, %c0_50, %c0_51] : memref<1x12x3x64xbf16, #tpu.memory_space<vmem>>, vector<1x2x2x64xbf16>
    %51 = vector.shape_cast %50 : vector<1x2x2x64xbf16> to vector<2x2x64xbf16>
    %52 = vector.shape_cast %51 : vector<2x2x64xbf16> to vector<4x64xbf16>
    %c7 = arith.constant 7 : index
    %c0_52 = arith.constant 0 : index
    %c0_53 = arith.constant 0 : index
    %53 = vector.load %arg2[%c7, %c0_52, %c0_53] : memref<9x64x128xbf16, #tpu.memory_space<vmem>>, vector<1x64x128xbf16>
    %54 = vector.shape_cast %53 : vector<1x64x128xbf16> to vector<64x128xbf16>
    %cst_54 = arith.constant dense<0.000000e+00> : vector<4x128xf32>
    %55 = tpu.matmul %52, %54, %cst_54 {dimension_numbers = #tpu.dot_dimension_numbers<[1], [0], [0], [1], [0, 0, 1, 1], [], []>} : vector<4x64xbf16>, vector<64x128xbf16>, vector<4x128xf32> -> vector<4x128xf32>
    %56 = arith.addf %49, %55 : vector<4x128xf32>
    %c0_55 = arith.constant 0 : index
    %c1_56 = arith.constant 1 : index
    %c1_57 = arith.constant 1 : index
    %c0_58 = arith.constant 0 : index
    %57 = vector.load %arg1[%c0_55, %c1_56, %c1_57, %c0_58] : memref<1x12x3x64xbf16, #tpu.memory_space<vmem>>, vector<1x2x2x64xbf16>
    %58 = vector.shape_cast %57 : vector<1x2x2x64xbf16> to vector<2x2x64xbf16>
    %59 = vector.shape_cast %58 : vector<2x2x64xbf16> to vector<4x64xbf16>
    %c8 = arith.constant 8 : index
    %c0_59 = arith.constant 0 : index
    %c0_60 = arith.constant 0 : index
    %60 = vector.load %arg2[%c8, %c0_59, %c0_60] : memref<9x64x128xbf16, #tpu.memory_space<vmem>>, vector<1x64x128xbf16>
    %61 = vector.shape_cast %60 : vector<1x64x128xbf16> to vector<64x128xbf16>
    %cst_61 = arith.constant dense<0.000000e+00> : vector<4x128xf32>
    %62 = tpu.matmul %59, %61, %cst_61 {dimension_numbers = #tpu.dot_dimension_numbers<[1], [0], [0], [1], [0, 0, 1, 1], [], []>} : vector<4x64xbf16>, vector<64x128xbf16>, vector<4x128xf32> -> vector<4x128xf32>
    %63 = arith.addf %56, %62 : vector<4x128xf32>
    %c0_62 = arith.constant 0 : index
    %c0_63 = arith.constant 0 : index
    %64 = vector.load %arg3[%c0_62, %c0_63] : memref<1x128xf32, #tpu.memory_space<vmem>>, vector<1x128xf32>
    %65 = vector.broadcast %64 : vector<1x128xf32> to vector<4x128xf32>
    %66 = arith.addf %63, %65 : vector<4x128xf32>
    %cst_64 = arith.constant 0.000000e+00 : f32
    %67 = vector.broadcast %cst_64 : f32 to vector<4x128xf32>
    %68 = arith.cmpf oge, %66, %67 : vector<4x128xf32>
    %cst_65 = arith.constant 0.00999999977 : f32
    %69 = vector.broadcast %cst_65 : f32 to vector<4x128xf32>
    %70 = arith.mulf %69, %66 : vector<4x128xf32>
    %71 = arith.select %68, %66, %70 : vector<4x128xi1>, vector<4x128xf32>
    %72 = arith.truncf %71 : vector<4x128xf32> to vector<4x128xbf16>
    %c0_66 = arith.constant 0 : index
    %c0_67 = arith.constant 0 : index
    %c0_68 = arith.constant 0 : index
    %73 = vector.load %arg4[%c0_66, %c0_67, %c0_68] : memref<1x4x128xbf16, #tpu.memory_space<vmem>>, vector<1x4x128xbf16>
    %74 = vector.shape_cast %73 : vector<1x4x128xbf16> to vector<4x128xbf16>
    %75 = vector.shape_cast %72 : vector<4x128xbf16> to vector<1x4x128xbf16>
    tpu.vector_store %arg4[%c0_66, %c0_67, %c0_68], %75 {strides = array<i32>} : memref<1x4x128xbf16, #tpu.memory_space<vmem>>, vector<1x4x128xbf16>,
    return
  }
  func.func @transform_0(%arg0: i32) -> (i32, i32, i32, i32) {
    %c0_i32 = arith.constant 0 : i32
    %c0_i32_0 = arith.constant 0 : i32
    %c0_i32_1 = arith.constant 0 : i32
    %c0_i32_2 = arith.constant 0 : i32
    return %arg0, %c0_i32, %c0_i32_0, %c0_i32_1 : i32, i32, i32, i32
  }
  func.func @transform_1(%arg0: i32) -> (i32, i32, i32) {
    %c0_i32 = arith.constant 0 : i32
    %c0_i32_0 = arith.constant 0 : i32
    %c0_i32_1 = arith.constant 0 : i32
    %c0_i32_2 = arith.constant 0 : i32
    return %c0_i32, %c0_i32_0, %c0_i32_1 : i32, i32, i32
  }
  func.func @transform_2(%arg0: i32) -> (i32, i32) {
    %c0_i32 = arith.constant 0 : i32
    %c0_i32_0 = arith.constant 0 : i32
    %c0_i32_1 = arith.constant 0 : i32
    return %c0_i32, %c0_i32_0 : i32, i32
  }
  func.func @transform_3(%arg0: i32) -> (i32, i32, i32) {
    %c0_i32 = arith.constant 0 : i32
    %c0_i32_0 = arith.constant 0 : i32
    %c0_i32_1 = arith.constant 0 : i32
    return %arg0, %c0_i32, %c0_i32_0 : i32, i32, i32
  }
}

module attributes {stable_mosaic.version = 11 : i64} {
  func.func @_conv_kernel(%arg0: i32, %arg1: memref<1x4x4x128xbf16, #tpu.memory_space<vmem>>, %arg2: memref<9x128x128xbf16, #tpu.memory_space<vmem>>, %arg3: memref<1x128xf32, #tpu.memory_space<vmem>>, %arg4: memref<1x4x128xbf16, #tpu.memory_space<vmem>>) attributes {dimension_semantics = [#tpu.dimension_semantics<parallel>], iteration_bounds = array<i64: 2>, scalar_prefetch = 0 : i64, scratch_operands = 0 : i64, tpu.core_type = #tpu.core_type<tc>, window_params = [{transform_indices = @transform_0, window_bounds = array<i64: 1, 4, 4, 128>}, {pipeline_mode = #tpu.pipeline_mode<synchronous>, transform_indices = @transform_1, window_bounds = array<i64: 9, 128, 128>}, {pipeline_mode = #tpu.pipeline_mode<synchronous>, transform_indices = @transform_2, window_bounds = array<i64: 1, 128>}, {transform_indices = @transform_3, window_bounds = array<i64: 1, 4, 128>}]} {
    %cst = arith.constant 0.000000e+00 : f32
    %0 = vector.broadcast %cst : f32 to vector<4x128xf32>
    %c0 = arith.constant 0 : index
    %c0_0 = arith.constant 0 : index
    %c0_1 = arith.constant 0 : index
    %c0_2 = arith.constant 0 : index
    %1 = vector.load %arg1[%c0, %c0_0, %c0_1, %c0_2] : memref<1x4x4x128xbf16, #tpu.memory_space<vmem>>, vector<1x2x2x128xbf16>
    %2 = vector.shape_cast %1 : vector<1x2x2x128xbf16> to vector<2x2x128xbf16>
    %3 = vector.shape_cast %2 : vector<2x2x128xbf16> to vector<4x128xbf16>
    %c0_3 = arith.constant 0 : index
    %c0_4 = arith.constant 0 : index
    %c0_5 = arith.constant 0 : index
    %4 = vector.load %arg2[%c0_3, %c0_4, %c0_5] : memref<9x128x128xbf16, #tpu.memory_space<vmem>>, vector<1x128x128xbf16>
    %5 = vector.shape_cast %4 : vector<1x128x128xbf16> to vector<128x128xbf16>
    %cst_6 = arith.constant dense<0.000000e+00> : vector<4x128xf32>
    %6 = tpu.matmul %3, %5, %cst_6 {dimension_numbers = #tpu.dot_dimension_numbers<[1], [0], [0], [1], [0, 0, 1, 1], [], []>} : vector<4x128xbf16>, vector<128x128xbf16>, vector<4x128xf32> -> vector<4x128xf32>
    %7 = arith.addf %0, %6 : vector<4x128xf32>
    %c0_7 = arith.constant 0 : index
    %c0_8 = arith.constant 0 : index
    %c1 = arith.constant 1 : index
    %c0_9 = arith.constant 0 : index
    %8 = vector.load %arg1[%c0_7, %c0_8, %c1, %c0_9] : memref<1x4x4x128xbf16, #tpu.memory_space<vmem>>, vector<1x2x2x128xbf16>
    %9 = vector.shape_cast %8 : vector<1x2x2x128xbf16> to vector<2x2x128xbf16>
    %10 = vector.shape_cast %9 : vector<2x2x128xbf16> to vector<4x128xbf16>
    %c1_10 = arith.constant 1 : index
    %c0_11 = arith.constant 0 : index
    %c0_12 = arith.constant 0 : index
    %11 = vector.load %arg2[%c1_10, %c0_11, %c0_12] : memref<9x128x128xbf16, #tpu.memory_space<vmem>>, vector<1x128x128xbf16>
    %12 = vector.shape_cast %11 : vector<1x128x128xbf16> to vector<128x128xbf16>
    %cst_13 = arith.constant dense<0.000000e+00> : vector<4x128xf32>
    %13 = tpu.matmul %10, %12, %cst_13 {dimension_numbers = #tpu.dot_dimension_numbers<[1], [0], [0], [1], [0, 0, 1, 1], [], []>} : vector<4x128xbf16>, vector<128x128xbf16>, vector<4x128xf32> -> vector<4x128xf32>
    %14 = arith.addf %7, %13 : vector<4x128xf32>
    %c0_14 = arith.constant 0 : index
    %c0_15 = arith.constant 0 : index
    %c2 = arith.constant 2 : index
    %c0_16 = arith.constant 0 : index
    %15 = vector.load %arg1[%c0_14, %c0_15, %c2, %c0_16] : memref<1x4x4x128xbf16, #tpu.memory_space<vmem>>, vector<1x2x2x128xbf16>
    %16 = vector.shape_cast %15 : vector<1x2x2x128xbf16> to vector<2x2x128xbf16>
    %17 = vector.shape_cast %16 : vector<2x2x128xbf16> to vector<4x128xbf16>
    %c2_17 = arith.constant 2 : index
    %c0_18 = arith.constant 0 : index
    %c0_19 = arith.constant 0 : index
    %18 = vector.load %arg2[%c2_17, %c0_18, %c0_19] : memref<9x128x128xbf16, #tpu.memory_space<vmem>>, vector<1x128x128xbf16>
    %19 = vector.shape_cast %18 : vector<1x128x128xbf16> to vector<128x128xbf16>
    %cst_20 = arith.constant dense<0.000000e+00> : vector<4x128xf32>
    %20 = tpu.matmul %17, %19, %cst_20 {dimension_numbers = #tpu.dot_dimension_numbers<[1], [0], [0], [1], [0, 0, 1, 1], [], []>} : vector<4x128xbf16>, vector<128x128xbf16>, vector<4x128xf32> -> vector<4x128xf32>
    %21 = arith.addf %14, %20 : vector<4x128xf32>
    %c0_21 = arith.constant 0 : index
    %c1_22 = arith.constant 1 : index
    %c0_23 = arith.constant 0 : index
    %c0_24 = arith.constant 0 : index
    %22 = vector.load %arg1[%c0_21, %c1_22, %c0_23, %c0_24] : memref<1x4x4x128xbf16, #tpu.memory_space<vmem>>, vector<1x2x2x128xbf16>
    %23 = vector.shape_cast %22 : vector<1x2x2x128xbf16> to vector<2x2x128xbf16>
    %24 = vector.shape_cast %23 : vector<2x2x128xbf16> to vector<4x128xbf16>
    %c3 = arith.constant 3 : index
    %c0_25 = arith.constant 0 : index
    %c0_26 = arith.constant 0 : index
    %25 = vector.load %arg2[%c3, %c0_25, %c0_26] : memref<9x128x128xbf16, #tpu.memory_space<vmem>>, vector<1x128x128xbf16>
    %26 = vector.shape_cast %25 : vector<1x128x128xbf16> to vector<128x128xbf16>
    %cst_27 = arith.constant dense<0.000000e+00> : vector<4x128xf32>
    %27 = tpu.matmul %24, %26, %cst_27 {dimension_numbers = #tpu.dot_dimension_numbers<[1], [0], [0], [1], [0, 0, 1, 1], [], []>} : vector<4x128xbf16>, vector<128x128xbf16>, vector<4x128xf32> -> vector<4x128xf32>
    %28 = arith.addf %21, %27 : vector<4x128xf32>
    %c0_28 = arith.constant 0 : index
    %c1_29 = arith.constant 1 : index
    %c1_30 = arith.constant 1 : index
    %c0_31 = arith.constant 0 : index
    %29 = vector.load %arg1[%c0_28, %c1_29, %c1_30, %c0_31] : memref<1x4x4x128xbf16, #tpu.memory_space<vmem>>, vector<1x2x2x128xbf16>
    %30 = vector.shape_cast %29 : vector<1x2x2x128xbf16> to vector<2x2x128xbf16>
    %31 = vector.shape_cast %30 : vector<2x2x128xbf16> to vector<4x128xbf16>
    %c4 = arith.constant 4 : index
    %c0_32 = arith.constant 0 : index
    %c0_33 = arith.constant 0 : index
    %32 = vector.load %arg2[%c4, %c0_32, %c0_33] : memref<9x128x128xbf16, #tpu.memory_space<vmem>>, vector<1x128x128xbf16>
    %33 = vector.shape_cast %32 : vector<1x128x128xbf16> to vector<128x128xbf16>
    %cst_34 = arith.constant dense<0.000000e+00> : vector<4x128xf32>
    %34 = tpu.matmul %31, %33, %cst_34 {dimension_numbers = #tpu.dot_dimension_numbers<[1], [0], [0], [1], [0, 0, 1, 1], [], []>} : vector<4x128xbf16>, vector<128x128xbf16>, vector<4x128xf32> -> vector<4x128xf32>
    %35 = arith.addf %28, %34 : vector<4x128xf32>
    %c0_35 = arith.constant 0 : index
    %c1_36 = arith.constant 1 : index
    %c2_37 = arith.constant 2 : index
    %c0_38 = arith.constant 0 : index
    %36 = vector.load %arg1[%c0_35, %c1_36, %c2_37, %c0_38] : memref<1x4x4x128xbf16, #tpu.memory_space<vmem>>, vector<1x2x2x128xbf16>
    %37 = vector.shape_cast %36 : vector<1x2x2x128xbf16> to vector<2x2x128xbf16>
    %38 = vector.shape_cast %37 : vector<2x2x128xbf16> to vector<4x128xbf16>
    %c5 = arith.constant 5 : index
    %c0_39 = arith.constant 0 : index
    %c0_40 = arith.constant 0 : index
    %39 = vector.load %arg2[%c5, %c0_39, %c0_40] : memref<9x128x128xbf16, #tpu.memory_space<vmem>>, vector<1x128x128xbf16>
    %40 = vector.shape_cast %39 : vector<1x128x128xbf16> to vector<128x128xbf16>
    %cst_41 = arith.constant dense<0.000000e+00> : vector<4x128xf32>
    %41 = tpu.matmul %38, %40, %cst_41 {dimension_numbers = #tpu.dot_dimension_numbers<[1], [0], [0], [1], [0, 0, 1, 1], [], []>} : vector<4x128xbf16>, vector<128x128xbf16>, vector<4x128xf32> -> vector<4x128xf32>
    %42 = arith.addf %35, %41 : vector<4x128xf32>
    %c0_42 = arith.constant 0 : index
    %c2_43 = arith.constant 2 : index
    %c0_44 = arith.constant 0 : index
    %c0_45 = arith.constant 0 : index
    %43 = vector.load %arg1[%c0_42, %c2_43, %c0_44, %c0_45] : memref<1x4x4x128xbf16, #tpu.memory_space<vmem>>, vector<1x2x2x128xbf16>
    %44 = vector.shape_cast %43 : vector<1x2x2x128xbf16> to vector<2x2x128xbf16>
    %45 = vector.shape_cast %44 : vector<2x2x128xbf16> to vector<4x128xbf16>
    %c6 = arith.constant 6 : index
    %c0_46 = arith.constant 0 : index
    %c0_47 = arith.constant 0 : index
    %46 = vector.load %arg2[%c6, %c0_46, %c0_47] : memref<9x128x128xbf16, #tpu.memory_space<vmem>>, vector<1x128x128xbf16>
    %47 = vector.shape_cast %46 : vector<1x128x128xbf16> to vector<128x128xbf16>
    %cst_48 = arith.constant dense<0.000000e+00> : vector<4x128xf32>
    %48 = tpu.matmul %45, %47, %cst_48 {dimension_numbers = #tpu.dot_dimension_numbers<[1], [0], [0], [1], [0, 0, 1, 1], [], []>} : vector<4x128xbf16>, vector<128x128xbf16>, vector<4x128xf32> -> vector<4x128xf32>
    %49 = arith.addf %42, %48 : vector<4x128xf32>
    %c0_49 = arith.constant 0 : index
    %c2_50 = arith.constant 2 : index
    %c1_51 = arith.constant 1 : index
    %c0_52 = arith.constant 0 : index
    %50 = vector.load %arg1[%c0_49, %c2_50, %c1_51, %c0_52] : memref<1x4x4x128xbf16, #tpu.memory_space<vmem>>, vector<1x2x2x128xbf16>
    %51 = vector.shape_cast %50 : vector<1x2x2x128xbf16> to vector<2x2x128xbf16>
    %52 = vector.shape_cast %51 : vector<2x2x128xbf16> to vector<4x128xbf16>
    %c7 = arith.constant 7 : index
    %c0_53 = arith.constant 0 : index
    %c0_54 = arith.constant 0 : index
    %53 = vector.load %arg2[%c7, %c0_53, %c0_54] : memref<9x128x128xbf16, #tpu.memory_space<vmem>>, vector<1x128x128xbf16>
    %54 = vector.shape_cast %53 : vector<1x128x128xbf16> to vector<128x128xbf16>
    %cst_55 = arith.constant dense<0.000000e+00> : vector<4x128xf32>
    %55 = tpu.matmul %52, %54, %cst_55 {dimension_numbers = #tpu.dot_dimension_numbers<[1], [0], [0], [1], [0, 0, 1, 1], [], []>} : vector<4x128xbf16>, vector<128x128xbf16>, vector<4x128xf32> -> vector<4x128xf32>
    %56 = arith.addf %49, %55 : vector<4x128xf32>
    %c0_56 = arith.constant 0 : index
    %c2_57 = arith.constant 2 : index
    %c2_58 = arith.constant 2 : index
    %c0_59 = arith.constant 0 : index
    %57 = vector.load %arg1[%c0_56, %c2_57, %c2_58, %c0_59] : memref<1x4x4x128xbf16, #tpu.memory_space<vmem>>, vector<1x2x2x128xbf16>
    %58 = vector.shape_cast %57 : vector<1x2x2x128xbf16> to vector<2x2x128xbf16>
    %59 = vector.shape_cast %58 : vector<2x2x128xbf16> to vector<4x128xbf16>
    %c8 = arith.constant 8 : index
    %c0_60 = arith.constant 0 : index
    %c0_61 = arith.constant 0 : index
    %60 = vector.load %arg2[%c8, %c0_60, %c0_61] : memref<9x128x128xbf16, #tpu.memory_space<vmem>>, vector<1x128x128xbf16>
    %61 = vector.shape_cast %60 : vector<1x128x128xbf16> to vector<128x128xbf16>
    %cst_62 = arith.constant dense<0.000000e+00> : vector<4x128xf32>
    %62 = tpu.matmul %59, %61, %cst_62 {dimension_numbers = #tpu.dot_dimension_numbers<[1], [0], [0], [1], [0, 0, 1, 1], [], []>} : vector<4x128xbf16>, vector<128x128xbf16>, vector<4x128xf32> -> vector<4x128xf32>
    %63 = arith.addf %56, %62 : vector<4x128xf32>
    %c0_63 = arith.constant 0 : index
    %c0_64 = arith.constant 0 : index
    %64 = vector.load %arg3[%c0_63, %c0_64] : memref<1x128xf32, #tpu.memory_space<vmem>>, vector<1x128xf32>
    %65 = vector.broadcast %64 : vector<1x128xf32> to vector<4x128xf32>
    %66 = arith.addf %63, %65 : vector<4x128xf32>
    %cst_65 = arith.constant 0.000000e+00 : f32
    %67 = vector.broadcast %cst_65 : f32 to vector<4x128xf32>
    %68 = arith.cmpf oge, %66, %67 : vector<4x128xf32>
    %cst_66 = arith.constant 0.00999999977 : f32
    %69 = vector.broadcast %cst_66 : f32 to vector<4x128xf32>
    %70 = arith.mulf %69, %66 : vector<4x128xf32>
    %71 = arith.select %68, %66, %70 : vector<4x128xi1>, vector<4x128xf32>
    %72 = arith.truncf %71 : vector<4x128xf32> to vector<4x128xbf16>
    %c0_67 = arith.constant 0 : index
    %c0_68 = arith.constant 0 : index
    %c0_69 = arith.constant 0 : index
    %73 = vector.load %arg4[%c0_67, %c0_68, %c0_69] : memref<1x4x128xbf16, #tpu.memory_space<vmem>>, vector<1x4x128xbf16>
    %74 = vector.shape_cast %73 : vector<1x4x128xbf16> to vector<4x128xbf16>
    %75 = vector.shape_cast %72 : vector<4x128xbf16> to vector<1x4x128xbf16>
    tpu.vector_store %arg4[%c0_67, %c0_68, %c0_69], %75 {strides = array<i32>} : memref<1x4x128xbf16, #tpu.memory_space<vmem>>, vector<1x4x128xbf16>,
    return
  }
  func.func @transform_0(%arg0: i32) -> (i32, i32, i32, i32) {
    %c0_i32 = arith.constant 0 : i32
    %c0_i32_0 = arith.constant 0 : i32
    %c0_i32_1 = arith.constant 0 : i32
    %c0_i32_2 = arith.constant 0 : i32
    return %arg0, %c0_i32, %c0_i32_0, %c0_i32_1 : i32, i32, i32, i32
  }
  func.func @transform_1(%arg0: i32) -> (i32, i32, i32) {
    %c0_i32 = arith.constant 0 : i32
    %c0_i32_0 = arith.constant 0 : i32
    %c0_i32_1 = arith.constant 0 : i32
    %c0_i32_2 = arith.constant 0 : i32
    return %c0_i32, %c0_i32_0, %c0_i32_1 : i32, i32, i32
  }
  func.func @transform_2(%arg0: i32) -> (i32, i32) {
    %c0_i32 = arith.constant 0 : i32
    %c0_i32_0 = arith.constant 0 : i32
    %c0_i32_1 = arith.constant 0 : i32
    return %c0_i32, %c0_i32_0 : i32, i32
  }
  func.func @transform_3(%arg0: i32) -> (i32, i32, i32) {
    %c0_i32 = arith.constant 0 : i32
    %c0_i32_0 = arith.constant 0 : i32
    %c0_i32_1 = arith.constant 0 : i32
    return %arg0, %c0_i32, %c0_i32_0 : i32, i32, i32
  }
}

module attributes {stable_mosaic.version = 11 : i64} {
  func.func @_conv_kernel(%arg0: i32, %arg1: memref<1x2x2x64xbf16, #tpu.memory_space<vmem>>, %arg2: memref<1x64x128xbf16, #tpu.memory_space<vmem>>, %arg3: memref<1x128xf32, #tpu.memory_space<vmem>>, %arg4: memref<1x4x128xbf16, #tpu.memory_space<vmem>>) attributes {dimension_semantics = [#tpu.dimension_semantics<parallel>], iteration_bounds = array<i64: 2>, scalar_prefetch = 0 : i64, scratch_operands = 0 : i64, tpu.core_type = #tpu.core_type<tc>, window_params = [{transform_indices = @transform_0, window_bounds = array<i64: 1, 2, 2, 64>}, {pipeline_mode = #tpu.pipeline_mode<synchronous>, transform_indices = @transform_1, window_bounds = array<i64: 1, 64, 128>}, {pipeline_mode = #tpu.pipeline_mode<synchronous>, transform_indices = @transform_2, window_bounds = array<i64: 1, 128>}, {transform_indices = @transform_3, window_bounds = array<i64: 1, 4, 128>}]} {
    %cst = arith.constant 0.000000e+00 : f32
    %0 = vector.broadcast %cst : f32 to vector<4x128xf32>
    %c0 = arith.constant 0 : index
    %c0_0 = arith.constant 0 : index
    %c0_1 = arith.constant 0 : index
    %c0_2 = arith.constant 0 : index
    %1 = vector.load %arg1[%c0, %c0_0, %c0_1, %c0_2] : memref<1x2x2x64xbf16, #tpu.memory_space<vmem>>, vector<1x2x2x64xbf16>
    %2 = vector.shape_cast %1 : vector<1x2x2x64xbf16> to vector<2x2x64xbf16>
    %3 = vector.shape_cast %2 : vector<2x2x64xbf16> to vector<4x64xbf16>
    %c0_3 = arith.constant 0 : index
    %c0_4 = arith.constant 0 : index
    %c0_5 = arith.constant 0 : index
    %4 = vector.load %arg2[%c0_3, %c0_4, %c0_5] : memref<1x64x128xbf16, #tpu.memory_space<vmem>>, vector<1x64x128xbf16>
    %5 = vector.shape_cast %4 : vector<1x64x128xbf16> to vector<64x128xbf16>
    %cst_6 = arith.constant dense<0.000000e+00> : vector<4x128xf32>
    %6 = tpu.matmul %3, %5, %cst_6 {dimension_numbers = #tpu.dot_dimension_numbers<[1], [0], [0], [1], [0, 0, 1, 1], [], []>} : vector<4x64xbf16>, vector<64x128xbf16>, vector<4x128xf32> -> vector<4x128xf32>
    %7 = arith.addf %0, %6 : vector<4x128xf32>
    %c0_7 = arith.constant 0 : index
    %c0_8 = arith.constant 0 : index
    %8 = vector.load %arg3[%c0_7, %c0_8] : memref<1x128xf32, #tpu.memory_space<vmem>>, vector<1x128xf32>
    %9 = vector.broadcast %8 : vector<1x128xf32> to vector<4x128xf32>
    %10 = arith.addf %7, %9 : vector<4x128xf32>
    %11 = arith.truncf %10 : vector<4x128xf32> to vector<4x128xbf16>
    %c0_9 = arith.constant 0 : index
    %c0_10 = arith.constant 0 : index
    %c0_11 = arith.constant 0 : index
    %12 = vector.load %arg4[%c0_9, %c0_10, %c0_11] : memref<1x4x128xbf16, #tpu.memory_space<vmem>>, vector<1x4x128xbf16>
    %13 = vector.shape_cast %12 : vector<1x4x128xbf16> to vector<4x128xbf16>
    %14 = vector.shape_cast %11 : vector<4x128xbf16> to vector<1x4x128xbf16>
    tpu.vector_store %arg4[%c0_9, %c0_10, %c0_11], %14 {strides = array<i32>} : memref<1x4x128xbf16, #tpu.memory_space<vmem>>, vector<1x4x128xbf16>,
    return
  }
  func.func @transform_0(%arg0: i32) -> (i32, i32, i32, i32) {
    %c0_i32 = arith.constant 0 : i32
    %c0_i32_0 = arith.constant 0 : i32
    %c0_i32_1 = arith.constant 0 : i32
    %c0_i32_2 = arith.constant 0 : i32
    return %arg0, %c0_i32, %c0_i32_0, %c0_i32_1 : i32, i32, i32, i32
  }
  func.func @transform_1(%arg0: i32) -> (i32, i32, i32) {
    %c0_i32 = arith.constant 0 : i32
    %c0_i32_0 = arith.constant 0 : i32
    %c0_i32_1 = arith.constant 0 : i32
    %c0_i32_2 = arith.constant 0 : i32
    return %c0_i32, %c0_i32_0, %c0_i32_1 : i32, i32, i32
  }
  func.func @transform_2(%arg0: i32) -> (i32, i32) {
    %c0_i32 = arith.constant 0 : i32
    %c0_i32_0 = arith.constant 0 : i32
    %c0_i32_1 = arith.constant 0 : i32
    return %c0_i32, %c0_i32_0 : i32, i32
  }
  func.func @transform_3(%arg0: i32) -> (i32, i32, i32) {
    %c0_i32 = arith.constant 0 : i32
    %c0_i32_0 = arith.constant 0 : i32
    %c0_i32_1 = arith.constant 0 : i32
    return %arg0, %c0_i32, %c0_i32_0 : i32, i32, i32
  }
}

module attributes {stable_mosaic.version = 11 : i64} {
  func.func @_conv_kernel(%arg0: i32, %arg1: memref<1x4x4x128xbf16, #tpu.memory_space<vmem>>, %arg2: memref<9x128x128xbf16, #tpu.memory_space<vmem>>, %arg3: memref<1x128xf32, #tpu.memory_space<vmem>>, %arg4: memref<1x4x128xbf16, #tpu.memory_space<vmem>>, %arg5: memref<1x4x128xbf16, #tpu.memory_space<vmem>>) attributes {dimension_semantics = [#tpu.dimension_semantics<parallel>], iteration_bounds = array<i64: 2>, scalar_prefetch = 0 : i64, scratch_operands = 0 : i64, tpu.core_type = #tpu.core_type<tc>, window_params = [{transform_indices = @transform_0, window_bounds = array<i64: 1, 4, 4, 128>}, {pipeline_mode = #tpu.pipeline_mode<synchronous>, transform_indices = @transform_1, window_bounds = array<i64: 9, 128, 128>}, {pipeline_mode = #tpu.pipeline_mode<synchronous>, transform_indices = @transform_2, window_bounds = array<i64: 1, 128>}, {transform_indices = @transform_3, window_bounds = array<i64: 1, 4, 128>}, {transform_indices = @transform_4, window_bounds = array<i64: 1, 4, 128>}]} {
    %cst = arith.constant 0.000000e+00 : f32
    %0 = vector.broadcast %cst : f32 to vector<4x128xf32>
    %c0 = arith.constant 0 : index
    %c0_0 = arith.constant 0 : index
    %c0_1 = arith.constant 0 : index
    %c0_2 = arith.constant 0 : index
    %1 = vector.load %arg1[%c0, %c0_0, %c0_1, %c0_2] : memref<1x4x4x128xbf16, #tpu.memory_space<vmem>>, vector<1x2x2x128xbf16>
    %2 = vector.shape_cast %1 : vector<1x2x2x128xbf16> to vector<2x2x128xbf16>
    %3 = vector.shape_cast %2 : vector<2x2x128xbf16> to vector<4x128xbf16>
    %c0_3 = arith.constant 0 : index
    %c0_4 = arith.constant 0 : index
    %c0_5 = arith.constant 0 : index
    %4 = vector.load %arg2[%c0_3, %c0_4, %c0_5] : memref<9x128x128xbf16, #tpu.memory_space<vmem>>, vector<1x128x128xbf16>
    %5 = vector.shape_cast %4 : vector<1x128x128xbf16> to vector<128x128xbf16>
    %cst_6 = arith.constant dense<0.000000e+00> : vector<4x128xf32>
    %6 = tpu.matmul %3, %5, %cst_6 {dimension_numbers = #tpu.dot_dimension_numbers<[1], [0], [0], [1], [0, 0, 1, 1], [], []>} : vector<4x128xbf16>, vector<128x128xbf16>, vector<4x128xf32> -> vector<4x128xf32>
    %7 = arith.addf %0, %6 : vector<4x128xf32>
    %c0_7 = arith.constant 0 : index
    %c0_8 = arith.constant 0 : index
    %c1 = arith.constant 1 : index
    %c0_9 = arith.constant 0 : index
    %8 = vector.load %arg1[%c0_7, %c0_8, %c1, %c0_9] : memref<1x4x4x128xbf16, #tpu.memory_space<vmem>>, vector<1x2x2x128xbf16>
    %9 = vector.shape_cast %8 : vector<1x2x2x128xbf16> to vector<2x2x128xbf16>
    %10 = vector.shape_cast %9 : vector<2x2x128xbf16> to vector<4x128xbf16>
    %c1_10 = arith.constant 1 : index
    %c0_11 = arith.constant 0 : index
    %c0_12 = arith.constant 0 : index
    %11 = vector.load %arg2[%c1_10, %c0_11, %c0_12] : memref<9x128x128xbf16, #tpu.memory_space<vmem>>, vector<1x128x128xbf16>
    %12 = vector.shape_cast %11 : vector<1x128x128xbf16> to vector<128x128xbf16>
    %cst_13 = arith.constant dense<0.000000e+00> : vector<4x128xf32>
    %13 = tpu.matmul %10, %12, %cst_13 {dimension_numbers = #tpu.dot_dimension_numbers<[1], [0], [0], [1], [0, 0, 1, 1], [], []>} : vector<4x128xbf16>, vector<128x128xbf16>, vector<4x128xf32> -> vector<4x128xf32>
    %14 = arith.addf %7, %13 : vector<4x128xf32>
    %c0_14 = arith.constant 0 : index
    %c0_15 = arith.constant 0 : index
    %c2 = arith.constant 2 : index
    %c0_16 = arith.constant 0 : index
    %15 = vector.load %arg1[%c0_14, %c0_15, %c2, %c0_16] : memref<1x4x4x128xbf16, #tpu.memory_space<vmem>>, vector<1x2x2x128xbf16>
    %16 = vector.shape_cast %15 : vector<1x2x2x128xbf16> to vector<2x2x128xbf16>
    %17 = vector.shape_cast %16 : vector<2x2x128xbf16> to vector<4x128xbf16>
    %c2_17 = arith.constant 2 : index
    %c0_18 = arith.constant 0 : index
    %c0_19 = arith.constant 0 : index
    %18 = vector.load %arg2[%c2_17, %c0_18, %c0_19] : memref<9x128x128xbf16, #tpu.memory_space<vmem>>, vector<1x128x128xbf16>
    %19 = vector.shape_cast %18 : vector<1x128x128xbf16> to vector<128x128xbf16>
    %cst_20 = arith.constant dense<0.000000e+00> : vector<4x128xf32>
    %20 = tpu.matmul %17, %19, %cst_20 {dimension_numbers = #tpu.dot_dimension_numbers<[1], [0], [0], [1], [0, 0, 1, 1], [], []>} : vector<4x128xbf16>, vector<128x128xbf16>, vector<4x128xf32> -> vector<4x128xf32>
    %21 = arith.addf %14, %20 : vector<4x128xf32>
    %c0_21 = arith.constant 0 : index
    %c1_22 = arith.constant 1 : index
    %c0_23 = arith.constant 0 : index
    %c0_24 = arith.constant 0 : index
    %22 = vector.load %arg1[%c0_21, %c1_22, %c0_23, %c0_24] : memref<1x4x4x128xbf16, #tpu.memory_space<vmem>>, vector<1x2x2x128xbf16>
    %23 = vector.shape_cast %22 : vector<1x2x2x128xbf16> to vector<2x2x128xbf16>
    %24 = vector.shape_cast %23 : vector<2x2x128xbf16> to vector<4x128xbf16>
    %c3 = arith.constant 3 : index
    %c0_25 = arith.constant 0 : index
    %c0_26 = arith.constant 0 : index
    %25 = vector.load %arg2[%c3, %c0_25, %c0_26] : memref<9x128x128xbf16, #tpu.memory_space<vmem>>, vector<1x128x128xbf16>
    %26 = vector.shape_cast %25 : vector<1x128x128xbf16> to vector<128x128xbf16>
    %cst_27 = arith.constant dense<0.000000e+00> : vector<4x128xf32>
    %27 = tpu.matmul %24, %26, %cst_27 {dimension_numbers = #tpu.dot_dimension_numbers<[1], [0], [0], [1], [0, 0, 1, 1], [], []>} : vector<4x128xbf16>, vector<128x128xbf16>, vector<4x128xf32> -> vector<4x128xf32>
    %28 = arith.addf %21, %27 : vector<4x128xf32>
    %c0_28 = arith.constant 0 : index
    %c1_29 = arith.constant 1 : index
    %c1_30 = arith.constant 1 : index
    %c0_31 = arith.constant 0 : index
    %29 = vector.load %arg1[%c0_28, %c1_29, %c1_30, %c0_31] : memref<1x4x4x128xbf16, #tpu.memory_space<vmem>>, vector<1x2x2x128xbf16>
    %30 = vector.shape_cast %29 : vector<1x2x2x128xbf16> to vector<2x2x128xbf16>
    %31 = vector.shape_cast %30 : vector<2x2x128xbf16> to vector<4x128xbf16>
    %c4 = arith.constant 4 : index
    %c0_32 = arith.constant 0 : index
    %c0_33 = arith.constant 0 : index
    %32 = vector.load %arg2[%c4, %c0_32, %c0_33] : memref<9x128x128xbf16, #tpu.memory_space<vmem>>, vector<1x128x128xbf16>
    %33 = vector.shape_cast %32 : vector<1x128x128xbf16> to vector<128x128xbf16>
    %cst_34 = arith.constant dense<0.000000e+00> : vector<4x128xf32>
    %34 = tpu.matmul %31, %33, %cst_34 {dimension_numbers = #tpu.dot_dimension_numbers<[1], [0], [0], [1], [0, 0, 1, 1], [], []>} : vector<4x128xbf16>, vector<128x128xbf16>, vector<4x128xf32> -> vector<4x128xf32>
    %35 = arith.addf %28, %34 : vector<4x128xf32>
    %c0_35 = arith.constant 0 : index
    %c1_36 = arith.constant 1 : index
    %c2_37 = arith.constant 2 : index
    %c0_38 = arith.constant 0 : index
    %36 = vector.load %arg1[%c0_35, %c1_36, %c2_37, %c0_38] : memref<1x4x4x128xbf16, #tpu.memory_space<vmem>>, vector<1x2x2x128xbf16>
    %37 = vector.shape_cast %36 : vector<1x2x2x128xbf16> to vector<2x2x128xbf16>
    %38 = vector.shape_cast %37 : vector<2x2x128xbf16> to vector<4x128xbf16>
    %c5 = arith.constant 5 : index
    %c0_39 = arith.constant 0 : index
    %c0_40 = arith.constant 0 : index
    %39 = vector.load %arg2[%c5, %c0_39, %c0_40] : memref<9x128x128xbf16, #tpu.memory_space<vmem>>, vector<1x128x128xbf16>
    %40 = vector.shape_cast %39 : vector<1x128x128xbf16> to vector<128x128xbf16>
    %cst_41 = arith.constant dense<0.000000e+00> : vector<4x128xf32>
    %41 = tpu.matmul %38, %40, %cst_41 {dimension_numbers = #tpu.dot_dimension_numbers<[1], [0], [0], [1], [0, 0, 1, 1], [], []>} : vector<4x128xbf16>, vector<128x128xbf16>, vector<4x128xf32> -> vector<4x128xf32>
    %42 = arith.addf %35, %41 : vector<4x128xf32>
    %c0_42 = arith.constant 0 : index
    %c2_43 = arith.constant 2 : index
    %c0_44 = arith.constant 0 : index
    %c0_45 = arith.constant 0 : index
    %43 = vector.load %arg1[%c0_42, %c2_43, %c0_44, %c0_45] : memref<1x4x4x128xbf16, #tpu.memory_space<vmem>>, vector<1x2x2x128xbf16>
    %44 = vector.shape_cast %43 : vector<1x2x2x128xbf16> to vector<2x2x128xbf16>
    %45 = vector.shape_cast %44 : vector<2x2x128xbf16> to vector<4x128xbf16>
    %c6 = arith.constant 6 : index
    %c0_46 = arith.constant 0 : index
    %c0_47 = arith.constant 0 : index
    %46 = vector.load %arg2[%c6, %c0_46, %c0_47] : memref<9x128x128xbf16, #tpu.memory_space<vmem>>, vector<1x128x128xbf16>
    %47 = vector.shape_cast %46 : vector<1x128x128xbf16> to vector<128x128xbf16>
    %cst_48 = arith.constant dense<0.000000e+00> : vector<4x128xf32>
    %48 = tpu.matmul %45, %47, %cst_48 {dimension_numbers = #tpu.dot_dimension_numbers<[1], [0], [0], [1], [0, 0, 1, 1], [], []>} : vector<4x128xbf16>, vector<128x128xbf16>, vector<4x128xf32> -> vector<4x128xf32>
    %49 = arith.addf %42, %48 : vector<4x128xf32>
    %c0_49 = arith.constant 0 : index
    %c2_50 = arith.constant 2 : index
    %c1_51 = arith.constant 1 : index
    %c0_52 = arith.constant 0 : index
    %50 = vector.load %arg1[%c0_49, %c2_50, %c1_51, %c0_52] : memref<1x4x4x128xbf16, #tpu.memory_space<vmem>>, vector<1x2x2x128xbf16>
    %51 = vector.shape_cast %50 : vector<1x2x2x128xbf16> to vector<2x2x128xbf16>
    %52 = vector.shape_cast %51 : vector<2x2x128xbf16> to vector<4x128xbf16>
    %c7 = arith.constant 7 : index
    %c0_53 = arith.constant 0 : index
    %c0_54 = arith.constant 0 : index
    %53 = vector.load %arg2[%c7, %c0_53, %c0_54] : memref<9x128x128xbf16, #tpu.memory_space<vmem>>, vector<1x128x128xbf16>
    %54 = vector.shape_cast %53 : vector<1x128x128xbf16> to vector<128x128xbf16>
    %cst_55 = arith.constant dense<0.000000e+00> : vector<4x128xf32>
    %55 = tpu.matmul %52, %54, %cst_55 {dimension_numbers = #tpu.dot_dimension_numbers<[1], [0], [0], [1], [0, 0, 1, 1], [], []>} : vector<4x128xbf16>, vector<128x128xbf16>, vector<4x128xf32> -> vector<4x128xf32>
    %56 = arith.addf %49, %55 : vector<4x128xf32>
    %c0_56 = arith.constant 0 : index
    %c2_57 = arith.constant 2 : index
    %c2_58 = arith.constant 2 : index
    %c0_59 = arith.constant 0 : index
    %57 = vector.load %arg1[%c0_56, %c2_57, %c2_58, %c0_59] : memref<1x4x4x128xbf16, #tpu.memory_space<vmem>>, vector<1x2x2x128xbf16>
    %58 = vector.shape_cast %57 : vector<1x2x2x128xbf16> to vector<2x2x128xbf16>
    %59 = vector.shape_cast %58 : vector<2x2x128xbf16> to vector<4x128xbf16>
    %c8 = arith.constant 8 : index
    %c0_60 = arith.constant 0 : index
    %c0_61 = arith.constant 0 : index
    %60 = vector.load %arg2[%c8, %c0_60, %c0_61] : memref<9x128x128xbf16, #tpu.memory_space<vmem>>, vector<1x128x128xbf16>
    %61 = vector.shape_cast %60 : vector<1x128x128xbf16> to vector<128x128xbf16>
    %cst_62 = arith.constant dense<0.000000e+00> : vector<4x128xf32>
    %62 = tpu.matmul %59, %61, %cst_62 {dimension_numbers = #tpu.dot_dimension_numbers<[1], [0], [0], [1], [0, 0, 1, 1], [], []>} : vector<4x128xbf16>, vector<128x128xbf16>, vector<4x128xf32> -> vector<4x128xf32>
    %63 = arith.addf %56, %62 : vector<4x128xf32>
    %c0_63 = arith.constant 0 : index
    %c0_64 = arith.constant 0 : index
    %64 = vector.load %arg3[%c0_63, %c0_64] : memref<1x128xf32, #tpu.memory_space<vmem>>, vector<1x128xf32>
    %65 = vector.broadcast %64 : vector<1x128xf32> to vector<4x128xf32>
    %66 = arith.addf %63, %65 : vector<4x128xf32>
    %cst_65 = arith.constant 0.000000e+00 : f32
    %67 = vector.broadcast %cst_65 : f32 to vector<4x128xf32>
    %68 = arith.cmpf oge, %66, %67 : vector<4x128xf32>
    %cst_66 = arith.constant 0.00999999977 : f32
    %69 = vector.broadcast %cst_66 : f32 to vector<4x128xf32>
    %70 = arith.mulf %69, %66 : vector<4x128xf32>
    %71 = arith.select %68, %66, %70 : vector<4x128xi1>, vector<4x128xf32>
    %c0_67 = arith.constant 0 : index
    %c0_68 = arith.constant 0 : index
    %c0_69 = arith.constant 0 : index
    %72 = vector.load %arg4[%c0_67, %c0_68, %c0_69] : memref<1x4x128xbf16, #tpu.memory_space<vmem>>, vector<1x4x128xbf16>
    %73 = vector.shape_cast %72 : vector<1x4x128xbf16> to vector<4x128xbf16>
    %74 = arith.extf %73 : vector<4x128xbf16> to vector<4x128xf32>
    %75 = arith.addf %71, %74 : vector<4x128xf32>
    %cst_70 = arith.constant 0.000000e+00 : f32
    %76 = vector.broadcast %cst_70 : f32 to vector<4x128xf32>
    %77 = arith.cmpf oge, %75, %76 : vector<4x128xf32>
    %cst_71 = arith.constant 0.00999999977 : f32
    %78 = vector.broadcast %cst_71 : f32 to vector<4x128xf32>
    %79 = arith.mulf %78, %75 : vector<4x128xf32>
    %80 = arith.select %77, %75, %79 : vector<4x128xi1>, vector<4x128xf32>
    %81 = arith.truncf %80 : vector<4x128xf32> to vector<4x128xbf16>
    %c0_72 = arith.constant 0 : index
    %c0_73 = arith.constant 0 : index
    %c0_74 = arith.constant 0 : index
    %82 = vector.load %arg5[%c0_72, %c0_73, %c0_74] : memref<1x4x128xbf16, #tpu.memory_space<vmem>>, vector<1x4x128xbf16>
    %83 = vector.shape_cast %82 : vector<1x4x128xbf16> to vector<4x128xbf16>
    %84 = vector.shape_cast %81 : vector<4x128xbf16> to vector<1x4x128xbf16>
    tpu.vector_store %arg5[%c0_72, %c0_73, %c0_74], %84 {strides = array<i32>} : memref<1x4x128xbf16, #tpu.memory_space<vmem>>, vector<1x4x128xbf16>,
    return
  }
  func.func @transform_0(%arg0: i32) -> (i32, i32, i32, i32) {
    %c0_i32 = arith.constant 0 : i32
    %c0_i32_0 = arith.constant 0 : i32
    %c0_i32_1 = arith.constant 0 : i32
    %c0_i32_2 = arith.constant 0 : i32
    return %arg0, %c0_i32, %c0_i32_0, %c0_i32_1 : i32, i32, i32, i32
  }
  func.func @transform_1(%arg0: i32) -> (i32, i32, i32) {
    %c0_i32 = arith.constant 0 : i32
    %c0_i32_0 = arith.constant 0 : i32
    %c0_i32_1 = arith.constant 0 : i32
    %c0_i32_2 = arith.constant 0 : i32
    return %c0_i32, %c0_i32_0, %c0_i32_1 : i32, i32, i32
  }
  func.func @transform_2(%arg0: i32) -> (i32, i32) {
    %c0_i32 = arith.constant 0 : i32
    %c0_i32_0 = arith.constant 0 : i32
    %c0_i32_1 = arith.constant 0 : i32
    return %c0_i32, %c0_i32_0 : i32, i32
  }
  func.func @transform_3(%arg0: i32) -> (i32, i32, i32) {
    %c0_i32 = arith.constant 0 : i32
    %c0_i32_0 = arith.constant 0 : i32
    %c0_i32_1 = arith.constant 0 : i32
    return %arg0, %c0_i32, %c0_i32_0 : i32, i32, i32
  }
  func.func @transform_4(%arg0: i32) -> (i32, i32, i32) {
    %c0_i32 = arith.constant 0 : i32
    %c0_i32_0 = arith.constant 0 : i32
    %c0_i32_1 = arith.constant 0 : i32
    return %arg0, %c0_i32, %c0_i32_0 : i32, i32, i32
  }
}

module attributes {stable_mosaic.version = 11 : i64} {
  func.func @_se_kernel(%arg0: memref<2x4x128xbf16, #tpu.memory_space<vmem>>, %arg1: memref<128x8xf32, #tpu.memory_space<vmem>>, %arg2: memref<8x128xf32, #tpu.memory_space<vmem>>, %arg3: memref<2x4x128xbf16, #tpu.memory_space<vmem>>) attributes {dimension_semantics = [], scalar_prefetch = 0 : i64, scratch_operands = 0 : i64, tpu.core_type = #tpu.core_type<tc>} {
    %c0 = arith.constant 0 : index
    %c0_0 = arith.constant 0 : index
    %c0_1 = arith.constant 0 : index
    %0 = vector.load %arg0[%c0, %c0_0, %c0_1] : memref<2x4x128xbf16, #tpu.memory_space<vmem>>, vector<2x4x128xbf16>
    %1 = arith.extf %0 : vector<2x4x128xbf16> to vector<2x4x128xf32>
    %cst = arith.constant dense<0.000000e+00> : vector<2x128xf32>
    %2 = vector.multi_reduction <add>, %1, %cst [1] : vector<2x4x128xf32> to vector<2x128xf32>
    %cst_2 = arith.constant 2.500000e-01 : f32
    %3 = vector.broadcast %cst_2 : f32 to vector<2x128xf32>
    %4 = arith.mulf %2, %3 : vector<2x128xf32>
    %c0_3 = arith.constant 0 : index
    %c0_4 = arith.constant 0 : index
    %5 = vector.load %arg1[%c0_3, %c0_4] : memref<128x8xf32, #tpu.memory_space<vmem>>, vector<128x8xf32>
    %cst_5 = arith.constant dense<0.000000e+00> : vector<2x8xf32>
    %6 = tpu.matmul %4, %5, %cst_5 {dimension_numbers = #tpu.dot_dimension_numbers<[1], [0], [0], [1], [0, 0, 1, 1], [], []>} : vector<2x128xf32>, vector<128x8xf32>, vector<2x8xf32> -> vector<2x8xf32>
    %cst_6 = arith.constant 0.000000e+00 : f32
    %7 = vector.broadcast %cst_6 : f32 to vector<2x8xf32>
    %8 = arith.maximumf %6, %7 : vector<2x8xf32>
    %c0_7 = arith.constant 0 : index
    %c0_8 = arith.constant 0 : index
    %9 = vector.load %arg2[%c0_7, %c0_8] : memref<8x128xf32, #tpu.memory_space<vmem>>, vector<8x128xf32>
    %cst_9 = arith.constant dense<0.000000e+00> : vector<2x128xf32>
    %10 = tpu.matmul %8, %9, %cst_9 {dimension_numbers = #tpu.dot_dimension_numbers<[1], [0], [0], [1], [0, 0, 1, 1], [], []>} : vector<2x8xf32>, vector<8x128xf32>, vector<2x128xf32> -> vector<2x128xf32>
    %11 = arith.negf %10 : vector<2x128xf32>
    %12 = math.exp %11 : vector<2x128xf32>
    %cst_10 = arith.constant 1.000000e+00 : f32
    %13 = vector.broadcast %cst_10 : f32 to vector<2x128xf32>
    %14 = arith.addf %13, %12 : vector<2x128xf32>
    %15 = arith.divf %13, %14 : vector<2x128xf32>
    %16 = vector.shape_cast %15 : vector<2x128xf32> to vector<2x1x128xf32>
    %17 = vector.broadcast %16 : vector<2x1x128xf32> to vector<2x4x128xf32>
    %18 = arith.mulf %1, %17 : vector<2x4x128xf32>
    %19 = arith.truncf %18 : vector<2x4x128xf32> to vector<2x4x128xbf16>
    %c0_11 = arith.constant 0 : index
    %c0_12 = arith.constant 0 : index
    %c0_13 = arith.constant 0 : index
    %20 = vector.load %arg3[%c0_11, %c0_12, %c0_13] : memref<2x4x128xbf16, #tpu.memory_space<vmem>>, vector<2x4x128xbf16>
    tpu.vector_store %arg3[%c0_11, %c0_12, %c0_13], %19 {strides = array<i32>} : memref<2x4x128xbf16, #tpu.memory_space<vmem>>, vector<2x4x128xbf16>,
    return
  }
}

module attributes {stable_mosaic.version = 11 : i64} {
  func.func @_head_kernel(%arg0: memref<2x4x128xbf16, #tpu.memory_space<vmem>>, %arg1: memref<128x256xf32, #tpu.memory_space<vmem>>, %arg2: memref<1x256xf32, #tpu.memory_space<vmem>>, %arg3: memref<256x6xf32, #tpu.memory_space<vmem>>, %arg4: memref<1x6xf32, #tpu.memory_space<vmem>>, %arg5: memref<2x6xf32, #tpu.memory_space<vmem>>) attributes {dimension_semantics = [], scalar_prefetch = 0 : i64, scratch_operands = 0 : i64, tpu.core_type = #tpu.core_type<tc>} {
    %c0 = arith.constant 0 : index
    %c0_0 = arith.constant 0 : index
    %c0_1 = arith.constant 0 : index
    %0 = vector.load %arg0[%c0, %c0_0, %c0_1] : memref<2x4x128xbf16, #tpu.memory_space<vmem>>, vector<2x4x128xbf16>
    %1 = arith.extf %0 : vector<2x4x128xbf16> to vector<2x4x128xf32>
    %cst = arith.constant dense<0.000000e+00> : vector<2x128xf32>
    %2 = vector.multi_reduction <add>, %1, %cst [1] : vector<2x4x128xf32> to vector<2x128xf32>
    %cst_2 = arith.constant 2.500000e-01 : f32
    %3 = vector.broadcast %cst_2 : f32 to vector<2x128xf32>
    %4 = arith.mulf %2, %3 : vector<2x128xf32>
    %c0_3 = arith.constant 0 : index
    %c0_4 = arith.constant 0 : index
    %5 = vector.load %arg1[%c0_3, %c0_4] : memref<128x256xf32, #tpu.memory_space<vmem>>, vector<128x256xf32>
    %cst_5 = arith.constant dense<0.000000e+00> : vector<2x256xf32>
    %6 = tpu.matmul %4, %5, %cst_5 {dimension_numbers = #tpu.dot_dimension_numbers<[1], [0], [0], [1], [0, 0, 1, 1], [], []>} : vector<2x128xf32>, vector<128x256xf32>, vector<2x256xf32> -> vector<2x256xf32>
    %c0_6 = arith.constant 0 : index
    %c0_7 = arith.constant 0 : index
    %7 = vector.load %arg2[%c0_6, %c0_7] : memref<1x256xf32, #tpu.memory_space<vmem>>, vector<1x256xf32>
    %8 = vector.broadcast %7 : vector<1x256xf32> to vector<2x256xf32>
    %9 = arith.addf %6, %8 : vector<2x256xf32>
    %cst_8 = arith.constant 0.000000e+00 : f32
    %10 = vector.broadcast %cst_8 : f32 to vector<2x256xf32>
    %11 = arith.maximumf %9, %10 : vector<2x256xf32>
    %c0_9 = arith.constant 0 : index
    %c0_10 = arith.constant 0 : index
    %12 = vector.load %arg3[%c0_9, %c0_10] : memref<256x6xf32, #tpu.memory_space<vmem>>, vector<256x6xf32>
    %cst_11 = arith.constant dense<0.000000e+00> : vector<2x6xf32>
    %13 = tpu.matmul %11, %12, %cst_11 {dimension_numbers = #tpu.dot_dimension_numbers<[1], [0], [0], [1], [0, 0, 1, 1], [], []>} : vector<2x256xf32>, vector<256x6xf32>, vector<2x6xf32> -> vector<2x6xf32>
    %c0_12 = arith.constant 0 : index
    %c0_13 = arith.constant 0 : index
    %14 = vector.load %arg4[%c0_12, %c0_13] : memref<1x6xf32, #tpu.memory_space<vmem>>, vector<1x6xf32>
    %15 = vector.broadcast %14 : vector<1x6xf32> to vector<2x6xf32>
    %16 = arith.addf %13, %15 : vector<2x6xf32>
    %c0_14 = arith.constant 0 : index
    %c0_15 = arith.constant 0 : index
    %17 = vector.load %arg5[%c0_14, %c0_15] : memref<2x6xf32, #tpu.memory_space<vmem>>, vector<2x6xf32>
    tpu.vector_store %arg5[%c0_14, %c0_15], %16 {strides = array<i32>} : memref<2x6xf32, #tpu.memory_space<vmem>>, vector<2x6xf32>,
    return
  }
}

</mosaic_0001>

<bundles_post_ra>
// kernel: improved_cnn_forward.11
= control target key start
LH: loop header
LB: loop body
LE: loop exit
PB: predicated region body
PF: predicated region fallthrough
CT: control target
= control target key end

     0   :  { %s2150_s12 = smov 0   ;;  %s2429_s0 = inlined_call_operand.vmem [shape: bf16[2,36,9,4], index: 0, kind: input, shape index: {}]   ;;  %s2430_s1 = inlined_call_operand.vmem [shape: bf16[9,4,32], index: 1, kind: input, shape index: {}]   ;;  %s2431_s2 = inlined_call_operand.vmem [shape: f32[1,32], index: 2, kind: input, shape index: {}]   ;;  %s2432_s3 = inlined_call_operand.vmem [shape: bf16[2,64,32], index: 3, kind: output, shape index: {}]  }
   0x1 LB: > { %s1698_s13 = sadd.s32 4294967295, %s2128_s12   ;;  %p1702_p0 = scmp.ge.s32.totalorder %s2128_s12, 1  ;;  %s2128_s12 = sphi %s2150_s12, %s13_s12  }
   0x2   : > { %p137_p1 = scmp.lt.s32.totalorder %s2128_s12, 3 }
   0x4   : > { %p138_p2 = pnand %p1702_p0, %p137_p1 }
   0x5   : > { %v1714_v0 = vld [vmem:[%s2430_s1 + $0x2] sm:$0x3] (!%p138_p2)  ;;  %vm225_vm0 = vcmask (!%p138_p2), 1041408   ;;  %v2164_v1 = vld [vmem:[%s2430_s1 + $0x8] sm:$0x3] (!%p138_p2)  ;;  %p161_p3 = scmp.lt.s32.totalorder (!%p138_p2), %s1698_s13, 1 }
   0x6   : > { %141 = sbr.rel (%p138_p2) target bundleno = 319 (0x13f), region = 32  ;;  %2079 = vmatprep.subr.msk.bf16.mxu1 (!%p138_p2), %vm225_vm0, %v1714_v0  ;;  %2083 = vmatprep.subr.msk.bf16.mxu0 (!%p138_p2), %vm225_vm0, %v2164_v1  ;;  %v227_v2 = vsel (!%p138_p2), %vm225_vm0, %v1714_v0, 0  ;;  %v2172_v3 = vsel (!%p138_p2), %vm225_vm0, %v2164_v1, 0  ;;  %v180_v4 = vld [vmem:[%s2430_s1] sm:$0x3] (!%p138_p2)  ;;  %vm212_vm1 = vcmask (!%p138_p2), 31744  }
   0x7   : > { %1924 = vmatpush3.bf16.msra.mxu1 (!%p138_p2), %v227_v2  ;;  %1964 = vmatpush3.bf16.msra.mxu0 (!%p138_p2), %v2172_v3  ;;  %v1790_v5 = vld [vmem:[%s2430_s1 + $0xa] sm:$0x3] (!%p138_p2)  ;;  %v327_v6 = vsel (!%p138_p2), %vm225_vm0, %v180_v4, 0  ;;  %v1807_v9 = vld [vmem:[%s2430_s1 + $0xc] sm:$0x3] (!%p138_p2)  ;;  %vm1634_vm7 = vcmask (!%p138_p2), 257024  }
   0x8   : > { %2080 = vmatprep.subr.msk.bf16.mxu1 (!%p138_p2), %vm225_vm0, %v180_v4  ;;  %2085 = vmatprep.subr.msk.bf16.mxu0 (!%p138_p2), %vm225_vm0, %v1790_v5  ;;  %v1020_v7 = vsel (!%p138_p2), %vm225_vm0, %v1790_v5, 0  ;;  %v1731_v10 = vld [vmem:[%s2430_s1 + $0x4] sm:$0x3] (!%p138_p2)  ;;  %vm410_vm2 = vsmask.f32 (!%p138_p2), 3328  ;;  %v2209_v15 = vsel (!%p138_p2), %vm225_vm0, %v1807_v9, 0 }
   0x9   : > { %vm411_vm3 = vsmask.f32 (!%p138_p2), 7440  ;;  %v2212_v16 = vsel (!%p138_p2), %vm225_vm0, %v1731_v10, 0 }
   0xa   : > { %vm2229_vm4 = vmor (!%p138_p2), %vm410_vm2, %vm411_vm3 }
   0xd   : > { %s2436_s13 = smov (!%p161_p3, %s1698_s13), 1 }
   0xe   : > { %s2089_s22 = smul.u32 288, %s2436_s13  ;;  %s1869_s11 = sshll.u32 %s2436_s13, 5 }
   0xf   : > { %s2408_s16 = scalar_lea.vmem %s2432_s3, %s1869_s11 }
  0x10   : > { %s2189_s25 = scalar_lea.vmem %s2429_s0, %s2089_s22 }
  0x11   : > { %v2098_v8 = vld [vmem:[%s2189_s25 + $0x48] ss:$8 sps:$4 sm:$0xff]   ;;  %v2099_v11 = vld [vmem:[%s2189_s25 + $0xd8] ss:$8 sps:$4 sm:$0xff]   ;;  %v1775_v19 = vld [vmem:[%s2189_s25 + $0x94] sm:$0x1] }
  0x12   : > { %1925 = vmatprep.mubr.msk.bf16.mxu1 %vm212_vm1, %v2098_v8  ;;  %v2100_v12 = vld [vmem:[%s2189_s25 + $0x58] ss:$8 sps:$4 sm:$0xff]   ;;  %1965 = vmatprep.mubr.msk.bf16.mxu0 %vm212_vm1, %v2099_v11  ;;  %v2101_v13 = vld [vmem:[%s2189_s25 + $0xe8] ss:$8 sps:$4 sm:$0xff]   ;;  %v1777_v21 = vld [vmem:[%s2189_s25 + $0x9c] sm:$0x1] }
  0x13   : > { %1926 = vmatmul.mubr.msk.bf16.vlgmr.msra.gmra.mrb[0].mxu1 %vm212_vm1, %v2100_v12  ;;  %v2102_v14 = vld [vmem:[%s2189_s25 + $0x68] ss:$8 sps:$4 sm:$0xff]   ;;  %1966 = vmatmul.mubr.msk.bf16.vlgmr.msra.gmra.mrb[0].mxu0 %vm212_vm1, %v2101_v13  ;;  %v2103_v17 = vld [vmem:[%s2189_s25 + $0x78] ss:$8 sps:$4 sm:$0xff]   ;;  %v891_v24 = vshll.u32 %v1775_v19, 16  ;;  %v905_v27 = vshll.u32 %v1777_v21, 16 }
  0x14   : > { %1934 = vmatpush3.bf16.msra.mxu1 %v327_v6  ;;  %1974 = vmatpush3.bf16.msra.mxu0 %v1020_v7  ;;  %v1774_v18 = vld [vmem:[%s2189_s25 + $0x90] sm:$0xf]  ;;  %v1776_v20 = vld [vmem:[%s2189_s25 + $0x98] sm:$0xf]  ;;  %v1778_v28 = vld [vmem:[%s2189_s25 + $0xa0] sm:$0xf] }
  0x15   : > { %1929 = vmatprep.mubr.msk.bf16.mxu1 %vm212_vm1, %v2102_v14  ;;  %v882_v22 = vshrl.u32 %v1774_v18, 16  ;;  %v885_v23 = vshll.u32 %v1774_v18, 16  ;;  %v896_v25 = vshrl.u32 %v1776_v20, 16  ;;  %2086 = vmatprep.subr.msk.bf16.mxu0 %vm225_vm0, %v1807_v9  ;;  %v899_v26 = vshll.u32 %v1776_v20, 16  ;;  %v1779_v29 = vld [vmem:[%s2189_s25 + $0xa4] sm:$0x1] }
  0x16   : > { %2081 = vmatprep.subr.msk.bf16.mxu1 %vm225_vm0, %v1731_v10  ;;  %v893_v32 = vrot.slane %v891_v24, 5  ;;  %v1780_v34 = vld [vmem:[%s2189_s25 + $0xa8] sm:$0xf]  ;;  %v907_v36 = vrot.slane %v905_v27, 5  ;;  %v1781_v37 = vld [vmem:[%s2189_s25 + $0xac] sm:$0x1] }
  0x17   : > { %v884_v30 = vrot.slane %v882_v22, 4  ;;  %v887_v31 = vrot.slane %v885_v23, 5  ;;  %v898_v33 = vrot.slane %v896_v25, 4  ;;  %v901_v35 = vrot.slane %v899_v26, 5  ;;  %v2104_v53 = vld [vmem:[%s2189_s25] ss:$8 sps:$4 sm:$0xff]  }
  0x18   : > { %v910_v38 = vshrl.u32 %v1778_v28, 16  ;;  %v913_v39 = vshll.u32 %v1778_v28, 16  ;;  %v919_v41 = vshll.u32 %v1779_v29, 16  ;;  %v924_v42 = vshrl.u32 %v1780_v34, 16  ;;  %v2105_v59 = vld [vmem:[%s2189_s25 + $0x10] ss:$8 sps:$4 sm:$0xff]  }
  0x19   : > { %v888_v40 = vor.u32 %v887_v31, %v884_v30  ;;  %v927_v43 = vshll.u32 %v1780_v34, 16  ;;  %v902_v45 = vor.u32 %v901_v35, %v898_v33  ;;  %v933_v48 = vshll.u32 %v1781_v37, 16  ;;  %v1782_v60 = vld [vmem:[%s2189_s25 + $0xb0] sm:$0xf]  ;;  %v1783_v61 = vld [vmem:[%s2189_s25 + $0xb4] sm:$0x1] }
  0x1a   : > { %v912_v46 = vrot.slane %v910_v38, 4  ;;  %v915_v47 = vrot.slane %v913_v39, 5  ;;  %v921_v50 = vrot.slane %v919_v41, 5  ;;  %v926_v51 = vrot.slane %v924_v42, 4  ;;  %v1784_v0 = vld [vmem:[%s2189_s25 + $0xb8] sm:$0xf] }
  0x1b   : > { %1930 = vmatmul.mubr.msk.bf16.gmra.mrb[4].mxu1 %vm212_vm1, %v2103_v17  ;;  %v889_v49 = vrot.slane %v888_v40, 4  ;;  %v929_v52 = vrot.slane %v927_v43, 5  ;;  %v903_v54 = vrot.slane %v902_v45, 4  ;;  %v935_v56 = vrot.slane %v933_v48, 5  ;;  %v1785_v2 = vld [vmem:[%s2189_s25 + $0xbc] sm:$0x1] }
  0x1c   : > { %v916_v55 = vor.u32 %v915_v47, %v912_v46  ;;  %1935 = vmatprep.mubr.msk.bf16.mxu1 %vm212_vm1, %v2104_v53  ;;  %v938_v4 = vshrl.u32 %v1782_v60, 16  ;;  %v941_v7 = vshll.u32 %v1782_v60, 16  ;;  %v947_v8 = vshll.u32 %v1783_v61, 16  ;;  %v1786_v9 = vld [vmem:[%s2189_s25 + $0xc0] sm:$0xf] }
  0x1d   : > { %v894_v57 = vsel %vm2229_vm4, %v889_v49, %v893_v32  ;;  %v930_v58 = vor.u32 %v929_v52, %v926_v51  ;;  %v908_v62 = vsel %vm2229_vm4, %v903_v54, %v907_v36  ;;  %v2248_v10 = vld [vmem:[%s2430_s1 + $0x6] sm:$0x3]  ;;  %v952_v13 = vshrl.u32 %v1784_v0, 16  ;;  %v1787_v17 = vld [vmem:[%s2189_s25 + $0xc4] sm:$0x1] }
  0x1e   : > { %v917_v63 = vrot.slane %v916_v55, 4  ;;  %v1791_v5 = vcombine.low %v894_v57, %v908_v62  ;;  %v940_v12 = vrot.slane %v938_v4, 4  ;;  %v955_v14 = vshll.u32 %v1784_v0, 16  ;;  %v1788_v22 = vld [vmem:[%s2189_s25 + $0xc8] sm:$0xf] }
  0x1f   : > { %v931_v6 = vrot.slane %v930_v58, 4  ;;  %v943_v19 = vrot.slane %v941_v7, 5  ;;  %v949_v20 = vrot.slane %v947_v8, 5  ;;  %v961_v21 = vshll.u32 %v1785_v2, 16  ;;  %v2260_v23 = vld [vmem:[%s2430_s1 + $0xe] sm:$0x3] }
  0x20   : > { %v922_v11 = vsel %vm2229_vm4, %v917_v63, %v921_v50  ;;  %1975 = vmatprep.mubr.msk.bf16.mxu0 %vm212_vm1, %v1791_v5  ;;  %v954_v25 = vrot.slane %v952_v13, 4  ;;  %v957_v26 = vrot.slane %v955_v14, 5  ;;  %v1789_v27 = vld [vmem:[%s2189_s25 + $0xcc] sm:$0x1]  ;;  %v966_v28 = vshrl.u32 %v1786_v9, 16 }
  0x21   : > { %v936_v18 = vsel %vm2229_vm4, %v931_v6, %v935_v56  ;;  %v944_v29 = vor.u32 %v943_v19, %v940_v12  ;;  %v963_v30 = vrot.slane %v961_v21, 5  ;;  %v969_v31 = vshll.u32 %v1786_v9, 16  ;;  %v2108_v53 = vld [vmem:[%s2189_s25 + $0x8] ss:$8 sps:$4 sm:$0xff]   ;;  %v394_v54 = vld [vmem:[%s2189_s25] sm:$0xf] }
  0x22   : > { %v1792_v24 = vcombine.low %v922_v11, %v936_v18  ;;  %v975_v32 = vshll.u32 %v1787_v17, 16  ;;  %v958_v33 = vor.u32 %v957_v26, %v954_v25  ;;  %v968_v34 = vrot.slane %v966_v28, 4  ;;  %v395_v56 = vld [vmem:[%s2189_s25 + $0x4] sm:$0x1]  ;;  %v396_v57 = vld [vmem:[%s2189_s25 + $0x8] sm:$0xf] }
  0x23   : > { %1936 = vmatmul.mubr.msk.bf16.vlgmr.msra.gmra.mrb[0].mxu1 %vm212_vm1, %v2105_v59  ;;  %v980_v35 = vshrl.u32 %v1788_v22, 16  ;;  %v983_v36 = vshll.u32 %v1788_v22, 16  ;;  %v945_v37 = vrot.slane %v944_v29, 4  ;;  %v971_v38 = vrot.slane %v969_v31, 5  ;;  %v397_v58 = vld [vmem:[%s2189_s25 + $0xc] sm:$0x1] }
  0x24   : > { %1944 = vmatpush3.bf16.msra.mxu1 %v2212_v16  ;;  %1976 = vmatmul.mubr.msk.bf16.vlgmr.msra.gmra.mrb[0].mxu0 %vm212_vm1, %v1792_v24  ;;  %v989_v39 = vshll.u32 %v1789_v27, 16  ;;  %v2106_v16 = vld [vmem:[%s2189_s25 + $0x20] ss:$8 sps:$4 sm:$0xff]   ;;  %v959_v40 = vrot.slane %v958_v33, 4  ;;  %v977_v46 = vrot.slane %v975_v32, 5  ;;  %v414_v60 = vshrl.u32 %v394_v54, 16 }
  0x25   : > { %2082 = vmatprep.subr.msk.bf16.mxu1 %vm225_vm0, %v2248_v10  ;;  %1984 = vmatpush3.bf16.msra.mxu0 %v2209_v15  ;;  %v982_v41 = vrot.slane %v980_v35, 4  ;;  %v985_v42 = vrot.slane %v983_v36, 5  ;;  %v950_v43 = vsel %vm2229_vm4, %v945_v37, %v949_v20  ;;  %v972_v45 = vor.u32 %v971_v38, %v968_v34  ;;  %v2107_v15 = vld [vmem:[%s2189_s25 + $0x30] ss:$8 sps:$4 sm:$0xff]   ;;  %v399_v6 = vld [vmem:[%s2189_s25 + $0x14] sm:$0x1] }
  0x26   : > { %2087 = vmatprep.subr.msk.bf16.mxu0 %vm225_vm0, %v2260_v23  ;;  %1939 = vmatprep.mubr.msk.bf16.mxu1 %vm212_vm1, %v2106_v16  ;;  %v964_v47 = vsel %vm2229_vm4, %v959_v40, %v963_v30  ;;  %v991_v49 = vrot.slane %v989_v39, 5  ;;  %v417_v61 = vshll.u32 %v394_v54, 16  ;;  %v423_v62 = vshll.u32 %v395_v56, 16  ;;  %v398_v63 = vld [vmem:[%s2189_s25 + $0x10] sm:$0xf] }
  0x27   : > { %v986_v48 = vor.u32 %v985_v42, %v982_v41  ;;  %v1793_v50 = vcombine.low %v950_v43, %v964_v47  ;;  %v973_v51 = vrot.slane %v972_v45, 4  ;;  %v428_v2 = vshrl.u32 %v396_v57, 16  ;;  %v400_v11 = vld [vmem:[%s2189_s25 + $0x18] sm:$0xf]  ;;  %v401_v18 = vld [vmem:[%s2189_s25 + $0x1c] sm:$0x1] }
  0x28   : > { %v431_v4 = vshll.u32 %v396_v57, 16  ;;  %v437_v5 = vshll.u32 %v397_v58, 16  ;;  %v416_v7 = vrot.slane %v414_v60, 4  ;;  %v419_v8 = vrot.slane %v417_v61, 5  ;;  %v2109_v29 = vld [vmem:[%s2189_s25 + $0x18] ss:$8 sps:$4 sm:$0xff]  }
  0x29   : > { %v987_v52 = vrot.slane %v986_v48, 4  ;;  %1979 = vmatprep.mubr.msk.bf16.mxu0 %vm212_vm1, %v1793_v50  ;;  %v978_v55 = vsel %vm2229_vm4, %v973_v51, %v977_v46  ;;  %v425_v9 = vrot.slane %v423_v62, 5  ;;  %v442_v12 = vshrl.u32 %v398_v63, 16  ;;  %v2110_v37 = vld [vmem:[%s2189_s25 + $0x28] ss:$8 sps:$4 sm:$0xff]  }
  0x2a   : > { %v430_v13 = vrot.slane %v428_v2, 4  ;;  %v433_v14 = vrot.slane %v431_v4, 5  ;;  %v439_v17 = vrot.slane %v437_v5, 5  ;;  %v445_v19 = vshll.u32 %v398_v63, 16  ;;  %v402_v40 = vld [vmem:[%s2189_s25 + $0x20] sm:$0xf] }
  0x2b   : > { %1940 = vmatmul.mubr.msk.bf16.gmra.mrb[4].mxu1 %vm212_vm1, %v2107_v15  ;;  %v992_v59 = vsel %vm2229_vm4, %v987_v52, %v991_v49  ;;  %v420_v20 = vor.u32 %v419_v8, %v416_v7  ;;  %v444_v21 = vrot.slane %v442_v12, 4  ;;  %v451_v22 = vshll.u32 %v399_v6, 16  ;;  %v403_v45 = vld [vmem:[%s2189_s25 + $0x24] sm:$0x1]  ;;  %v404_v46 = vld [vmem:[%s2189_s25 + $0x28] sm:$0xf] }
  0x2c   : > { %v1794_v0 = vcombine.low %v978_v55, %v992_v59  ;;  %v456_v24 = vshrl.u32 %v400_v11, 16  ;;  %v434_v25 = vor.u32 %v433_v14, %v430_v13  ;;  %v447_v26 = vrot.slane %v445_v19, 5  ;;  %v405_v48 = vld [vmem:[%s2189_s25 + $0x2c] sm:$0x1]  ;;  %v406_v55 = vld [vmem:[%s2189_s25 + $0x30] sm:$0xf] }
  0x2d   : > { %v459_v27 = vshll.u32 %v400_v11, 16  ;;  %v465_v28 = vshll.u32 %v401_v18, 16  ;;  %v1258_v30 = vsel %vm225_vm0, %v2260_v23, 0  ;;  %v421_v31 = vrot.slane %v420_v20, 4  ;;  %v2307_v23 = vld [vmem:[%s2430_s1 + $0x10] sm:$0x3] }
  0x2e   : > { %1980 = vmatmul.mubr.msk.bf16.gmra.mrb[4].mxu0 %vm212_vm1, %v1794_v0  ;;  %v453_v32 = vrot.slane %v451_v22, 5  ;;  %v458_v33 = vrot.slane %v456_v24, 4  ;;  %v435_v34 = vrot.slane %v434_v25, 4  ;;  %v448_v35 = vor.u32 %v447_v26, %v444_v21  ;;  %v407_v60 = vld [vmem:[%s2189_s25 + $0x34] sm:$0x1] }
  0x2f   : > { %1985 = vmatprep.mubr.msk.bf16.mxu0 %vm212_vm1, %v2108_v53  ;;  %v461_v36 = vrot.slane %v459_v27, 5  ;;  %v426_v38 = vsel %vm2229_vm4, %v421_v31, %v425_v9  ;;  %v467_v39 = vrot.slane %v465_v28, 5  ;;  %v671_v16 = vsel %vm225_vm0, %v2248_v10, 0  ;;  %v2111_v62 = vld [vmem:[%s2189_s25 + $0x38] ss:$8 sps:$4 sm:$0xff]  }
  0x30   : > { %v440_v41 = vsel %vm2229_vm4, %v435_v34, %v439_v17  ;;  %v449_v42 = vrot.slane %v448_v35, 4  ;;  %v470_v15 = vshrl.u32 %v402_v40, 16  ;;  %v473_v49 = vshll.u32 %v402_v40, 16  ;;  %v408_v0 = vld [vmem:[%s2189_s25 + $0x38] sm:$0xf] }
  0x31   : > { %v462_v43 = vor.u32 %v461_v36, %v458_v33  ;;  %v1732_v47 = vcombine.low %v426_v38, %v440_v41  ;;  %v479_v10 = vshll.u32 %v403_v45, 16  ;;  %v484_v50 = vshrl.u32 %v404_v46, 16  ;;  %v409_v2 = vld [vmem:[%s2189_s25 + $0x3c] sm:$0x1]  ;;  %v2112_v14 = vld [vmem:[%s2189_s25 + $0x50] ss:$8 sps:$4 sm:$0xff]  }
  0x32   : > { %v454_v51 = vsel %vm2229_vm4, %v449_v42, %v453_v32  ;;  %v472_v53 = vrot.slane %v470_v15, 4  ;;  %v487_v54 = vshll.u32 %v404_v46, 16  ;;  %v475_v56 = vrot.slane %v473_v49, 5  ;;  %v2113_v35 = vld [vmem:[%s2189_s25 + $0x60] ss:$8 sps:$4 sm:$0xff]  }
  0x33   : > { %v463_v52 = vrot.slane %v462_v43, 4  ;;  %1945 = vmatprep.mubr.msk.bf16.mxu1 %vm212_vm1, %v1732_v47  ;;  %v481_v57 = vrot.slane %v479_v10, 5  ;;  %v486_v58 = vrot.slane %v484_v50, 4  ;;  %v493_v59 = vshll.u32 %v405_v48, 16  ;;  %v1834_v40 = vld [vmem:[%s2189_s25 + $0xc] sm:$0x1] }
  0x34   : > { %v489_v63 = vrot.slane %v487_v54, 5  ;;  %v498_v4 = vshrl.u32 %v406_v55, 16  ;;  %v476_v6 = vor.u32 %v475_v56, %v472_v53  ;;  %v501_v8 = vshll.u32 %v406_v55, 16  ;;  %v1835_v41 = vld [vmem:[%s2189_s25 + $0x10] sm:$0xf] }
  0x35   : > { %v468_v61 = vsel %vm2229_vm4, %v463_v52, %v467_v39  ;;  %v495_v7 = vrot.slane %v493_v59, 5  ;;  %v507_v12 = vshll.u32 %v407_v60, 16  ;;  %v512_v13 = vshrl.u32 %v408_v0, 16  ;;  %v2116_v39 = vld [vmem:[%s2189_s25 + $0x70] ss:$8 sps:$4 sm:$0xff]  }
  0x36   : > { %1986 = vmatmul.mubr.msk.bf16.vlgmr.msra.gmra.mrb[0].mxu0 %vm212_vm1, %v2109_v29  ;;  %v1733_v5 = vcombine.low %v454_v51, %v468_v61  ;;  %v490_v9 = vor.u32 %v489_v63, %v486_v58  ;;  %v500_v11 = vrot.slane %v498_v4, 4  ;;  %v477_v17 = vrot.slane %v476_v6, 4  ;;  %v1836_v42 = vld [vmem:[%s2189_s25 + $0x14] sm:$0x1]  ;;  %v1837_v48 = vld [vmem:[%s2189_s25 + $0x18] sm:$0xf] }
  0x37   : > { %1994 = vmatpush3.bf16.msra.mxu0 %v1258_v30  ;;  %1989 = vmatprep.mubr.msk.bf16.mxu0 %vm212_vm1, %v2110_v37  ;;  %v503_v18 = vrot.slane %v501_v8, 5  ;;  %v515_v19 = vshll.u32 %v408_v0, 16  ;;  %v521_v20 = vshll.u32 %v409_v2, 16  ;;  %v514_v22 = vrot.slane %v512_v13, 4  ;;  %v2114_v37 = vld [vmem:[%s2189_s25 + $0x90] ss:$8 sps:$4 sm:$0xff]  }
  0x38   : > { %2088 = vmatprep.subr.msk.bf16.mxu0 %vm225_vm0, %v2307_v23  ;;  %1946 = vmatmul.mubr.msk.bf16.vlgmr.msra.gmra.mrb[0].mxu1 %vm212_vm1, %v1733_v5  ;;  %v491_v21 = vrot.slane %v490_v9, 4  ;;  %v482_v24 = vsel %vm2229_vm4, %v477_v17, %v481_v57  ;;  %v509_v26 = vrot.slane %v507_v12, 5  ;;  %v1488_v34 = vsel %vm225_vm0, %v2307_v23, 0  ;;  %v1838_v50 = vld [vmem:[%s2189_s25 + $0x1c] sm:$0x1] }
  0x39   : > { %1954 = vmatpush3.bf16.msra.mxu1 %v671_v16  ;;  %v504_v25 = vor.u32 %v503_v18, %v500_v11  ;;  %v517_v27 = vrot.slane %v515_v19, 5  ;;  %v523_v32 = vrot.slane %v521_v20, 5  ;;  %v1833_v16 = vld [vmem:[%s2189_s25 + $0x8] sm:$0xf]  ;;  %v1359_v23 = vshll.u32 %v1834_v40, 16 }
  0x3a   : > { %2084 = vmatprep.subr.msk.bf16.mxu1 %vm225_vm0, %v2164_v1  ;;  %v496_v28 = vsel %vm2229_vm4, %v491_v21, %v495_v7  ;;  %v1350_v43 = vshrl.u32 %v1833_v16, 16  ;;  %v1353_v45 = vshll.u32 %v1833_v16, 16  ;;  %v1364_v46 = vshrl.u32 %v1835_v41, 16  ;;  %v1839_v51 = vld [vmem:[%s2189_s25 + $0x20] sm:$0xf] }
  0x3b   : > { %v1734_v29 = vcombine.low %v482_v24, %v496_v28  ;;  %v505_v30 = vrot.slane %v504_v25, 4  ;;  %v518_v31 = vor.u32 %v517_v27, %v514_v22  ;;  %v1367_v15 = vshll.u32 %v1835_v41, 16  ;;  %v2115_v52 = vld [vmem:[%s2189_s25 + $0xa0] ss:$8 sps:$4 sm:$0xff]   ;;  %v1840_v58 = vld [vmem:[%s2189_s25 + $0x24] sm:$0x1] }
  0x3c   : > { %v1373_v47 = vshll.u32 %v1836_v42, 16  ;;  %v1352_v49 = vrot.slane %v1350_v43, 4  ;;  %v1355_v10 = vrot.slane %v1353_v45, 5  ;;  %v2117_v53 = vld [vmem:[%s2189_s25 + $0x80] ss:$8 sps:$4 sm:$0xff]   ;;  %v1361_v54 = vrot.slane %v1359_v23, 5 }
  0x3d   : > { %1949 = vmatprep.mubr.msk.bf16.mxu1 %vm212_vm1, %v1734_v29  ;;  %v510_v1 = vsel %vm2229_vm4, %v505_v30, %v509_v26  ;;  %v519_v33 = vrot.slane %v518_v31, 4  ;;  %v1366_v55 = vrot.slane %v1364_v46, 4  ;;  %v1369_v56 = vrot.slane %v1367_v15, 5  ;;  %v2118_v5 = vld [vmem:[%s2189_s25 + $0xb0] ss:$8 sps:$4 sm:$0xff]  }
  0x3e   : > { %1990 = vmatmul.mubr.msk.bf16.gmra.mrb[4].mxu0 %vm212_vm1, %v2111_v62  ;;  %v1375_v57 = vrot.slane %v1373_v47, 5  ;;  %v1356_v59 = vor.u32 %v1355_v10, %v1352_v49  ;;  %v1378_v60 = vshrl.u32 %v1837_v48, 16  ;;  %v1381_v61 = vshll.u32 %v1837_v48, 16  ;;  %v1841_v17 = vld [vmem:[%s2189_s25 + $0x28] sm:$0xf] }
  0x3f   : > { %1995 = vmatprep.mubr.msk.bf16.mxu0 %vm212_vm1, %v2112_v14  ;;  %v524_v36 = vsel %vm2229_vm4, %v519_v33, %v523_v32  ;;  %v1387_v62 = vshll.u32 %v1838_v50, 16  ;;  %v1370_v63 = vor.u32 %v1369_v56, %v1366_v55  ;;  %v1392_v0 = vshrl.u32 %v1839_v51, 16  ;;  %v1842_v20 = vld [vmem:[%s2189_s25 + $0x2c] sm:$0x1]  ;;  %v1843_v21 = vld [vmem:[%s2189_s25 + $0x30] sm:$0xf] }
  0x40   : > { %v1735_v38 = vcombine.low %v510_v1, %v524_v36  ;;  %v1395_v2 = vshll.u32 %v1839_v51, 16  ;;  %v1401_v4 = vshll.u32 %v1840_v58, 16  ;;  %v1357_v6 = vrot.slane %v1356_v59, 4  ;;  %v1844_v22 = vld [vmem:[%s2189_s25 + $0x34] sm:$0x1] }
  0x41   : > { %v1380_v7 = vrot.slane %v1378_v60, 4  ;;  %v1383_v8 = vrot.slane %v1381_v61, 5  ;;  %v1389_v9 = vrot.slane %v1387_v62, 5  ;;  %v1371_v11 = vrot.slane %v1370_v63, 4  ;;  %v2119_v32 = vld [vmem:[%s2189_s25 + $0xc0] ss:$8 sps:$4 sm:$0xff]  }
  0x42   : > { %1950 = vmatmul.mubr.msk.bf16.gmra.mrb[4].mxu1 %vm212_vm1, %v1735_v38  ;;  %v1394_v12 = vrot.slane %v1392_v0, 4  ;;  %v1397_v13 = vrot.slane %v1395_v2, 5  ;;  %v1403_v14 = vrot.slane %v1401_v4, 5  ;;  %v1362_v18 = vsel %vm2229_vm4, %v1357_v6, %v1361_v54  ;;  %v1845_v36 = vld [vmem:[%s2189_s25 + $0x38] sm:$0xf] }
  0x43   : > { %1955 = vmatprep.mubr.msk.bf16.mxu1 %vm212_vm1, %v2114_v37  ;;  %v1384_v19 = vor.u32 %v1383_v8, %v1380_v7  ;;  %v1376_v24 = vsel %vm2229_vm4, %v1371_v11, %v1375_v57  ;;  %v1406_v26 = vshrl.u32 %v1841_v17, 16  ;;  %v1409_v27 = vshll.u32 %v1841_v17, 16  ;;  %v1846_v16 = vld [vmem:[%s2189_s25 + $0x3c] sm:$0x1]  ;;  %v1847_v43 = vld [vmem:[%s2189_s25 + $0x40] sm:$0xf] }
  0x44   : > { %v1398_v25 = vor.u32 %v1397_v13, %v1394_v12  ;;  %v1850_v28 = vcombine.low %v1362_v18, %v1376_v24  ;;  %v1415_v30 = vshll.u32 %v1842_v20, 16  ;;  %v1420_v31 = vshrl.u32 %v1843_v21, 16  ;;  %v1848_v45 = vld [vmem:[%s2189_s25 + $0x44] sm:$0x1]  ;;  %v2120_v15 = vld [vmem:[%s2189_s25 + $0xf8] ss:$8 sps:$4 sm:$0xff]  }
  0x45   : > { %v1385_v29 = vrot.slane %v1384_v19, 4  ;;  %v1408_v33 = vrot.slane %v1406_v26, 4  ;;  %v1434_v23 = vshrl.u32 %v1845_v36, 16  ;;  %v1437_v48 = vshll.u32 %v1845_v36, 16  ;;  %v2121_v8 = vld [vmem:[%s2189_s25 + $0x108] ss:$8 sps:$4 sm:$0xff]  }
  0x46   : > { %1996 = vmatmul.mubr.msk.bf16.vlgmr.msra.gmra.mrb[0].mxu0 %vm212_vm1, %v2113_v35  ;;  %v1399_v1 = vrot.slane %v1398_v25, 4  ;;  %v1423_v35 = vshll.u32 %v1843_v21, 16  ;;  %v1417_v37 = vrot.slane %v1415_v30, 5  ;;  %v1422_v38 = vrot.slane %v1420_v31, 4  ;;  %v1858_v18 = vld [vmem:[%s2431_s2] ss:$0 sm:$0xff] }
  0x47   : > { %2004 = vmatpush3.bf16.msra.mxu0 %v1488_v34  ;;  %1999 = vmatprep.mubr.msk.bf16.mxu0 %vm212_vm1, %v2116_v39  ;;  %v1411_v34 = vrot.slane %v1409_v27, 5  ;;  %v1429_v39 = vshll.u32 %v1844_v22, 16  ;;  %v1443_v49 = vshll.u32 %v1846_v16, 16  ;;  %v1436_v51 = vrot.slane %v1434_v23, 4 }
  0x48   : > { %v1404_v40 = vsel %vm2229_vm4, %v1399_v1, %v1403_v14  ;;  %v1425_v42 = vrot.slane %v1423_v35, 5  ;;  %v1451_v54 = vshll.u32 %v1847_v43, 16  ;;  %v1457_v55 = vshll.u32 %v1848_v45, 16 }
  0x49   : > { %v1412_v41 = vor.u32 %v1411_v34, %v1408_v33  ;;  %v1431_v47 = vrot.slane %v1429_v39, 5  ;;  %v1445_v60 = vrot.slane %v1443_v49, 5 }
  0x4a   : > { %1956 = vmatmul.mubr.msk.bf16.vlgmr.msra.gmra.mrb[0].mxu1 %vm212_vm1, %v2115_v52  ;;  %v1426_v50 = vor.u32 %v1425_v42, %v1422_v38  ;;  %v1448_v52 = vshrl.u32 %v1847_v43, 16  ;;  %v1453_v61 = vrot.slane %v1451_v54, 5  ;;  %v1459_v4 = vrot.slane %v1457_v55, 5 }
  0x4b   : > { %2014 = vmatpush3.bf16.msra.mxu1 %v2172_v3  ;;  %1959 = vmatprep.mubr.msk.bf16.mxu1 %vm212_vm1, %v2118_v5  ;;  %v1390_v3 = vsel %vm2229_vm4, %v1385_v29, %v1389_v9  ;;  %v1413_v10 = vrot.slane %v1412_v41, 4 }
  0x4c   : > { %v1851_v46 = vcombine.low %v1390_v3, %v1404_v40  ;;  %v1427_v57 = vrot.slane %v1426_v50, 4  ;;  %v1450_v58 = vrot.slane %v1448_v52, 4 }
  0x4d   : > { %v1418_v56 = vsel %vm2229_vm4, %v1413_v10, %v1417_v37 }
  0x4e   : > { %2000 = vmatmul.mubr.msk.bf16.gmra.mrb[4].mxu0 %vm212_vm1, %v2117_v53  ;;  %v1439_v53 = vrot.slane %v1437_v48, 5  ;;  %v1432_v62 = vsel %vm2229_vm4, %v1427_v57, %v1431_v47  ;;  %v1454_v2 = vor.u32 %v1453_v61, %v1450_v58 }
  0x4f   : > { %2005 = vmatprep.mubr.msk.bf16.mxu0 %vm212_vm1, %v1850_v28  ;;  %v1852_v63 = vcombine.low %v1418_v56, %v1432_v62 }
  0x50   : > { %v1440_v59 = vor.u32 %v1439_v53, %v1436_v51  ;;  %v1455_v6 = vrot.slane %v1454_v2, 4 }
  0x52   : > { %1960 = vmatmul.mubr.msk.bf16.gmra.mrb[4].mxu1 %vm212_vm1, %v2119_v32  ;;  %v1441_v0 = vrot.slane %v1440_v59, 4  ;;  %v1460_v7 = vsel %vm2229_vm4, %v1455_v6, %v1459_v4 }
  0x53   : > { %1969 = vmatprep.mubr.msk.bf16.mxu1 %vm212_vm1, %v2120_v15 }
  0x54   : > { %v1446_v5 = vsel %vm2229_vm4, %v1441_v0, %v1445_v60 }
  0x55   : > { %v1853_v9 = vcombine.low %v1446_v5, %v1460_v7 }
  0x56   : > { %2006 = vmatmul.mubr.msk.bf16.vlgmr.msra.gmra.mrb[0].mxu0 %vm212_vm1, %v1851_v46 }
  0x57   : > { %2009 = vmatprep.mubr.msk.bf16.mxu0 %vm212_vm1, %v1852_v63 }
  0x5e   : > { %2010 = vmatmul.mubr.msk.bf16.gmra.mrb[4].mxu0 %vm212_vm1, %v1853_v9  ;;  %1970 = vmatmul.mubr.msk.bf16.vlgmr.msra.gmra.mrb[4].mxu1 %vm212_vm1, %v2121_v8 }
 0x11d   : > { %v1957_v11 = vpop.f32.mrb[0].mxu1 }
 0x11e   : > { %v707_v12 = vpop.f32.mrb[1].mxu1 }
 0x11f   : > { %v1958_v13 = vpop.f32.mrb[2].mxu1 }
 0x120   : > { %v710_v14 = vpop.f32.mrb[3].mxu1 }
 0x129   : > { %v2007_v17 = vpop.f32.mrb[0].mxu0 }
 0x12a   : > { %v2015_v19 = vadd.f32 %v2007_v17, %v1957_v11  ;;  %v1524_v20 = vpop.f32.mrb[1].mxu0 }
 0x12b   : > { %v2016_v44 = vadd.f32 %v1524_v20, %v707_v12  ;;  %v2008_v21 = vpop.f32.mrb[2].mxu0 }
 0x12c   : > { %v1572_v22 = vadd.f32 %v2015_v19, %v1858_v18  ;;  %v2017_v24 = vadd.f32 %v2008_v21, %v1958_v13  ;;  %v1527_v25 = vpop.f32.mrb[3].mxu0 }
 0x12d   : > { %v1570_v26 = vadd.f32 %v2016_v44, %v1858_v18  ;;  %v2018_v27 = vadd.f32 %v1527_v25, %v710_v14 }
 0x12e   : > { %vm1580_vm5 = vcmp.ge.f32.partialorder %v1572_v22, 0.0  ;;  %v1588_v28 = vmul.f32 0.01, %v1572_v22  ;;  %v1573_v29 = vadd.f32 %v2017_v24, %v1858_v18 }
 0x12f   : > { %vm1578_vm6 = vcmp.ge.f32.partialorder %v1570_v26, 0.0  ;;  %v1586_v30 = vmul.f32 0.01, %v1570_v26  ;;  %v1571_v31 = vadd.f32 %v2018_v27, %v1858_v18 }
 0x130   : > { %v1596_v32 = vsel %vm1580_vm5, %v1572_v22, %v1588_v28  ;;  %vm1581_vm8 = vcmp.ge.f32.partialorder %v1573_v29, 0.0  ;;  %v1589_v1 = vmul.f32 0.01, %v1573_v29 }
 0x131   : > { %v1872_v33 = vpack.c.bf16 %v1596_v32, %v1596_v32  ;;  %v1594_v34 = vsel %vm1578_vm6, %v1570_v26, %v1586_v30  ;;  %vm1579_vm9 = vcmp.ge.f32.partialorder %v1571_v31, 0.0  ;;  %v1587_v35 = vmul.f32 0.01, %v1571_v31  ;;  %v2011_v39 = vpop.f32.mrb[4].mxu0  ;;  %v1971_v41 = vpop.f32.mrb[4].mxu1 }
 0x132   : > { %v1870_v36 = vpack.c.bf16 %v1594_v34, %v1594_v34  ;;  %v1597_v3 = vsel %vm1581_vm8, %v1573_v29, %v1589_v1  ;;  %v1540_v40 = vpop.f32.mrb[5].mxu0  ;;  %v2019_v43 = vadd.f32 %v2011_v39, %v1971_v41  ;;  %v842_v45 = vpop.f32.mrb[5].mxu1 }
 0x133   : > { %1637 = vst.msk [vmem:[%s2408_s16 + $0x8] sm:$0xf] %vm1634_vm7, %v1872_v33  ;;  %v1873_v37 = vpack.c.bf16 %v1597_v3, %v1597_v3  ;;  %v1595_v38 = vsel %vm1579_vm9, %v1571_v31, %v1587_v35  ;;  %v2012_v42 = vpop.f32.mrb[6].mxu0  ;;  %v2020_v46 = vadd.f32 %v1540_v40, %v842_v45  ;;  %v1972_v15 = vpop.f32.mrb[6].mxu1 }
 0x134   : > { %1635 = vst.msk [vmem:[%s2408_s16] sm:$0xf] %vm1634_vm7, %v1870_v36  ;;  %v1871_v16 = vpack.c.bf16 %v1595_v38, %v1595_v38  ;;  %v1543_v23 = vpop.f32.mrb[7].mxu0  ;;  %v1576_v47 = vadd.f32 %v2019_v43, %v1858_v18  ;;  %v2021_v48 = vadd.f32 %v2012_v42, %v1972_v15  ;;  %v845_v49 = vpop.f32.mrb[7].mxu1 }
 0x135   : > { %1638 = vst.msk [vmem:[%s2408_s16 + $0xc] sm:$0xf] %vm1634_vm7, %v1873_v37  ;;  %v1574_v10 = vadd.f32 %v2020_v46, %v1858_v18  ;;  %v2022_v50 = vadd.f32 %v1543_v23, %v845_v49 }
 0x136   : > { %1636 = vst.msk [vmem:[%s2408_s16 + $0x4] sm:$0xf] %vm1634_vm7, %v1871_v16  ;;  %vm1584_vm10 = vcmp.ge.f32.partialorder %v1576_v47, 0.0  ;;  %v1592_v51 = vmul.f32 0.01, %v1576_v47  ;;  %v1577_v52 = vadd.f32 %v2021_v48, %v1858_v18 }
 0x137   : > { %vm1582_vm11 = vcmp.ge.f32.partialorder %v1574_v10, 0.0  ;;  %v1590_v53 = vmul.f32 0.01, %v1574_v10  ;;  %v1575_v54 = vadd.f32 %v2022_v50, %v1858_v18 }
 0x138   : > { %v1600_v55 = vsel %vm1584_vm10, %v1576_v47, %v1592_v51  ;;  %vm1585_vm12 = vcmp.ge.f32.partialorder %v1577_v52, 0.0  ;;  %v1593_v56 = vmul.f32 0.01, %v1577_v52 }
 0x139   : > { %v1876_v57 = vpack.c.bf16 %v1600_v55, %v1600_v55  ;;  %v1598_v58 = vsel %vm1582_vm11, %v1574_v10, %v1590_v53  ;;  %vm1583_vm13 = vcmp.ge.f32.partialorder %v1575_v54, 0.0  ;;  %v1591_v59 = vmul.f32 0.01, %v1575_v54 }
 0x13a   : > { %v1874_v60 = vpack.c.bf16 %v1598_v58, %v1598_v58  ;;  %v1601_v61 = vsel %vm1585_vm12, %v1577_v52, %v1593_v56 }
 0x13b   : > { %1641 = vst.msk [vmem:[%s2408_s16 + $0x18] sm:$0xf] %vm1634_vm7, %v1876_v57  ;;  %v1877_v62 = vpack.c.bf16 %v1601_v61, %v1601_v61  ;;  %v1599_v63 = vsel %vm1583_vm13, %v1575_v54, %v1591_v59 }
 0x13c   : > { %1639 = vst.msk [vmem:[%s2408_s16 + $0x10] sm:$0xf] %vm1634_vm7, %v1874_v60  ;;  %v1875_v0 = vpack.c.bf16 %v1599_v63, %v1599_v63 }
 0x13d   : > { %1642 = vst.msk [vmem:[%s2408_s16 + $0x1c] sm:$0xf] %vm1634_vm7, %v1877_v62 }
 0x13e   : > { %1640 = vst.msk [vmem:[%s2408_s16 + $0x14] sm:$0xf] %vm1634_vm7, %v1875_v0 }
 0x13f PF: > { %s13_s12 = sadd.s32 1, %s2128_s12  }
 0x140   : > { %p10_p4 = scmp.ge.s32.totalorder %s13_s12, 4  }
 0x142   :  { %12 = sbr.rel (!%p10_p4) target bundleno = 1 (0x1), region = 75 }

// kernel: improved_cnn_forward.13
= control target key start
LH: loop header
LB: loop body
LE: loop exit
PB: predicated region body
PF: predicated region fallthrough
CT: control target
= control target key end

     0   :  { %s1616_s12 = smov 0   ;;  %s1825_s0 = inlined_call_operand.vmem [shape: bf16[2,20,5,32], index: 0, kind: input, shape index: {}]   ;;  %s1826_s1 = inlined_call_operand.vmem [shape: bf16[9,32,64], index: 1, kind: input, shape index: {}]   ;;  %s1827_s2 = inlined_call_operand.vmem [shape: f32[1,64], index: 2, kind: input, shape index: {}]   ;;  %s1828_s3 = inlined_call_operand.vmem [shape: bf16[2,16,64], index: 3, kind: output, shape index: {}]  }
   0x1 LB: > { %s1317_s13 = sadd.s32 4294967295, %s1591_s12   ;;  %p1321_p0 = scmp.ge.s32.totalorder %s1591_s12, 1  ;;  %s1591_s12 = sphi %s1616_s12, %s13_s12  }
   0x2   : > { %p137_p1 = scmp.lt.s32.totalorder %s1591_s12, 3 }
   0x4   : > { %p138_p2 = pnand %p1321_p0, %p137_p1 }
   0x5   : > { %v1543_v0 = vld [vmem:[%s1826_s1 + $0x10] sm:$0xff] (!%p138_p2)   ;;  %v1593_v1 = vmov (!%p138_p2), 0.0   ;;  %v1544_v2 = vld [vmem:[%s1826_s1] sm:$0xff] (!%p138_p2)   ;;  %v199_v3 = vlaneseq (!%p138_p2)  ;;  %v1545_v4 = vld [vmem:[%s1826_s1 + $0x18] sm:$0xff] (!%p138_p2)   ;;  %vm1594_vm0 = vmmov (!%p138_p2), 0   ;;  %p161_p3 = scmp.lt.s32.totalorder (!%p138_p2), %s1317_s13, 1 }
   0x6   : > { %141 = sbr.rel (%p138_p2) target bundleno = 292 (0x124), region = 32  ;;  %1459 = vmatprep.subr.bf16.mxu0 (!%p138_p2), %v1593_v1  ;;  %1467 = vmatprep.subr.bf16.mxu1 (!%p138_p2), %v1593_v1  ;;  %v1546_v5 = vld [vmem:[%s1826_s1 + $0x8] sm:$0xff] (!%p138_p2)   ;;  %v1595_v6 = vmov (!%p138_p2), 1983009808   ;;  %vm223_vm1 = vcmask (!%p138_p2), 261120   ;;  %v1551_v13 = vld [vmem:[%s1826_s1 + $0x20] sm:$0xff] (!%p138_p2)  }
   0x7   : > { %1460 = vmatpush3.bf16.msra.mxu0 (!%p138_p2), %v1543_v0  ;;  %1463 = vmatprep.mubr.msk.bf16.mxu0 (!%p138_p2), %vm1594_vm0, %v1593_v1  ;;  %v197_v7 = vunpack.c.l.s4 (!%p138_p2), %v1595_v6  ;;  %v200_v8 = vshrl.u32 (!%p138_p2), %v199_v3, 7  ;;  %vm385_vm2 = vsmask.f32 (!%p138_p2), 1280  ;;  %v1552_v16 = vld [vmem:[%s1826_s1 + $0x30] sm:$0xff] (!%p138_p2)   ;;  %vm386_vm3 = vsmask.f32 (!%p138_p2), 3336 }
   0x8   : > { %1468 = vmatpush3.bf16.msra.mxu1 (!%p138_p2), %v1544_v2  ;;  %1461 = vmatprep.subr.bf16.mxu0 (!%p138_p2), %v1593_v1  ;;  %v1553_v21 = vld [vmem:[%s1826_s1 + $0x28] sm:$0xff] (!%p138_p2)   ;;  %vm388_vm4 = vsmask.f32 (!%p138_p2), 5392  ;;  %vm1675_vm5 = vmor (!%p138_p2), %vm385_vm2, %vm386_vm3  ;;  %vm390_vm6 = vsmask.f32 (!%p138_p2), 7448  ;;  %v1554_v28 = vld [vmem:[%s1826_s1 + $0x38] sm:$0xff] (!%p138_p2)  }
   0x9   : > { %1469 = vmatprep.subr.bf16.mxu1 (!%p138_p2), %v1593_v1  ;;  %1471 = vmatprep.mubr.msk.bf16.mxu1 (!%p138_p2), %vm1594_vm0, %v1593_v1  ;;  %v198_v9 = vunpack.c.0.s8 (!%p138_p2), %v197_v7  ;;  %vm1689_vm7 = vmor (!%p138_p2), %vm1675_vm5, %vm388_vm4  ;;  %v1558_v62 = vld [vmem:[%s1826_s1 + $0x50] sm:$0xff] (!%p138_p2)   ;;  %vm1259_vm10 = vcmask (!%p138_p2), 519168  }
   0xa   : > { %vm1700_vm8 = vmor (!%p138_p2), %vm1689_vm7, %vm390_vm6 }
   0xb   : > { %1462 = vmatpush3.bf16.msra.mxu0 (!%p138_p2), %v1545_v4  ;;  %v1654_v10 = vsub.s32 (!%p138_p2), %v198_v9, %v200_v8  ;;  %v1560_v9 = vld [vmem:[%s1826_s1 + $0x58] sm:$0xff] (!%p138_p2)  }
   0xc   : > { %1470 = vmatpush3.bf16.msra.mxu1 (!%p138_p2), %v1546_v5  ;;  %1475 = vmatprep.subr.bf16.mxu0 (!%p138_p2), %v1593_v1 }
   0xd   : > { %s1836_s13 = smov (!%p161_p3, %s1317_s13), 1  ;;  %1483 = vmatprep.subr.bf16.mxu1 %v1593_v1 }
   0xe   : > { %s1531_s22 = smul.u32 80, %s1836_s13  ;;  %s1429_s4 = sshll.u32 %s1836_s13, 3 }
   0xf   : > { %s170_s7 = scalar_lea.vmem %s1828_s3, %s1429_s4 }
  0x10   : > { %s1651_s25 = scalar_lea.vmem %s1825_s0, %s1531_s22 }
  0x11   : > { %v1573_v11 = vld.sshfl [vmem:[%s1651_s25 + $0x14] sm:$0xf pattern:$0x76325410] }
  0x12   : > { %v1574_v12 = vld.sshfl [vmem:[%s1651_s25 + $0x1c] sm:$0xf pattern:$0x76325410] }
  0x13   : > { %v1575_v14 = vld.sshfl [vmem:[%s1651_s25] sm:$0xf pattern:$0x76325410]  ;;  %v210_v18 = vcombine.low %v1573_v11, %v1574_v12 }
  0x14   : > { %v1576_v15 = vld.sshfl [vmem:[%s1651_s25 + $0x8] sm:$0xf pattern:$0x76325410] }
  0x15   : > { %v1339_v17 = vld.sshfl [vmem:[%s1651_s25] sm:$0x13 pattern:$0x76325410]  ;;  %1464 = vmatmul.mubr.msk.bf16.vlgmr.msra.gmra.mrb[0].mxu0 %vm223_vm1, %v210_v18  ;;  %v288_v24 = vcombine.low %v1575_v14, %v1576_v15 }
  0x16   : > { %v1340_v19 = vld.sshfl [vmem:[%s1651_s25 + $0x4] sm:$0x13 pattern:$0x76325410]  ;;  %v360_v20 = vcombine.high %v1339_v17, %v1339_v17  ;;  %1476 = vmatpush3.bf16.msra.mxu0 %v1551_v13  ;;  %1479 = vmatprep.mubr.msk.bf16.mxu0 %vm1594_vm0, %v1593_v1  ;;  %v393_v30 = vshrl.u32 %v1339_v17, 16  ;;  %v396_v31 = vshll.u32 %v1339_v17, 16 }
  0x17   : > { %v1341_v22 = vld.sshfl [vmem:[%s1651_s25 + $0x8] sm:$0x13 pattern:$0x76325410]  ;;  %v368_v23 = vcombine.high %v1340_v19, %v1340_v19  ;;  %1472 = vmatmul.mubr.msk.bf16.vlgmr.msra.gmra.mrb[0].mxu1 %vm223_vm1, %v288_v24  ;;  %1477 = vmatprep.subr.bf16.mxu0 %v1593_v1  ;;  %v407_v33 = vshrl.u32 %v1340_v19, 16  ;;  %v410_v34 = vshll.u32 %v1340_v19, 16 }
  0x18   : > { %v1342_v25 = vld.sshfl [vmem:[%s1651_s25 + $0xc] sm:$0x13 pattern:$0x76325410]  ;;  %v376_v26 = vcombine.high %v1341_v22, %v1341_v22  ;;  %v402_v32 = vshll.u32 %v360_v20, 16  ;;  %v421_v36 = vshrl.u32 %v1341_v22, 16  ;;  %1484 = vmatpush3.bf16.msra.mxu1 %v1552_v16  ;;  %1487 = vmatprep.mubr.msk.bf16.mxu1 %vm1594_vm0, %v1593_v1 }
  0x19   : > { %v384_v29 = vcombine.high %v1342_v25, %v1342_v25  ;;  %v416_v35 = vshll.u32 %v368_v23, 16  ;;  %v395_v38 = vrot.slane %v393_v30, 6  ;;  %v398_v39 = vrot.slane %v396_v31, 7  ;;  %1485 = vmatprep.subr.bf16.mxu1 %v1593_v1  ;;  %v1555_v30 = vld [vmem:[%s1826_s1 + $0x40] sm:$0xff]  }
  0x1a   : > { %v404_v40 = vrot.slane %v402_v32, 7  ;;  %v424_v41 = vshll.u32 %v1341_v22, 16  ;;  %v409_v42 = vrot.slane %v407_v33, 6  ;;  %v412_v43 = vrot.slane %v410_v34, 7  ;;  %1478 = vmatpush3.bf16.msra.mxu0 %v1553_v21 }
  0x1b   : > { %v418_v44 = vrot.slane %v416_v35, 7  ;;  %v423_v45 = vrot.slane %v421_v36, 6  ;;  %v399_v46 = vor.u32 %v398_v39, %v395_v38  ;;  %v430_v48 = vshll.u32 %v376_v26, 16  ;;  %1491 = vmatprep.subr.bf16.mxu0 %v1593_v1  ;;  %v1559_v39 = vld [vmem:[%s1826_s1 + $0x48] sm:$0xff]  }
  0x1c   : > { %v426_v47 = vrot.slane %v424_v41, 7  ;;  %v435_v49 = vshrl.u32 %v1342_v25, 16  ;;  %v413_v51 = vor.u32 %v412_v43, %v409_v42  ;;  %v438_v52 = vshll.u32 %v1342_v25, 16  ;;  %1486 = vmatpush3.bf16.msra.mxu1 %v1554_v28 }
  0x1d   : > { %v444_v53 = vshll.u32 %v384_v29, 16  ;;  %v1577_v54 = vld.sshfl [vmem:[%s1651_s25 + $0x28] sm:$0xf pattern:$0x76325410]  ;;  %v400_v56 = vrot.slane %v399_v46, 2  ;;  %1499 = vmatprep.subr.bf16.mxu1 %v1593_v1 }
  0x1e   : > { %v1578_v55 = vld.sshfl [vmem:[%s1651_s25 + $0x30] sm:$0xf pattern:$0x76325410]  ;;  %v427_v57 = vor.u32 %v426_v47, %v423_v45  ;;  %v437_v58 = vrot.slane %v435_v49, 6  ;;  %v414_v59 = vrot.slane %v413_v51, 2 }
  0x1f   : > { %v432_v60 = vrot.slane %v430_v48, 7  ;;  %v440_v61 = vrot.slane %v438_v52, 7  ;;  %v405_v63 = vsel %vm1700_vm8, %v400_v56, %v404_v40  ;;  %v446_v2 = vrot.slane %v444_v53, 7 }
  0x20   : > { %v428_v0 = vrot.slane %v427_v57, 2  ;;  %v1714_v3 = vsel %vm1700_vm8, %v414_v59, %v418_v44  ;;  %v558_v6 = vcombine.low %v1577_v54, %v1578_v55  ;;  %v1725_v11 = vld.sshfl [vmem:[%s1651_s25 + $0x3c] sm:$0xf pattern:$0x76325410] }
  0x21   : > { %v441_v4 = vor.u32 %v440_v61, %v437_v58  ;;  %v453_v5 = vcombine.low %v405_v63, %v1714_v3  ;;  %v1728_v12 = vld.sshfl [vmem:[%s1651_s25 + $0x44] sm:$0xf pattern:$0x76325410] }
  0x22   : > { %v1719_v7 = vsel %vm1700_vm8, %v428_v0, %v432_v60  ;;  %1488 = vmatmul.mubr.msk.bf16.vlgmr.msra.gmra.mrb[4].mxu1 %vm223_vm1, %v558_v6  ;;  %v1376_v15 = vld.sshfl [vmem:[%s1651_s25 + $0x28] sm:$0x13 pattern:$0x76325410]  ;;  %v1563_v55 = vld [vmem:[%s1826_s1 + $0x60] sm:$0xff]   ;;  %v647_v61 = vcombine.low %v1725_v11, %v1728_v12 }
  0x23   : > { %v442_v8 = vrot.slane %v441_v4, 2  ;;  %v461_v14 = vrot.slane %v453_v5, %v1654_v10  ;;  %1500 = vmatpush3.bf16.msra.mxu1 %v1558_v62  ;;  %1503 = vmatprep.mubr.msk.bf16.mxu1 %vm1594_vm0, %v1593_v1  ;;  %v1377_v17 = vld.sshfl [vmem:[%s1651_s25 + $0x2c] sm:$0x13 pattern:$0x76325410]  ;;  %v721_v18 = vcombine.high %v1376_v15, %v1376_v15  ;;  %v747_v19 = vshrl.u32 %v1376_v15, 16 }
  0x24   : > { %1501 = vmatprep.subr.bf16.mxu1 %v1593_v1  ;;  %v750_v20 = vshll.u32 %v1376_v15, 16  ;;  %v1378_v21 = vld.sshfl [vmem:[%s1651_s25 + $0x30] sm:$0x13 pattern:$0x76325410]  ;;  %v729_v22 = vcombine.high %v1377_v17, %v1377_v17  ;;  %v761_v23 = vshrl.u32 %v1377_v17, 16 }
  0x25   : > { %v1733_v13 = vsel %vm1700_vm8, %v442_v8, %v446_v2  ;;  %v764_v24 = vshll.u32 %v1377_v17, 16  ;;  %v1379_v26 = vld.sshfl [vmem:[%s1651_s25 + $0x34] sm:$0x13 pattern:$0x76325410]  ;;  %v737_v27 = vcombine.high %v1378_v21, %v1378_v21  ;;  %v749_v28 = vrot.slane %v747_v19, 6 }
  0x26   : > { %v454_v16 = vcombine.low %v1719_v7, %v1733_v13  ;;  %v752_v29 = vrot.slane %v750_v20, 7  ;;  %v745_v31 = vcombine.high %v1379_v26, %v1379_v26  ;;  %v756_v32 = vshll.u32 %v721_v18, 16  ;;  %v1581_v60 = vld.sshfl [vmem:[%s1651_s25 + $0x4] sm:$0xf pattern:$0x76325410] }
  0x27   : > { %1502 = vmatpush3.bf16.msra.mxu1 %v1560_v9  ;;  %v763_v33 = vrot.slane %v761_v23, 6  ;;  %v766_v34 = vrot.slane %v764_v24, 7  ;;  %v770_v37 = vshll.u32 %v729_v22, 16  ;;  %v775_v38 = vshrl.u32 %v1378_v21, 16  ;;  %v1565_v11 = vld [vmem:[%s1826_s1 + $0x68] sm:$0xff]  }
  0x28   : > { %v468_v25 = vrot.slane %v454_v16, %v1654_v10  ;;  %v753_v36 = vor.u32 %v752_v29, %v749_v28  ;;  %1515 = vmatprep.subr.bf16.mxu1 %v1593_v1  ;;  %v758_v40 = vrot.slane %v756_v32, 7  ;;  %v778_v42 = vshll.u32 %v1378_v21, 16  ;;  %v1582_v62 = vld.sshfl [vmem:[%s1651_s25 + $0xc] sm:$0xf pattern:$0x76325410] }
  0x29   : > { %v767_v41 = vor.u32 %v766_v34, %v763_v33  ;;  %v784_v43 = vshll.u32 %v737_v27, 16  ;;  %v772_v45 = vrot.slane %v770_v37, 7  ;;  %v777_v46 = vrot.slane %v775_v38, 6  ;;  %v1566_v32 = vld [vmem:[%s1826_s1 + $0x78] sm:$0xff]   ;;  %v1572_v33 = vld [vmem:[%s1826_s1 + $0x88] sm:$0xff]  }
  0x2a   : > { %v469_v35 = vcombine.low %v461_v14, %v468_v25  ;;  %v754_v44 = vrot.slane %v753_v36, 2  ;;  %v789_v47 = vshrl.u32 %v1379_v26, 16  ;;  %v780_v49 = vrot.slane %v778_v42, 7  ;;  %v1564_v25 = vld [vmem:[%s1826_s1 + $0x70] sm:$0xff]  }
  0x2b   : > { %v768_v48 = vrot.slane %v767_v41, 2  ;;  %v786_v51 = vrot.slane %v784_v43, 7  ;;  %v792_v52 = vshll.u32 %v1379_v26, 16  ;;  %v798_v54 = vshll.u32 %v745_v31, 16  ;;  %v1569_v26 = vld [vmem:[%s1826_s1 + $0x80] sm:$0xff]  }
  0x2c   : > { %1480 = vmatmul.mubr.msk.bf16.vlgmr.msra.gmra.mrb[4].mxu0 %vm223_vm1, %v469_v35  ;;  %v791_v53 = vrot.slane %v789_v47, 6  ;;  %v759_v56 = vsel %vm1700_vm8, %v754_v44, %v758_v40  ;;  %v781_v58 = vor.u32 %v780_v49, %v777_v46  ;;  %v1416_v8 = vld.sshfl [vmem:[%s1651_s25 + $0x10] sm:$0x13 pattern:$0x76325410]  ;;  %v912_v21 = vcombine.low %v1581_v60, %v1582_v62 }
  0x2d   : > { %1492 = vmatpush3.bf16.msra.mxu0 %v1555_v30  ;;  %1495 = vmatprep.mubr.msk.bf16.mxu0 %vm1594_vm0, %v1593_v1  ;;  %v773_v57 = vsel %vm1700_vm8, %v768_v48, %v772_v45  ;;  %v794_v59 = vrot.slane %v792_v52, 7  ;;  %v800_v2 = vrot.slane %v798_v54, 7  ;;  %v1099_v12 = vcombine.high %v1416_v8, %v1416_v8  ;;  %v1583_v22 = vld.sshfl [vmem:[%s1651_s25 + $0x18] sm:$0xf pattern:$0x76325410] }
  0x2e   : > { %1493 = vmatprep.subr.bf16.mxu0 %v1593_v1  ;;  %v782_v63 = vrot.slane %v781_v58, 2  ;;  %v807_v4 = vcombine.low %v759_v56, %v773_v57  ;;  %v1143_v14 = vshrl.u32 %v1416_v8, 16  ;;  %v1146_v17 = vshll.u32 %v1416_v8, 16 }
  0x2f   : > { %v795_v0 = vor.u32 %v794_v59, %v791_v53  ;;  %v1152_v19 = vshll.u32 %v1099_v12, 16  ;;  %v1584_v23 = vld.sshfl [vmem:[%s1651_s25 + $0x20] sm:$0xf pattern:$0x76325410]  ;;  %v1161_v30 = vcombine.low %v1714_v3, %v1719_v7 }
  0x30   : > { %v787_v5 = vsel %vm1700_vm8, %v782_v63, %v786_v51  ;;  %v815_v16 = vrot.slane %v807_v4, %v1654_v10  ;;  %v1145_v18 = vrot.slane %v1143_v14, 6  ;;  %v1148_v24 = vrot.slane %v1146_v17, 7 }
  0x31   : > { %1494 = vmatpush3.bf16.msra.mxu0 %v1559_v39  ;;  %v796_v6 = vrot.slane %v795_v0, 2  ;;  %v1154_v29 = vrot.slane %v1152_v19, 7  ;;  %v1169_v34 = vrot.slane %v1161_v30, %v1654_v10  ;;  %v1001_v35 = vcombine.low %v1583_v22, %v1584_v23 }
  0x32   : > { %1507 = vmatprep.subr.bf16.mxu0 %v1593_v1  ;;  %v1149_v28 = vor.u32 %v1148_v24, %v1145_v18 }
  0x33   : > { %v801_v9 = vsel %vm1700_vm8, %v796_v6, %v800_v2 }
  0x34   : > { %1496 = vmatmul.mubr.msk.bf16.vlgmr.msra.gmra.mrb[8].mxu0 %vm223_vm1, %v647_v61  ;;  %v808_v15 = vcombine.low %v787_v5, %v801_v9  ;;  %v1150_v31 = vrot.slane %v1149_v28, 2 }
  0x35   : > { %1508 = vmatpush3.bf16.msra.mxu0 %v1563_v55  ;;  %1511 = vmatprep.mubr.msk.bf16.mxu0 %vm1594_vm0, %v1593_v1 }
  0x36   : > { %1509 = vmatprep.subr.bf16.mxu0 %v1593_v1  ;;  %v822_v20 = vrot.slane %v808_v15, %v1654_v10  ;;  %v1155_v3 = vsel %vm1700_vm8, %v1150_v31, %v1154_v29 }
  0x37   : > { %v1162_v7 = vcombine.low %v1733_v13, %v1155_v3 }
  0x38   : > { %v823_v27 = vcombine.low %v815_v16, %v822_v20 }
  0x39   : > { %1510 = vmatpush3.bf16.msra.mxu0 %v1565_v11  ;;  %v1176_v36 = vrot.slane %v1162_v7, %v1654_v10 }
  0x3a   : > { %1523 = vmatprep.subr.bf16.mxu0 %v1593_v1  ;;  %1504 = vmatmul.mubr.msk.bf16.vlgmr.msra.gmra.mrb[8].mxu1 %vm223_vm1, %v823_v27 }
  0x3b   : > { %1516 = vmatpush3.bf16.msra.mxu1 %v1564_v25  ;;  %1519 = vmatprep.mubr.msk.bf16.mxu1 %vm1594_vm0, %v1593_v1  ;;  %v1177_v37 = vcombine.low %v1169_v34, %v1176_v36 }
  0x3c   : > { %1512 = vmatmul.mubr.msk.bf16.vlgmr.msra.gmra.mrb[12].mxu0 %vm223_vm1, %v912_v21  ;;  %1517 = vmatprep.subr.bf16.mxu1 %v1593_v1  ;;  %v1424_v21 = vld [vmem:[%s1827_s2] ss:$0 sm:$0xff] }
  0x3d   : > { %1524 = vmatpush3.bf16.msra.mxu0 %v1569_v26  ;;  %1527 = vmatprep.mubr.msk.bf16.mxu0 %vm1594_vm0, %v1593_v1 }
  0x3e   : > { %1525 = vmatprep.subr.bf16.mxu0 %v1593_v1 }
  0x3f   : > { %1518 = vmatpush3.bf16.msra.mxu1 %v1566_v32 }
  0x41   : > { %1526 = vmatpush3.bf16.msra.mxu0 %v1572_v33 }
  0x42   : > { %1520 = vmatmul.mubr.msk.bf16.vlgmr.msra.gmra.mrb[12].mxu1 %vm223_vm1, %v1001_v35 }
  0x44   : > { %1528 = vmatmul.mubr.msk.bf16.vlgmr.msra.gmra.mrb[16].mxu0 %vm223_vm1, %v1177_v37 }
  0xe8   : > { %v261_v50 = vpop.f32.mrb[0].mxu0 }
  0xe9   : > { %v1465_v38 = vpop.f32.mrb[1].mxu0 }
  0xea   : > { %v338_v39 = vpop.f32.mrb[0].mxu1  ;;  %v264_v40 = vpop.f32.mrb[2].mxu0 }
  0xeb   : > { %v339_v41 = vadd.f32 %v338_v39, %v261_v50  ;;  %v1473_v1 = vpop.f32.mrb[1].mxu1  ;;  %v1466_v42 = vpop.f32.mrb[3].mxu0 }
  0xec   : > { %v341_v13 = vpop.f32.mrb[2].mxu1 }
  0xed   : > { %v342_v43 = vadd.f32 %v341_v13, %v264_v40  ;;  %v1474_v44 = vpop.f32.mrb[3].mxu1 }
  0xf5   : > { %v608_v45 = vpop.f32.mrb[4].mxu1 }
  0xf6   : > { %v1489_v46 = vpop.f32.mrb[5].mxu1 }
  0xf7   : > { %v611_v47 = vpop.f32.mrb[6].mxu1 }
  0xf8   : > { %v1490_v48 = vpop.f32.mrb[7].mxu1 }
  0xff   : > { %v519_v10 = vpop.f32.mrb[4].mxu0 }
 0x100   : > { %v526_v49 = vadd.f32 %v519_v10, %v339_v41  ;;  %v1481_v51 = vpop.f32.mrb[5].mxu0 }
 0x101   : > { %v522_v52 = vpop.f32.mrb[6].mxu0 }
 0x102   : > { %v527_v53 = vadd.f32 %v522_v52, %v342_v43  ;;  %v615_v54 = vadd.f32 %v608_v45, %v526_v49  ;;  %v1482_v55 = vpop.f32.mrb[7].mxu0 }
 0x104   : > { %v616_v56 = vadd.f32 %v611_v47, %v527_v53 }
 0x107   : > { %v697_v57 = vpop.f32.mrb[8].mxu0 }
 0x108   : > { %v704_v58 = vadd.f32 %v697_v57, %v615_v54  ;;  %v1497_v59 = vpop.f32.mrb[9].mxu0 }
 0x109   : > { %v700_v60 = vpop.f32.mrb[10].mxu0 }
 0x10a   : > { %v705_v61 = vadd.f32 %v700_v60, %v616_v56  ;;  %v1498_v62 = vpop.f32.mrb[11].mxu0 }
 0x10d   : > { %v873_v63 = vpop.f32.mrb[8].mxu1 }
 0x10e   : > { %v880_v2 = vadd.f32 %v873_v63, %v704_v58  ;;  %v1505_v4 = vpop.f32.mrb[9].mxu1 }
 0x10f   : > { %v962_v0 = vpop.f32.mrb[12].mxu0  ;;  %v876_v6 = vpop.f32.mrb[10].mxu1 }
 0x110   : > { %v1513_v5 = vpop.f32.mrb[13].mxu0  ;;  %v881_v9 = vadd.f32 %v876_v6, %v705_v61  ;;  %v1506_v11 = vpop.f32.mrb[11].mxu1  ;;  %v969_v12 = vadd.f32 %v962_v0, %v880_v2 }
 0x111   : > { %v965_v8 = vpop.f32.mrb[14].mxu0 }
 0x112   : > { %v1514_v14 = vpop.f32.mrb[15].mxu0  ;;  %v970_v15 = vadd.f32 %v965_v8, %v881_v9 }
 0x115   : > { %v1051_v16 = vpop.f32.mrb[12].mxu1 }
 0x116   : > { %v1058_v17 = vadd.f32 %v1051_v16, %v969_v12  ;;  %v1521_v18 = vpop.f32.mrb[13].mxu1 }
 0x117   : > { %v1227_v19 = vpop.f32.mrb[16].mxu0  ;;  %v1054_v20 = vpop.f32.mrb[14].mxu1 }
 0x118   : > { %v1529_v22 = vpop.f32.mrb[17].mxu0  ;;  %v1059_v23 = vadd.f32 %v1054_v20, %v970_v15  ;;  %v1522_v24 = vpop.f32.mrb[15].mxu1  ;;  %v1234_v25 = vadd.f32 %v1227_v19, %v1058_v17 }
 0x119   : > { %v1230_v26 = vpop.f32.mrb[18].mxu0 }
 0x11a   : > { %v1530_v27 = vpop.f32.mrb[19].mxu0  ;;  %v1243_v28 = vadd.f32 %v1424_v21, %v1234_v25  ;;  %v1235_v29 = vadd.f32 %v1230_v26, %v1059_v23 }
 0x11c   : > { %vm1245_vm9 = vcmp.ge.f32.partialorder %v1243_v28, 0.0  ;;  %v1247_v30 = vmul.f32 0.01, %v1243_v28  ;;  %v1244_v31 = vadd.f32 %v1424_v21, %v1235_v29 }
 0x11e   : > { %v1249_v32 = vsel %vm1245_vm9, %v1243_v28, %v1247_v30  ;;  %vm1246_vm11 = vcmp.ge.f32.partialorder %v1244_v31, 0.0  ;;  %v1248_v33 = vmul.f32 0.01, %v1244_v31 }
 0x11f   : > { %v1430_v3 = vpack.c.bf16 %v1249_v32, %v1249_v32 }
 0x120   : > { %v1250_v7 = vsel %vm1246_vm11, %v1244_v31, %v1248_v33 }
 0x121   : > { %1260 = vst.msk [vmem:[%s170_s7] sm:$0xf] %vm1259_vm10, %v1430_v3  ;;  %v1431_v34 = vpack.c.bf16 %v1250_v7, %v1250_v7 }
 0x123   : > { %1261 = vst.msk [vmem:[%s170_s7 + $0x4] sm:$0xf] %vm1259_vm10, %v1431_v34 }
 0x124 PF: > { %s13_s12 = sadd.s32 1, %s1591_s12  }
 0x125   : > { %p10_p4 = scmp.ge.s32.totalorder %s13_s12, 4  }
 0x127   :  { %12 = sbr.rel (!%p10_p4) target bundleno = 1 (0x1), region = 75 }

// kernel: improved_cnn_forward.12
= control target key start
LH: loop header
LB: loop body
LE: loop exit
PB: predicated region body
PF: predicated region fallthrough
CT: control target
= control target key end

     0   :  { %s407_s12 = smov 0   ;;  %s433_s0 = inlined_call_operand.vmem [shape: bf16[2,4,4,32], index: 0, kind: input, shape index: {}]   ;;  %s434_s1 = inlined_call_operand.vmem [shape: bf16[1,32,64], index: 1, kind: input, shape index: {}]   ;;  %s435_s2 = inlined_call_operand.vmem [shape: f32[1,64], index: 2, kind: input, shape index: {}]   ;;  %s436_s3 = inlined_call_operand.vmem [shape: bf16[2,16,64], index: 3, kind: output, shape index: {}]  }
   0x1 LB: > { %s331_s13 = sadd.s32 4294967295, %s382_s12   ;;  %p335_p0 = scmp.ge.s32.totalorder %s382_s12, 1  ;;  %s382_s12 = sphi %s407_s12, %s13_s12  }
   0x2   : > { %p137_p1 = scmp.lt.s32.totalorder %s382_s12, 3 }
   0x4   : > { %p138_p2 = pnand %p335_p0, %p137_p1 }
   0x5   : > { %v374_v0 = vld [vmem:[%s434_s1] sm:$0xff] (!%p138_p2)   ;;  %v196_v1 = vlaneseq (!%p138_p2)  ;;  %v384_v2 = vmov (!%p138_p2), 0.0   ;;  %v375_v3 = vld [vmem:[%s434_s1 + $0x8] sm:$0xff] (!%p138_p2)   ;;  %vm385_vm0 = vmmov (!%p138_p2), 0   ;;  %p161_p3 = scmp.lt.s32.totalorder (!%p138_p2), %s331_s13, 1  ;;  %vm220_vm1 = vcmask (!%p138_p2), 261120  }
   0x6   : > { %141 = sbr.rel (%p138_p2) target bundleno = 243 (0xf3), region = 32  ;;  %355 = vmatprep.subr.bf16.mxu0 (!%p138_p2), %v384_v2  ;;  %359 = vmatprep.mubr.msk.bf16.mxu0 (!%p138_p2), %vm385_vm0, %v384_v2  ;;  %v386_v4 = vmov (!%p138_p2), 1983009808   ;;  %v340_v18 = vld [vmem:[%s435_s2] ss:$0 sm:$0xff] (!%p138_p2)  ;;  %vm273_vm2 = vcmask (!%p138_p2), 519168  }
   0x7   : > { %356 = vmatpush3.bf16.msra.mxu0 (!%p138_p2), %v374_v0  ;;  %v194_v5 = vunpack.c.l.s4 (!%p138_p2), %v386_v4  ;;  %v197_v6 = vshrl.u32 (!%p138_p2), %v196_v1, 7 }
   0x8   : > { %357 = vmatprep.subr.bf16.mxu0 (!%p138_p2), %v384_v2 }
   0x9   : > { %v195_v7 = vunpack.c.0.s8 (!%p138_p2), %v194_v5 }
   0xb   : > { %358 = vmatpush3.bf16.msra.mxu0 (!%p138_p2), %v375_v3  ;;  %v198_v8 = vsub.s32 (!%p138_p2), %v195_v7, %v197_v6 }
   0xd   : > { %s438_s13 = smov (!%p161_p3, %s331_s13), 1 }
   0xe   : > { %s348_s18 = sshll.u32 %s438_s13, 3 }
   0xf   : > { %s165_s21 = scalar_lea.vmem %s433_s0, %s348_s18  ;;  %s170_s26 = scalar_lea.vmem %s436_s3, %s348_s18 }
  0x10   : > { %v172_v9 = vld [vmem:[%s165_s21] sm:$0x3]  ;;  %v173_v10 = vld [vmem:[%s165_s21 + $0x2] sm:$0x3]  ;;  %v174_v11 = vld [vmem:[%s165_s21 + $0x4] sm:$0x3] }
  0x11   : > { %v175_v12 = vld [vmem:[%s165_s21 + $0x6] sm:$0x3]  ;;  %v191_v13 = vcombine.low %v172_v9, %v173_v10 }
  0x12   : > { %v192_v14 = vcombine.low %v174_v11, %v175_v12 }
  0x13   : > { %v199_v15 = vrot.slane %v191_v13, %v198_v8 }
  0x14   : > { %v206_v16 = vrot.slane %v192_v14, %v198_v8 }
  0x16   : > { %v207_v17 = vcombine.low %v199_v15, %v206_v16 }
  0x18   : > { %360 = vmatmul.mubr.msk.bf16.vlgmr.msra.gmra.mrb[0].mxu0 %vm220_vm1, %v207_v17 }
  0xeb   : > { %v258_v19 = vpop.f32.mrb[0].mxu0 }
  0xec   : > { %v259_v20 = vadd.f32 %v340_v18, %v258_v19  ;;  %v361_v21 = vpop.f32.mrb[1].mxu0 }
  0xed   : > { %v261_v22 = vpop.f32.mrb[2].mxu0 }
  0xee   : > { %v350_v23 = vpack.c.bf16 %v259_v20, %v259_v20  ;;  %v262_v24 = vadd.f32 %v340_v18, %v261_v22  ;;  %v362_v25 = vpop.f32.mrb[3].mxu0 }
  0xf0   : > { %274 = vst.msk [vmem:[%s170_s26] sm:$0xf] %vm273_vm2, %v350_v23  ;;  %v351_v26 = vpack.c.bf16 %v262_v24, %v262_v24 }
  0xf2   : > { %275 = vst.msk [vmem:[%s170_s26 + $0x4] sm:$0xf] %vm273_vm2, %v351_v26 }
  0xf3 PF: > { %s13_s12 = sadd.s32 1, %s382_s12  }
  0xf4   : > { %p10_p4 = scmp.ge.s32.totalorder %s13_s12, 4  }
  0xf6   :  { %12 = sbr.rel (!%p10_p4) target bundleno = 1 (0x1), region = 62 }

// kernel: improved_cnn_forward.14
= control target key start
LH: loop header
LB: loop body
LE: loop exit
PB: predicated region body
PF: predicated region fallthrough
CT: control target
= control target key end

     0   :  { %s2038_s12 = smov 0   ;;  %s2354_s0 = inlined_call_operand.vmem [shape: bf16[2,6,6,64], index: 0, kind: input, shape index: {}]   ;;  %s2355_s1 = inlined_call_operand.vmem [shape: bf16[9,64,64], index: 1, kind: input, shape index: {}]   ;;  %s2356_s2 = inlined_call_operand.vmem [shape: f32[1,64], index: 2, kind: input, shape index: {}]   ;;  %s2357_s3 = inlined_call_operand.vmem [shape: bf16[2,16,64], index: 3, kind: output, shape index: {}]  }
   0x1 LB: > { %s1609_s13 = sadd.s32 4294967295, %s2013_s12   ;;  %p1613_p0 = scmp.ge.s32.totalorder %s2013_s12, 1  ;;  %s2013_s12 = sphi %s2038_s12, %s13_s12  }
   0x2   : > { %p137_p1 = scmp.lt.s32.totalorder %s2013_s12, 3 }
   0x4   : > { %p138_p2 = pnand %p1613_p0, %p137_p1 }
   0x5   : > { %v1959_v0 = vld [vmem:[%s2355_s1 + $0x20] sm:$0xff] (!%p138_p2)   ;;  %v2015_v1 = vmov (!%p138_p2), 0.0   ;;  %v1961_v3 = vld [vmem:[%s2355_s1 + $0x28] sm:$0xff] (!%p138_p2)   ;;  %vm2016_vm0 = vmmov (!%p138_p2), 0   ;;  %p161_p3 = scmp.lt.s32.totalorder (!%p138_p2), %s1609_s13, 1  ;;  %v1963_v5 = vld [vmem:[%s2355_s1 + $0x30] sm:$0xff] (!%p138_p2)   ;;  %v301_v23 = vlaneseq (!%p138_p2) }
   0x6   : > { %141 = sbr.rel (%p138_p2) target bundleno = 328 (0x148), region = 32  ;;  %1839 = vmatprep.subr.bf16.mxu0 (!%p138_p2), %v2015_v1  ;;  %1851 = vmatprep.subr.bf16.mxu1 (!%p138_p2), %v2015_v1  ;;  %v1960_v2 = vld [vmem:[%s2355_s1] sm:$0xff] (!%p138_p2)   ;;  %v1962_v4 = vld [vmem:[%s2355_s1 + $0x8] sm:$0xff] (!%p138_p2)   ;;  %v1964_v6 = vld [vmem:[%s2355_s1 + $0x10] sm:$0xff] (!%p138_p2)   ;;  %vm224_vm1 = vsmask.f32 (!%p138_p2), 1280 }
   0x7   : > { %1840 = vmatpush3.bf16.msra.mxu0 (!%p138_p2), %v1959_v0  ;;  %1847 = vmatprep.mubr.msk.bf16.mxu0 (!%p138_p2), %vm2016_vm0, %v2015_v1  ;;  %v1965_v7 = vld [vmem:[%s2355_s1 + $0x38] sm:$0xff] (!%p138_p2)   ;;  %vm225_vm2 = vsmask.f32 (!%p138_p2), 3336  ;;  %vm227_vm3 = vsmask.f32 (!%p138_p2), 5392  ;;  %v302_v45 = vshrl.u32 (!%p138_p2), %v301_v23, 7 }
   0x8   : > { %1852 = vmatpush3.bf16.msra.mxu1 (!%p138_p2), %v1960_v2  ;;  %1841 = vmatprep.subr.bf16.mxu0 (!%p138_p2), %v2015_v1  ;;  %v1966_v8 = vld [vmem:[%s2355_s1 + $0x18] sm:$0xff] (!%p138_p2)   ;;  %vm229_vm4 = vsmask.f32 (!%p138_p2), 7448  ;;  %vm2090_vm5 = vmor (!%p138_p2), %vm224_vm1, %vm225_vm2  ;;  %v2017_v52 = vmov (!%p138_p2), 1983009808   ;;  %vm511_vm8 = vcmask (!%p138_p2), 1040384  }
   0x9   : > { %1853 = vmatprep.subr.bf16.mxu1 (!%p138_p2), %v2015_v1  ;;  %1859 = vmatprep.mubr.msk.bf16.mxu1 (!%p138_p2), %vm2016_vm0, %v2015_v1  ;;  %vm2101_vm6 = vmor (!%p138_p2), %vm2090_vm5, %vm227_vm3  ;;  %v299_v53 = vunpack.c.l.s4 (!%p138_p2), %v2017_v52  ;;  %vm512_vm9 = vcmask (!%p138_p2), 1042434   ;;  %vm337_vm10 = vcmask (!%p138_p2), 523264   ;;  %vm514_vm12 = vcmask (!%p138_p2), 1044484   ;;  %v1972_v12 = vld [vmem:[%s2355_s1 + $0x68] sm:$0xff] (!%p138_p2)  }
   0xa   : > { %vm2109_vm7 = vmor (!%p138_p2), %vm2101_vm6, %vm229_vm4  ;;  %vm516_vm14 = vcmask (!%p138_p2), 1046534   ;;  %v1989_v37 = vld [vmem:[%s2355_s1 + $0xc8] sm:$0xff] (!%p138_p2)   ;;  %vm1551_vm1 = vcmask (!%p138_p2), 519168  }
   0xb   : > { %1842 = vmatpush3.bf16.msra.mxu0 (!%p138_p2), %v1961_v3  ;;  %v300_v59 = vunpack.c.0.s8 (!%p138_p2), %v299_v53  ;;  %vm513_vm11 = vmor (!%p138_p2), %vm511_vm8, %vm512_vm9 }
   0xc   : > { %1854 = vmatpush3.bf16.msra.mxu1 (!%p138_p2), %v1962_v4  ;;  %1843 = vmatprep.subr.bf16.mxu0 (!%p138_p2), %v2015_v1  ;;  %v1970_v4 = vld [vmem:[%s2355_s1 + $0x60] sm:$0xff] (!%p138_p2)   ;;  %vm2144_vm13 = vmor (!%p138_p2), %vm513_vm11, %vm514_vm12 }
   0xd   : > { %s2369_s13 = smov (!%p161_p3, %s1609_s13), 1  ;;  %1855 = vmatprep.subr.bf16.mxu1 %v2015_v1  ;;  %v2127_v63 = vsub.s32 %v300_v59, %v302_v45  ;;  %vm2161_vm15 = vmor %vm2144_vm13, %vm516_vm14 }
   0xe   : > { %s1947_s24 = smul.u32 24, %s2369_s13  ;;  %s1791_s18 = sshll.u32 %s2369_s13, 3 }
   0xf   : > { %1844 = vmatpush3.bf16.msra.mxu0 %v1963_v5  ;;  %s170_s21 = scalar_lea.vmem %s2357_s3, %s1791_s18 }
  0x10   : > { %s2083_s4 = scalar_lea.vmem %s2354_s0, %s1947_s24  ;;  %1856 = vmatpush3.bf16.msra.mxu1 %v1964_v6  ;;  %1845 = vmatprep.subr.bf16.mxu0 %v2015_v1 }
  0x11   : > { %v1617_v9 = vld.sshfl [vmem:[%s2083_s4] sm:$0x13 pattern:$0x76325410]  ;;  %1857 = vmatprep.subr.bf16.mxu1 %v2015_v1 }
  0x12   : > { %v1618_v10 = vld.sshfl [vmem:[%s2083_s4 + $0x4] sm:$0x13 pattern:$0x76325410]  ;;  %v199_v11 = vcombine.high %v1617_v9, %v1617_v9  ;;  %v232_v13 = vshrl.u32 %v1617_v9, 16  ;;  %v235_v14 = vshll.u32 %v1617_v9, 16 }
  0x13   : > { %v1619_v15 = vld.sshfl [vmem:[%s2083_s4 + $0x8] sm:$0x13 pattern:$0x76325410]  ;;  %v207_v16 = vcombine.high %v1618_v10, %v1618_v10  ;;  %v246_v17 = vshrl.u32 %v1618_v10, 16  ;;  %v249_v18 = vshll.u32 %v1618_v10, 16  ;;  %1846 = vmatpush3.bf16.msra.mxu0 %v1965_v7 }
  0x14   : > { %v1620_v19 = vld.sshfl [vmem:[%s2083_s4 + $0xc] sm:$0x13 pattern:$0x76325410]  ;;  %v215_v20 = vcombine.high %v1619_v15, %v1619_v15  ;;  %v234_v21 = vrot.slane %v232_v13, 6  ;;  %v237_v22 = vrot.slane %v235_v14, 7  ;;  %1858 = vmatpush3.bf16.msra.mxu1 %v1966_v8  ;;  %1863 = vmatprep.subr.bf16.mxu0 %v2015_v1 }
  0x15   : > { %v223_v24 = vcombine.high %v1620_v19, %v1620_v19  ;;  %v241_v26 = vshll.u32 %v199_v11, 16  ;;  %v248_v27 = vrot.slane %v246_v17, 6  ;;  %v251_v28 = vrot.slane %v249_v18, 7  ;;  %1875 = vmatprep.subr.bf16.mxu1 %v2015_v1  ;;  %v1969_v7 = vld [vmem:[%s2355_s1 + $0x40] sm:$0xff]  }
  0x16   : > { %v238_v29 = vor.u32 %v237_v22, %v234_v21  ;;  %v255_v30 = vshll.u32 %v207_v16, 16  ;;  %v260_v31 = vshrl.u32 %v1619_v15, 16  ;;  %v263_v32 = vshll.u32 %v1619_v15, 16 }
  0x17   : > { %v243_v33 = vrot.slane %v241_v26, 7  ;;  %v252_v34 = vor.u32 %v251_v28, %v248_v27  ;;  %v269_v35 = vshll.u32 %v215_v20, 16  ;;  %v274_v36 = vshrl.u32 %v1620_v19, 16  ;;  %v1971_v26 = vld [vmem:[%s2355_s1 + $0x48] sm:$0xff]   ;;  %v1974_v28 = vld [vmem:[%s2355_s1 + $0x70] sm:$0xff]  }
  0x18   : > { %v239_v38 = vrot.slane %v238_v29, 2  ;;  %v257_v39 = vrot.slane %v255_v30, 7  ;;  %v262_v40 = vrot.slane %v260_v31, 6  ;;  %v265_v41 = vrot.slane %v263_v32, 7 }
  0x19   : > { %v253_v42 = vrot.slane %v252_v34, 2  ;;  %v276_v43 = vrot.slane %v274_v36, 6  ;;  %v277_v44 = vshll.u32 %v1620_v19, 16  ;;  %v271_v47 = vrot.slane %v269_v35, 7 }
  0x1a   : > { %v266_v46 = vor.u32 %v265_v41, %v262_v40  ;;  %v283_v48 = vshll.u32 %v223_v24, 16  ;;  %v244_v49 = vsel %vm2109_vm7, %v239_v38, %v243_v33  ;;  %v2001_v54 = vld.sshfl [vmem:[%s2083_s4] sm:$0xf pattern:$0x76325410]  ;;  %v1976_v40 = vld [vmem:[%s2355_s1 + $0x78] sm:$0xff]  }
  0x1b   : > { %v2118_v50 = vsel %vm2109_vm7, %v253_v42, %v257_v39  ;;  %v279_v51 = vrot.slane %v277_v44, 7  ;;  %v2002_v55 = vld.sshfl [vmem:[%s2083_s4 + $0x8] sm:$0xf pattern:$0x76325410]  ;;  %v1973_v39 = vld [vmem:[%s2355_s1 + $0x50] sm:$0xff]  }
  0x1c   : > { %v267_v56 = vrot.slane %v266_v46, 2  ;;  %v285_v57 = vrot.slane %v283_v48, 7  ;;  %v296_v60 = vcombine.low %v244_v49, %v2118_v50  ;;  %v1639_v5 = vld.sshfl [vmem:[%s2083_s4] sm:$0x12 pattern:$0x76325410]  ;;  %v402_v6 = vcombine.low %v2001_v54, %v2002_v55 }
  0x1d   : > { %v280_v58 = vor.u32 %v279_v51, %v276_v43  ;;  %v1640_v8 = vld.sshfl [vmem:[%s2083_s4 + $0x4] sm:$0x12 pattern:$0x76325410]  ;;  %v486_v9 = vcombine.high %v1639_v5, %v1639_v5  ;;  %v1643_v15 = vrot.slane %v1639_v5, 9  ;;  %v1975_v44 = vld [vmem:[%s2355_s1 + $0x58] sm:$0xff]  }
  0x1e   : > { %v2125_v61 = vsel %vm2109_vm7, %v267_v56, %v271_v47  ;;  %v304_v3 = vrot.slane %v296_v60, %v2127_v63  ;;  %v1641_v13 = vld.sshfl [vmem:[%s2083_s4 + $0x8] sm:$0x12 pattern:$0x76325410]  ;;  %v494_v14 = vcombine.high %v1640_v8, %v1640_v8  ;;  %v1644_v16 = vrot.slane %v1640_v8, 9  ;;  %1860 = vmatmul.mubr.msk.bf16.vlgmr.msra.gmra.mrb[0].mxu1 %vm337_vm10, %v402_v6  ;;  %v1980_v46 = vld [vmem:[%s2355_s1 + $0xa0] sm:$0xff]  }
  0x1f   : > { %v281_v62 = vrot.slane %v280_v58, 2  ;;  %v1642_v17 = vld.sshfl [vmem:[%s2083_s4 + $0xc] sm:$0x12 pattern:$0x76325410]  ;;  %v502_v18 = vcombine.high %v1641_v13, %v1641_v13  ;;  %v520_v19 = vrot.slane %v486_v9, 7  ;;  %1876 = vmatpush3.bf16.msra.mxu1 %v1970_v4  ;;  %1883 = vmatprep.mubr.msk.bf16.mxu1 %vm2016_vm0, %v2015_v1  ;;  %v840_v10 = vcombine.low %v2118_v50, %v2125_v61 }
  0x20   : > { %v1645_v20 = vrot.slane %v1641_v13, 9  ;;  %v510_v22 = vcombine.high %v1642_v17, %v1642_v17  ;;  %v524_v24 = vrot.slane %v494_v14, 7  ;;  %v1646_v25 = vrot.slane %v1642_v17, 9  ;;  %1877 = vmatprep.subr.bf16.mxu1 %v2015_v1  ;;  %v1981_v5 = vld [vmem:[%s2355_s1 + $0x88] sm:$0xff]   ;;  %v1984_v6 = vld [vmem:[%s2355_s1 + $0xb0] sm:$0xff]   ;;  %v1986_v50 = vld [vmem:[%s2355_s1 + $0xb8] sm:$0xff]  }
  0x21   : > { %v2131_v0 = vsel %vm2109_vm7, %v281_v62, %v285_v57  ;;  %v528_v27 = vrot.slane %v502_v18, 7  ;;  %v521_v30 = vsel %vm2161_vm15, %v1643_v15, %v520_v19  ;;  %v2003_v33 = vld.sshfl [vmem:[%s2083_s4 + $0x4] sm:$0xf pattern:$0x76325410] }
  0x22   : > { %v297_v2 = vcombine.low %v2125_v61, %v2131_v0  ;;  %v532_v29 = vrot.slane %v510_v22, 7  ;;  %v2181_v31 = vsel %vm2161_vm15, %v1644_v16, %v524_v24  ;;  %v2004_v34 = vld.sshfl [vmem:[%s2083_s4 + $0xc] sm:$0xf pattern:$0x76325410]  ;;  %v1977_v57 = vld [vmem:[%s2355_s1 + $0x80] sm:$0xff]  }
  0x23   : > { %v2185_v32 = vsel %vm2161_vm15, %v1645_v20, %v528_v27  ;;  %1878 = vmatpush3.bf16.msra.mxu1 %v1972_v12  ;;  %v543_v36 = vcombine.low %v521_v30, %v2181_v31  ;;  %v1684_v43 = vld.sshfl [vmem:[%s2083_s4 + $0x10] sm:$0x13 pattern:$0x76325410]  ;;  %v664_v45 = vcombine.low %v2003_v33, %v2004_v34  ;;  %v1985_v24 = vld [vmem:[%s2355_s1 + $0x98] sm:$0xff]   ;;  %v1988_v27 = vld [vmem:[%s2355_s1 + $0xe0] sm:$0xff]  }
  0x24   : > { %v2149_v11 = vrot.slane %v297_v2, %v2127_v63  ;;  %v533_v35 = vsel %vm2161_vm15, %v1646_v25, %v532_v29  ;;  %1879 = vmatprep.subr.bf16.mxu1 %v2015_v1  ;;  %v774_v47 = vcombine.high %v1684_v43, %v1684_v43  ;;  %v818_v48 = vshrl.u32 %v1684_v43, 16  ;;  %v1705_v51 = vld.sshfl [vmem:[%s2083_s4 + $0x10] sm:$0x12 pattern:$0x76325410]  ;;  %v1982_v2 = vld [vmem:[%s2355_s1 + $0xa8] sm:$0xff]  }
  0x25   : > { %v544_v38 = vcombine.low %v2185_v32, %v533_v35  ;;  %v551_v41 = vrot.slane %v543_v36, %v2127_v63  ;;  %v821_v49 = vshll.u32 %v1684_v43, 16  ;;  %v966_v55 = vcombine.high %v1705_v51, %v1705_v51  ;;  %v1983_v12 = vld [vmem:[%s2355_s1 + $0x90] sm:$0xff]   ;;  %v1990_v36 = vld [vmem:[%s2355_s1 + $0xe8] sm:$0xff]  }
  0x26   : > { %v312_v21 = vcombine.low %v304_v3, %v2149_v11  ;;  %v820_v52 = vrot.slane %v818_v48, 6  ;;  %v827_v54 = vshll.u32 %v774_v47, 16  ;;  %v1709_v58 = vrot.slane %v1705_v51, 9  ;;  %v1992_v43 = vld [vmem:[%s2355_s1 + $0xf0] sm:$0xff]   ;;  %v1994_v48 = vld [vmem:[%s2355_s1 + $0xf8] sm:$0xff]  }
  0x27   : > { %1880 = vmatpush3.bf16.msra.mxu1 %v1974_v28  ;;  %v2205_v42 = vrot.slane %v544_v38, %v2127_v63  ;;  %v823_v53 = vrot.slane %v821_v49, 7  ;;  %v981_v62 = vrot.slane %v966_v55, 7  ;;  %v992_v8 = vcombine.low %v2181_v31, %v2185_v32  ;;  %v1747_v16 = vld.sshfl [vmem:[%s2083_s4 + $0x14] sm:$0x13 pattern:$0x76325410] }
  0x28   : > { %1848 = vmatmul.mubr.msk.bf16.vlgmr.msra.gmra.mrb[0].mxu0 %vm337_vm10, %v312_v21  ;;  %1881 = vmatprep.subr.bf16.mxu1 %v2015_v1  ;;  %v829_v60 = vrot.slane %v827_v54, 7  ;;  %v1223_v61 = vcombine.high %v1747_v16, %v1747_v16  ;;  %v1267_v17 = vshrl.u32 %v1747_v16, 16  ;;  %v1270_v18 = vshll.u32 %v1747_v16, 16  ;;  %v1993_v49 = vld [vmem:[%s2355_s1 + $0xd8] sm:$0xff]  }
  0x29   : > { %1864 = vmatpush3.bf16.msra.mxu0 %v1969_v7  ;;  %1871 = vmatprep.mubr.msk.bf16.mxu0 %vm2016_vm0, %v2015_v1  ;;  %v559_v56 = vcombine.low %v551_v41, %v2205_v42  ;;  %v824_v59 = vor.u32 %v823_v53, %v820_v52  ;;  %v2231_v4 = vsel %vm2161_vm15, %v1709_v58, %v981_v62  ;;  %v1997_v52 = vld [vmem:[%s2355_s1 + $0x100] sm:$0xff]   ;;  %v1999_v53 = vld [vmem:[%s2355_s1 + $0x110] sm:$0xff]   ;;  %v2000_v54 = vld [vmem:[%s2355_s1 + $0x118] sm:$0xff]  }
  0x2a   : > { %1865 = vmatprep.subr.bf16.mxu0 %v2015_v1  ;;  %v993_v9 = vcombine.low %v533_v35, %v2231_v4  ;;  %v1000_v14 = vrot.slane %v992_v8, %v2127_v63  ;;  %v1269_v20 = vrot.slane %v1267_v17, 6  ;;  %v1272_v21 = vrot.slane %v1270_v18, 7  ;;  %v1987_v35 = vld [vmem:[%s2355_s1 + $0xc0] sm:$0xff]  }
  0x2b   : > { %1882 = vmatpush3.bf16.msra.mxu1 %v1976_v40  ;;  %v825_v3 = vrot.slane %v824_v59, 2  ;;  %v1276_v22 = vshll.u32 %v1223_v61, 16 }
  0x2c   : > { %1899 = vmatprep.subr.bf16.mxu1 %v2015_v1  ;;  %v1007_v15 = vrot.slane %v993_v9, %v2127_v63  ;;  %v1273_v28 = vor.u32 %v1272_v21, %v1269_v20 }
  0x2d   : > { %1866 = vmatpush3.bf16.msra.mxu0 %v1971_v26  ;;  %v2244_v7 = vsel %vm2109_vm7, %v825_v3, %v829_v60  ;;  %v1768_v26 = vld.sshfl [vmem:[%s2083_s4 + $0x14] sm:$0x12 pattern:$0x76325410]  ;;  %v1278_v29 = vrot.slane %v1276_v22, 7 }
  0x2e   : > { %1867 = vmatprep.subr.bf16.mxu0 %v2015_v1  ;;  %1884 = vmatmul.mubr.msk.bf16.vlgmr.msra.gmra.mrb[4].mxu1 %vm337_vm10, %v664_v45  ;;  %v841_v13 = vcombine.low %v2131_v0, %v2244_v7  ;;  %v848_v0 = vrot.slane %v840_v10, %v2127_v63  ;;  %v1008_v25 = vcombine.low %v1000_v14, %v1007_v15  ;;  %v1772_v31 = vrot.slane %v1768_v26, 9  ;;  %v2006_v45 = vld.sshfl [vmem:[%s2083_s4 + $0x10] sm:$0xf pattern:$0x76325410] }
  0x2f   : > { %1900 = vmatpush3.bf16.msra.mxu1 %v1980_v46  ;;  %1907 = vmatprep.mubr.msk.bf16.mxu1 %vm2016_vm0, %v2015_v1  ;;  %v1415_v30 = vcombine.high %v1768_v26, %v1768_v26  ;;  %v1274_v33 = vrot.slane %v1273_v28, 2  ;;  %v1991_v46 = vld [vmem:[%s2355_s1 + $0xd0] sm:$0xff]  }
  0x30   : > { %1901 = vmatprep.subr.bf16.mxu1 %v2015_v1  ;;  %v855_v19 = vrot.slane %v841_v13, %v2127_v63 }
  0x31   : > { %1868 = vmatpush3.bf16.msra.mxu0 %v1973_v39  ;;  %v1430_v34 = vrot.slane %v1415_v30, 7  ;;  %v1279_v38 = vsel %vm2109_vm7, %v1274_v33, %v1278_v29 }
  0x32   : > { %1869 = vmatprep.subr.bf16.mxu0 %v2015_v1  ;;  %v856_v32 = vcombine.low %v848_v0, %v855_v19  ;;  %v1290_v23 = vcombine.low %v2244_v7, %v1279_v38 }
  0x33   : > { %1902 = vmatpush3.bf16.msra.mxu1 %v1982_v2  ;;  %v1431_v39 = vsel %vm2161_vm15, %v1772_v31, %v1430_v34 }
  0x34   : > { %1903 = vmatprep.subr.bf16.mxu1 %v2015_v1  ;;  %v1442_v40 = vcombine.low %v2231_v4, %v1431_v39  ;;  %v1304_v47 = vrot.slane %v1290_v23, %v2127_v63 }
  0x35   : > { %1870 = vmatpush3.bf16.msra.mxu0 %v1975_v44  ;;  %v2005_v44 = vld.sshfl [vmem:[%s2083_s4 + $0x8] sm:$0xf pattern:$0x76325410] }
  0x36   : > { %1887 = vmatprep.subr.bf16.mxu0 %v2015_v1  ;;  %v1456_v41 = vrot.slane %v1442_v40, %v2127_v63  ;;  %v1305_v51 = vcombine.low %v2149_v11, %v1304_v47  ;;  %v1113_v63 = vcombine.low %v2005_v44, %v2006_v45  ;;  %v1998_v11 = vld [vmem:[%s2355_s1 + $0x108] sm:$0xff]  }
  0x37   : > { %1904 = vmatpush3.bf16.msra.mxu1 %v1984_v6 }
  0x38   : > { %1872 = vmatmul.mubr.msk.bf16.vlgmr.msra.gmra.mrb[4].mxu0 %vm337_vm10, %v559_v56  ;;  %1905 = vmatprep.subr.bf16.mxu1 %v2015_v1  ;;  %v1457_v55 = vcombine.low %v2205_v42, %v1456_v41 }
  0x39   : > { %1888 = vmatpush3.bf16.msra.mxu0 %v1977_v57  ;;  %1895 = vmatprep.mubr.msk.bf16.mxu0 %vm2016_vm0, %v2015_v1 }
  0x3a   : > { %1889 = vmatprep.subr.bf16.mxu0 %v2015_v1 }
  0x3b   : > { %1906 = vmatpush3.bf16.msra.mxu1 %v1986_v50 }
  0x3c   : > { %1923 = vmatprep.subr.bf16.mxu1 %v2015_v1 }
  0x3d   : > { %1890 = vmatpush3.bf16.msra.mxu0 %v1981_v5 }
  0x3e   : > { %1891 = vmatprep.subr.bf16.mxu0 %v2015_v1  ;;  %1908 = vmatmul.mubr.msk.bf16.vlgmr.msra.gmra.mrb[8].mxu1 %vm337_vm10, %v1008_v25 }
  0x3f   : > { %1924 = vmatpush3.bf16.msra.mxu1 %v1988_v27  ;;  %1931 = vmatprep.mubr.msk.bf16.mxu1 %vm2016_vm0, %v2015_v1 }
  0x40   : > { %1925 = vmatprep.subr.bf16.mxu1 %v2015_v1 }
  0x41   : > { %1892 = vmatpush3.bf16.msra.mxu0 %v1983_v12 }
  0x42   : > { %1893 = vmatprep.subr.bf16.mxu0 %v2015_v1 }
  0x43   : > { %1926 = vmatpush3.bf16.msra.mxu1 %v1990_v36 }
  0x44   : > { %1927 = vmatprep.subr.bf16.mxu1 %v2015_v1 }
  0x45   : > { %1894 = vmatpush3.bf16.msra.mxu0 %v1985_v24 }
  0x46   : > { %1911 = vmatprep.subr.bf16.mxu0 %v2015_v1 }
  0x47   : > { %1928 = vmatpush3.bf16.msra.mxu1 %v1992_v43 }
  0x48   : > { %1896 = vmatmul.mubr.msk.bf16.vlgmr.msra.gmra.mrb[8].mxu0 %vm337_vm10, %v856_v32  ;;  %1929 = vmatprep.subr.bf16.mxu1 %v2015_v1 }
  0x49   : > { %1912 = vmatpush3.bf16.msra.mxu0 %v1987_v35  ;;  %1919 = vmatprep.mubr.msk.bf16.mxu0 %vm2016_vm0, %v2015_v1 }
  0x4a   : > { %1913 = vmatprep.subr.bf16.mxu0 %v2015_v1 }
  0x4b   : > { %1930 = vmatpush3.bf16.msra.mxu1 %v1994_v48 }
  0x4d   : > { %1914 = vmatpush3.bf16.msra.mxu0 %v1989_v37  ;;  %v1786_v37 = vld [vmem:[%s2356_s2] ss:$0 sm:$0xff] }
  0x4e   : > { %1915 = vmatprep.subr.bf16.mxu0 %v2015_v1  ;;  %1932 = vmatmul.mubr.msk.bf16.vlgmr.msra.gmra.mrb[12].mxu1 %vm337_vm10, %v1305_v51 }
  0x51   : > { %1916 = vmatpush3.bf16.msra.mxu0 %v1991_v46 }
  0x52   : > { %1917 = vmatprep.subr.bf16.mxu0 %v2015_v1 }
  0x55   : > { %1918 = vmatpush3.bf16.msra.mxu0 %v1993_v49 }
  0x56   : > { %1935 = vmatprep.subr.bf16.mxu0 %v2015_v1 }
  0x58   : > { %1920 = vmatmul.mubr.msk.bf16.vlgmr.msra.gmra.mrb[12].mxu0 %vm337_vm10, %v1113_v63 }
  0x59   : > { %1936 = vmatpush3.bf16.msra.mxu0 %v1997_v52  ;;  %1943 = vmatprep.mubr.msk.bf16.mxu0 %vm2016_vm0, %v2015_v1 }
  0x5a   : > { %1937 = vmatprep.subr.bf16.mxu0 %v2015_v1 }
  0x5d   : > { %1938 = vmatpush3.bf16.msra.mxu0 %v1998_v11 }
  0x5e   : > { %1939 = vmatprep.subr.bf16.mxu0 %v2015_v1 }
  0x61   : > { %1940 = vmatpush3.bf16.msra.mxu0 %v1999_v53 }
  0x62   : > { %1941 = vmatprep.subr.bf16.mxu0 %v2015_v1 }
  0x65   : > { %1942 = vmatpush3.bf16.msra.mxu0 %v2000_v54 }
  0x68   : > { %1944 = vmatmul.mubr.msk.bf16.vlgmr.msra.gmra.mrb[16].mxu0 %vm337_vm10, %v1457_v55 }
  0xf1   : > { %v464_v56 = vpop.f32.mrb[0].mxu1 }
  0xf2   : > { %v1861_v57 = vpop.f32.mrb[1].mxu1 }
  0xf3   : > { %v467_v58 = vpop.f32.mrb[2].mxu1 }
  0xf4   : > { %v1862_v60 = vpop.f32.mrb[3].mxu1 }
  0xfb   : > { %v375_v59 = vpop.f32.mrb[0].mxu0 }
  0xfc   : > { %v465_v62 = vadd.f32 %v464_v56, %v375_v59  ;;  %v1849_v2 = vpop.f32.mrb[1].mxu0 }
  0xfd   : > { %v378_v3 = vpop.f32.mrb[2].mxu0 }
  0xfe   : > { %v468_v4 = vadd.f32 %v467_v58, %v378_v3  ;;  %v1850_v5 = vpop.f32.mrb[3].mxu0 }
 0x101   : > { %v726_v6 = vpop.f32.mrb[4].mxu1 }
 0x102   : > { %v1885_v7 = vpop.f32.mrb[5].mxu1 }
 0x103   : > { %v729_v8 = vpop.f32.mrb[6].mxu1 }
 0x104   : > { %v1886_v1 = vpop.f32.mrb[7].mxu1 }
 0x10b   : > { %v621_v9 = vpop.f32.mrb[4].mxu0 }
 0x10c   : > { %v628_v10 = vadd.f32 %v621_v9, %v465_v62  ;;  %v1873_v42 = vpop.f32.mrb[5].mxu0 }
 0x10d   : > { %v624_v12 = vpop.f32.mrb[6].mxu0 }
 0x10e   : > { %v629_v13 = vadd.f32 %v624_v12, %v468_v4  ;;  %v733_v14 = vadd.f32 %v726_v6, %v628_v10  ;;  %v1874_v15 = vpop.f32.mrb[7].mxu0 }
 0x110   : > { %v734_v16 = vadd.f32 %v729_v8, %v629_v13 }
 0x111   : > { %v1070_v50 = vpop.f32.mrb[8].mxu1 }
 0x112   : > { %v1909_v61 = vpop.f32.mrb[9].mxu1 }
 0x113   : > { %v1073_v17 = vpop.f32.mrb[10].mxu1 }
 0x114   : > { %v1910_v0 = vpop.f32.mrb[11].mxu1 }
 0x11b   : > { %v918_v18 = vpop.f32.mrb[8].mxu0 }
 0x11c   : > { %v925_v19 = vadd.f32 %v918_v18, %v733_v14  ;;  %v1897_v20 = vpop.f32.mrb[9].mxu0 }
 0x11d   : > { %v921_v21 = vpop.f32.mrb[10].mxu0 }
 0x11e   : > { %v926_v22 = vadd.f32 %v921_v21, %v734_v16  ;;  %v1077_v24 = vadd.f32 %v1070_v50, %v925_v19  ;;  %v1898_v25 = vpop.f32.mrb[11].mxu0 }
 0x120   : > { %v1078_v26 = vadd.f32 %v1073_v17, %v926_v22 }
 0x121   : > { %v1367_v27 = vpop.f32.mrb[12].mxu1 }
 0x122   : > { %v1933_v28 = vpop.f32.mrb[13].mxu1 }
 0x123   : > { %v1370_v29 = vpop.f32.mrb[14].mxu1 }
 0x124   : > { %v1934_v31 = vpop.f32.mrb[15].mxu1 }
 0x12b   : > { %v1175_v30 = vpop.f32.mrb[12].mxu0 }
 0x12c   : > { %v1182_v32 = vadd.f32 %v1175_v30, %v1077_v24  ;;  %v1921_v33 = vpop.f32.mrb[13].mxu0 }
 0x12d   : > { %v1178_v34 = vpop.f32.mrb[14].mxu0 }
 0x12e   : > { %v1183_v35 = vadd.f32 %v1178_v34, %v1078_v26  ;;  %v1374_v36 = vadd.f32 %v1367_v27, %v1182_v32  ;;  %v1922_v38 = vpop.f32.mrb[15].mxu0 }
 0x130   : > { %v1375_v39 = vadd.f32 %v1370_v29, %v1183_v35 }
 0x13b   : > { %v1519_v40 = vpop.f32.mrb[16].mxu0 }
 0x13c   : > { %v1526_v23 = vadd.f32 %v1519_v40, %v1374_v36  ;;  %v1945_v41 = vpop.f32.mrb[17].mxu0 }
 0x13d   : > { %v1522_v43 = vpop.f32.mrb[18].mxu0 }
 0x13e   : > { %v1535_v44 = vadd.f32 %v1786_v37, %v1526_v23  ;;  %v1527_v45 = vadd.f32 %v1522_v43, %v1375_v39  ;;  %v1946_v46 = vpop.f32.mrb[19].mxu0 }
 0x140   : > { %vm1537_vm0 = vcmp.ge.f32.partialorder %v1535_v44, 0.0  ;;  %v1539_v47 = vmul.f32 0.01, %v1535_v44  ;;  %v1536_v48 = vadd.f32 %v1786_v37, %v1527_v45 }
 0x142   : > { %v1541_v49 = vsel %vm1537_vm0, %v1535_v44, %v1539_v47  ;;  %vm1538_vm2 = vcmp.ge.f32.partialorder %v1536_v48, 0.0  ;;  %v1540_v51 = vmul.f32 0.01, %v1536_v48 }
 0x143   : > { %v1792_v63 = vpack.c.bf16 %v1541_v49, %v1541_v49 }
 0x144   : > { %v1542_v52 = vsel %vm1538_vm2, %v1536_v48, %v1540_v51 }
 0x145   : > { %1552 = vst.msk [vmem:[%s170_s21] sm:$0xf] %vm1551_vm1, %v1792_v63  ;;  %v1793_v11 = vpack.c.bf16 %v1542_v52, %v1542_v52 }
 0x147   : > { %1553 = vst.msk [vmem:[%s170_s21 + $0x4] sm:$0xf] %vm1551_vm1, %v1793_v11 }
 0x148 PF: > { %s13_s12 = sadd.s32 1, %s2013_s12  }
 0x149   : > { %p10_p4 = scmp.ge.s32.totalorder %s13_s12, 4  }
 0x14b   :  { %12 = sbr.rel (!%p10_p4) target bundleno = 1 (0x1), region = 72 }

// kernel: improved_cnn_forward.15
= control target key start
LH: loop header
LB: loop body
LE: loop exit
PB: predicated region body
PF: predicated region fallthrough
CT: control target
= control target key end

     0   :  { %s2121_s15 = smov 0   ;;  %s2440_s0 = inlined_call_operand.vmem [shape: bf16[2,6,6,64], index: 0, kind: input, shape index: {}]   ;;  %s2441_s1 = inlined_call_operand.vmem [shape: bf16[9,64,64], index: 1, kind: input, shape index: {}]   ;;  %s2442_s2 = inlined_call_operand.vmem [shape: f32[1,64], index: 2, kind: input, shape index: {}]   ;;  %s2443_s3 = inlined_call_operand.vmem [shape: bf16[2,16,64], index: 3, kind: input, shape index: {}]   ;;  %s2444_s4 = inlined_call_operand.vmem [shape: bf16[2,16,64], index: 4, kind: output, shape index: {}]  }
   0x1 LB: > { %s1680_s16 = sadd.s32 4294967295, %s2091_s15   ;;  %p1684_p0 = scmp.ge.s32.totalorder %s2091_s15, 1  ;;  %s2091_s15 = sphi %s2121_s15, %s14_s15  }
   0x2   : > { %p172_p1 = scmp.lt.s32.totalorder %s2091_s15, 3 }
   0x4   : > { %p173_p2 = pnand %p1684_p0, %p172_p1 }
   0x5   : > { %v2037_v0 = vld [vmem:[%s2441_s1 + $0x20] sm:$0xff] (!%p173_p2)   ;;  %v2093_v1 = vmov (!%p173_p2), 0.0   ;;  %v2039_v3 = vld [vmem:[%s2441_s1 + $0x28] sm:$0xff] (!%p173_p2)   ;;  %vm2094_vm0 = vmmov (!%p173_p2), 0   ;;  %p203_p3 = scmp.lt.s32.totalorder (!%p173_p2), %s1680_s16, 1  ;;  %v2041_v5 = vld [vmem:[%s2441_s1 + $0x30] sm:$0xff] (!%p173_p2)   ;;  %v348_v23 = vlaneseq (!%p173_p2) }
   0x6   : > { %176 = sbr.rel (%p173_p2) target bundleno = 333 (0x14d), region = 36  ;;  %1917 = vmatprep.subr.bf16.mxu0 (!%p173_p2), %v2093_v1  ;;  %1929 = vmatprep.subr.bf16.mxu1 (!%p173_p2), %v2093_v1  ;;  %v2038_v2 = vld [vmem:[%s2441_s1] sm:$0xff] (!%p173_p2)   ;;  %v2040_v4 = vld [vmem:[%s2441_s1 + $0x8] sm:$0xff] (!%p173_p2)   ;;  %v2042_v6 = vld [vmem:[%s2441_s1 + $0x10] sm:$0xff] (!%p173_p2)   ;;  %vm271_vm1 = vsmask.f32 (!%p173_p2), 1280 }
   0x7   : > { %1918 = vmatpush3.bf16.msra.mxu0 (!%p173_p2), %v2037_v0  ;;  %1925 = vmatprep.mubr.msk.bf16.mxu0 (!%p173_p2), %vm2094_vm0, %v2093_v1  ;;  %v2043_v7 = vld [vmem:[%s2441_s1 + $0x38] sm:$0xff] (!%p173_p2)   ;;  %vm272_vm2 = vsmask.f32 (!%p173_p2), 3336  ;;  %vm274_vm3 = vsmask.f32 (!%p173_p2), 5392  ;;  %v349_v45 = vshrl.u32 (!%p173_p2), %v348_v23, 7 }
   0x8   : > { %1930 = vmatpush3.bf16.msra.mxu1 (!%p173_p2), %v2038_v2  ;;  %1919 = vmatprep.subr.bf16.mxu0 (!%p173_p2), %v2093_v1  ;;  %v2044_v8 = vld [vmem:[%s2441_s1 + $0x18] sm:$0xff] (!%p173_p2)   ;;  %vm276_vm4 = vsmask.f32 (!%p173_p2), 7448  ;;  %vm2173_vm5 = vmor (!%p173_p2), %vm271_vm1, %vm272_vm2  ;;  %v2095_v52 = vmov (!%p173_p2), 1983009808   ;;  %vm558_vm8 = vcmask (!%p173_p2), 1040384  }
   0x9   : > { %1931 = vmatprep.subr.bf16.mxu1 (!%p173_p2), %v2093_v1  ;;  %1937 = vmatprep.mubr.msk.bf16.mxu1 (!%p173_p2), %vm2094_vm0, %v2093_v1  ;;  %vm2184_vm6 = vmor (!%p173_p2), %vm2173_vm5, %vm274_vm3  ;;  %v346_v53 = vunpack.c.l.s4 (!%p173_p2), %v2095_v52  ;;  %vm559_vm9 = vcmask (!%p173_p2), 1042434   ;;  %vm384_vm10 = vcmask (!%p173_p2), 523264   ;;  %vm561_vm12 = vcmask (!%p173_p2), 1044484   ;;  %v2050_v12 = vld [vmem:[%s2441_s1 + $0x68] sm:$0xff] (!%p173_p2)  }
   0xa   : > { %vm2192_vm7 = vmor (!%p173_p2), %vm2184_vm6, %vm276_vm4  ;;  %vm563_vm14 = vcmask (!%p173_p2), 1046534   ;;  %v2067_v37 = vld [vmem:[%s2441_s1 + $0xc8] sm:$0xff] (!%p173_p2)   ;;  %vm1610_vm3 = vcmask (!%p173_p2), 519168  }
   0xb   : > { %1920 = vmatpush3.bf16.msra.mxu0 (!%p173_p2), %v2039_v3  ;;  %v347_v59 = vunpack.c.0.s8 (!%p173_p2), %v346_v53  ;;  %vm560_vm11 = vmor (!%p173_p2), %vm558_vm8, %vm559_vm9 }
   0xc   : > { %1932 = vmatpush3.bf16.msra.mxu1 (!%p173_p2), %v2040_v4  ;;  %1921 = vmatprep.subr.bf16.mxu0 (!%p173_p2), %v2093_v1  ;;  %v2048_v4 = vld [vmem:[%s2441_s1 + $0x60] sm:$0xff] (!%p173_p2)   ;;  %vm2227_vm13 = vmor (!%p173_p2), %vm560_vm11, %vm561_vm12 }
   0xd   : > { %s2456_s16 = smov (!%p203_p3, %s1680_s16), 1  ;;  %1933 = vmatprep.subr.bf16.mxu1 %v2093_v1  ;;  %v2210_v63 = vsub.s32 %v347_v59, %v349_v45  ;;  %vm2244_vm15 = vmor %vm2227_vm13, %vm563_vm14 }
   0xe   : > { %s2025_s27 = smul.u32 24, %s2456_s16  ;;  %s1864_s22 = sshll.u32 %s2456_s16, 3 }
   0xf   : > { %1922 = vmatpush3.bf16.msra.mxu0 %v2041_v5  ;;  %s212_s25 = scalar_lea.vmem %s2443_s3, %s1864_s22  ;;  %s217_s29 = scalar_lea.vmem %s2444_s4, %s1864_s22 }
  0x10   : > { %s2166_s8 = scalar_lea.vmem %s2440_s0, %s2025_s27  ;;  %1934 = vmatpush3.bf16.msra.mxu1 %v2042_v6  ;;  %1923 = vmatprep.subr.bf16.mxu0 %v2093_v1 }
  0x11   : > { %v1690_v9 = vld.sshfl [vmem:[%s2166_s8] sm:$0x13 pattern:$0x76325410]  ;;  %1935 = vmatprep.subr.bf16.mxu1 %v2093_v1 }
  0x12   : > { %v1691_v10 = vld.sshfl [vmem:[%s2166_s8 + $0x4] sm:$0x13 pattern:$0x76325410]  ;;  %v246_v11 = vcombine.high %v1690_v9, %v1690_v9  ;;  %v279_v13 = vshrl.u32 %v1690_v9, 16  ;;  %v282_v14 = vshll.u32 %v1690_v9, 16 }
  0x13   : > { %v1692_v15 = vld.sshfl [vmem:[%s2166_s8 + $0x8] sm:$0x13 pattern:$0x76325410]  ;;  %v254_v16 = vcombine.high %v1691_v10, %v1691_v10  ;;  %v293_v17 = vshrl.u32 %v1691_v10, 16  ;;  %v296_v18 = vshll.u32 %v1691_v10, 16  ;;  %1924 = vmatpush3.bf16.msra.mxu0 %v2043_v7 }
  0x14   : > { %v1693_v19 = vld.sshfl [vmem:[%s2166_s8 + $0xc] sm:$0x13 pattern:$0x76325410]  ;;  %v262_v20 = vcombine.high %v1692_v15, %v1692_v15  ;;  %v281_v21 = vrot.slane %v279_v13, 6  ;;  %v284_v22 = vrot.slane %v282_v14, 7  ;;  %1936 = vmatpush3.bf16.msra.mxu1 %v2044_v8  ;;  %1941 = vmatprep.subr.bf16.mxu0 %v2093_v1 }
  0x15   : > { %v270_v24 = vcombine.high %v1693_v19, %v1693_v19  ;;  %v288_v26 = vshll.u32 %v246_v11, 16  ;;  %v295_v27 = vrot.slane %v293_v17, 6  ;;  %v298_v28 = vrot.slane %v296_v18, 7  ;;  %1953 = vmatprep.subr.bf16.mxu1 %v2093_v1  ;;  %v2047_v7 = vld [vmem:[%s2441_s1 + $0x40] sm:$0xff]  }
  0x16   : > { %v285_v29 = vor.u32 %v284_v22, %v281_v21  ;;  %v302_v30 = vshll.u32 %v254_v16, 16  ;;  %v307_v31 = vshrl.u32 %v1692_v15, 16  ;;  %v310_v32 = vshll.u32 %v1692_v15, 16 }
  0x17   : > { %v290_v33 = vrot.slane %v288_v26, 7  ;;  %v299_v34 = vor.u32 %v298_v28, %v295_v27  ;;  %v316_v35 = vshll.u32 %v262_v20, 16  ;;  %v321_v36 = vshrl.u32 %v1693_v19, 16  ;;  %v2049_v26 = vld [vmem:[%s2441_s1 + $0x48] sm:$0xff]   ;;  %v2052_v28 = vld [vmem:[%s2441_s1 + $0x70] sm:$0xff]  }
  0x18   : > { %v286_v38 = vrot.slane %v285_v29, 2  ;;  %v304_v39 = vrot.slane %v302_v30, 7  ;;  %v309_v40 = vrot.slane %v307_v31, 6  ;;  %v312_v41 = vrot.slane %v310_v32, 7 }
  0x19   : > { %v300_v42 = vrot.slane %v299_v34, 2  ;;  %v323_v43 = vrot.slane %v321_v36, 6  ;;  %v324_v44 = vshll.u32 %v1693_v19, 16  ;;  %v318_v47 = vrot.slane %v316_v35, 7 }
  0x1a   : > { %v313_v46 = vor.u32 %v312_v41, %v309_v40  ;;  %v330_v48 = vshll.u32 %v270_v24, 16  ;;  %v291_v49 = vsel %vm2192_vm7, %v286_v38, %v290_v33  ;;  %v2079_v54 = vld.sshfl [vmem:[%s2166_s8] sm:$0xf pattern:$0x76325410]  ;;  %v2054_v40 = vld [vmem:[%s2441_s1 + $0x78] sm:$0xff]  }
  0x1b   : > { %v2201_v50 = vsel %vm2192_vm7, %v300_v42, %v304_v39  ;;  %v326_v51 = vrot.slane %v324_v44, 7  ;;  %v2080_v55 = vld.sshfl [vmem:[%s2166_s8 + $0x8] sm:$0xf pattern:$0x76325410]  ;;  %v2051_v39 = vld [vmem:[%s2441_s1 + $0x50] sm:$0xff]  }
  0x1c   : > { %v314_v56 = vrot.slane %v313_v46, 2  ;;  %v332_v57 = vrot.slane %v330_v48, 7  ;;  %v343_v60 = vcombine.low %v291_v49, %v2201_v50  ;;  %v1712_v5 = vld.sshfl [vmem:[%s2166_s8] sm:$0x12 pattern:$0x76325410]  ;;  %v449_v6 = vcombine.low %v2079_v54, %v2080_v55 }
  0x1d   : > { %v327_v58 = vor.u32 %v326_v51, %v323_v43  ;;  %v1713_v8 = vld.sshfl [vmem:[%s2166_s8 + $0x4] sm:$0x12 pattern:$0x76325410]  ;;  %v533_v9 = vcombine.high %v1712_v5, %v1712_v5  ;;  %v1716_v15 = vrot.slane %v1712_v5, 9  ;;  %v2053_v44 = vld [vmem:[%s2441_s1 + $0x58] sm:$0xff]  }
  0x1e   : > { %v2208_v61 = vsel %vm2192_vm7, %v314_v56, %v318_v47  ;;  %v351_v3 = vrot.slane %v343_v60, %v2210_v63  ;;  %v1714_v13 = vld.sshfl [vmem:[%s2166_s8 + $0x8] sm:$0x12 pattern:$0x76325410]  ;;  %v541_v14 = vcombine.high %v1713_v8, %v1713_v8  ;;  %v1717_v16 = vrot.slane %v1713_v8, 9  ;;  %1938 = vmatmul.mubr.msk.bf16.vlgmr.msra.gmra.mrb[0].mxu1 %vm384_vm10, %v449_v6  ;;  %v2058_v46 = vld [vmem:[%s2441_s1 + $0xa0] sm:$0xff]  }
  0x1f   : > { %v328_v62 = vrot.slane %v327_v58, 2  ;;  %v1715_v17 = vld.sshfl [vmem:[%s2166_s8 + $0xc] sm:$0x12 pattern:$0x76325410]  ;;  %v549_v18 = vcombine.high %v1714_v13, %v1714_v13  ;;  %v567_v19 = vrot.slane %v533_v9, 7  ;;  %1954 = vmatpush3.bf16.msra.mxu1 %v2048_v4  ;;  %1961 = vmatprep.mubr.msk.bf16.mxu1 %vm2094_vm0, %v2093_v1  ;;  %v887_v10 = vcombine.low %v2201_v50, %v2208_v61 }
  0x20   : > { %v1718_v20 = vrot.slane %v1714_v13, 9  ;;  %v557_v22 = vcombine.high %v1715_v17, %v1715_v17  ;;  %v571_v24 = vrot.slane %v541_v14, 7  ;;  %v1719_v25 = vrot.slane %v1715_v17, 9  ;;  %1955 = vmatprep.subr.bf16.mxu1 %v2093_v1  ;;  %v2059_v5 = vld [vmem:[%s2441_s1 + $0x88] sm:$0xff]   ;;  %v2062_v6 = vld [vmem:[%s2441_s1 + $0xb0] sm:$0xff]   ;;  %v2064_v50 = vld [vmem:[%s2441_s1 + $0xb8] sm:$0xff]  }
  0x21   : > { %v2214_v0 = vsel %vm2192_vm7, %v328_v62, %v332_v57  ;;  %v575_v27 = vrot.slane %v549_v18, 7  ;;  %v568_v30 = vsel %vm2244_vm15, %v1716_v15, %v567_v19  ;;  %v2081_v33 = vld.sshfl [vmem:[%s2166_s8 + $0x4] sm:$0xf pattern:$0x76325410] }
  0x22   : > { %v344_v2 = vcombine.low %v2208_v61, %v2214_v0  ;;  %v579_v29 = vrot.slane %v557_v22, 7  ;;  %v2264_v31 = vsel %vm2244_vm15, %v1717_v16, %v571_v24  ;;  %v2082_v34 = vld.sshfl [vmem:[%s2166_s8 + $0xc] sm:$0xf pattern:$0x76325410]  ;;  %v2055_v57 = vld [vmem:[%s2441_s1 + $0x80] sm:$0xff]  }
  0x23   : > { %v2268_v32 = vsel %vm2244_vm15, %v1718_v20, %v575_v27  ;;  %1956 = vmatpush3.bf16.msra.mxu1 %v2050_v12  ;;  %v590_v36 = vcombine.low %v568_v30, %v2264_v31  ;;  %v1757_v43 = vld.sshfl [vmem:[%s2166_s8 + $0x10] sm:$0x13 pattern:$0x76325410]  ;;  %v711_v45 = vcombine.low %v2081_v33, %v2082_v34  ;;  %v2063_v24 = vld [vmem:[%s2441_s1 + $0x98] sm:$0xff]   ;;  %v2066_v27 = vld [vmem:[%s2441_s1 + $0xe0] sm:$0xff]  }
  0x24   : > { %v2232_v11 = vrot.slane %v344_v2, %v2210_v63  ;;  %v580_v35 = vsel %vm2244_vm15, %v1719_v25, %v579_v29  ;;  %1957 = vmatprep.subr.bf16.mxu1 %v2093_v1  ;;  %v821_v47 = vcombine.high %v1757_v43, %v1757_v43  ;;  %v865_v48 = vshrl.u32 %v1757_v43, 16  ;;  %v1778_v51 = vld.sshfl [vmem:[%s2166_s8 + $0x10] sm:$0x12 pattern:$0x76325410]  ;;  %v2060_v2 = vld [vmem:[%s2441_s1 + $0xa8] sm:$0xff]  }
  0x25   : > { %v591_v38 = vcombine.low %v2268_v32, %v580_v35  ;;  %v598_v41 = vrot.slane %v590_v36, %v2210_v63  ;;  %v868_v49 = vshll.u32 %v1757_v43, 16  ;;  %v1013_v55 = vcombine.high %v1778_v51, %v1778_v51  ;;  %v2061_v12 = vld [vmem:[%s2441_s1 + $0x90] sm:$0xff]   ;;  %v2068_v36 = vld [vmem:[%s2441_s1 + $0xe8] sm:$0xff]  }
  0x26   : > { %v359_v21 = vcombine.low %v351_v3, %v2232_v11  ;;  %v867_v52 = vrot.slane %v865_v48, 6  ;;  %v874_v54 = vshll.u32 %v821_v47, 16  ;;  %v1782_v58 = vrot.slane %v1778_v51, 9  ;;  %v2070_v43 = vld [vmem:[%s2441_s1 + $0xf0] sm:$0xff]   ;;  %v2072_v48 = vld [vmem:[%s2441_s1 + $0xf8] sm:$0xff]  }
  0x27   : > { %1958 = vmatpush3.bf16.msra.mxu1 %v2052_v28  ;;  %v2288_v42 = vrot.slane %v591_v38, %v2210_v63  ;;  %v870_v53 = vrot.slane %v868_v49, 7  ;;  %v1028_v62 = vrot.slane %v1013_v55, 7  ;;  %v1039_v8 = vcombine.low %v2264_v31, %v2268_v32  ;;  %v1820_v16 = vld.sshfl [vmem:[%s2166_s8 + $0x14] sm:$0x13 pattern:$0x76325410] }
  0x28   : > { %1926 = vmatmul.mubr.msk.bf16.vlgmr.msra.gmra.mrb[0].mxu0 %vm384_vm10, %v359_v21  ;;  %1959 = vmatprep.subr.bf16.mxu1 %v2093_v1  ;;  %v876_v60 = vrot.slane %v874_v54, 7  ;;  %v1270_v61 = vcombine.high %v1820_v16, %v1820_v16  ;;  %v1314_v17 = vshrl.u32 %v1820_v16, 16  ;;  %v1317_v18 = vshll.u32 %v1820_v16, 16  ;;  %v2071_v49 = vld [vmem:[%s2441_s1 + $0xd8] sm:$0xff]  }
  0x29   : > { %1942 = vmatpush3.bf16.msra.mxu0 %v2047_v7  ;;  %1949 = vmatprep.mubr.msk.bf16.mxu0 %vm2094_vm0, %v2093_v1  ;;  %v606_v56 = vcombine.low %v598_v41, %v2288_v42  ;;  %v871_v59 = vor.u32 %v870_v53, %v867_v52  ;;  %v2314_v4 = vsel %vm2244_vm15, %v1782_v58, %v1028_v62  ;;  %v2075_v52 = vld [vmem:[%s2441_s1 + $0x100] sm:$0xff]   ;;  %v2077_v53 = vld [vmem:[%s2441_s1 + $0x110] sm:$0xff]   ;;  %v2078_v54 = vld [vmem:[%s2441_s1 + $0x118] sm:$0xff]  }
  0x2a   : > { %1943 = vmatprep.subr.bf16.mxu0 %v2093_v1  ;;  %v1040_v9 = vcombine.low %v580_v35, %v2314_v4  ;;  %v1047_v14 = vrot.slane %v1039_v8, %v2210_v63  ;;  %v1316_v20 = vrot.slane %v1314_v17, 6  ;;  %v1319_v21 = vrot.slane %v1317_v18, 7  ;;  %v2065_v35 = vld [vmem:[%s2441_s1 + $0xc0] sm:$0xff]  }
  0x2b   : > { %1960 = vmatpush3.bf16.msra.mxu1 %v2054_v40  ;;  %v872_v3 = vrot.slane %v871_v59, 2  ;;  %v1323_v22 = vshll.u32 %v1270_v61, 16 }
  0x2c   : > { %1977 = vmatprep.subr.bf16.mxu1 %v2093_v1  ;;  %v1054_v15 = vrot.slane %v1040_v9, %v2210_v63  ;;  %v1320_v28 = vor.u32 %v1319_v21, %v1316_v20 }
  0x2d   : > { %1944 = vmatpush3.bf16.msra.mxu0 %v2049_v26  ;;  %v2327_v7 = vsel %vm2192_vm7, %v872_v3, %v876_v60  ;;  %v1841_v26 = vld.sshfl [vmem:[%s2166_s8 + $0x14] sm:$0x12 pattern:$0x76325410]  ;;  %v1325_v29 = vrot.slane %v1323_v22, 7 }
  0x2e   : > { %1945 = vmatprep.subr.bf16.mxu0 %v2093_v1  ;;  %1962 = vmatmul.mubr.msk.bf16.vlgmr.msra.gmra.mrb[4].mxu1 %vm384_vm10, %v711_v45  ;;  %v888_v13 = vcombine.low %v2214_v0, %v2327_v7  ;;  %v895_v0 = vrot.slane %v887_v10, %v2210_v63  ;;  %v1055_v25 = vcombine.low %v1047_v14, %v1054_v15  ;;  %v1845_v31 = vrot.slane %v1841_v26, 9  ;;  %v2084_v45 = vld.sshfl [vmem:[%s2166_s8 + $0x10] sm:$0xf pattern:$0x76325410] }
  0x2f   : > { %1978 = vmatpush3.bf16.msra.mxu1 %v2058_v46  ;;  %1985 = vmatprep.mubr.msk.bf16.mxu1 %vm2094_vm0, %v2093_v1  ;;  %v1462_v30 = vcombine.high %v1841_v26, %v1841_v26  ;;  %v1321_v33 = vrot.slane %v1320_v28, 2  ;;  %v2069_v46 = vld [vmem:[%s2441_s1 + $0xd0] sm:$0xff]  }
  0x30   : > { %1979 = vmatprep.subr.bf16.mxu1 %v2093_v1  ;;  %v902_v19 = vrot.slane %v888_v13, %v2210_v63 }
  0x31   : > { %1946 = vmatpush3.bf16.msra.mxu0 %v2051_v39  ;;  %v1477_v34 = vrot.slane %v1462_v30, 7  ;;  %v1326_v38 = vsel %vm2192_vm7, %v1321_v33, %v1325_v29 }
  0x32   : > { %1947 = vmatprep.subr.bf16.mxu0 %v2093_v1  ;;  %v903_v32 = vcombine.low %v895_v0, %v902_v19  ;;  %v1337_v23 = vcombine.low %v2327_v7, %v1326_v38 }
  0x33   : > { %1980 = vmatpush3.bf16.msra.mxu1 %v2060_v2  ;;  %v1478_v39 = vsel %vm2244_vm15, %v1845_v31, %v1477_v34 }
  0x34   : > { %1981 = vmatprep.subr.bf16.mxu1 %v2093_v1  ;;  %v1489_v40 = vcombine.low %v2314_v4, %v1478_v39  ;;  %v1351_v47 = vrot.slane %v1337_v23, %v2210_v63 }
  0x35   : > { %1948 = vmatpush3.bf16.msra.mxu0 %v2053_v44  ;;  %v2083_v44 = vld.sshfl [vmem:[%s2166_s8 + $0x8] sm:$0xf pattern:$0x76325410] }
  0x36   : > { %1965 = vmatprep.subr.bf16.mxu0 %v2093_v1  ;;  %v1503_v41 = vrot.slane %v1489_v40, %v2210_v63  ;;  %v1352_v51 = vcombine.low %v2232_v11, %v1351_v47  ;;  %v1160_v63 = vcombine.low %v2083_v44, %v2084_v45  ;;  %v2076_v11 = vld [vmem:[%s2441_s1 + $0x108] sm:$0xff]  }
  0x37   : > { %1982 = vmatpush3.bf16.msra.mxu1 %v2062_v6 }
  0x38   : > { %1950 = vmatmul.mubr.msk.bf16.vlgmr.msra.gmra.mrb[4].mxu0 %vm384_vm10, %v606_v56  ;;  %1983 = vmatprep.subr.bf16.mxu1 %v2093_v1  ;;  %v1504_v55 = vcombine.low %v2288_v42, %v1503_v41  ;;  %v1869_v41 = vld [vmem:[%s212_s25] sm:$0xff]  }
  0x39   : > { %1966 = vmatpush3.bf16.msra.mxu0 %v2055_v57  ;;  %1973 = vmatprep.mubr.msk.bf16.mxu0 %vm2094_vm0, %v2093_v1 }
  0x3a   : > { %1967 = vmatprep.subr.bf16.mxu0 %v2093_v1 }
  0x3b   : > { %1984 = vmatpush3.bf16.msra.mxu1 %v2064_v50 }
  0x3c   : > { %2001 = vmatprep.subr.bf16.mxu1 %v2093_v1 }
  0x3d   : > { %1968 = vmatpush3.bf16.msra.mxu0 %v2059_v5 }
  0x3e   : > { %1969 = vmatprep.subr.bf16.mxu0 %v2093_v1  ;;  %1986 = vmatmul.mubr.msk.bf16.vlgmr.msra.gmra.mrb[8].mxu1 %vm384_vm10, %v1055_v25 }
  0x3f   : > { %2002 = vmatpush3.bf16.msra.mxu1 %v2066_v27  ;;  %2009 = vmatprep.mubr.msk.bf16.mxu1 %vm2094_vm0, %v2093_v1 }
  0x40   : > { %2003 = vmatprep.subr.bf16.mxu1 %v2093_v1 }
  0x41   : > { %1970 = vmatpush3.bf16.msra.mxu0 %v2061_v12 }
  0x42   : > { %1971 = vmatprep.subr.bf16.mxu0 %v2093_v1 }
  0x43   : > { %2004 = vmatpush3.bf16.msra.mxu1 %v2068_v36 }
  0x44   : > { %2005 = vmatprep.subr.bf16.mxu1 %v2093_v1 }
  0x45   : > { %1972 = vmatpush3.bf16.msra.mxu0 %v2063_v24 }
  0x46   : > { %1989 = vmatprep.subr.bf16.mxu0 %v2093_v1 }
  0x47   : > { %2006 = vmatpush3.bf16.msra.mxu1 %v2070_v43 }
  0x48   : > { %1974 = vmatmul.mubr.msk.bf16.vlgmr.msra.gmra.mrb[8].mxu0 %vm384_vm10, %v903_v32  ;;  %2007 = vmatprep.subr.bf16.mxu1 %v2093_v1 }
  0x49   : > { %1990 = vmatpush3.bf16.msra.mxu0 %v2065_v35  ;;  %1997 = vmatprep.mubr.msk.bf16.mxu0 %vm2094_vm0, %v2093_v1 }
  0x4a   : > { %1991 = vmatprep.subr.bf16.mxu0 %v2093_v1 }
  0x4b   : > { %2008 = vmatpush3.bf16.msra.mxu1 %v2072_v48  ;;  %v1870_v48 = vunpack.c.l.bf16 %v1869_v41 }
  0x4d   : > { %1992 = vmatpush3.bf16.msra.mxu0 %v2067_v37  ;;  %v1859_v37 = vld [vmem:[%s2442_s2] ss:$0 sm:$0xff] }
  0x4e   : > { %1993 = vmatprep.subr.bf16.mxu0 %v2093_v1  ;;  %2010 = vmatmul.mubr.msk.bf16.vlgmr.msra.gmra.mrb[12].mxu1 %vm384_vm10, %v1352_v51 }
  0x51   : > { %1994 = vmatpush3.bf16.msra.mxu0 %v2069_v46 }
  0x52   : > { %1995 = vmatprep.subr.bf16.mxu0 %v2093_v1 }
  0x55   : > { %1996 = vmatpush3.bf16.msra.mxu0 %v2071_v49 }
  0x56   : > { %2013 = vmatprep.subr.bf16.mxu0 %v2093_v1 }
  0x58   : > { %1998 = vmatmul.mubr.msk.bf16.vlgmr.msra.gmra.mrb[12].mxu0 %vm384_vm10, %v1160_v63  ;;  %v1871_v63 = vunpack.c.h.bf16 %v1869_v41 }
  0x59   : > { %2014 = vmatpush3.bf16.msra.mxu0 %v2075_v52  ;;  %2021 = vmatprep.mubr.msk.bf16.mxu0 %vm2094_vm0, %v2093_v1 }
  0x5a   : > { %2015 = vmatprep.subr.bf16.mxu0 %v2093_v1 }
  0x5d   : > { %2016 = vmatpush3.bf16.msra.mxu0 %v2076_v11 }
  0x5e   : > { %2017 = vmatprep.subr.bf16.mxu0 %v2093_v1 }
  0x61   : > { %2018 = vmatpush3.bf16.msra.mxu0 %v2077_v53 }
  0x62   : > { %2019 = vmatprep.subr.bf16.mxu0 %v2093_v1 }
  0x65   : > { %2020 = vmatpush3.bf16.msra.mxu0 %v2078_v54 }
  0x68   : > { %2022 = vmatmul.mubr.msk.bf16.vlgmr.msra.gmra.mrb[16].mxu0 %vm384_vm10, %v1504_v55 }
  0xf1   : > { %v511_v56 = vpop.f32.mrb[0].mxu1 }
  0xf2   : > { %v1939_v57 = vpop.f32.mrb[1].mxu1 }
  0xf3   : > { %v514_v58 = vpop.f32.mrb[2].mxu1 }
  0xf4   : > { %v1940_v60 = vpop.f32.mrb[3].mxu1 }
  0xfb   : > { %v422_v59 = vpop.f32.mrb[0].mxu0 }
  0xfc   : > { %v512_v62 = vadd.f32 %v511_v56, %v422_v59  ;;  %v1927_v2 = vpop.f32.mrb[1].mxu0 }
  0xfd   : > { %v425_v3 = vpop.f32.mrb[2].mxu0 }
  0xfe   : > { %v515_v4 = vadd.f32 %v514_v58, %v425_v3  ;;  %v1928_v5 = vpop.f32.mrb[3].mxu0 }
 0x101   : > { %v773_v6 = vpop.f32.mrb[4].mxu1 }
 0x102   : > { %v1963_v7 = vpop.f32.mrb[5].mxu1 }
 0x103   : > { %v776_v8 = vpop.f32.mrb[6].mxu1 }
 0x104   : > { %v1964_v1 = vpop.f32.mrb[7].mxu1 }
 0x10b   : > { %v668_v9 = vpop.f32.mrb[4].mxu0 }
 0x10c   : > { %v675_v10 = vadd.f32 %v668_v9, %v512_v62  ;;  %v1951_v42 = vpop.f32.mrb[5].mxu0 }
 0x10d   : > { %v671_v12 = vpop.f32.mrb[6].mxu0 }
 0x10e   : > { %v676_v13 = vadd.f32 %v671_v12, %v515_v4  ;;  %v780_v14 = vadd.f32 %v773_v6, %v675_v10  ;;  %v1952_v15 = vpop.f32.mrb[7].mxu0 }
 0x110   : > { %v781_v16 = vadd.f32 %v776_v8, %v676_v13 }
 0x111   : > { %v1117_v50 = vpop.f32.mrb[8].mxu1 }
 0x112   : > { %v1987_v61 = vpop.f32.mrb[9].mxu1 }
 0x113   : > { %v1120_v17 = vpop.f32.mrb[10].mxu1 }
 0x114   : > { %v1988_v0 = vpop.f32.mrb[11].mxu1 }
 0x11b   : > { %v965_v18 = vpop.f32.mrb[8].mxu0 }
 0x11c   : > { %v972_v19 = vadd.f32 %v965_v18, %v780_v14  ;;  %v1975_v20 = vpop.f32.mrb[9].mxu0 }
 0x11d   : > { %v968_v21 = vpop.f32.mrb[10].mxu0 }
 0x11e   : > { %v973_v22 = vadd.f32 %v968_v21, %v781_v16  ;;  %v1124_v24 = vadd.f32 %v1117_v50, %v972_v19  ;;  %v1976_v25 = vpop.f32.mrb[11].mxu0 }
 0x120   : > { %v1125_v26 = vadd.f32 %v1120_v17, %v973_v22 }
 0x121   : > { %v1414_v27 = vpop.f32.mrb[12].mxu1 }
 0x122   : > { %v2011_v28 = vpop.f32.mrb[13].mxu1 }
 0x123   : > { %v1417_v29 = vpop.f32.mrb[14].mxu1 }
 0x124   : > { %v2012_v31 = vpop.f32.mrb[15].mxu1 }
 0x12b   : > { %v1222_v30 = vpop.f32.mrb[12].mxu0 }
 0x12c   : > { %v1229_v32 = vadd.f32 %v1222_v30, %v1124_v24  ;;  %v1999_v33 = vpop.f32.mrb[13].mxu0 }
 0x12d   : > { %v1225_v34 = vpop.f32.mrb[14].mxu0 }
 0x12e   : > { %v1230_v35 = vadd.f32 %v1225_v34, %v1125_v26  ;;  %v1421_v36 = vadd.f32 %v1414_v27, %v1229_v32  ;;  %v2000_v38 = vpop.f32.mrb[15].mxu0 }
 0x130   : > { %v1422_v39 = vadd.f32 %v1417_v29, %v1230_v35 }
 0x13b   : > { %v1566_v40 = vpop.f32.mrb[16].mxu0 }
 0x13c   : > { %v1573_v23 = vadd.f32 %v1566_v40, %v1421_v36  ;;  %v2023_v43 = vpop.f32.mrb[17].mxu0 }
 0x13d   : > { %v1569_v44 = vpop.f32.mrb[18].mxu0 }
 0x13e   : > { %v1582_v45 = vadd.f32 %v1859_v37, %v1573_v23  ;;  %v1574_v46 = vadd.f32 %v1569_v44, %v1422_v39  ;;  %v2024_v47 = vpop.f32.mrb[19].mxu0 }
 0x140   : > { %vm1584_vm0 = vcmp.ge.f32.partialorder %v1582_v45, 0.0  ;;  %v1586_v49 = vmul.f32 0.01, %v1582_v45  ;;  %v1583_v51 = vadd.f32 %v1859_v37, %v1574_v46 }
 0x142   : > { %v1588_v52 = vsel %vm1584_vm0, %v1582_v45, %v1586_v49  ;;  %vm1585_vm1 = vcmp.ge.f32.partialorder %v1583_v51, 0.0  ;;  %v1587_v11 = vmul.f32 0.01, %v1583_v51 }
 0x143   : > { %v1594_v53 = vadd.f32 %v1870_v48, %v1588_v52 }
 0x144   : > { %v1589_v54 = vsel %vm1585_vm1, %v1583_v51, %v1587_v11 }
 0x145   : > { %vm1596_vm2 = vcmp.ge.f32.partialorder %v1594_v53, 0.0  ;;  %v1598_v55 = vmul.f32 0.01, %v1594_v53  ;;  %v1595_v56 = vadd.f32 %v1871_v63, %v1589_v54 }
 0x147   : > { %v1600_v57 = vsel %vm1596_vm2, %v1594_v53, %v1598_v55  ;;  %vm1597_vm4 = vcmp.ge.f32.partialorder %v1595_v56, 0.0  ;;  %v1599_v58 = vmul.f32 0.01, %v1595_v56 }
 0x148   : > { %v1866_v59 = vpack.c.bf16 %v1600_v57, %v1600_v57 }
 0x149   : > { %v1601_v60 = vsel %vm1597_vm4, %v1595_v56, %v1599_v58 }
 0x14a   : > { %1611 = vst.msk [vmem:[%s217_s29] sm:$0xf] %vm1610_vm3, %v1866_v59  ;;  %v1867_v62 = vpack.c.bf16 %v1601_v60, %v1601_v60 }
 0x14c   : > { %1612 = vst.msk [vmem:[%s217_s29 + $0x4] sm:$0xf] %vm1610_vm3, %v1867_v62 }
 0x14d PF: > { %s14_s15 = sadd.s32 1, %s2091_s15  }
 0x14e   : > { %p11_p4 = scmp.ge.s32.totalorder %s14_s15, 4  }
 0x150   :  { %13 = sbr.rel (!%p11_p4) target bundleno = 1 (0x1), region = 79 }

// kernel: improved_cnn_forward.17
= control target key start
LH: loop header
LB: loop body
LE: loop exit
PB: predicated region body
PF: predicated region fallthrough
CT: control target
= control target key end

     0   :  { %s1597_s12 = smov 0   ;;  %s1852_s0 = inlined_call_operand.vmem [shape: bf16[2,12,3,64], index: 0, kind: input, shape index: {}]   ;;  %s1853_s1 = inlined_call_operand.vmem [shape: bf16[9,64,128], index: 1, kind: input, shape index: {}]   ;;  %s1854_s2 = inlined_call_operand.vmem [shape: f32[1,128], index: 2, kind: input, shape index: {}]   ;;  %s1855_s3 = inlined_call_operand.vmem [shape: bf16[2,4,128], index: 3, kind: output, shape index: {}]  }
   0x1 LB: > { %s1220_s13 = sadd.s32 4294967295, %s1572_s12   ;;  %p1224_p0 = scmp.ge.s32.totalorder %s1572_s12, 1  ;;  %s1572_s12 = sphi %s1597_s12, %s13_s12  }
   0x2   : > { %p137_p1 = scmp.lt.s32.totalorder %s1572_s12, 3 }
   0x4   : > { %p138_p2 = pnand %p1224_p0, %p137_p1 }
   0x5   : > { %v1530_v0 = vld [vmem:[%s1853_s1 + $0x20] sm:$0xff] (!%p138_p2)   ;;  %v1574_v1 = vmov (!%p138_p2), 0.0   ;;  %v1532_v3 = vld [vmem:[%s1853_s1 + $0x28] sm:$0xff] (!%p138_p2)   ;;  %vm1575_vm0 = vmmov (!%p138_p2), 0   ;;  %p160_p3 = scmp.lt.s32.totalorder (!%p138_p2), %s1220_s13, 1  ;;  %v198_v5 = vlaneseq (!%p138_p2)  ;;  %v1534_v6 = vld [vmem:[%s1853_s1 + $0x30] sm:$0xff] (!%p138_p2)  }
   0x6   : > { %141 = sbr.rel (%p138_p2) target bundleno = 310 (0x136), region = 32  ;;  %1410 = vmatprep.subr.bf16.mxu0 (!%p138_p2), %v1574_v1  ;;  %1422 = vmatprep.subr.bf16.mxu1 (!%p138_p2), %v1574_v1  ;;  %v1531_v2 = vld [vmem:[%s1853_s1] sm:$0xff] (!%p138_p2)   ;;  %v1533_v4 = vld [vmem:[%s1853_s1 + $0x8] sm:$0xff] (!%p138_p2)   ;;  %v1535_v7 = vld [vmem:[%s1853_s1 + $0x10] sm:$0xff] (!%p138_p2)   ;;  %v1576_v11 = vmov (!%p138_p2), 1966171168  }
   0x7   : > { %1411 = vmatpush3.bf16.msra.mxu0 (!%p138_p2), %v1530_v0  ;;  %1418 = vmatprep.mubr.msk.bf16.mxu0 (!%p138_p2), %vm1575_vm0, %v1574_v1  ;;  %v199_v8 = vshrl.u32 (!%p138_p2), %v198_v5, 7  ;;  %v196_v12 = vunpack.c.l.s4 (!%p138_p2), %v1576_v11  ;;  %v1536_v14 = vld [vmem:[%s1853_s1 + $0x38] sm:$0xff] (!%p138_p2)   ;;  %v1538_v23 = vld [vmem:[%s1853_s1 + $0x40] sm:$0xff] (!%p138_p2)   ;;  %vm233_vm1 = vcmask (!%p138_p2), 523264   ;;  %vm381_vm2 = vsmask.f32 (!%p138_p2), 256 }
   0x8   : > { %1423 = vmatpush3.bf16.msra.mxu1 (!%p138_p2), %v1531_v2  ;;  %1412 = vmatprep.subr.bf16.mxu0 (!%p138_p2), %v1574_v1  ;;  %v1537_v16 = vld [vmem:[%s1853_s1 + $0x18] sm:$0xff] (!%p138_p2)   ;;  %v1539_v24 = vld [vmem:[%s1853_s1 + $0x60] sm:$0xff] (!%p138_p2)   ;;  %v1540_v27 = vld [vmem:[%s1853_s1 + $0x48] sm:$0xff] (!%p138_p2)   ;;  %vm382_vm3 = vsmask.f32 (!%p138_p2), 1284 }
   0x9   : > { %1424 = vmatprep.subr.bf16.mxu1 (!%p138_p2), %v1574_v1  ;;  %1430 = vmatprep.mubr.msk.bf16.mxu1 (!%p138_p2), %vm1575_vm0, %v1574_v1  ;;  %v197_v18 = vunpack.c.0.s8 (!%p138_p2), %v196_v12  ;;  %v1541_v28 = vld [vmem:[%s1853_s1 + $0x68] sm:$0xff] (!%p138_p2)   ;;  %vm383_vm4 = vmor (!%p138_p2), %vm381_vm2, %vm382_vm3  ;;  %vm384_vm5 = vsmask.f32 (!%p138_p2), 2312  ;;  %vm386_vm7 = vsmask.f32 (!%p138_p2), 3340  ;;  %v1542_v35 = vld [vmem:[%s1853_s1 + $0x50] sm:$0xff] (!%p138_p2)  }
   0xa   : > { %vm385_vm6 = vmor (!%p138_p2), %vm383_vm4, %vm384_vm5  ;;  %vm388_vm8 = vsmask.f32 (!%p138_p2), 4368  ;;  %vm390_vm9 = vsmask.f32 (!%p138_p2), 5396  ;;  %vm392_vm11 = vsmask.f32 (!%p138_p2), 6424 }
   0xb   : > { %1413 = vmatpush3.bf16.msra.mxu0 (!%p138_p2), %v1532_v3  ;;  %v1653_v20 = vsub.s32 (!%p138_p2), %v197_v18, %v199_v8  ;;  %vm387_vm10 = vmor (!%p138_p2), %vm385_vm6, %vm386_vm7  ;;  %vm394_vm12 = vsmask.f32 (!%p138_p2), 7452  ;;  %v1543_v36 = vld [vmem:[%s1853_s1 + $0x70] sm:$0xff] (!%p138_p2)   ;;  %v1544_v45 = vld [vmem:[%s1853_s1 + $0x58] sm:$0xff] (!%p138_p2)  }
   0xc   : > { %1425 = vmatpush3.bf16.msra.mxu1 (!%p138_p2), %v1533_v4  ;;  %1414 = vmatprep.subr.bf16.mxu0 (!%p138_p2), %v1574_v1  ;;  %vm389_vm13 = vmor (!%p138_p2), %vm387_vm10, %vm388_vm8  ;;  %v1545_v48 = vld [vmem:[%s1853_s1 + $0x78] sm:$0xff] (!%p138_p2)   ;;  %v1546_v51 = vld [vmem:[%s1853_s1 + $0x80] sm:$0xff] (!%p138_p2)  }
   0xd   : > { %s1859_s13 = smov (!%p160_p3, %s1220_s13), 1  ;;  %1426 = vmatprep.subr.bf16.mxu1 %v1574_v1  ;;  %vm391_vm14 = vmor %vm389_vm13, %vm390_vm9  ;;  %v1547_v53 = vld [vmem:[%s1853_s1 + $0xa0] sm:$0xff]   ;;  %v1548_v60 = vld [vmem:[%s1853_s1 + $0x88] sm:$0xff]  }
   0xe   : > { %s1518_s24 = smul.u32 24, %s1859_s13  ;;  %vm393_vm15 = vmor %vm391_vm14, %vm392_vm11  ;;  %v1549_v63 = vld [vmem:[%s1853_s1 + $0xa8] sm:$0xff]   ;;  %v1550_v3 = vld [vmem:[%s1853_s1 + $0x90] sm:$0xff]   ;;  %s1226_s18 = sshll.u32 %s1859_s13, 1 }
   0xf   : > { %1415 = vmatpush3.bf16.msra.mxu0 %v1534_v6  ;;  %vm1696_vm2 = vmor %vm393_vm15, %vm394_vm12  ;;  %v1553_v12 = vld [vmem:[%s1853_s1 + $0xb8] sm:$0xff]   ;;  %v1557_v18 = vld [vmem:[%s1853_s1 + $0xe8] sm:$0xff]   ;;  %s168_s21 = scalar_lea.vmem %s1855_s3, %s1226_s18 }
  0x10   : > { %s1639_s29 = scalar_lea.vmem %s1852_s0, %s1518_s24  ;;  %1427 = vmatpush3.bf16.msra.mxu1 %v1535_v7  ;;  %1416 = vmatprep.subr.bf16.mxu0 %v1574_v1  ;;  %v1551_v7 = vld [vmem:[%s1853_s1 + $0xb0] sm:$0xff]  }
  0x11   : > { %v1227_v9 = vld [vmem:[%s1639_s29 + $0x6] sm:$0x1]  ;;  %v1228_v10 = vld [vmem:[%s1639_s29 + $0x8] sm:$0x1]  ;;  %v170_v13 = vld [vmem:[%s1639_s29] sm:$0x1]  ;;  %1428 = vmatprep.subr.bf16.mxu1 %v1574_v1 }
  0x12   : > { %v171_v15 = vld [vmem:[%s1639_s29 + $0x2] sm:$0x1]  ;;  %v194_v17 = vcombine.low %v1227_v9, %v1228_v10  ;;  %v1247_v29 = vld.sshfl [vmem:[%s1639_s29] sm:$0x11 pattern:$0x75316420] }
  0x13   : > { %v279_v19 = vcombine.low %v170_v13, %v171_v15  ;;  %1417 = vmatpush3.bf16.msra.mxu0 %v1536_v14  ;;  %v1248_v30 = vld.sshfl [vmem:[%s1639_s29 + $0x2] sm:$0x11 pattern:$0x75316420]  ;;  %v372_v31 = vcombine.high %v1247_v29, %v1247_v29  ;;  %v397_v33 = vshrl.u32 %v1247_v29, 16  ;;  %v1552_v9 = vld [vmem:[%s1853_s1 + $0x98] sm:$0xff]  }
  0x14   : > { %1429 = vmatpush3.bf16.msra.mxu1 %v1537_v16  ;;  %v201_v21 = vrot.slane %v194_v17, %v1653_v20  ;;  %1434 = vmatprep.subr.bf16.mxu0 %v1574_v1  ;;  %v380_v32 = vcombine.high %v1248_v30, %v1248_v30  ;;  %v406_v37 = vshrl.u32 %v1248_v30, 16  ;;  %v1264_v39 = vld [vmem:[%s1639_s29 + $0xc] sm:$0x1]  ;;  %v1265_v40 = vld [vmem:[%s1639_s29 + $0xe] sm:$0x1]  ;;  %v1554_v15 = vld [vmem:[%s1853_s1 + $0xc0] sm:$0xff]  }
  0x15   : > { %v286_v22 = vrot.slane %v279_v19, %v1653_v20  ;;  %1446 = vmatprep.subr.bf16.mxu1 %v1574_v1  ;;  %v402_v34 = vshll.u32 %v372_v31, 16  ;;  %v520_v41 = vcombine.low %v1264_v39, %v1265_v40  ;;  %v1296_v54 = vld.sshfl [vmem:[%s1639_s29 + $0xc] sm:$0x11 pattern:$0x75316420]  ;;  %v1555_v16 = vld [vmem:[%s1853_s1 + $0xe0] sm:$0xff]  }
  0x16   : > { %v208_v25 = vrot.slane %v201_v21, %v1653_v20  ;;  %v411_v38 = vshll.u32 %v380_v32, 16  ;;  %v1279_v55 = vld [vmem:[%s1639_s29 + $0x12] sm:$0x1]  ;;  %v1280_v56 = vld [vmem:[%s1639_s29 + $0x14] sm:$0x1]  ;;  %v711_v58 = vcombine.high %v1296_v54, %v1296_v54  ;;  %v721_v59 = vshrl.u32 %v1296_v54, 16 }
  0x17   : > { %v293_v26 = vrot.slane %v286_v22, %v1653_v20  ;;  %v404_v43 = vsel %vm1696_vm2, %v397_v33, %v402_v34  ;;  %v527_v47 = vrot.slane %v520_v41, %v1653_v20  ;;  %v1297_v57 = vld.sshfl [vmem:[%s1639_s29 + $0xe] sm:$0x11 pattern:$0x75316420]  ;;  %v617_v5 = vcombine.low %v1279_v55, %v1280_v56  ;;  %v1313_v19 = vld [vmem:[%s1639_s29 + $0x2] sm:$0x1] }
  0x18   : > { %1419 = vmatmul.mubr.msk.bf16.vlgmr.msra.gmra.mrb[0].mxu0 %vm233_vm1, %v208_v25  ;;  %v1704_v44 = vsel %vm1696_vm2, %v406_v37, %v411_v38  ;;  %v719_v61 = vcombine.high %v1297_v57, %v1297_v57  ;;  %v730_v62 = vshrl.u32 %v1297_v57, 16  ;;  %v726_v0 = vshll.u32 %v711_v58, 16  ;;  %v1556_v17 = vld [vmem:[%s1853_s1 + $0xc8] sm:$0xff]   ;;  %v1314_v21 = vld [vmem:[%s1639_s29 + $0x4] sm:$0x1]  ;;  %v1560_v31 = vld [vmem:[%s1853_s1 + $0xd8] sm:$0xff]  }
  0x19   : > { %1431 = vmatmul.mubr.msk.bf16.vlgmr.msra.gmra.mrb[0].mxu1 %vm233_vm1, %v293_v26  ;;  %1435 = vmatpush3.bf16.msra.mxu0 %v1538_v23  ;;  %v423_v46 = vcombine.low %v404_v43, %v1704_v44  ;;  %v534_v52 = vrot.slane %v527_v47, %v1653_v20  ;;  %v624_v10 = vrot.slane %v617_v5, %v1653_v20  ;;  %v1328_v22 = vld [vmem:[%s1639_s29 + $0x8] sm:$0x1]  ;;  %v1329_v23 = vld [vmem:[%s1639_s29 + $0xa] sm:$0x1]  ;;  %v1558_v26 = vld [vmem:[%s1853_s1 + $0xd0] sm:$0xff]  }
  0x1a   : > { %1447 = vmatpush3.bf16.msra.mxu1 %v1539_v24  ;;  %1436 = vmatprep.subr.bf16.mxu0 %v1574_v1  ;;  %v735_v2 = vshll.u32 %v719_v61, 16  ;;  %v728_v4 = vsel %vm1696_vm2, %v721_v59, %v726_v0  ;;  %v844_v24 = vcombine.low %v1313_v19, %v1314_v21  ;;  %v941_v25 = vcombine.low %v1328_v22, %v1329_v23  ;;  %v1561_v32 = vld [vmem:[%s1853_s1 + $0xf8] sm:$0xff]   ;;  %v1563_v39 = vld [vmem:[%s1853_s1 + $0x108] sm:$0xff]   ;;  %v1564_v43 = vld [vmem:[%s1853_s1 + $0x110] sm:$0xff]  }
  0x1b   : > { %1448 = vmatprep.subr.bf16.mxu1 %v1574_v1  ;;  %1442 = vmatprep.mubr.msk.bf16.mxu0 %vm1575_vm0, %v1574_v1  ;;  %v430_v49 = vrot.slane %v423_v46, %v1653_v20  ;;  %v631_v13 = vrot.slane %v624_v10, %v1653_v20  ;;  %v1565_v46 = vld [vmem:[%s1853_s1 + $0x118] sm:$0xff]   ;;  %v1362_v22 = vld [vmem:[%s1854_s2] ss:$0 sm:$0xff] }
  0x1c   : > { %1454 = vmatprep.mubr.msk.bf16.mxu1 %vm1575_vm0, %v1574_v1  ;;  %v737_v6 = vsel %vm1696_vm2, %v730_v62, %v735_v2  ;;  %v851_v29 = vrot.slane %v844_v24, %v1653_v20  ;;  %v948_v30 = vrot.slane %v941_v25, %v1653_v20 }
  0x1d   : > { %1437 = vmatpush3.bf16.msra.mxu0 %v1540_v27  ;;  %v437_v50 = vrot.slane %v430_v49, %v1653_v20  ;;  %v747_v8 = vcombine.low %v728_v4, %v737_v6  ;;  %v1559_v27 = vld [vmem:[%s1853_s1 + $0xf0] sm:$0xff]  }
  0x1e   : > { %1449 = vmatpush3.bf16.msra.mxu1 %v1541_v28  ;;  %1438 = vmatprep.subr.bf16.mxu0 %v1574_v1  ;;  %v1346_v28 = vld.sshfl [vmem:[%s1639_s29 + $0x4] sm:$0x11 pattern:$0x75316420]  ;;  %v858_v34 = vrot.slane %v851_v29, %v1653_v20 }
  0x1f   : > { %1450 = vmatprep.subr.bf16.mxu1 %v1574_v1  ;;  %v754_v11 = vrot.slane %v747_v8, %v1653_v20  ;;  %v1043_v33 = vcombine.high %v1346_v28, %v1346_v28  ;;  %v1054_v37 = vshrl.u32 %v1346_v28, 16 }
  0x21   : > { %1439 = vmatpush3.bf16.msra.mxu0 %v1542_v35  ;;  %v761_v14 = vrot.slane %v754_v11, %v1653_v20  ;;  %v955_v35 = vrot.slane %v948_v30, %v1653_v20  ;;  %v1059_v38 = vshll.u32 %v1043_v33, 16 }
  0x22   : > { %1451 = vmatpush3.bf16.msra.mxu1 %v1543_v36  ;;  %1440 = vmatprep.subr.bf16.mxu0 %v1574_v1  ;;  %v1562_v36 = vld [vmem:[%s1853_s1 + $0x100] sm:$0xff]  }
  0x23   : > { %1452 = vmatprep.subr.bf16.mxu1 %v1574_v1  ;;  %v1061_v40 = vsel %vm1696_vm2, %v1054_v37, %v1059_v38 }
  0x24   : > { %v1071_v41 = vcombine.low %v1704_v44, %v1061_v40 }
  0x25   : > { %1441 = vmatpush3.bf16.msra.mxu0 %v1544_v45 }
  0x26   : > { %1453 = vmatpush3.bf16.msra.mxu1 %v1545_v48  ;;  %1458 = vmatprep.subr.bf16.mxu0 %v1574_v1  ;;  %v1078_v45 = vrot.slane %v1071_v41, %v1653_v20 }
  0x27   : > { %1470 = vmatprep.subr.bf16.mxu1 %v1574_v1 }
  0x28   : > { %1443 = vmatmul.mubr.msk.bf16.vlgmr.msra.gmra.mrb[4].mxu0 %vm233_vm1, %v437_v50  ;;  %v1085_v42 = vrot.slane %v1078_v45, %v1653_v20 }
  0x29   : > { %1455 = vmatmul.mubr.msk.bf16.vlgmr.msra.gmra.mrb[4].mxu1 %vm233_vm1, %v534_v52  ;;  %1459 = vmatpush3.bf16.msra.mxu0 %v1546_v51 }
  0x2a   : > { %1471 = vmatpush3.bf16.msra.mxu1 %v1547_v53  ;;  %1460 = vmatprep.subr.bf16.mxu0 %v1574_v1 }
  0x2b   : > { %1472 = vmatprep.subr.bf16.mxu1 %v1574_v1  ;;  %1466 = vmatprep.mubr.msk.bf16.mxu0 %vm1575_vm0, %v1574_v1 }
  0x2c   : > { %1478 = vmatprep.mubr.msk.bf16.mxu1 %vm1575_vm0, %v1574_v1 }
  0x2d   : > { %1461 = vmatpush3.bf16.msra.mxu0 %v1548_v60 }
  0x2e   : > { %1473 = vmatpush3.bf16.msra.mxu1 %v1549_v63  ;;  %1462 = vmatprep.subr.bf16.mxu0 %v1574_v1 }
  0x2f   : > { %1474 = vmatprep.subr.bf16.mxu1 %v1574_v1 }
  0x31   : > { %1463 = vmatpush3.bf16.msra.mxu0 %v1550_v3 }
  0x32   : > { %1475 = vmatpush3.bf16.msra.mxu1 %v1551_v7  ;;  %1464 = vmatprep.subr.bf16.mxu0 %v1574_v1 }
  0x33   : > { %1476 = vmatprep.subr.bf16.mxu1 %v1574_v1 }
  0x35   : > { %1465 = vmatpush3.bf16.msra.mxu0 %v1552_v9 }
  0x36   : > { %1477 = vmatpush3.bf16.msra.mxu1 %v1553_v12  ;;  %1482 = vmatprep.subr.bf16.mxu0 %v1574_v1 }
  0x37   : > { %1494 = vmatprep.subr.bf16.mxu1 %v1574_v1 }
  0x38   : > { %1467 = vmatmul.mubr.msk.bf16.vlgmr.msra.gmra.mrb[8].mxu0 %vm233_vm1, %v631_v13 }
  0x39   : > { %1479 = vmatmul.mubr.msk.bf16.vlgmr.msra.gmra.mrb[8].mxu1 %vm233_vm1, %v761_v14  ;;  %1483 = vmatpush3.bf16.msra.mxu0 %v1554_v15 }
  0x3a   : > { %1495 = vmatpush3.bf16.msra.mxu1 %v1555_v16  ;;  %1484 = vmatprep.subr.bf16.mxu0 %v1574_v1 }
  0x3b   : > { %1496 = vmatprep.subr.bf16.mxu1 %v1574_v1  ;;  %1490 = vmatprep.mubr.msk.bf16.mxu0 %vm1575_vm0, %v1574_v1 }
  0x3c   : > { %1502 = vmatprep.mubr.msk.bf16.mxu1 %vm1575_vm0, %v1574_v1 }
  0x3d   : > { %1485 = vmatpush3.bf16.msra.mxu0 %v1556_v17 }
  0x3e   : > { %1497 = vmatpush3.bf16.msra.mxu1 %v1557_v18  ;;  %1486 = vmatprep.subr.bf16.mxu0 %v1574_v1 }
  0x3f   : > { %1498 = vmatprep.subr.bf16.mxu1 %v1574_v1 }
  0x41   : > { %1487 = vmatpush3.bf16.msra.mxu0 %v1558_v26 }
  0x42   : > { %1499 = vmatpush3.bf16.msra.mxu1 %v1559_v27  ;;  %1488 = vmatprep.subr.bf16.mxu0 %v1574_v1 }
  0x43   : > { %1500 = vmatprep.subr.bf16.mxu1 %v1574_v1 }
  0x45   : > { %1489 = vmatpush3.bf16.msra.mxu0 %v1560_v31 }
  0x46   : > { %1501 = vmatpush3.bf16.msra.mxu1 %v1561_v32  ;;  %1506 = vmatprep.subr.bf16.mxu0 %v1574_v1 }
  0x48   : > { %1491 = vmatmul.mubr.msk.bf16.vlgmr.msra.gmra.mrb[12].mxu0 %vm233_vm1, %v858_v34 }
  0x49   : > { %1503 = vmatmul.mubr.msk.bf16.vlgmr.msra.gmra.mrb[12].mxu1 %vm233_vm1, %v955_v35  ;;  %1507 = vmatpush3.bf16.msra.mxu0 %v1562_v36 }
  0x4a   : > { %1514 = vmatprep.mubr.msk.bf16.mxu0 %vm1575_vm0, %v1574_v1  ;;  %1508 = vmatprep.subr.bf16.mxu0 %v1574_v1 }
  0x4d   : > { %1509 = vmatpush3.bf16.msra.mxu0 %v1563_v39 }
  0x4e   : > { %1510 = vmatprep.subr.bf16.mxu0 %v1574_v1 }
  0x51   : > { %1511 = vmatpush3.bf16.msra.mxu0 %v1564_v43 }
  0x52   : > { %1512 = vmatprep.subr.bf16.mxu0 %v1574_v1 }
  0x55   : > { %1513 = vmatpush3.bf16.msra.mxu0 %v1565_v46 }
  0x58   : > { %1515 = vmatmul.mubr.msk.bf16.vlgmr.msra.gmra.mrb[16].mxu0 %vm233_vm1, %v1085_v42 }
  0xeb   : > { %v271_v44 = vpop.f32.mrb[0].mxu0 }
  0xec   : > { %v355_v47 = vpop.f32.mrb[0].mxu1  ;;  %v1420_v48 = vpop.f32.mrb[1].mxu0 }
  0xed   : > { %v356_v49 = vadd.f32 %v355_v47, %v271_v44  ;;  %v1432_v50 = vpop.f32.mrb[1].mxu1  ;;  %v274_v51 = vpop.f32.mrb[2].mxu0 }
  0xee   : > { %v358_v52 = vpop.f32.mrb[2].mxu1  ;;  %v1421_v53 = vpop.f32.mrb[3].mxu0 }
  0xef   : > { %v1433_v54 = vpop.f32.mrb[3].mxu1 }
  0xfb   : > { %v499_v55 = vpop.f32.mrb[4].mxu0 }
  0xfc   : > { %v596_v56 = vpop.f32.mrb[4].mxu1  ;;  %v505_v57 = vadd.f32 %v499_v55, %v356_v49  ;;  %v1444_v58 = vpop.f32.mrb[5].mxu0 }
  0xfd   : > { %v1456_v59 = vpop.f32.mrb[5].mxu1  ;;  %v502_v1 = vpop.f32.mrb[6].mxu0 }
  0xfe   : > { %v599_v60 = vpop.f32.mrb[6].mxu1  ;;  %v602_v20 = vadd.f32 %v596_v56, %v505_v57  ;;  %v1445_v61 = vpop.f32.mrb[7].mxu0 }
  0xff   : > { %v1457_v62 = vpop.f32.mrb[7].mxu1 }
 0x10b   : > { %v693_v63 = vpop.f32.mrb[8].mxu0 }
 0x10c   : > { %v823_v0 = vpop.f32.mrb[8].mxu1  ;;  %v699_v2 = vadd.f32 %v693_v63, %v602_v20  ;;  %v1468_v3 = vpop.f32.mrb[9].mxu0 }
 0x10d   : > { %v1480_v4 = vpop.f32.mrb[9].mxu1  ;;  %v696_v5 = vpop.f32.mrb[10].mxu0 }
 0x10e   : > { %v826_v6 = vpop.f32.mrb[10].mxu1  ;;  %v829_v7 = vadd.f32 %v823_v0, %v699_v2  ;;  %v1469_v8 = vpop.f32.mrb[11].mxu0 }
 0x10f   : > { %v1481_v9 = vpop.f32.mrb[11].mxu1 }
 0x11b   : > { %v920_v10 = vpop.f32.mrb[12].mxu0 }
 0x11c   : > { %v1017_v11 = vpop.f32.mrb[12].mxu1  ;;  %v926_v12 = vadd.f32 %v920_v10, %v829_v7  ;;  %v1492_v13 = vpop.f32.mrb[13].mxu0 }
 0x11d   : > { %v1504_v14 = vpop.f32.mrb[13].mxu1  ;;  %v923_v15 = vpop.f32.mrb[14].mxu0 }
 0x11e   : > { %v1020_v16 = vpop.f32.mrb[14].mxu1  ;;  %v1023_v17 = vadd.f32 %v1017_v11, %v926_v12  ;;  %v1493_v18 = vpop.f32.mrb[15].mxu0 }
 0x11f   : > { %v1505_v19 = vpop.f32.mrb[15].mxu1 }
 0x12b   : > { %v1147_v21 = vpop.f32.mrb[16].mxu0 }
 0x12c   : > { %v1153_v23 = vadd.f32 %v1147_v21, %v1023_v17  ;;  %v1516_v24 = vpop.f32.mrb[17].mxu0 }
 0x12d   : > { %v1150_v25 = vpop.f32.mrb[18].mxu0 }
 0x12e   : > { %v1161_v26 = vadd.f32 %v1362_v22, %v1153_v23  ;;  %v1517_v27 = vpop.f32.mrb[19].mxu0 }
 0x130   : > { %vm1162_vm0 = vcmp.ge.f32.partialorder %v1161_v26, 0.0  ;;  %v1163_v28 = vmul.f32 0.01, %v1161_v26 }
 0x132   : > { %v1164_v29 = vsel %vm1162_vm0, %v1161_v26, %v1163_v28 }
 0x133   : > { %v1165_v30 = vpack.c.bf16 %v1164_v29, %v1164_v29 }
 0x135   : > { %1166 = vst [vmem:[%s168_s21] sm:$0x3] %v1165_v30 }
 0x136 PF: > { %s13_s12 = sadd.s32 1, %s1572_s12  }
 0x137   : > { %p10_p4 = scmp.ge.s32.totalorder %s13_s12, 4  }
 0x139   :  { %12 = sbr.rel (!%p10_p4) target bundleno = 1 (0x1), region = 75 }

// kernel: improved_cnn_forward.16
= control target key start
LH: loop header
LB: loop body
LE: loop exit
PB: predicated region body
PF: predicated region fallthrough
CT: control target
= control target key end

     0   :  { %s402_s12 = smov 0   ;;  %s434_s0 = inlined_call_operand.vmem [shape: bf16[2,2,2,64], index: 0, kind: input, shape index: {}]   ;;  %s435_s1 = inlined_call_operand.vmem [shape: bf16[1,64,128], index: 1, kind: input, shape index: {}]   ;;  %s436_s2 = inlined_call_operand.vmem [shape: f32[1,128], index: 2, kind: input, shape index: {}]   ;;  %s437_s3 = inlined_call_operand.vmem [shape: bf16[2,4,128], index: 3, kind: output, shape index: {}]  }
   0x1 LB: > { %s324_s13 = sadd.s32 4294967295, %s377_s12   ;;  %p328_p0 = scmp.ge.s32.totalorder %s377_s12, 1  ;;  %s377_s12 = sphi %s402_s12, %s13_s12  }
   0x2   : > { %p136_p1 = scmp.lt.s32.totalorder %s377_s12, 3 }
   0x4   : > { %p137_p2 = pnand %p328_p0, %p136_p1 }
   0x5   : > { %v367_v0 = vld [vmem:[%s435_s1] sm:$0xff] (!%p137_p2)   ;;  %v379_v1 = vmov (!%p137_p2), 0.0   ;;  %v190_v2 = vlaneseq (!%p137_p2)  ;;  %v368_v3 = vld [vmem:[%s435_s1 + $0x8] sm:$0xff] (!%p137_p2)   ;;  %vm380_vm0 = vmmov (!%p137_p2), 0   ;;  %p158_p3 = scmp.lt.s32.totalorder (!%p137_p2), %s324_s13, 1  ;;  %v369_v7 = vld [vmem:[%s435_s1 + $0x10] sm:$0xff] (!%p137_p2)  }
   0x6   : > { %140 = sbr.rel (%p137_p2) target bundleno = 240 (0xf0), region = 32  ;;  %344 = vmatprep.subr.bf16.mxu0 (!%p137_p2), %v379_v1  ;;  %352 = vmatprep.mubr.msk.bf16.mxu0 (!%p137_p2), %vm380_vm0, %v379_v1  ;;  %v381_v4 = vmov (!%p137_p2), 1966171168   ;;  %v370_v13 = vld [vmem:[%s435_s1 + $0x18] sm:$0xff] (!%p137_p2)   ;;  %vm225_vm1 = vcmask (!%p137_p2), 523264  }
   0x7   : > { %345 = vmatpush3.bf16.msra.mxu0 (!%p137_p2), %v367_v0  ;;  %v188_v5 = vunpack.c.l.s4 (!%p137_p2), %v381_v4  ;;  %v191_v6 = vshrl.u32 (!%p137_p2), %v190_v2, 7  ;;  %v331_v16 = vld [vmem:[%s436_s2] ss:$0 sm:$0xff] (!%p137_p2) }
   0x8   : > { %346 = vmatprep.subr.bf16.mxu0 (!%p137_p2), %v379_v1 }
   0x9   : > { %v189_v8 = vunpack.c.0.s8 (!%p137_p2), %v188_v5 }
   0xb   : > { %347 = vmatpush3.bf16.msra.mxu0 (!%p137_p2), %v368_v3  ;;  %v192_v12 = vsub.s32 (!%p137_p2), %v189_v8, %v191_v6 }
   0xc   : > { %348 = vmatprep.subr.bf16.mxu0 (!%p137_p2), %v379_v1 }
   0xd   : > { %s439_s13 = smov (!%p158_p3, %s324_s13), 1 }
   0xe   : > { %s329_s20 = sshll.u32 %s439_s13, 1 }
   0xf   : > { %s161_s23 = scalar_lea.vmem %s434_s0, %s329_s20  ;;  %349 = vmatpush3.bf16.msra.mxu0 %v369_v7  ;;  %s165_s30 = scalar_lea.vmem %s437_s3, %s329_s20 }
  0x10   : > { %v167_v9 = vld [vmem:[%s161_s23] sm:$0x1]  ;;  %v168_v10 = vld [vmem:[%s161_s23 + $0x1] sm:$0x1]  ;;  %350 = vmatprep.subr.bf16.mxu0 %v379_v1 }
  0x11   : > { %v186_v11 = vcombine.low %v167_v9, %v168_v10 }
  0x13   : > { %v193_v14 = vrot.slane %v186_v11, %v192_v12  ;;  %351 = vmatpush3.bf16.msra.mxu0 %v370_v13 }
  0x15   : > { %v200_v15 = vrot.slane %v193_v14, %v192_v12 }
  0x17   : > { %353 = vmatmul.mubr.msk.bf16.vlgmr.msra.gmra.mrb[0].mxu0 %vm225_vm1, %v200_v15 }
  0xea   : > { %v263_v17 = vpop.f32.mrb[0].mxu0 }
  0xeb   : > { %v264_v18 = vadd.f32 %v331_v16, %v263_v17  ;;  %v354_v19 = vpop.f32.mrb[1].mxu0 }
  0xec   : > { %v266_v20 = vpop.f32.mrb[2].mxu0 }
  0xed   : > { %v269_v21 = vpack.c.bf16 %v264_v18, %v264_v18  ;;  %v355_v22 = vpop.f32.mrb[3].mxu0 }
  0xef   : > { %270 = vst [vmem:[%s165_s30] sm:$0x3] %v269_v21 }
  0xf0 PF: > { %s13_s12 = sadd.s32 1, %s377_s12  }
  0xf1   : > { %p10_p4 = scmp.ge.s32.totalorder %s13_s12, 4  }
  0xf3   :  { %12 = sbr.rel (!%p10_p4) target bundleno = 1 (0x1), region = 62 }

// kernel: improved_cnn_forward.20
= control target key start
LH: loop header
LB: loop body
LE: loop exit
PB: predicated region body
PF: predicated region fallthrough
CT: control target
= control target key end

     0   :  { %v344_v0 = vmov 0.0|0.0   ;;  %vm345_vm0 = vmmov 0   ;;  %v346_v4 = vmov 0.0   ;;  %vm18_vm1 = vcmask 1043456   ;;  %s453_s1 = inlined_call_operand.vmem [shape: f32[128,8], index: 1, kind: input, shape index: {}]   ;;  %s454_s0 = inlined_call_operand.vmem [shape: bf16[2,4,128], index: 0, kind: input, shape index: {}]   ;;  %s455_s2 = inlined_call_operand.vmem [shape: f32[8,128], index: 2, kind: input, shape index: {}]   ;;  %s456_s3 = inlined_call_operand.vmem [shape: bf16[2,4,128], index: 3, kind: output, shape index: {}]  }
   0x1   :  { %312 = vmatprep.subr.bf16.mxu0 %v344_v0  ;;  %v35_v1 = vld [vmem:[%s453_s1] sm:$0xff]  ;;  %v36_v2 = vld [vmem:[%s453_s1 + $0x8] sm:$0xff]  ;;  %v37_v3 = vld [vmem:[%s453_s1 + $0x10] sm:$0xff]  ;;  %304 = vmatprep.mubr.msk.f32.mxu0 %vm345_vm0, %v346_v4  ;;  %vm53_vm2 = vcmask 1041409   ;;  %vm128_vm3 = vcmask 64512   ;;  %v212_v58 = vlaneseq }
   0x2   :  { %v313_v5 = vpack.c.bf16 %v36_v2, %v35_v1  ;;  %v38_v6 = vld [vmem:[%s453_s1 + $0x18] sm:$0xff]  ;;  %307 = vmatprep.subr.mxu1 %v346_v4  ;;  %309 = vmatprep.mubr.msk.f32.mxu1 %vm345_vm0, %v346_v4  ;;  %v39_v8 = vld [vmem:[%s453_s1 + $0x20] sm:$0xff]  ;;  %v40_v9 = vld [vmem:[%s453_s1 + $0x28] sm:$0xff]  ;;  %v347_v56 = vmov 1966171168  }
   0x3   :  { %v316_v7 = vpack.c.bf16 %v38_v6, %v37_v3  ;;  %v391_v10 = vld [vmem:[%s454_s0] sm:$0x3]  ;;  %v396_v11 = vld [vmem:[%s454_s0 + $0x2] sm:$0x3]  ;;  %v319_v14 = vpack.c.bf16 %v40_v9, %v39_v8  ;;  %v41_v15 = vld [vmem:[%s453_s1 + $0x30] sm:$0xff]  ;;  %v210_v57 = vunpack.c.l.s4 %v347_v56  ;;  %v213_v60 = vshrl.u32 %v212_v58, 7 }
   0x4   :  { %314 = vmatpush3.bf16.msra.mxu0 %v313_v5  ;;  %v16_v12 = vunpack.c.l.bf16 %v391_v10  ;;  %v17_v13 = vunpack.c.l.bf16 %v396_v11  ;;  %v42_v16 = vld [vmem:[%s453_s1 + $0x38] sm:$0xff]  ;;  %v43_v24 = vld [vmem:[%s453_s1 + $0x40] sm:$0xff]  ;;  %v44_v25 = vld [vmem:[%s453_s1 + $0x48] sm:$0xff] }
   0x5   :  { %315 = vmatprep.subr.bf16.mxu0 %v344_v0  ;;  %v322_v21 = vpack.c.bf16 %v42_v16, %v41_v15  ;;  %v325_v28 = vpack.c.bf16 %v44_v25, %v43_v24  ;;  %v45_v31 = vld [vmem:[%s453_s1 + $0x50] sm:$0xff]  ;;  %v46_v32 = vld [vmem:[%s453_s1 + $0x58] sm:$0xff]  ;;  %v47_v36 = vld [vmem:[%s453_s1 + $0x60] sm:$0xff]  ;;  %v211_v59 = vunpack.c.0.s8 %v210_v57 }
   0x6   :  { %v19_v17 = vsel %vm18_vm1, %v16_v12, 0.0  ;;  %v26_v18 = vsel %vm18_vm1, %v17_v13, 0.0  ;;  %v328_v33 = vpack.c.bf16 %v46_v32, %v45_v31  ;;  %v48_v37 = vld [vmem:[%s453_s1 + $0x68] sm:$0xff]  ;;  %v49_v41 = vld [vmem:[%s453_s1 + $0x70] sm:$0xff]  ;;  %v50_v42 = vld [vmem:[%s453_s1 + $0x78] sm:$0xff] }
   0x7   :  { %v20_v19 = vrot.slane %v19_v17, 4  ;;  %v27_v20 = vrot.slane %v26_v18, 4  ;;  %v331_v38 = vpack.c.bf16 %v48_v37, %v47_v36  ;;  %v334_v43 = vpack.c.bf16 %v50_v42, %v49_v41  ;;  %v127_v47 = vld [vmem:[%s455_s2] sm:$0xff] }
   0x8   :  { %317 = vmatpush3.bf16.msra.mxu0 %v316_v7  ;;  %308 = vmatpush3.msra.mxu1 %v127_v47  ;;  %v214_v61 = vsub.s32 %v211_v59, %v213_v60 }
   0x9   :  { %318 = vmatprep.subr.bf16.mxu0 %v344_v0  ;;  %v21_v22 = vadd.f32 %v20_v19, %v19_v17  ;;  %v28_v23 = vadd.f32 %v27_v20, %v26_v18 }
   0xb   :  { %v22_v26 = vrot.slane %v21_v22, 2  ;;  %v29_v27 = vrot.slane %v28_v23, 2 }
   0xc   :  { %320 = vmatpush3.bf16.msra.mxu0 %v319_v14 }
   0xd   :  { %321 = vmatprep.subr.bf16.mxu0 %v344_v0  ;;  %v23_v29 = vadd.f32 %v22_v26, %v21_v22  ;;  %v30_v30 = vadd.f32 %v29_v27, %v28_v23 }
   0xf   :  { %v24_v34 = vrot.slane %v23_v29, 1  ;;  %v31_v35 = vrot.slane %v30_v30, 1 }
  0x10   :  { %323 = vmatpush3.bf16.msra.mxu0 %v322_v21 }
  0x11   :  { %324 = vmatprep.subr.bf16.mxu0 %v344_v0  ;;  %v25_v39 = vadd.f32 %v24_v34, %v23_v29  ;;  %v32_v40 = vadd.f32 %v31_v35, %v30_v30 }
  0x13   :  { %v33_v44 = vmul.f32 0.25, %v25_v39  ;;  %v34_v45 = vmul.f32 0.25, %v32_v40 }
  0x14   :  { %326 = vmatpush3.bf16.msra.mxu0 %v325_v28 }
  0x15   :  { %327 = vmatprep.subr.bf16.mxu0 %v344_v0  ;;  %v54_v46 = vsel %vm53_vm2, %v34_v45, %v33_v44 }
  0x18   :  { %329 = vmatpush3.bf16.msra.mxu0 %v328_v33 }
  0x19   :  { %330 = vmatprep.subr.bf16.mxu0 %v344_v0 }
  0x1c   :  { %332 = vmatpush3.bf16.msra.mxu0 %v331_v38 }
  0x1d   :  { %333 = vmatprep.subr.bf16.mxu0 %v344_v0  ;;  %v233_v0 = vsub.s32 0, %v213_v60 }
  0x20   :  { %335 = vmatpush3.bf16.msra.mxu0 %v334_v43 }
  0x23   :  { %305 = vmatmul.mubr.f32.vlgmr.msra.gmra.mrb[0].mxu0 %v54_v46 }
  0xf6   :  { %v122_v48 = vpop.f32.mrb[0].mxu0 }
  0xf7   :  { %v126_v49 = vmax.f32 %v122_v48, 0.0  ;;  %v306_v50 = vpop.f32.mrb[1].mxu0 }
  0xf9   :  { %310 = vmatmul.mubr.msk.f32.vlgmr.msra.gmra.mrb[0].mxu1 %vm128_vm3, %v126_v49 }
 0x1cc   :  { %v198_v51 = vpop.f32.mrb[0].mxu1 }
 0x1cd   :  { %v252_v52 = vmul.f32 -1.442695, %v198_v51  ;;  %v311_v53 = vpop.f32.mrb[1].mxu1 }
 0x1cf   :  { %340 = vpow2.f32 %v252_v52 }
 0x1d9   :  { %v341_v54 = vpop.eup %340 }
 0x1da   :  { %v205_v55 = vadd.f32 1.0, %v341_v54 }
 0x1dc   :  { %342 = vrcp.f32 %v205_v55 }
 0x1e6   :  { %v343_v62 = vpop.eup %342 }
 0x1e7   :  { %v215_v63 = vrot.slane %v343_v62, %v214_v61 }
 0x1e9   :  { %v216_v1 = vcombine.high %v215_v63, %v215_v63  ;;  %v223_v2 = vrot.slane %v215_v63, %v214_v61 }
 0x1eb   :  { %v230_v3 = vrot.slane %v216_v1, %v214_v61  ;;  %v234_v4 = vrot.slane %v223_v2, %v233_v0 }
 0x1ed   :  { %v238_v5 = vrot.slane %v230_v3, %v233_v0  ;;  %v241_v6 = vmul.f32 %v234_v4, %v16_v12 }
 0x1ef   :  { %v242_v7 = vmul.f32 %v238_v5, %v17_v13  ;;  %v243_v8 = vpack.c.bf16 %v241_v6, %v241_v6 }
 0x1f1   :  { %v244_v9 = vpack.c.bf16 %v242_v7, %v242_v7  ;;  %245 = vst [vmem:[%s456_s3] sm:$0x3] %v243_v8 }
 0x1f3   :  { %246 = vst [vmem:[%s456_s3 + $0x2] sm:$0x3] %v244_v9 }

// kernel: improved_cnn_forward.18
= control target key start
LH: loop header
LB: loop body
LE: loop exit
PB: predicated region body
PF: predicated region fallthrough
CT: control target
= control target key end

     0   :  { %s2154_s12 = smov 0   ;;  %s2557_s0 = inlined_call_operand.vmem [shape: bf16[2,4,4,128], index: 0, kind: input, shape index: {}]   ;;  %s2558_s1 = inlined_call_operand.vmem [shape: bf16[9,128,128], index: 1, kind: input, shape index: {}]   ;;  %s2559_s2 = inlined_call_operand.vmem [shape: f32[1,128], index: 2, kind: input, shape index: {}]   ;;  %s2560_s3 = inlined_call_operand.vmem [shape: bf16[2,4,128], index: 3, kind: output, shape index: {}]  }
   0x1 LB: > { %s1534_s13 = sadd.s32 4294967295, %s2129_s12   ;;  %p1538_p0 = scmp.ge.s32.totalorder %s2129_s12, 1  ;;  %s2129_s12 = sphi %s2154_s12, %s13_s12  }
   0x2   : > { %p137_p1 = scmp.lt.s32.totalorder %s2129_s12, 3 }
   0x4   : > { %p138_p2 = pnand %p1538_p0, %p137_p1 }
   0x5   : > { %v2051_v0 = vld [vmem:[%s2558_s1 + $0x40] sm:$0xff] (!%p138_p2)   ;;  %v2131_v1 = vmov (!%p138_p2), 0.0   ;;  %v2053_v3 = vld [vmem:[%s2558_s1 + $0x48] sm:$0xff] (!%p138_p2)   ;;  %vm2132_vm0 = vmmov (!%p138_p2), 0   ;;  %p160_p3 = scmp.lt.s32.totalorder (!%p138_p2), %s1534_s13, 1  ;;  %v2055_v5 = vld [vmem:[%s2558_s1 + $0x50] sm:$0xff] (!%p138_p2)   ;;  %v262_v16 = vlaneseq (!%p138_p2) }
   0x6   : > { %141 = sbr.rel (%p138_p2) target bundleno = 388 (0x184), region = 32  ;;  %1860 = vmatprep.subr.bf16.mxu0 (!%p138_p2), %v2131_v1  ;;  %1880 = vmatprep.subr.bf16.mxu1 (!%p138_p2), %v2131_v1  ;;  %v2052_v2 = vld [vmem:[%s2558_s1] sm:$0xff] (!%p138_p2)   ;;  %v2054_v4 = vld [vmem:[%s2558_s1 + $0x8] sm:$0xff] (!%p138_p2)   ;;  %v2056_v6 = vld [vmem:[%s2558_s1 + $0x10] sm:$0xff] (!%p138_p2)   ;;  %vm208_vm1 = vsmask.f32 (!%p138_p2), 256 }
   0x7   : > { %1861 = vmatpush3.bf16.msra.mxu0 (!%p138_p2), %v2051_v0  ;;  %1876 = vmatprep.mubr.msk.bf16.mxu0 (!%p138_p2), %vm2132_vm0, %v2131_v1  ;;  %v2057_v7 = vld [vmem:[%s2558_s1 + $0x58] sm:$0xff] (!%p138_p2)   ;;  %v2059_v9 = vld [vmem:[%s2558_s1 + $0x60] sm:$0xff] (!%p138_p2)   ;;  %v2061_v11 = vld [vmem:[%s2558_s1 + $0x68] sm:$0xff] (!%p138_p2)   ;;  %vm209_vm2 = vsmask.f32 (!%p138_p2), 1284  ;;  %v263_v28 = vshrl.u32 (!%p138_p2), %v262_v16, 7 }
   0x8   : > { %1881 = vmatpush3.bf16.msra.mxu1 (!%p138_p2), %v2052_v2  ;;  %1862 = vmatprep.subr.bf16.mxu0 (!%p138_p2), %v2131_v1  ;;  %v2058_v8 = vld [vmem:[%s2558_s1 + $0x18] sm:$0xff] (!%p138_p2)   ;;  %v2060_v10 = vld [vmem:[%s2558_s1 + $0x20] sm:$0xff] (!%p138_p2)   ;;  %v2062_v13 = vld [vmem:[%s2558_s1 + $0x28] sm:$0xff] (!%p138_p2)   ;;  %vm211_vm4 = vsmask.f32 (!%p138_p2), 2312 }
   0x9   : > { %1882 = vmatprep.subr.bf16.mxu1 (!%p138_p2), %v2131_v1  ;;  %1896 = vmatprep.mubr.msk.bf16.mxu1 (!%p138_p2), %vm2132_vm0, %v2131_v1  ;;  %vm210_vm3 = vmor (!%p138_p2), %vm208_vm1, %vm209_vm2  ;;  %vm213_vm5 = vsmask.f32 (!%p138_p2), 3340  ;;  %vm215_vm6 = vsmask.f32 (!%p138_p2), 4368  ;;  %vm217_vm8 = vsmask.f32 (!%p138_p2), 5396 }
   0xa   : > { %vm212_vm7 = vmor (!%p138_p2), %vm210_vm3, %vm211_vm4  ;;  %vm219_vm9 = vsmask.f32 (!%p138_p2), 6424  ;;  %vm221_vm10 = vsmask.f32 (!%p138_p2), 7452  ;;  %v2063_v18 = vld [vmem:[%s2558_s1 + $0x70] sm:$0xff] (!%p138_p2)   ;;  %v2065_v34 = vld [vmem:[%s2558_s1 + $0x78] sm:$0xff] (!%p138_p2)  }
   0xb   : > { %1863 = vmatpush3.bf16.msra.mxu0 (!%p138_p2), %v2053_v3  ;;  %vm214_vm11 = vmor (!%p138_p2), %vm212_vm7, %vm213_vm5  ;;  %v2064_v25 = vld [vmem:[%s2558_s1 + $0x30] sm:$0xff] (!%p138_p2)   ;;  %v2133_v26 = vmov (!%p138_p2), 1966171168   ;;  %v2066_v37 = vld [vmem:[%s2558_s1 + $0x38] sm:$0xff] (!%p138_p2)  }
   0xc   : > { %1883 = vmatpush3.bf16.msra.mxu1 (!%p138_p2), %v2054_v4  ;;  %1864 = vmatprep.subr.bf16.mxu0 (!%p138_p2), %v2131_v1  ;;  %vm216_vm12 = vmor (!%p138_p2), %vm214_vm11, %vm215_vm6  ;;  %v260_v27 = vunpack.c.l.s4 (!%p138_p2), %v2133_v26  ;;  %v2067_v42 = vld [vmem:[%s2558_s1 + $0x80] sm:$0xff] (!%p138_p2)   ;;  %v2069_v44 = vld [vmem:[%s2558_s1 + $0x88] sm:$0xff] (!%p138_p2)  }
   0xd   : > { %s2564_s13 = smov (!%p160_p3, %s1534_s13), 1  ;;  %1884 = vmatprep.subr.bf16.mxu1 %v2131_v1  ;;  %vm218_vm13 = vmor %vm216_vm12, %vm217_vm8  ;;  %v2068_v43 = vld [vmem:[%s2558_s1 + $0xc0] sm:$0xff]   ;;  %v2070_v45 = vld [vmem:[%s2558_s1 + $0xc8] sm:$0xff]  }
   0xe   : > { %s1778_s28 = sshll.u32 %s2564_s13, 3  ;;  %vm220_vm14 = vmor %vm218_vm13, %vm219_vm9  ;;  %v261_v30 = vunpack.c.0.s8 %v260_v27  ;;  %v2071_v46 = vld [vmem:[%s2558_s1 + $0x90] sm:$0xff]   ;;  %v2073_v48 = vld [vmem:[%s2558_s1 + $0x98] sm:$0xff]   ;;  %s1541_s18 = sshll.u32 %s2564_s13, 1 }
   0xf   : > { %1865 = vmatpush3.bf16.msra.mxu0 %v2055_v5  ;;  %s2204_s6 = scalar_lea.vmem %s2557_s0, %s1778_s28  ;;  %vm2238_vm15 = vmor %vm220_vm14, %vm221_vm10  ;;  %v2072_v47 = vld [vmem:[%s2558_s1 + $0xd0] sm:$0xff]   ;;  %v2074_v49 = vld [vmem:[%s2558_s1 + $0xd8] sm:$0xff]   ;;  %s168_s21 = scalar_lea.vmem %s2560_s3, %s1541_s18 }
  0x10   : > { %1885 = vmatpush3.bf16.msra.mxu1 %v2056_v6  ;;  %1866 = vmatprep.subr.bf16.mxu0 %v2131_v1  ;;  %v1542_v12 = vld.sshfl [vmem:[%s2204_s6] sm:$0x11 pattern:$0x75316420]  ;;  %v171_v24 = vld [vmem:[%s2204_s6 + $0x2] sm:$0x1]  ;;  %v2252_v36 = vsub.s32 %v261_v30, %v263_v28 }
  0x11   : > { %1886 = vmatprep.subr.bf16.mxu1 %v2131_v1  ;;  %v1543_v14 = vld.sshfl [vmem:[%s2204_s6 + $0x2] sm:$0x11 pattern:$0x75316420]  ;;  %v199_v15 = vcombine.high %v1542_v12, %v1542_v12  ;;  %v224_v19 = vshrl.u32 %v1542_v12, 16  ;;  %v2077_v52 = vld [vmem:[%s2558_s1 + $0xa8] sm:$0xff]  }
  0x12   : > { %v207_v17 = vcombine.high %v1543_v14, %v1543_v14  ;;  %v233_v21 = vshrl.u32 %v1543_v14, 16  ;;  %v170_v23 = vld [vmem:[%s2204_s6] sm:$0x1]  ;;  %v2078_v55 = vld [vmem:[%s2558_s1 + $0xe8] sm:$0xff]   ;;  %v1605_v56 = vld [vmem:[%s2204_s6 + $0x2] sm:$0x1] }
  0x13   : > { %1867 = vmatpush3.bf16.msra.mxu0 %v2057_v7  ;;  %v229_v20 = vshll.u32 %v199_v15, 16  ;;  %v364_v31 = vcombine.low %v170_v23, %v171_v24  ;;  %v2075_v50 = vld [vmem:[%s2558_s1 + $0xa0] sm:$0xff]   ;;  %v2079_v59 = vld [vmem:[%s2558_s1 + $0xb0] sm:$0xff]   ;;  %v2081_v3 = vld [vmem:[%s2558_s1 + $0xb8] sm:$0xff]  }
  0x14   : > { %1887 = vmatpush3.bf16.msra.mxu1 %v2058_v8  ;;  %1868 = vmatprep.subr.bf16.mxu0 %v2131_v1  ;;  %v238_v22 = vshll.u32 %v207_v17, 16  ;;  %v2076_v51 = vld [vmem:[%s2558_s1 + $0xe0] sm:$0xff]   ;;  %v2080_v61 = vld [vmem:[%s2558_s1 + $0xf0] sm:$0xff]   ;;  %v2082_v5 = vld [vmem:[%s2558_s1 + $0xf8] sm:$0xff]  }
  0x15   : > { %1888 = vmatprep.subr.bf16.mxu1 %v2131_v1  ;;  %v231_v32 = vsel %vm2238_vm15, %v224_v19, %v229_v20  ;;  %v371_v39 = vrot.slane %v364_v31, %v2252_v36  ;;  %v1578_v53 = vld.sshfl [vmem:[%s2204_s6] sm:$0x10 pattern:$0x75316420]  ;;  %v1606_v57 = vld [vmem:[%s2204_s6 + $0x4] sm:$0x1] }
  0x16   : > { %v2246_v33 = vsel %vm2238_vm15, %v233_v21, %v238_v22  ;;  %v2312_v54 = vld.sshfl [vmem:[%s2204_s6 + $0x2] sm:$0x10 pattern:$0x75316420]  ;;  %v632_v60 = vcombine.low %v1605_v56, %v1606_v57  ;;  %v2085_v14 = vld [vmem:[%s2558_s1 + $0x108] sm:$0xff]   ;;  %v2087_v17 = vld [vmem:[%s2558_s1 + $0x110] sm:$0xff]  }
  0x17   : > { %1869 = vmatpush3.bf16.msra.mxu0 %v2059_v9  ;;  %v258_v35 = vcombine.low %v231_v32, %v2246_v33  ;;  %v378_v41 = vrot.slane %v371_v39, %v2252_v36  ;;  %v1596_v58 = vcombine.high %v1578_v53, %v2312_v54  ;;  %v1634_v62 = vld.sshfl [vmem:[%s2204_s6 + $0x4] sm:$0x11 pattern:$0x75316420]  ;;  %v2086_v16 = vld [vmem:[%s2558_s1 + $0x148] sm:$0xff]   ;;  %v2089_v19 = vld [vmem:[%s2558_s1 + $0x118] sm:$0xff]  }
  0x18   : > { %1889 = vmatpush3.bf16.msra.mxu1 %v2060_v10  ;;  %1870 = vmatprep.subr.bf16.mxu0 %v2131_v1  ;;  %v756_v0 = vcombine.high %v1634_v62, %v1634_v62  ;;  %v767_v2 = vshrl.u32 %v1634_v62, 16  ;;  %v639_v4 = vrot.slane %v632_v60, %v2252_v36  ;;  %v2083_v9 = vld [vmem:[%s2558_s1 + $0x100] sm:$0xff]   ;;  %v2090_v20 = vld [vmem:[%s2558_s1 + $0x158] sm:$0xff]   ;;  %v2093_v30 = vld [vmem:[%s2558_s1 + $0x128] sm:$0xff]  }
  0x19   : > { %1890 = vmatprep.subr.bf16.mxu1 %v2131_v1  ;;  %v265_v38 = vrot.slane %v258_v35, %v2252_v36  ;;  %v512_v63 = vrot.slane %v1596_v58, %v2252_v36  ;;  %v2084_v12 = vld [vmem:[%s2558_s1 + $0x140] sm:$0xff]   ;;  %v2094_v31 = vld [vmem:[%s2558_s1 + $0x168] sm:$0xff]   ;;  %v2111_v57 = vld [vmem:[%s2558_s1 + $0x1b0] sm:$0xff]  }
  0x1a   : > { %v772_v6 = vshll.u32 %v756_v0, 16  ;;  %v646_v10 = vrot.slane %v639_v4, %v2252_v36  ;;  %v1719_v21 = vld.sshfl [vmem:[%s2204_s6 + $0x6] sm:$0x11 pattern:$0x75316420]  ;;  %v2112_v58 = vld [vmem:[%s2558_s1 + $0x1f0] sm:$0xff]  }
  0x1b   : > { %1871 = vmatpush3.bf16.msra.mxu0 %v2061_v11  ;;  %v272_v40 = vrot.slane %v265_v38, %v2252_v36  ;;  %v519_v7 = vrot.slane %v512_v63, %v2252_v36  ;;  %v1185_v22 = vcombine.high %v1719_v21, %v1719_v21  ;;  %v1196_v23 = vshrl.u32 %v1719_v21, 16  ;;  %v2091_v24 = vld [vmem:[%s2558_s1 + $0x120] sm:$0xff]   ;;  %v2097_v38 = vld [vmem:[%s2558_s1 + $0x138] sm:$0xff]   ;;  %v2116_v0 = vld [vmem:[%s2558_s1 + $0x208] sm:$0xff]  }
  0x1c   : > { %1891 = vmatpush3.bf16.msra.mxu1 %v2062_v13  ;;  %1872 = vmatprep.subr.bf16.mxu0 %v2131_v1  ;;  %v774_v8 = vsel %vm2238_vm15, %v767_v2, %v772_v6  ;;  %v2092_v26 = vld [vmem:[%s2558_s1 + $0x160] sm:$0xff]   ;;  %v2113_v60 = vld [vmem:[%s2558_s1 + $0x1b8] sm:$0xff]   ;;  %v2117_v2 = vld [vmem:[%s2558_s1 + $0x210] sm:$0xff]  }
  0x1d   : > { %1892 = vmatprep.subr.bf16.mxu1 %v2131_v1  ;;  %v792_v11 = vcombine.low %v2246_v33, %v774_v8  ;;  %v2406_v32 = vld.sshfl [vmem:[%s2204_s6 + $0x4] sm:$0x10 pattern:$0x75316420]  ;;  %v1690_v53 = vld [vmem:[%s2204_s6 + $0x4] sm:$0x1] }
  0x1e   : > { %v1681_v35 = vcombine.high %v2312_v54, %v2406_v32  ;;  %v1691_v54 = vld [vmem:[%s2204_s6 + $0x6] sm:$0x1]  ;;  %v1749_v6 = vld.sshfl [vmem:[%s2204_s6 + $0x6] sm:$0x10 pattern:$0x75316420] }
  0x1f   : > { %1873 = vmatpush3.bf16.msra.mxu0 %v2063_v18  ;;  %v2355_v13 = vrot.slane %v792_v11, %v2252_v36  ;;  %v2088_v18 = vld [vmem:[%s2558_s1 + $0x150] sm:$0xff]   ;;  %v1061_v56 = vcombine.low %v1690_v53, %v1691_v54  ;;  %v2115_v63 = vld [vmem:[%s2558_s1 + $0x200] sm:$0xff]  }
  0x20   : > { %1893 = vmatpush3.bf16.msra.mxu1 %v2064_v25  ;;  %1874 = vmatprep.subr.bf16.mxu0 %v2131_v1  ;;  %v1201_v25 = vshll.u32 %v1185_v22, 16  ;;  %v941_v39 = vrot.slane %v1681_v35, %v2252_v36  ;;  %v2119_v4 = vld [vmem:[%s2558_s1 + $0x220] sm:$0xff]  }
  0x21   : > { %1894 = vmatprep.subr.bf16.mxu1 %v2131_v1  ;;  %v806_v15 = vrot.slane %v2355_v13, %v2252_v36 }
  0x22   : > { %v1203_v27 = vsel %vm2238_vm15, %v1196_v23, %v1201_v25 }
  0x23   : > { %1875 = vmatpush3.bf16.msra.mxu0 %v2065_v34  ;;  %v1221_v28 = vcombine.low %v774_v8, %v1203_v27  ;;  %v2095_v34 = vld [vmem:[%s2558_s1 + $0x130] sm:$0xff]  }
  0x24   : > { %1895 = vmatpush3.bf16.msra.mxu1 %v2066_v37  ;;  %1900 = vmatprep.subr.bf16.mxu0 %v2131_v1  ;;  %v2096_v37 = vld [vmem:[%s2558_s1 + $0x170] sm:$0xff]  }
  0x25   : > { %1920 = vmatprep.subr.bf16.mxu1 %v2131_v1  ;;  %v2409_v33 = vrot.slane %v1221_v28, %v2252_v36  ;;  %v2121_v8 = vld [vmem:[%s2558_s1 + $0x230] sm:$0xff]  }
  0x26   : > { %1877 = vmatmul.mubr.bf16.vlgmr.msra.gmra.mrb[0].mxu0 %v272_v40  ;;  %v2098_v40 = vld [vmem:[%s2558_s1 + $0x178] sm:$0xff]  }
  0x27   : > { %1897 = vmatmul.mubr.bf16.vlgmr.msra.gmra.mrb[0].mxu1 %v378_v41  ;;  %1901 = vmatpush3.bf16.msra.mxu0 %v2067_v42  ;;  %v1235_v29 = vrot.slane %v2409_v33, %v2252_v36  ;;  %v2099_v41 = vld [vmem:[%s2558_s1 + $0x180] sm:$0xff]   ;;  %v948_v42 = vrot.slane %v941_v39, %v2252_v36 }
  0x28   : > { %1921 = vmatpush3.bf16.msra.mxu1 %v2068_v43  ;;  %1902 = vmatprep.subr.bf16.mxu0 %v2131_v1  ;;  %v2100_v43 = vld [vmem:[%s2558_s1 + $0x1c0] sm:$0xff]  }
  0x29   : > { %1922 = vmatprep.subr.bf16.mxu1 %v2131_v1  ;;  %1916 = vmatprep.mubr.msk.bf16.mxu0 %vm2132_vm0, %v2131_v1 }
  0x2a   : > { %1936 = vmatprep.mubr.msk.bf16.mxu1 %vm2132_vm0, %v2131_v1 }
  0x2b   : > { %1903 = vmatpush3.bf16.msra.mxu0 %v2069_v44  ;;  %v2101_v44 = vld [vmem:[%s2558_s1 + $0x188] sm:$0xff]  }
  0x2c   : > { %1923 = vmatpush3.bf16.msra.mxu1 %v2070_v45  ;;  %1904 = vmatprep.subr.bf16.mxu0 %v2131_v1  ;;  %v2102_v45 = vld [vmem:[%s2558_s1 + $0x1c8] sm:$0xff]  }
  0x2d   : > { %1924 = vmatprep.subr.bf16.mxu1 %v2131_v1 }
  0x2f   : > { %1905 = vmatpush3.bf16.msra.mxu0 %v2071_v46  ;;  %v2103_v46 = vld [vmem:[%s2558_s1 + $0x190] sm:$0xff]  }
  0x30   : > { %1925 = vmatpush3.bf16.msra.mxu1 %v2072_v47  ;;  %1906 = vmatprep.subr.bf16.mxu0 %v2131_v1  ;;  %v2104_v47 = vld [vmem:[%s2558_s1 + $0x1d0] sm:$0xff]  }
  0x31   : > { %1926 = vmatprep.subr.bf16.mxu1 %v2131_v1 }
  0x33   : > { %1907 = vmatpush3.bf16.msra.mxu0 %v2073_v48  ;;  %v2105_v48 = vld [vmem:[%s2558_s1 + $0x198] sm:$0xff]  }
  0x34   : > { %1927 = vmatpush3.bf16.msra.mxu1 %v2074_v49  ;;  %1908 = vmatprep.subr.bf16.mxu0 %v2131_v1  ;;  %v2106_v49 = vld [vmem:[%s2558_s1 + $0x1d8] sm:$0xff]  }
  0x35   : > { %1928 = vmatprep.subr.bf16.mxu1 %v2131_v1 }
  0x37   : > { %1909 = vmatpush3.bf16.msra.mxu0 %v2075_v50  ;;  %v2107_v50 = vld [vmem:[%s2558_s1 + $0x1a0] sm:$0xff]  }
  0x38   : > { %1929 = vmatpush3.bf16.msra.mxu1 %v2076_v51  ;;  %1910 = vmatprep.subr.bf16.mxu0 %v2131_v1  ;;  %v2108_v51 = vld [vmem:[%s2558_s1 + $0x1e0] sm:$0xff]  }
  0x39   : > { %1930 = vmatprep.subr.bf16.mxu1 %v2131_v1 }
  0x3b   : > { %1911 = vmatpush3.bf16.msra.mxu0 %v2077_v52  ;;  %v2109_v52 = vld [vmem:[%s2558_s1 + $0x1a8] sm:$0xff]  }
  0x3c   : > { %1931 = vmatpush3.bf16.msra.mxu1 %v2078_v55  ;;  %1912 = vmatprep.subr.bf16.mxu0 %v2131_v1  ;;  %v2110_v55 = vld [vmem:[%s2558_s1 + $0x1e8] sm:$0xff]  }
  0x3d   : > { %1932 = vmatprep.subr.bf16.mxu1 %v2131_v1 }
  0x3f   : > { %1913 = vmatpush3.bf16.msra.mxu0 %v2079_v59  ;;  %v1068_v59 = vrot.slane %v1061_v56, %v2252_v36 }
  0x40   : > { %1933 = vmatpush3.bf16.msra.mxu1 %v2080_v61  ;;  %1914 = vmatprep.subr.bf16.mxu0 %v2131_v1  ;;  %v2114_v61 = vld [vmem:[%s2558_s1 + $0x1f8] sm:$0xff]  }
  0x41   : > { %1934 = vmatprep.subr.bf16.mxu1 %v2131_v1  ;;  %v1075_v62 = vrot.slane %v1068_v59, %v2252_v36 }
  0x43   : > { %1915 = vmatpush3.bf16.msra.mxu0 %v2081_v3  ;;  %v2118_v3 = vld [vmem:[%s2558_s1 + $0x218] sm:$0xff]  }
  0x44   : > { %1935 = vmatpush3.bf16.msra.mxu1 %v2082_v5  ;;  %1940 = vmatprep.subr.bf16.mxu0 %v2131_v1  ;;  %v2120_v5 = vld [vmem:[%s2558_s1 + $0x228] sm:$0xff]  }
  0x45   : > { %1960 = vmatprep.subr.bf16.mxu1 %v2131_v1 }
  0x46   : > { %1917 = vmatmul.mubr.bf16.vlgmr.msra.gmra.mrb[4].mxu0 %v519_v7  ;;  %v1766_v7 = vcombine.high %v2406_v32, %v1749_v6 }
  0x47   : > { %1941 = vmatpush3.bf16.msra.mxu0 %v2083_v9  ;;  %1937 = vmatmul.mubr.bf16.vlgmr.msra.gmra.mrb[4].mxu1 %v646_v10  ;;  %v2122_v10 = vld [vmem:[%s2558_s1 + $0x238] sm:$0xff]  }
  0x48   : > { %1961 = vmatpush3.bf16.msra.mxu1 %v2084_v12  ;;  %1942 = vmatprep.subr.bf16.mxu0 %v2131_v1  ;;  %v1370_v9 = vrot.slane %v1766_v7, %v2252_v36 }
  0x49   : > { %1962 = vmatprep.subr.bf16.mxu1 %v2131_v1  ;;  %1956 = vmatprep.mubr.msk.bf16.mxu0 %vm2132_vm0, %v2131_v1 }
  0x4a   : > { %1976 = vmatprep.mubr.msk.bf16.mxu1 %vm2132_vm0, %v2131_v1  ;;  %v1377_v11 = vrot.slane %v1370_v9, %v2252_v36 }
  0x4b   : > { %1943 = vmatpush3.bf16.msra.mxu0 %v2085_v14 }
  0x4c   : > { %1963 = vmatpush3.bf16.msra.mxu1 %v2086_v16  ;;  %1944 = vmatprep.subr.bf16.mxu0 %v2131_v1 }
  0x4d   : > { %1964 = vmatprep.subr.bf16.mxu1 %v2131_v1 }
  0x4f   : > { %1945 = vmatpush3.bf16.msra.mxu0 %v2087_v17 }
  0x50   : > { %1965 = vmatpush3.bf16.msra.mxu1 %v2088_v18  ;;  %1946 = vmatprep.subr.bf16.mxu0 %v2131_v1 }
  0x51   : > { %1966 = vmatprep.subr.bf16.mxu1 %v2131_v1 }
  0x53   : > { %1947 = vmatpush3.bf16.msra.mxu0 %v2089_v19 }
  0x54   : > { %1967 = vmatpush3.bf16.msra.mxu1 %v2090_v20  ;;  %1948 = vmatprep.subr.bf16.mxu0 %v2131_v1 }
  0x55   : > { %1968 = vmatprep.subr.bf16.mxu1 %v2131_v1 }
  0x57   : > { %1949 = vmatpush3.bf16.msra.mxu0 %v2091_v24 }
  0x58   : > { %1969 = vmatpush3.bf16.msra.mxu1 %v2092_v26  ;;  %1950 = vmatprep.subr.bf16.mxu0 %v2131_v1 }
  0x59   : > { %1970 = vmatprep.subr.bf16.mxu1 %v2131_v1 }
  0x5b   : > { %1951 = vmatpush3.bf16.msra.mxu0 %v2093_v30 }
  0x5c   : > { %1971 = vmatpush3.bf16.msra.mxu1 %v2094_v31  ;;  %1952 = vmatprep.subr.bf16.mxu0 %v2131_v1 }
  0x5d   : > { %1972 = vmatprep.subr.bf16.mxu1 %v2131_v1 }
  0x5f   : > { %1953 = vmatpush3.bf16.msra.mxu0 %v2095_v34 }
  0x60   : > { %1973 = vmatpush3.bf16.msra.mxu1 %v2096_v37  ;;  %1954 = vmatprep.subr.bf16.mxu0 %v2131_v1 }
  0x61   : > { %1974 = vmatprep.subr.bf16.mxu1 %v2131_v1 }
  0x63   : > { %1955 = vmatpush3.bf16.msra.mxu0 %v2097_v38 }
  0x64   : > { %1975 = vmatpush3.bf16.msra.mxu1 %v2098_v40  ;;  %1980 = vmatprep.subr.bf16.mxu0 %v2131_v1 }
  0x65   : > { %2000 = vmatprep.subr.bf16.mxu1 %v2131_v1 }
  0x66   : > { %1957 = vmatmul.mubr.bf16.vlgmr.msra.gmra.mrb[8].mxu0 %v806_v15 }
  0x67   : > { %1981 = vmatpush3.bf16.msra.mxu0 %v2099_v41  ;;  %1977 = vmatmul.mubr.bf16.vlgmr.msra.gmra.mrb[8].mxu1 %v948_v42 }
  0x68   : > { %2001 = vmatpush3.bf16.msra.mxu1 %v2100_v43  ;;  %1982 = vmatprep.subr.bf16.mxu0 %v2131_v1 }
  0x69   : > { %2002 = vmatprep.subr.bf16.mxu1 %v2131_v1  ;;  %1996 = vmatprep.mubr.msk.bf16.mxu0 %vm2132_vm0, %v2131_v1 }
  0x6a   : > { %2016 = vmatprep.mubr.msk.bf16.mxu1 %vm2132_vm0, %v2131_v1 }
  0x6b   : > { %1983 = vmatpush3.bf16.msra.mxu0 %v2101_v44 }
  0x6c   : > { %2003 = vmatpush3.bf16.msra.mxu1 %v2102_v45  ;;  %1984 = vmatprep.subr.bf16.mxu0 %v2131_v1 }
  0x6d   : > { %2004 = vmatprep.subr.bf16.mxu1 %v2131_v1 }
  0x6f   : > { %1985 = vmatpush3.bf16.msra.mxu0 %v2103_v46 }
  0x70   : > { %2005 = vmatpush3.bf16.msra.mxu1 %v2104_v47  ;;  %1986 = vmatprep.subr.bf16.mxu0 %v2131_v1 }
  0x71   : > { %2006 = vmatprep.subr.bf16.mxu1 %v2131_v1 }
  0x73   : > { %1987 = vmatpush3.bf16.msra.mxu0 %v2105_v48 }
  0x74   : > { %2007 = vmatpush3.bf16.msra.mxu1 %v2106_v49  ;;  %1988 = vmatprep.subr.bf16.mxu0 %v2131_v1 }
  0x75   : > { %2008 = vmatprep.subr.bf16.mxu1 %v2131_v1 }
  0x77   : > { %1989 = vmatpush3.bf16.msra.mxu0 %v2107_v50 }
  0x78   : > { %2009 = vmatpush3.bf16.msra.mxu1 %v2108_v51  ;;  %1990 = vmatprep.subr.bf16.mxu0 %v2131_v1  ;;  %v1775_v51 = vld [vmem:[%s2559_s2] ss:$0 sm:$0xff] }
  0x79   : > { %2010 = vmatprep.subr.bf16.mxu1 %v2131_v1 }
  0x7b   : > { %1991 = vmatpush3.bf16.msra.mxu0 %v2109_v52 }
  0x7c   : > { %2011 = vmatpush3.bf16.msra.mxu1 %v2110_v55  ;;  %1992 = vmatprep.subr.bf16.mxu0 %v2131_v1 }
  0x7d   : > { %2012 = vmatprep.subr.bf16.mxu1 %v2131_v1 }
  0x7f   : > { %1993 = vmatpush3.bf16.msra.mxu0 %v2111_v57 }
  0x80   : > { %2013 = vmatpush3.bf16.msra.mxu1 %v2112_v58  ;;  %1994 = vmatprep.subr.bf16.mxu0 %v2131_v1 }
  0x81   : > { %2014 = vmatprep.subr.bf16.mxu1 %v2131_v1 }
  0x83   : > { %1995 = vmatpush3.bf16.msra.mxu0 %v2113_v60 }
  0x84   : > { %2015 = vmatpush3.bf16.msra.mxu1 %v2114_v61  ;;  %2020 = vmatprep.subr.bf16.mxu0 %v2131_v1 }
  0x86   : > { %1997 = vmatmul.mubr.bf16.vlgmr.msra.gmra.mrb[12].mxu0 %v1075_v62 }
  0x87   : > { %2021 = vmatpush3.bf16.msra.mxu0 %v2115_v63  ;;  %2017 = vmatmul.mubr.bf16.vlgmr.msra.gmra.mrb[12].mxu1 %v1235_v29 }
  0x88   : > { %2022 = vmatprep.subr.bf16.mxu0 %v2131_v1  ;;  %2036 = vmatprep.mubr.msk.bf16.mxu0 %vm2132_vm0, %v2131_v1 }
  0x8b   : > { %2023 = vmatpush3.bf16.msra.mxu0 %v2116_v0 }
  0x8c   : > { %2024 = vmatprep.subr.bf16.mxu0 %v2131_v1 }
  0x8f   : > { %2025 = vmatpush3.bf16.msra.mxu0 %v2117_v2 }
  0x90   : > { %2026 = vmatprep.subr.bf16.mxu0 %v2131_v1 }
  0x93   : > { %2027 = vmatpush3.bf16.msra.mxu0 %v2118_v3 }
  0x94   : > { %2028 = vmatprep.subr.bf16.mxu0 %v2131_v1 }
  0x97   : > { %2029 = vmatpush3.bf16.msra.mxu0 %v2119_v4 }
  0x98   : > { %2030 = vmatprep.subr.bf16.mxu0 %v2131_v1 }
  0x9b   : > { %2031 = vmatpush3.bf16.msra.mxu0 %v2120_v5 }
  0x9c   : > { %2032 = vmatprep.subr.bf16.mxu0 %v2131_v1 }
  0x9f   : > { %2033 = vmatpush3.bf16.msra.mxu0 %v2121_v8 }
  0xa0   : > { %2034 = vmatprep.subr.bf16.mxu0 %v2131_v1 }
  0xa3   : > { %2035 = vmatpush3.bf16.msra.mxu0 %v2122_v10 }
  0xa6   : > { %2037 = vmatmul.mubr.bf16.vlgmr.msra.gmra.mrb[16].mxu0 %v1377_v11 }
  0xf9   : > { %v356_v12 = vpop.f32.mrb[0].mxu0 }
  0xfa   : > { %v1878_v13 = vpop.f32.mrb[1].mxu0  ;;  %v462_v14 = vpop.f32.mrb[0].mxu1 }
  0xfb   : > { %v463_v15 = vadd.f32 %v462_v14, %v356_v12  ;;  %v359_v16 = vpop.f32.mrb[2].mxu0  ;;  %v1898_v17 = vpop.f32.mrb[1].mxu1 }
  0xfc   : > { %v1879_v18 = vpop.f32.mrb[3].mxu0  ;;  %v465_v19 = vpop.f32.mrb[2].mxu1 }
  0xfd   : > { %v1899_v20 = vpop.f32.mrb[3].mxu1 }
 0x119   : > { %v603_v21 = vpop.f32.mrb[4].mxu0 }
 0x11a   : > { %v609_v22 = vadd.f32 %v603_v21, %v463_v15  ;;  %v1918_v23 = vpop.f32.mrb[5].mxu0  ;;  %v730_v24 = vpop.f32.mrb[4].mxu1 }
 0x11b   : > { %v606_v25 = vpop.f32.mrb[6].mxu0  ;;  %v1938_v26 = vpop.f32.mrb[5].mxu1 }
 0x11c   : > { %v736_v1 = vadd.f32 %v730_v24, %v609_v22  ;;  %v1919_v27 = vpop.f32.mrb[7].mxu0  ;;  %v733_v36 = vpop.f32.mrb[6].mxu1 }
 0x11d   : > { %v1939_v28 = vpop.f32.mrb[7].mxu1 }
 0x139   : > { %v890_v30 = vpop.f32.mrb[8].mxu0 }
 0x13a   : > { %v896_v31 = vadd.f32 %v890_v30, %v736_v1  ;;  %v1958_v32 = vpop.f32.mrb[9].mxu0  ;;  %v1032_v33 = vpop.f32.mrb[8].mxu1 }
 0x13b   : > { %v893_v29 = vpop.f32.mrb[10].mxu0  ;;  %v1978_v34 = vpop.f32.mrb[9].mxu1 }
 0x13c   : > { %v1038_v35 = vadd.f32 %v1032_v33, %v896_v31  ;;  %v1959_v37 = vpop.f32.mrb[11].mxu0  ;;  %v1035_v38 = vpop.f32.mrb[10].mxu1 }
 0x13d   : > { %v1979_v39 = vpop.f32.mrb[11].mxu1 }
 0x159   : > { %v1159_v40 = vpop.f32.mrb[12].mxu0 }
 0x15a   : > { %v1165_v41 = vadd.f32 %v1159_v40, %v1038_v35  ;;  %v1998_v42 = vpop.f32.mrb[13].mxu0  ;;  %v1319_v43 = vpop.f32.mrb[12].mxu1 }
 0x15b   : > { %v1162_v44 = vpop.f32.mrb[14].mxu0  ;;  %v2018_v45 = vpop.f32.mrb[13].mxu1 }
 0x15c   : > { %v1325_v46 = vadd.f32 %v1319_v43, %v1165_v41  ;;  %v1999_v47 = vpop.f32.mrb[15].mxu0  ;;  %v1322_v48 = vpop.f32.mrb[14].mxu1 }
 0x15d   : > { %v2019_v49 = vpop.f32.mrb[15].mxu1 }
 0x179   : > { %v1461_v50 = vpop.f32.mrb[16].mxu0 }
 0x17a   : > { %v1467_v52 = vadd.f32 %v1461_v50, %v1325_v46  ;;  %v2038_v53 = vpop.f32.mrb[17].mxu0 }
 0x17b   : > { %v1464_v54 = vpop.f32.mrb[18].mxu0 }
 0x17c   : > { %v1475_v55 = vadd.f32 %v1775_v51, %v1467_v52  ;;  %v2039_v56 = vpop.f32.mrb[19].mxu0 }
 0x17e   : > { %vm1476_vm0 = vcmp.ge.f32.partialorder %v1475_v55, 0.0  ;;  %v1477_v57 = vmul.f32 0.01, %v1475_v55 }
 0x180   : > { %v1478_v58 = vsel %vm1476_vm0, %v1475_v55, %v1477_v57 }
 0x181   : > { %v1479_v59 = vpack.c.bf16 %v1478_v58, %v1478_v58 }
 0x183   : > { %1480 = vst [vmem:[%s168_s21] sm:$0x3] %v1479_v59 }
 0x184 PF: > { %s13_s12 = sadd.s32 1, %s2129_s12  }
 0x185   : > { %p10_p4 = scmp.ge.s32.totalorder %s13_s12, 4  }
 0x187   :  { %12 = sbr.rel (!%p10_p4) target bundleno = 1 (0x1), region = 72 }

// kernel: improved_cnn_forward.21
= control target key start
LH: loop header
LB: loop body
LE: loop exit
PB: predicated region body
PF: predicated region fallthrough
CT: control target
= control target key end

     0   :  { %v415_v7 = vmov 0.0   ;;  %vm25_vm0 = vcmask 1043456   ;;  %s665_s0 = inlined_call_operand.vmem [shape: bf16[2,4,128], index: 0, kind: input, shape index: {}]   ;;  %s666_s1 = inlined_call_operand.vmem [shape: f32[128,256], index: 1, kind: input, shape index: {}]   ;;  %s667_s2 = inlined_call_operand.vmem [shape: f32[1,256], index: 2, kind: input, shape index: {}]   ;;  %s668_s3 = inlined_call_operand.vmem [shape: f32[256,6], index: 3, kind: input, shape index: {}]   ;;  %s669_s4 = inlined_call_operand.vmem [shape: f32[1,6], index: 4, kind: input, shape index: {}]   ;;  %s670_s5 = inlined_call_operand.hbm [shape: f32[2,6], index: 5, kind: output, shape index: {}]  }
   0x1   :  { %v43_v0 = vld [vmem:[%s666_s1 + $0x8] sm:$0xff]  ;;  %v45_v1 = vld [vmem:[%s666_s1 + $0x18] sm:$0xff]  ;;  %v42_v2 = vld [vmem:[%s666_s1] sm:$0xff]  ;;  %155 = vmatprep.mubr.f32.mxu0 %v415_v7 }
   0x2   :  { %v325_v3 = vpack.c.bf16 %v45_v1, %v43_v0  ;;  %v44_v4 = vld [vmem:[%s666_s1 + $0x10] sm:$0xff]  ;;  %v47_v5 = vld [vmem:[%s666_s1 + $0x28] sm:$0xff]  ;;  %v49_v6 = vld [vmem:[%s666_s1 + $0x38] sm:$0xff] }
   0x3   :  { %v327_v8 = vpack.c.bf16 %v44_v4, %v42_v2  ;;  %v329_v9 = vpack.c.bf16 %v49_v6, %v47_v5  ;;  %v46_v10 = vld [vmem:[%s666_s1 + $0x20] sm:$0xff]  ;;  %v48_v11 = vld [vmem:[%s666_s1 + $0x30] sm:$0xff]  ;;  %v51_v12 = vld [vmem:[%s666_s1 + $0x48] sm:$0xff] }
   0x4   :  { %326 = vmatprep.subr.bf16.mxu0 %v325_v3  ;;  %v53_v13 = vld [vmem:[%s666_s1 + $0x58] sm:$0xff]  ;;  %v331_v14 = vpack.c.bf16 %v48_v11, %v46_v10  ;;  %v50_v16 = vld [vmem:[%s666_s1 + $0x40] sm:$0xff]  ;;  %v52_v17 = vld [vmem:[%s666_s1 + $0x50] sm:$0xff] }
   0x5   :  { %328 = vmatpush1.bf16.msra.mxu0 %v327_v8  ;;  %v333_v15 = vpack.c.bf16 %v53_v13, %v51_v12  ;;  %v55_v18 = vld [vmem:[%s666_s1 + $0x68] sm:$0xff]  ;;  %v57_v19 = vld [vmem:[%s666_s1 + $0x78] sm:$0xff]  ;;  %v335_v20 = vpack.c.bf16 %v52_v17, %v50_v16  ;;  %v54_v22 = vld [vmem:[%s666_s1 + $0x60] sm:$0xff] }
   0x6   :  { %330 = vmatprep.subr.bf16.mxu0 %v329_v9  ;;  %v337_v21 = vpack.c.bf16 %v57_v19, %v55_v18  ;;  %v56_v23 = vld [vmem:[%s666_s1 + $0x70] sm:$0xff]  ;;  %v59_v24 = vld [vmem:[%s666_s1 + $0x88] sm:$0xff]  ;;  %v61_v25 = vld [vmem:[%s666_s1 + $0x98] sm:$0xff] }
   0x7   :  { %v21_v26 = vld [vmem:[%s665_s0] sm:$0x3]  ;;  %v60_v28 = vld [vmem:[%s666_s1 + $0x90] sm:$0xff]  ;;  %v22_v29 = vld [vmem:[%s665_s0 + $0x2] sm:$0x3]  ;;  %v339_v33 = vpack.c.bf16 %v56_v23, %v54_v22  ;;  %v341_v40 = vpack.c.bf16 %v61_v25, %v59_v24 }
   0x8   :  { %v58_v27 = vld [vmem:[%s666_s1 + $0x80] sm:$0xff]  ;;  %v23_v30 = vunpack.c.l.bf16 %v21_v26  ;;  %v181_v32 = vld [vmem:[%s668_s3 + $0x88] sm:$0xff]  ;;  %v24_v35 = vunpack.c.l.bf16 %v22_v29  ;;  %v182_v39 = vld [vmem:[%s668_s3 + $0x90] sm:$0xff] }
   0x9   :  { %332 = vmatpush1.bf16.msra.mxu0 %v331_v14  ;;  %v180_v31 = vld [vmem:[%s668_s3 + $0x80] sm:$0xff]  ;;  %v63_v34 = vld [vmem:[%s666_s1 + $0xa8] sm:$0xff]  ;;  %v183_v43 = vld [vmem:[%s668_s3 + $0x98] sm:$0xff]  ;;  %v343_v54 = vpack.c.bf16 %v60_v28, %v58_v27 }
   0xa   :  { %334 = vmatprep.subr.bf16.mxu0 %v333_v15  ;;  %v357_v36 = vpack.c.bf16 %v181_v32, %v180_v31  ;;  %v164_v37 = vld [vmem:[%s668_s3] sm:$0xff]  ;;  %v165_v38 = vld [vmem:[%s668_s3 + $0x8] sm:$0xff]  ;;  %v26_v41 = vsel %vm25_vm0, %v23_v30, 0.0  ;;  %v166_v44 = vld [vmem:[%s668_s3 + $0x10] sm:$0xff]  ;;  %v33_v48 = vsel %vm25_vm0, %v24_v35, 0.0  ;;  %v361_v49 = vpack.c.bf16 %v183_v43, %v182_v39 }
   0xb   :  { %v359_v42 = vpack.c.bf16 %v165_v38, %v164_v37  ;;  %v167_v45 = vld [vmem:[%s668_s3 + $0x18] sm:$0xff]  ;;  %v27_v47 = vrot.slane %v26_v41, 4  ;;  %v184_v50 = vld [vmem:[%s668_s3 + $0xa0] sm:$0xff]  ;;  %v185_v51 = vld [vmem:[%s668_s3 + $0xa8] sm:$0xff]  ;;  %v34_v52 = vrot.slane %v33_v48, 4 }
   0xc   :  { %v65_v46 = vld [vmem:[%s666_s1 + $0xb8] sm:$0xff]  ;;  %358 = vmatprep.subr.bf16.mxu1 %v357_v36  ;;  %v363_v53 = vpack.c.bf16 %v167_v45, %v166_v44  ;;  %v62_v55 = vld [vmem:[%s666_s1 + $0xa0] sm:$0xff]  ;;  %v365_v57 = vpack.c.bf16 %v185_v51, %v184_v50  ;;  %v169_v59 = vld [vmem:[%s668_s3 + $0x28] sm:$0xff] }
   0xd   :  { %336 = vmatpush1.bf16.msra.mxu0 %v335_v20  ;;  %360 = vmatpush3.bf16.msra.mxu1 %v359_v42  ;;  %v28_v56 = vadd.f32 %v27_v47, %v26_v41  ;;  %v168_v58 = vld [vmem:[%s668_s3 + $0x20] sm:$0xff]  ;;  %v345_v60 = vpack.c.bf16 %v65_v46, %v63_v34  ;;  %v64_v61 = vld [vmem:[%s666_s1 + $0xb0] sm:$0xff]  ;;  %v35_v62 = vadd.f32 %v34_v52, %v33_v48  ;;  %v187_v0 = vld [vmem:[%s668_s3 + $0xb8] sm:$0xff] }
   0xe   :  { %338 = vmatprep.subr.bf16.mxu0 %v337_v21  ;;  %362 = vmatprep.subr.bf16.mxu1 %v361_v49  ;;  %v186_v63 = vld [vmem:[%s668_s3 + $0xb0] sm:$0xff]  ;;  %v67_v1 = vld [vmem:[%s666_s1 + $0xc8] sm:$0xff]  ;;  %v69_v2 = vld [vmem:[%s666_s1 + $0xd8] sm:$0xff]  ;;  %v367_v6 = vpack.c.bf16 %v169_v59, %v168_v58  ;;  %v347_v7 = vpack.c.bf16 %v64_v61, %v62_v55 }
   0xf   :  { %v29_v3 = vrot.slane %v28_v56, 2  ;;  %v66_v4 = vld [vmem:[%s666_s1 + $0xc0] sm:$0xff]  ;;  %v36_v5 = vrot.slane %v35_v62, 2  ;;  %v369_v9 = vpack.c.bf16 %v187_v0, %v186_v63  ;;  %v170_v10 = vld [vmem:[%s668_s3 + $0x30] sm:$0xff]  ;;  %v171_v11 = vld [vmem:[%s668_s3 + $0x38] sm:$0xff] }
  0x11   :  { %340 = vmatpush1.bf16.msra.mxu0 %v339_v33  ;;  %364 = vmatpush3.bf16.msra.mxu1 %v363_v53  ;;  %v30_v8 = vadd.f32 %v29_v3, %v28_v56 }
  0x12   :  { %342 = vmatprep.subr.bf16.mxu0 %v341_v40  ;;  %366 = vmatprep.subr.bf16.mxu1 %v365_v57 }
  0x15   :  { %344 = vmatpush1.bf16.msra.mxu0 %v343_v54 }
  0x16   :  { %10 = vsyncpa [#allocation3], 0  ;;  %346 = vmatprep.subr.bf16.mxu0 %v345_v60  ;;  %v349_v12 = vpack.c.bf16 %v69_v2, %v67_v1  ;;  %v68_v13 = vld [vmem:[%s666_s1 + $0xd0] sm:$0xff]  ;;  %v37_v14 = vadd.f32 %v36_v5, %v35_v62  ;;  %v188_v15 = vld [vmem:[%s668_s3 + $0xc0] sm:$0xff]  ;;  %v31_v19 = vrot.slane %v30_v8, 1  ;;  %368 = vmatpush3.bf16.msra.mxu1 %v367_v6  ;;  %v371_v21 = vpack.c.bf16 %v171_v11, %v170_v10  ;;  %s416_s23 = smov [#allocation2]  }
  0x17   :  { %v189_v16 = vld [vmem:[%s668_s3 + $0xc8] sm:$0xff]  ;;  %v73_v18 = vld [vmem:[%s666_s1 + $0xf8] sm:$0xff]  ;;  %v351_v22 = vpack.c.bf16 %v68_v13, %v66_v4  ;;  %v70_v23 = vld [vmem:[%s666_s1 + $0xe0] sm:$0xff]  ;;  %370 = vmatprep.subr.bf16.mxu1 %v369_v9  ;;  %vm88_vm1 = vcmask 1041409   ;;  %v76_v54 = vlaneseq  ;;  %s281_s24 = sshll.u32 %s416_s23, 4  ;;  %vm273_vm2 = vcmask 41984   ;;  %s282_s24 = int_to_ptr.vmem [resolvable:$true] %s281_s24 }
  0x18   :  { %v71_v17 = vld [vmem:[%s666_s1 + $0xe8] sm:$0xff]  ;;  %v38_v20 = vrot.slane %v37_v14, 1  ;;  %v32_v24 = vadd.f32 %v31_v19, %v30_v8  ;;  %v373_v25 = vpack.c.bf16 %v189_v16, %v188_v15  ;;  %v172_v26 = vld [vmem:[%s668_s3 + $0x40] sm:$0xff]  ;;  %v72_v29 = vld [vmem:[%s666_s1 + $0xf0] sm:$0xff]  ;;  %p396_p1 = scmp.lt.s32.totalorder %s282_s24, %s282_s24 }
  0x19   :  { %348 = vmatpush1.bf16.msra.mxu0 %v347_v7  ;;  %v173_v27 = vld [vmem:[%s668_s3 + $0x48] sm:$0xff]  ;;  %v353_v28 = vpack.c.bf16 %v73_v18, %v71_v17  ;;  %v190_v31 = vld [vmem:[%s668_s3 + $0xd0] sm:$0xff]  ;;  %v191_v32 = vld [vmem:[%s668_s3 + $0xd8] sm:$0xff]  ;;  %v355_v34 = vpack.c.bf16 %v72_v29, %v70_v23  ;;  %v77_v55 = vshrl.u32 %v76_v54, 7 }
  0x1a   :  { %350 = vmatprep.subr.bf16.mxu0 %v349_v12  ;;  %v39_v30 = vadd.f32 %v38_v20, %v37_v14  ;;  %372 = vmatpush3.bf16.msra.mxu1 %v371_v21  ;;  %v375_v33 = vpack.c.bf16 %v173_v27, %v172_v26  ;;  %v40_v35 = vmul.f32 0.25, %v32_v24  ;;  %v377_v37 = vpack.c.bf16 %v191_v32, %v190_v31  ;;  %v174_v38 = vld [vmem:[%s668_s3 + $0x50] sm:$0xff]  ;;  %v175_v39 = vld [vmem:[%s668_s3 + $0x58] sm:$0xff]  ;;  %v192_v40 = vld [vmem:[%s668_s3 + $0xe0] sm:$0xff] }
  0x1b   :  { %374 = vmatprep.subr.bf16.mxu1 %v373_v25  ;;  %v193_v41 = vld [vmem:[%s668_s3 + $0xe8] sm:$0xff]  ;;  %v379_v42 = vpack.c.bf16 %v175_v39, %v174_v38  ;;  %v176_v45 = vld [vmem:[%s668_s3 + $0x60] sm:$0xff]  ;;  %v194_v48 = vld [vmem:[%s668_s3 + $0xf0] sm:$0xff]  ;;  %v78_v56 = vsub.s32 0, %v77_v55  ;;  %v82_v58 = vsub.s32 1, %v77_v55 }
  0x1c   :  { %v41_v36 = vmul.f32 0.25, %v39_v30  ;;  %v381_v44 = vpack.c.bf16 %v193_v41, %v192_v40  ;;  %v177_v46 = vld [vmem:[%s668_s3 + $0x68] sm:$0xff]  ;;  %v195_v49 = vld [vmem:[%s668_s3 + $0xf8] sm:$0xff]  ;;  %v178_v51 = vld [vmem:[%s668_s3 + $0x70] sm:$0xff] }
  0x1d   :  { %352 = vmatpush1.bf16.msra.mxu0 %v351_v22  ;;  %v383_v47 = vpack.c.bf16 %v177_v46, %v176_v45  ;;  %v385_v50 = vpack.c.bf16 %v195_v49, %v194_v48  ;;  %v179_v52 = vld [vmem:[%s668_s3 + $0x78] sm:$0xff]  ;;  %v74_v57 = vld [vmem:[%s667_s2] sm:$0x3]  ;;  %s391_s2 = scalar_lea.vmem %s282_s24, 32 }
  0x1e   :  { %354 = vmatprep.subr.bf16.mxu0 %v353_v28  ;;  %376 = vmatpush3.bf16.msra.mxu1 %v375_v33  ;;  %v89_v43 = vsel %vm88_vm1, %v41_v36, %v40_v35  ;;  %v387_v53 = vpack.c.bf16 %v179_v52, %v178_v51  ;;  %v79_v59 = vrot.slane %v74_v57, %v78_v56  ;;  %v289_v4 = vld [vmem:[%s669_s4] ss:$0 sm:$0xff]  ;;  %p392_p0 = scmp.ne.s32.totalorder %s282_s24, %s391_s2  ;;  %p397_p2 = scmp.lt.s32.totalorder %s391_s2, %s391_s2 }
  0x1f   :  { %378 = vmatprep.subr.bf16.mxu1 %v377_v37  ;;  %v83_v60 = vrot.slane %v74_v57, %v82_v58 }
  0x20   :  { %p398_p3 = por %p397_p2, %p396_p1 }
  0x21   :  { %356 = vmatpush1.bf16.msra.mxu0 %v355_v34 }
  0x22   :  { %380 = vmatpush3.bf16.msra.mxu1 %v379_v42  ;;  %p399_p4 = pnand %p398_p3, %p392_p0 }
  0x23   :  { %382 = vmatprep.subr.bf16.mxu1 %v381_v44 }
  0x24   :  { %156 = vmatmul.mubr.f32.vlgmr.msra.gmra.mrb[0].mxu0 %v89_v43 }
  0x26   :  { %384 = vmatpush3.bf16.msra.mxu1 %v383_v47 }
  0x27   :  { %386 = vmatprep.subr.bf16.mxu1 %v385_v50 }
  0x2a   :  { %388 = vmatpush3.bf16.msra.mxu1 %v387_v53 }
  0xf7   :  { %v157_v61 = vpop.f32.mrb[0].mxu0 }
  0xf8   :  { %v158_v62 = vadd.f32 %v157_v61, %v79_v59  ;;  %v159_v63 = vpop.f32.mrb[1].mxu0 }
  0xf9   :  { %v160_v0 = vadd.f32 %v159_v63, %v83_v60 }
  0xfa   :  { %v162_v2 = vmax.f32 %v158_v62, 0.0 }
  0xfb   :  { %v163_v1 = vmax.f32 %v160_v0, 0.0 }
  0xfd   :  { %267 = vmatprep.mubr.f32.mxu1 %v163_v1 }
  0xfe   :  { %268 = vmatmul.mubr.f32.vlgmr.msra.gmra.mrb[0].mxu1 %v162_v2 }
 0x1d1   :  { %v322_v3 = vpop.f32.mrb[0].mxu1 }
 0x1d2   :  { %v323_v5 = vpop.f32.mrb[1].mxu1 }
 0x1d3   :  { %v324_v6 = vadd.f32 %v323_v5, %v322_v3 }
 0x1d5   :  { %v270_v7 = vadd.f32 %v324_v6, %v289_v4 }
 0x1d7   :  { %274 = vst.msk [vmem:[#allocation2] sm:$0x3] %vm273_vm2, %v270_v7 }
 0x1d8   :  { %402 = shalt.err (!%p399_p4)
}
 0x1d9   :  { %s403_s27 = scalar_lea.hbm %s670_s5, 32 }
 0x1da   :  { %p404_p5 = scmp.ne.s32.totalorder %s670_s5, %s403_s27  ;;  %p407_p6 = scmp.lt.u32.totalorder %s403_s27, %s670_s5 }
 0x1dc   :  { %p409_p7 = pnand %p407_p6, %p404_p5 }
 0x1de   :  { %412 = shalt.err (!%p409_p7)
}
 0x1df   :  { %284 = dma.vmem_to_hbm [thread:$0]  %s282_s24, 32, %s670_s5, [#allocation3]  }
 0x1e0   :  { %413 = dma.done.wait [#allocation3], 32  }
 0x1e1   :  { %414 = vsyncadd [#allocation3], 4294967264 }
 0x1e2   :  { %288 = vsyncpa [#allocation3], 1 }

// kernel: improved_cnn_forward.19
= control target key start
LH: loop header
LB: loop body
LE: loop exit
PB: predicated region body
PF: predicated region fallthrough
CT: control target
= control target key end

     0   :  { %s2222_s15 = smov 0   ;;  %s2628_s0 = inlined_call_operand.vmem [shape: bf16[2,4,4,128], index: 0, kind: input, shape index: {}]   ;;  %s2629_s1 = inlined_call_operand.vmem [shape: bf16[9,128,128], index: 1, kind: input, shape index: {}]   ;;  %s2630_s2 = inlined_call_operand.vmem [shape: f32[1,128], index: 2, kind: input, shape index: {}]   ;;  %s2631_s3 = inlined_call_operand.vmem [shape: bf16[2,4,128], index: 3, kind: input, shape index: {}]   ;;  %s2632_s4 = inlined_call_operand.vmem [shape: bf16[2,4,128], index: 4, kind: output, shape index: {}]  }
   0x1 LB: > { %s1596_s16 = sadd.s32 4294967295, %s2192_s15   ;;  %p1600_p0 = scmp.ge.s32.totalorder %s2192_s15, 1  ;;  %s2192_s15 = sphi %s2222_s15, %s14_s15  }
   0x2   : > { %p171_p1 = scmp.lt.s32.totalorder %s2192_s15, 3 }
   0x4   : > { %p172_p2 = pnand %p1600_p0, %p171_p1 }
   0x5   : > { %v2114_v0 = vld [vmem:[%s2629_s1 + $0x40] sm:$0xff] (!%p172_p2)   ;;  %v2194_v1 = vmov (!%p172_p2), 0.0   ;;  %v2116_v3 = vld [vmem:[%s2629_s1 + $0x48] sm:$0xff] (!%p172_p2)   ;;  %vm2195_vm0 = vmmov (!%p172_p2), 0   ;;  %p200_p3 = scmp.lt.s32.totalorder (!%p172_p2), %s1596_s16, 1  ;;  %v2118_v5 = vld [vmem:[%s2629_s1 + $0x50] sm:$0xff] (!%p172_p2)   ;;  %v306_v16 = vlaneseq (!%p172_p2) }
   0x6   : > { %175 = sbr.rel (%p172_p2) target bundleno = 393 (0x189), region = 36  ;;  %1923 = vmatprep.subr.bf16.mxu0 (!%p172_p2), %v2194_v1  ;;  %1943 = vmatprep.subr.bf16.mxu1 (!%p172_p2), %v2194_v1  ;;  %v2115_v2 = vld [vmem:[%s2629_s1] sm:$0xff] (!%p172_p2)   ;;  %v2117_v4 = vld [vmem:[%s2629_s1 + $0x8] sm:$0xff] (!%p172_p2)   ;;  %v2119_v6 = vld [vmem:[%s2629_s1 + $0x10] sm:$0xff] (!%p172_p2)   ;;  %vm252_vm1 = vsmask.f32 (!%p172_p2), 256 }
   0x7   : > { %1924 = vmatpush3.bf16.msra.mxu0 (!%p172_p2), %v2114_v0  ;;  %1939 = vmatprep.mubr.msk.bf16.mxu0 (!%p172_p2), %vm2195_vm0, %v2194_v1  ;;  %v2120_v7 = vld [vmem:[%s2629_s1 + $0x58] sm:$0xff] (!%p172_p2)   ;;  %v2122_v9 = vld [vmem:[%s2629_s1 + $0x60] sm:$0xff] (!%p172_p2)   ;;  %v2124_v11 = vld [vmem:[%s2629_s1 + $0x68] sm:$0xff] (!%p172_p2)   ;;  %vm253_vm2 = vsmask.f32 (!%p172_p2), 1284  ;;  %v307_v28 = vshrl.u32 (!%p172_p2), %v306_v16, 7 }
   0x8   : > { %1944 = vmatpush3.bf16.msra.mxu1 (!%p172_p2), %v2115_v2  ;;  %1925 = vmatprep.subr.bf16.mxu0 (!%p172_p2), %v2194_v1  ;;  %v2121_v8 = vld [vmem:[%s2629_s1 + $0x18] sm:$0xff] (!%p172_p2)   ;;  %v2123_v10 = vld [vmem:[%s2629_s1 + $0x20] sm:$0xff] (!%p172_p2)   ;;  %v2125_v13 = vld [vmem:[%s2629_s1 + $0x28] sm:$0xff] (!%p172_p2)   ;;  %vm255_vm4 = vsmask.f32 (!%p172_p2), 2312 }
   0x9   : > { %1945 = vmatprep.subr.bf16.mxu1 (!%p172_p2), %v2194_v1  ;;  %1959 = vmatprep.mubr.msk.bf16.mxu1 (!%p172_p2), %vm2195_vm0, %v2194_v1  ;;  %vm254_vm3 = vmor (!%p172_p2), %vm252_vm1, %vm253_vm2  ;;  %vm257_vm5 = vsmask.f32 (!%p172_p2), 3340  ;;  %vm259_vm6 = vsmask.f32 (!%p172_p2), 4368  ;;  %vm261_vm8 = vsmask.f32 (!%p172_p2), 5396 }
   0xa   : > { %vm256_vm7 = vmor (!%p172_p2), %vm254_vm3, %vm255_vm4  ;;  %vm263_vm9 = vsmask.f32 (!%p172_p2), 6424  ;;  %vm265_vm10 = vsmask.f32 (!%p172_p2), 7452  ;;  %v2126_v18 = vld [vmem:[%s2629_s1 + $0x70] sm:$0xff] (!%p172_p2)   ;;  %v2128_v34 = vld [vmem:[%s2629_s1 + $0x78] sm:$0xff] (!%p172_p2)  }
   0xb   : > { %1926 = vmatpush3.bf16.msra.mxu0 (!%p172_p2), %v2116_v3  ;;  %vm258_vm11 = vmor (!%p172_p2), %vm256_vm7, %vm257_vm5  ;;  %v2127_v25 = vld [vmem:[%s2629_s1 + $0x30] sm:$0xff] (!%p172_p2)   ;;  %v2196_v26 = vmov (!%p172_p2), 1966171168   ;;  %v2129_v37 = vld [vmem:[%s2629_s1 + $0x38] sm:$0xff] (!%p172_p2)  }
   0xc   : > { %1946 = vmatpush3.bf16.msra.mxu1 (!%p172_p2), %v2117_v4  ;;  %1927 = vmatprep.subr.bf16.mxu0 (!%p172_p2), %v2194_v1  ;;  %vm260_vm12 = vmor (!%p172_p2), %vm258_vm11, %vm259_vm6  ;;  %v304_v27 = vunpack.c.l.s4 (!%p172_p2), %v2196_v26  ;;  %v2130_v42 = vld [vmem:[%s2629_s1 + $0x80] sm:$0xff] (!%p172_p2)   ;;  %v2132_v44 = vld [vmem:[%s2629_s1 + $0x88] sm:$0xff] (!%p172_p2)  }
   0xd   : > { %s2636_s16 = smov (!%p200_p3, %s1596_s16), 1  ;;  %1947 = vmatprep.subr.bf16.mxu1 %v2194_v1  ;;  %vm262_vm13 = vmor %vm260_vm12, %vm261_vm8  ;;  %v2131_v43 = vld [vmem:[%s2629_s1 + $0xc0] sm:$0xff]   ;;  %v2133_v45 = vld [vmem:[%s2629_s1 + $0xc8] sm:$0xff]  }
   0xe   : > { %s1841_s5 = sshll.u32 %s2636_s16, 3  ;;  %vm264_vm14 = vmor %vm262_vm13, %vm263_vm9  ;;  %v305_v30 = vunpack.c.0.s8 %v304_v27  ;;  %v2134_v46 = vld [vmem:[%s2629_s1 + $0x90] sm:$0xff]   ;;  %v2136_v48 = vld [vmem:[%s2629_s1 + $0x98] sm:$0xff]  }
   0xf   : > { %1928 = vmatpush3.bf16.msra.mxu0 %v2118_v5  ;;  %s2272_s10 = scalar_lea.vmem %s2628_s0, %s1841_s5  ;;  %vm2306_vm15 = vmor %vm264_vm14, %vm265_vm10  ;;  %v2135_v47 = vld [vmem:[%s2629_s1 + $0xd0] sm:$0xff]   ;;  %v2137_v49 = vld [vmem:[%s2629_s1 + $0xd8] sm:$0xff]  }
  0x10   : > { %1948 = vmatpush3.bf16.msra.mxu1 %v2119_v6  ;;  %1929 = vmatprep.subr.bf16.mxu0 %v2194_v1  ;;  %v1605_v12 = vld.sshfl [vmem:[%s2272_s10] sm:$0x11 pattern:$0x75316420]  ;;  %v215_v24 = vld [vmem:[%s2272_s10 + $0x2] sm:$0x1]  ;;  %v2320_v36 = vsub.s32 %v305_v30, %v307_v28 }
  0x11   : > { %1949 = vmatprep.subr.bf16.mxu1 %v2194_v1  ;;  %v1606_v14 = vld.sshfl [vmem:[%s2272_s10 + $0x2] sm:$0x11 pattern:$0x75316420]  ;;  %v243_v15 = vcombine.high %v1605_v12, %v1605_v12  ;;  %v268_v19 = vshrl.u32 %v1605_v12, 16  ;;  %v2140_v52 = vld [vmem:[%s2629_s1 + $0xa8] sm:$0xff]  }
  0x12   : > { %v251_v17 = vcombine.high %v1606_v14, %v1606_v14  ;;  %v277_v21 = vshrl.u32 %v1606_v14, 16  ;;  %v214_v23 = vld [vmem:[%s2272_s10] sm:$0x1]  ;;  %v2141_v55 = vld [vmem:[%s2629_s1 + $0xe8] sm:$0xff]   ;;  %v1668_v56 = vld [vmem:[%s2272_s10 + $0x2] sm:$0x1] }
  0x13   : > { %1930 = vmatpush3.bf16.msra.mxu0 %v2120_v7  ;;  %v273_v20 = vshll.u32 %v243_v15, 16  ;;  %v408_v31 = vcombine.low %v214_v23, %v215_v24  ;;  %v2138_v50 = vld [vmem:[%s2629_s1 + $0xa0] sm:$0xff]   ;;  %v2142_v59 = vld [vmem:[%s2629_s1 + $0xb0] sm:$0xff]   ;;  %v2144_v3 = vld [vmem:[%s2629_s1 + $0xb8] sm:$0xff]  }
  0x14   : > { %1950 = vmatpush3.bf16.msra.mxu1 %v2121_v8  ;;  %1931 = vmatprep.subr.bf16.mxu0 %v2194_v1  ;;  %v282_v22 = vshll.u32 %v251_v17, 16  ;;  %v2139_v51 = vld [vmem:[%s2629_s1 + $0xe0] sm:$0xff]   ;;  %v2143_v61 = vld [vmem:[%s2629_s1 + $0xf0] sm:$0xff]   ;;  %v2145_v5 = vld [vmem:[%s2629_s1 + $0xf8] sm:$0xff]  }
  0x15   : > { %1951 = vmatprep.subr.bf16.mxu1 %v2194_v1  ;;  %v275_v32 = vsel %vm2306_vm15, %v268_v19, %v273_v20  ;;  %v415_v39 = vrot.slane %v408_v31, %v2320_v36  ;;  %v1641_v53 = vld.sshfl [vmem:[%s2272_s10] sm:$0x10 pattern:$0x75316420]  ;;  %v1669_v57 = vld [vmem:[%s2272_s10 + $0x4] sm:$0x1] }
  0x16   : > { %v2314_v33 = vsel %vm2306_vm15, %v277_v21, %v282_v22  ;;  %v2380_v54 = vld.sshfl [vmem:[%s2272_s10 + $0x2] sm:$0x10 pattern:$0x75316420]  ;;  %v676_v60 = vcombine.low %v1668_v56, %v1669_v57  ;;  %v2148_v14 = vld [vmem:[%s2629_s1 + $0x108] sm:$0xff]   ;;  %v2150_v17 = vld [vmem:[%s2629_s1 + $0x110] sm:$0xff]  }
  0x17   : > { %1932 = vmatpush3.bf16.msra.mxu0 %v2122_v9  ;;  %v302_v35 = vcombine.low %v275_v32, %v2314_v33  ;;  %v422_v41 = vrot.slane %v415_v39, %v2320_v36  ;;  %v1659_v58 = vcombine.high %v1641_v53, %v2380_v54  ;;  %v1697_v62 = vld.sshfl [vmem:[%s2272_s10 + $0x4] sm:$0x11 pattern:$0x75316420]  ;;  %v2149_v16 = vld [vmem:[%s2629_s1 + $0x148] sm:$0xff]   ;;  %v2152_v19 = vld [vmem:[%s2629_s1 + $0x118] sm:$0xff]  }
  0x18   : > { %1952 = vmatpush3.bf16.msra.mxu1 %v2123_v10  ;;  %1933 = vmatprep.subr.bf16.mxu0 %v2194_v1  ;;  %v800_v0 = vcombine.high %v1697_v62, %v1697_v62  ;;  %v811_v2 = vshrl.u32 %v1697_v62, 16  ;;  %v683_v4 = vrot.slane %v676_v60, %v2320_v36  ;;  %v2146_v9 = vld [vmem:[%s2629_s1 + $0x100] sm:$0xff]   ;;  %v2153_v20 = vld [vmem:[%s2629_s1 + $0x158] sm:$0xff]   ;;  %v2156_v30 = vld [vmem:[%s2629_s1 + $0x128] sm:$0xff]  }
  0x19   : > { %1953 = vmatprep.subr.bf16.mxu1 %v2194_v1  ;;  %v309_v38 = vrot.slane %v302_v35, %v2320_v36  ;;  %v556_v63 = vrot.slane %v1659_v58, %v2320_v36  ;;  %v2147_v12 = vld [vmem:[%s2629_s1 + $0x140] sm:$0xff]   ;;  %v2157_v31 = vld [vmem:[%s2629_s1 + $0x168] sm:$0xff]   ;;  %v2174_v57 = vld [vmem:[%s2629_s1 + $0x1b0] sm:$0xff]  }
  0x1a   : > { %v816_v6 = vshll.u32 %v800_v0, 16  ;;  %v690_v10 = vrot.slane %v683_v4, %v2320_v36  ;;  %v1782_v21 = vld.sshfl [vmem:[%s2272_s10 + $0x6] sm:$0x11 pattern:$0x75316420]  ;;  %v2175_v58 = vld [vmem:[%s2629_s1 + $0x1f0] sm:$0xff]  }
  0x1b   : > { %1934 = vmatpush3.bf16.msra.mxu0 %v2124_v11  ;;  %v316_v40 = vrot.slane %v309_v38, %v2320_v36  ;;  %v563_v7 = vrot.slane %v556_v63, %v2320_v36  ;;  %v1229_v22 = vcombine.high %v1782_v21, %v1782_v21  ;;  %v1240_v23 = vshrl.u32 %v1782_v21, 16  ;;  %v2154_v24 = vld [vmem:[%s2629_s1 + $0x120] sm:$0xff]   ;;  %v2160_v38 = vld [vmem:[%s2629_s1 + $0x138] sm:$0xff]   ;;  %v2179_v0 = vld [vmem:[%s2629_s1 + $0x208] sm:$0xff]  }
  0x1c   : > { %1954 = vmatpush3.bf16.msra.mxu1 %v2125_v13  ;;  %1935 = vmatprep.subr.bf16.mxu0 %v2194_v1  ;;  %v818_v8 = vsel %vm2306_vm15, %v811_v2, %v816_v6  ;;  %v2155_v26 = vld [vmem:[%s2629_s1 + $0x160] sm:$0xff]   ;;  %v2176_v60 = vld [vmem:[%s2629_s1 + $0x1b8] sm:$0xff]   ;;  %v2180_v2 = vld [vmem:[%s2629_s1 + $0x210] sm:$0xff]  }
  0x1d   : > { %1955 = vmatprep.subr.bf16.mxu1 %v2194_v1  ;;  %v836_v11 = vcombine.low %v2314_v33, %v818_v8  ;;  %v2474_v32 = vld.sshfl [vmem:[%s2272_s10 + $0x4] sm:$0x10 pattern:$0x75316420]  ;;  %v1753_v53 = vld [vmem:[%s2272_s10 + $0x4] sm:$0x1] }
  0x1e   : > { %v1744_v35 = vcombine.high %v2380_v54, %v2474_v32  ;;  %v1754_v54 = vld [vmem:[%s2272_s10 + $0x6] sm:$0x1]  ;;  %v1812_v6 = vld.sshfl [vmem:[%s2272_s10 + $0x6] sm:$0x10 pattern:$0x75316420] }
  0x1f   : > { %1936 = vmatpush3.bf16.msra.mxu0 %v2126_v18  ;;  %v2423_v13 = vrot.slane %v836_v11, %v2320_v36  ;;  %v2151_v18 = vld [vmem:[%s2629_s1 + $0x150] sm:$0xff]   ;;  %v1105_v56 = vcombine.low %v1753_v53, %v1754_v54  ;;  %v2178_v63 = vld [vmem:[%s2629_s1 + $0x200] sm:$0xff]   ;;  %s1603_s10 = sshll.u32 %s2636_s16, 1 }
  0x20   : > { %1956 = vmatpush3.bf16.msra.mxu1 %v2127_v25  ;;  %1937 = vmatprep.subr.bf16.mxu0 %v2194_v1  ;;  %v1245_v25 = vshll.u32 %v1229_v22, 16  ;;  %v985_v39 = vrot.slane %v1744_v35, %v2320_v36  ;;  %v2182_v4 = vld [vmem:[%s2629_s1 + $0x220] sm:$0xff]   ;;  %s208_s28 = scalar_lea.vmem %s2631_s3, %s1603_s10  ;;  %s212_s6 = scalar_lea.vmem %s2632_s4, %s1603_s10 }
  0x21   : > { %1957 = vmatprep.subr.bf16.mxu1 %v2194_v1  ;;  %v850_v15 = vrot.slane %v2423_v13, %v2320_v36  ;;  %v1523_v53 = vld [vmem:[%s208_s28] sm:$0x3] }
  0x22   : > { %v1247_v27 = vsel %vm2306_vm15, %v1240_v23, %v1245_v25 }
  0x23   : > { %1938 = vmatpush3.bf16.msra.mxu0 %v2128_v34  ;;  %v1265_v28 = vcombine.low %v818_v8, %v1247_v27  ;;  %v2158_v34 = vld [vmem:[%s2629_s1 + $0x130] sm:$0xff]  }
  0x24   : > { %1958 = vmatpush3.bf16.msra.mxu1 %v2129_v37  ;;  %1963 = vmatprep.subr.bf16.mxu0 %v2194_v1  ;;  %v2159_v37 = vld [vmem:[%s2629_s1 + $0x170] sm:$0xff]  }
  0x25   : > { %1983 = vmatprep.subr.bf16.mxu1 %v2194_v1  ;;  %v2477_v33 = vrot.slane %v1265_v28, %v2320_v36  ;;  %v2184_v8 = vld [vmem:[%s2629_s1 + $0x230] sm:$0xff]  }
  0x26   : > { %1940 = vmatmul.mubr.bf16.vlgmr.msra.gmra.mrb[0].mxu0 %v316_v40  ;;  %v2161_v40 = vld [vmem:[%s2629_s1 + $0x178] sm:$0xff]  }
  0x27   : > { %1960 = vmatmul.mubr.bf16.vlgmr.msra.gmra.mrb[0].mxu1 %v422_v41  ;;  %1964 = vmatpush3.bf16.msra.mxu0 %v2130_v42  ;;  %v1279_v29 = vrot.slane %v2477_v33, %v2320_v36  ;;  %v2162_v41 = vld [vmem:[%s2629_s1 + $0x180] sm:$0xff]   ;;  %v992_v42 = vrot.slane %v985_v39, %v2320_v36 }
  0x28   : > { %1984 = vmatpush3.bf16.msra.mxu1 %v2131_v43  ;;  %1965 = vmatprep.subr.bf16.mxu0 %v2194_v1  ;;  %v2163_v43 = vld [vmem:[%s2629_s1 + $0x1c0] sm:$0xff]  }
  0x29   : > { %1985 = vmatprep.subr.bf16.mxu1 %v2194_v1  ;;  %1979 = vmatprep.mubr.msk.bf16.mxu0 %vm2195_vm0, %v2194_v1 }
  0x2a   : > { %1999 = vmatprep.mubr.msk.bf16.mxu1 %vm2195_vm0, %v2194_v1 }
  0x2b   : > { %1966 = vmatpush3.bf16.msra.mxu0 %v2132_v44  ;;  %v2164_v44 = vld [vmem:[%s2629_s1 + $0x188] sm:$0xff]  }
  0x2c   : > { %1986 = vmatpush3.bf16.msra.mxu1 %v2133_v45  ;;  %1967 = vmatprep.subr.bf16.mxu0 %v2194_v1  ;;  %v2165_v45 = vld [vmem:[%s2629_s1 + $0x1c8] sm:$0xff]  }
  0x2d   : > { %1987 = vmatprep.subr.bf16.mxu1 %v2194_v1 }
  0x2f   : > { %1968 = vmatpush3.bf16.msra.mxu0 %v2134_v46  ;;  %v2166_v46 = vld [vmem:[%s2629_s1 + $0x190] sm:$0xff]  }
  0x30   : > { %1988 = vmatpush3.bf16.msra.mxu1 %v2135_v47  ;;  %1969 = vmatprep.subr.bf16.mxu0 %v2194_v1  ;;  %v2167_v47 = vld [vmem:[%s2629_s1 + $0x1d0] sm:$0xff]  }
  0x31   : > { %1989 = vmatprep.subr.bf16.mxu1 %v2194_v1 }
  0x33   : > { %1970 = vmatpush3.bf16.msra.mxu0 %v2136_v48  ;;  %v2168_v48 = vld [vmem:[%s2629_s1 + $0x198] sm:$0xff]  }
  0x34   : > { %1990 = vmatpush3.bf16.msra.mxu1 %v2137_v49  ;;  %1971 = vmatprep.subr.bf16.mxu0 %v2194_v1  ;;  %v2169_v49 = vld [vmem:[%s2629_s1 + $0x1d8] sm:$0xff]  }
  0x35   : > { %1991 = vmatprep.subr.bf16.mxu1 %v2194_v1 }
  0x37   : > { %1972 = vmatpush3.bf16.msra.mxu0 %v2138_v50  ;;  %v2170_v50 = vld [vmem:[%s2629_s1 + $0x1a0] sm:$0xff]  }
  0x38   : > { %1992 = vmatpush3.bf16.msra.mxu1 %v2139_v51  ;;  %1973 = vmatprep.subr.bf16.mxu0 %v2194_v1  ;;  %v2171_v51 = vld [vmem:[%s2629_s1 + $0x1e0] sm:$0xff]  }
  0x39   : > { %1993 = vmatprep.subr.bf16.mxu1 %v2194_v1 }
  0x3b   : > { %1974 = vmatpush3.bf16.msra.mxu0 %v2140_v52  ;;  %v2172_v52 = vld [vmem:[%s2629_s1 + $0x1a8] sm:$0xff]  }
  0x3c   : > { %1994 = vmatpush3.bf16.msra.mxu1 %v2141_v55  ;;  %1975 = vmatprep.subr.bf16.mxu0 %v2194_v1  ;;  %v2173_v55 = vld [vmem:[%s2629_s1 + $0x1e8] sm:$0xff]  }
  0x3d   : > { %1995 = vmatprep.subr.bf16.mxu1 %v2194_v1 }
  0x3f   : > { %1976 = vmatpush3.bf16.msra.mxu0 %v2142_v59  ;;  %v1112_v59 = vrot.slane %v1105_v56, %v2320_v36 }
  0x40   : > { %1996 = vmatpush3.bf16.msra.mxu1 %v2143_v61  ;;  %1977 = vmatprep.subr.bf16.mxu0 %v2194_v1  ;;  %v2177_v61 = vld [vmem:[%s2629_s1 + $0x1f8] sm:$0xff]  }
  0x41   : > { %1997 = vmatprep.subr.bf16.mxu1 %v2194_v1  ;;  %v1119_v62 = vrot.slane %v1112_v59, %v2320_v36 }
  0x43   : > { %1978 = vmatpush3.bf16.msra.mxu0 %v2144_v3  ;;  %v2181_v3 = vld [vmem:[%s2629_s1 + $0x218] sm:$0xff]  }
  0x44   : > { %1998 = vmatpush3.bf16.msra.mxu1 %v2145_v5  ;;  %2003 = vmatprep.subr.bf16.mxu0 %v2194_v1  ;;  %v2183_v5 = vld [vmem:[%s2629_s1 + $0x228] sm:$0xff]  }
  0x45   : > { %2023 = vmatprep.subr.bf16.mxu1 %v2194_v1 }
  0x46   : > { %1980 = vmatmul.mubr.bf16.vlgmr.msra.gmra.mrb[4].mxu0 %v563_v7  ;;  %v1829_v7 = vcombine.high %v2474_v32, %v1812_v6 }
  0x47   : > { %2004 = vmatpush3.bf16.msra.mxu0 %v2146_v9  ;;  %2000 = vmatmul.mubr.bf16.vlgmr.msra.gmra.mrb[4].mxu1 %v690_v10  ;;  %v2185_v10 = vld [vmem:[%s2629_s1 + $0x238] sm:$0xff]  }
  0x48   : > { %2024 = vmatpush3.bf16.msra.mxu1 %v2147_v12  ;;  %2005 = vmatprep.subr.bf16.mxu0 %v2194_v1  ;;  %v1414_v9 = vrot.slane %v1829_v7, %v2320_v36 }
  0x49   : > { %2025 = vmatprep.subr.bf16.mxu1 %v2194_v1  ;;  %2019 = vmatprep.mubr.msk.bf16.mxu0 %vm2195_vm0, %v2194_v1 }
  0x4a   : > { %2039 = vmatprep.mubr.msk.bf16.mxu1 %vm2195_vm0, %v2194_v1  ;;  %v1421_v11 = vrot.slane %v1414_v9, %v2320_v36 }
  0x4b   : > { %2006 = vmatpush3.bf16.msra.mxu0 %v2148_v14 }
  0x4c   : > { %2026 = vmatpush3.bf16.msra.mxu1 %v2149_v16  ;;  %2007 = vmatprep.subr.bf16.mxu0 %v2194_v1 }
  0x4d   : > { %2027 = vmatprep.subr.bf16.mxu1 %v2194_v1 }
  0x4f   : > { %2008 = vmatpush3.bf16.msra.mxu0 %v2150_v17 }
  0x50   : > { %2028 = vmatpush3.bf16.msra.mxu1 %v2151_v18  ;;  %2009 = vmatprep.subr.bf16.mxu0 %v2194_v1 }
  0x51   : > { %2029 = vmatprep.subr.bf16.mxu1 %v2194_v1 }
  0x53   : > { %2010 = vmatpush3.bf16.msra.mxu0 %v2152_v19 }
  0x54   : > { %2030 = vmatpush3.bf16.msra.mxu1 %v2153_v20  ;;  %2011 = vmatprep.subr.bf16.mxu0 %v2194_v1 }
  0x55   : > { %2031 = vmatprep.subr.bf16.mxu1 %v2194_v1 }
  0x57   : > { %2012 = vmatpush3.bf16.msra.mxu0 %v2154_v24 }
  0x58   : > { %2032 = vmatpush3.bf16.msra.mxu1 %v2155_v26  ;;  %2013 = vmatprep.subr.bf16.mxu0 %v2194_v1 }
  0x59   : > { %2033 = vmatprep.subr.bf16.mxu1 %v2194_v1 }
  0x5b   : > { %2014 = vmatpush3.bf16.msra.mxu0 %v2156_v30 }
  0x5c   : > { %2034 = vmatpush3.bf16.msra.mxu1 %v2157_v31  ;;  %2015 = vmatprep.subr.bf16.mxu0 %v2194_v1 }
  0x5d   : > { %2035 = vmatprep.subr.bf16.mxu1 %v2194_v1 }
  0x5f   : > { %2016 = vmatpush3.bf16.msra.mxu0 %v2158_v34 }
  0x60   : > { %2036 = vmatpush3.bf16.msra.mxu1 %v2159_v37  ;;  %2017 = vmatprep.subr.bf16.mxu0 %v2194_v1 }
  0x61   : > { %2037 = vmatprep.subr.bf16.mxu1 %v2194_v1 }
  0x63   : > { %2018 = vmatpush3.bf16.msra.mxu0 %v2160_v38 }
  0x64   : > { %2038 = vmatpush3.bf16.msra.mxu1 %v2161_v40  ;;  %2043 = vmatprep.subr.bf16.mxu0 %v2194_v1 }
  0x65   : > { %2063 = vmatprep.subr.bf16.mxu1 %v2194_v1 }
  0x66   : > { %2020 = vmatmul.mubr.bf16.vlgmr.msra.gmra.mrb[8].mxu0 %v850_v15 }
  0x67   : > { %2044 = vmatpush3.bf16.msra.mxu0 %v2162_v41  ;;  %2040 = vmatmul.mubr.bf16.vlgmr.msra.gmra.mrb[8].mxu1 %v992_v42 }
  0x68   : > { %2064 = vmatpush3.bf16.msra.mxu1 %v2163_v43  ;;  %2045 = vmatprep.subr.bf16.mxu0 %v2194_v1 }
  0x69   : > { %2065 = vmatprep.subr.bf16.mxu1 %v2194_v1  ;;  %2059 = vmatprep.mubr.msk.bf16.mxu0 %vm2195_vm0, %v2194_v1 }
  0x6a   : > { %2079 = vmatprep.mubr.msk.bf16.mxu1 %vm2195_vm0, %v2194_v1 }
  0x6b   : > { %2046 = vmatpush3.bf16.msra.mxu0 %v2164_v44 }
  0x6c   : > { %2066 = vmatpush3.bf16.msra.mxu1 %v2165_v45  ;;  %2047 = vmatprep.subr.bf16.mxu0 %v2194_v1 }
  0x6d   : > { %2067 = vmatprep.subr.bf16.mxu1 %v2194_v1 }
  0x6f   : > { %2048 = vmatpush3.bf16.msra.mxu0 %v2166_v46 }
  0x70   : > { %2068 = vmatpush3.bf16.msra.mxu1 %v2167_v47  ;;  %2049 = vmatprep.subr.bf16.mxu0 %v2194_v1 }
  0x71   : > { %2069 = vmatprep.subr.bf16.mxu1 %v2194_v1 }
  0x73   : > { %2050 = vmatpush3.bf16.msra.mxu0 %v2168_v48 }
  0x74   : > { %2070 = vmatpush3.bf16.msra.mxu1 %v2169_v49  ;;  %2051 = vmatprep.subr.bf16.mxu0 %v2194_v1 }
  0x75   : > { %2071 = vmatprep.subr.bf16.mxu1 %v2194_v1 }
  0x77   : > { %2052 = vmatpush3.bf16.msra.mxu0 %v2170_v50 }
  0x78   : > { %2072 = vmatpush3.bf16.msra.mxu1 %v2171_v51  ;;  %2053 = vmatprep.subr.bf16.mxu0 %v2194_v1  ;;  %v1838_v51 = vld [vmem:[%s2630_s2] ss:$0 sm:$0xff] }
  0x79   : > { %2073 = vmatprep.subr.bf16.mxu1 %v2194_v1 }
  0x7b   : > { %2054 = vmatpush3.bf16.msra.mxu0 %v2172_v52 }
  0x7c   : > { %2074 = vmatpush3.bf16.msra.mxu1 %v2173_v55  ;;  %2055 = vmatprep.subr.bf16.mxu0 %v2194_v1 }
  0x7d   : > { %2075 = vmatprep.subr.bf16.mxu1 %v2194_v1 }
  0x7f   : > { %2056 = vmatpush3.bf16.msra.mxu0 %v2174_v57 }
  0x80   : > { %2076 = vmatpush3.bf16.msra.mxu1 %v2175_v58  ;;  %2057 = vmatprep.subr.bf16.mxu0 %v2194_v1  ;;  %v1524_v58 = vunpack.c.l.bf16 %v1523_v53 }
  0x81   : > { %2077 = vmatprep.subr.bf16.mxu1 %v2194_v1 }
  0x83   : > { %2058 = vmatpush3.bf16.msra.mxu0 %v2176_v60 }
  0x84   : > { %2078 = vmatpush3.bf16.msra.mxu1 %v2177_v61  ;;  %2083 = vmatprep.subr.bf16.mxu0 %v2194_v1 }
  0x86   : > { %2060 = vmatmul.mubr.bf16.vlgmr.msra.gmra.mrb[12].mxu0 %v1119_v62 }
  0x87   : > { %2084 = vmatpush3.bf16.msra.mxu0 %v2178_v63  ;;  %2080 = vmatmul.mubr.bf16.vlgmr.msra.gmra.mrb[12].mxu1 %v1279_v29 }
  0x88   : > { %2085 = vmatprep.subr.bf16.mxu0 %v2194_v1  ;;  %2099 = vmatprep.mubr.msk.bf16.mxu0 %vm2195_vm0, %v2194_v1 }
  0x8b   : > { %2086 = vmatpush3.bf16.msra.mxu0 %v2179_v0 }
  0x8c   : > { %2087 = vmatprep.subr.bf16.mxu0 %v2194_v1 }
  0x8f   : > { %2088 = vmatpush3.bf16.msra.mxu0 %v2180_v2 }
  0x90   : > { %2089 = vmatprep.subr.bf16.mxu0 %v2194_v1 }
  0x93   : > { %2090 = vmatpush3.bf16.msra.mxu0 %v2181_v3 }
  0x94   : > { %2091 = vmatprep.subr.bf16.mxu0 %v2194_v1 }
  0x97   : > { %2092 = vmatpush3.bf16.msra.mxu0 %v2182_v4 }
  0x98   : > { %2093 = vmatprep.subr.bf16.mxu0 %v2194_v1 }
  0x9b   : > { %2094 = vmatpush3.bf16.msra.mxu0 %v2183_v5 }
  0x9c   : > { %2095 = vmatprep.subr.bf16.mxu0 %v2194_v1 }
  0x9f   : > { %2096 = vmatpush3.bf16.msra.mxu0 %v2184_v8 }
  0xa0   : > { %2097 = vmatprep.subr.bf16.mxu0 %v2194_v1 }
  0xa3   : > { %2098 = vmatpush3.bf16.msra.mxu0 %v2185_v10 }
  0xa6   : > { %2100 = vmatmul.mubr.bf16.vlgmr.msra.gmra.mrb[16].mxu0 %v1421_v11 }
  0xf9   : > { %v400_v12 = vpop.f32.mrb[0].mxu0 }
  0xfa   : > { %v1941_v13 = vpop.f32.mrb[1].mxu0  ;;  %v506_v14 = vpop.f32.mrb[0].mxu1 }
  0xfb   : > { %v507_v15 = vadd.f32 %v506_v14, %v400_v12  ;;  %v403_v16 = vpop.f32.mrb[2].mxu0  ;;  %v1961_v17 = vpop.f32.mrb[1].mxu1 }
  0xfc   : > { %v1942_v18 = vpop.f32.mrb[3].mxu0  ;;  %v509_v19 = vpop.f32.mrb[2].mxu1 }
  0xfd   : > { %v1962_v20 = vpop.f32.mrb[3].mxu1 }
 0x119   : > { %v647_v21 = vpop.f32.mrb[4].mxu0 }
 0x11a   : > { %v653_v22 = vadd.f32 %v647_v21, %v507_v15  ;;  %v1981_v23 = vpop.f32.mrb[5].mxu0  ;;  %v774_v24 = vpop.f32.mrb[4].mxu1 }
 0x11b   : > { %v650_v25 = vpop.f32.mrb[6].mxu0  ;;  %v2001_v26 = vpop.f32.mrb[5].mxu1 }
 0x11c   : > { %v780_v1 = vadd.f32 %v774_v24, %v653_v22  ;;  %v1982_v27 = vpop.f32.mrb[7].mxu0  ;;  %v777_v36 = vpop.f32.mrb[6].mxu1 }
 0x11d   : > { %v2002_v28 = vpop.f32.mrb[7].mxu1 }
 0x139   : > { %v934_v30 = vpop.f32.mrb[8].mxu0 }
 0x13a   : > { %v940_v31 = vadd.f32 %v934_v30, %v780_v1  ;;  %v2021_v32 = vpop.f32.mrb[9].mxu0  ;;  %v1076_v33 = vpop.f32.mrb[8].mxu1 }
 0x13b   : > { %v937_v29 = vpop.f32.mrb[10].mxu0  ;;  %v2041_v34 = vpop.f32.mrb[9].mxu1 }
 0x13c   : > { %v1082_v35 = vadd.f32 %v1076_v33, %v940_v31  ;;  %v2022_v37 = vpop.f32.mrb[11].mxu0  ;;  %v1079_v38 = vpop.f32.mrb[10].mxu1 }
 0x13d   : > { %v2042_v39 = vpop.f32.mrb[11].mxu1 }
 0x159   : > { %v1203_v40 = vpop.f32.mrb[12].mxu0 }
 0x15a   : > { %v1209_v41 = vadd.f32 %v1203_v40, %v1082_v35  ;;  %v2061_v42 = vpop.f32.mrb[13].mxu0  ;;  %v1363_v43 = vpop.f32.mrb[12].mxu1 }
 0x15b   : > { %v1206_v44 = vpop.f32.mrb[14].mxu0  ;;  %v2081_v45 = vpop.f32.mrb[13].mxu1 }
 0x15c   : > { %v1369_v46 = vadd.f32 %v1363_v43, %v1209_v41  ;;  %v2062_v47 = vpop.f32.mrb[15].mxu0  ;;  %v1366_v48 = vpop.f32.mrb[14].mxu1 }
 0x15d   : > { %v2082_v49 = vpop.f32.mrb[15].mxu1 }
 0x179   : > { %v1505_v50 = vpop.f32.mrb[16].mxu0 }
 0x17a   : > { %v1511_v52 = vadd.f32 %v1505_v50, %v1369_v46  ;;  %v2101_v54 = vpop.f32.mrb[17].mxu0 }
 0x17b   : > { %v1508_v55 = vpop.f32.mrb[18].mxu0 }
 0x17c   : > { %v1519_v56 = vadd.f32 %v1838_v51, %v1511_v52  ;;  %v2102_v57 = vpop.f32.mrb[19].mxu0 }
 0x17e   : > { %vm1520_vm0 = vcmp.ge.f32.partialorder %v1519_v56, 0.0  ;;  %v1521_v59 = vmul.f32 0.01, %v1519_v56 }
 0x180   : > { %v1522_v60 = vsel %vm1520_vm0, %v1519_v56, %v1521_v59 }
 0x181   : > { %v1525_v61 = vadd.f32 %v1524_v58, %v1522_v60 }
 0x183   : > { %vm1526_vm1 = vcmp.ge.f32.partialorder %v1525_v61, 0.0  ;;  %v1527_v62 = vmul.f32 0.01, %v1525_v61 }
 0x185   : > { %v1528_v63 = vsel %vm1526_vm1, %v1525_v61, %v1527_v62 }
 0x186   : > { %v1529_v0 = vpack.c.bf16 %v1528_v63, %v1528_v63 }
 0x188   : > { %1530 = vst [vmem:[%s212_s6] sm:$0x3] %v1529_v0 }
 0x189 PF: > { %s14_s15 = sadd.s32 1, %s2192_s15  }
 0x18a   : > { %p11_p4 = scmp.ge.s32.totalorder %s14_s15, 4  }
 0x18c   :  { %13 = sbr.rel (!%p11_p4) target bundleno = 1 (0x1), region = 79 }

</bundles_post_ra>
